<compile_context>
chip_gen: v6e
topology: v6e:2x2x1
jax: 0.10.0
libtpu: 0.0.40
codegen_flags: <defaults>
</compile_context>

<pallas_src>
import functools

import jax
import jax.numpy as jnp
from jax import lax
from jax.experimental import pallas as pl
from jax.experimental.pallas import tpu as pltpu

BN_EPS = 1e-5
H1, H2, H3 = 512, 256, 64
NUM_PHASES = 4
# ~512-row tiles stay comfortably inside v7x's 64 MiB VMEM with double-buffered x tiles;
# v5e/v6e (128 MiB) can take 1024-2048 row tiles.
MAX_TILE_B = 512
VMEM_LIMIT_BYTES = 48 * 1024 * 1024


def _bn_scale_shift(s, sq, gamma, beta, inv_n):
    """Fold training-mode BN (biased batch stats) + affine into one scale/shift."""
    mean = s * inv_n
    var = jnp.maximum(sq * inv_n - mean * mean, 0.0)      # single-pass stats, clamped
    scale = gamma * lax.rsqrt(var + BN_EPS)
    shift = beta - mean * scale
    return scale, shift


def weight_net_kernel(x_ref, w1_ref, w2_ref, w3_ref, pp_ref, o_ref,
                      h1_scr, h2_scr, h3_scr,
                      s1_sum, s1_sq, s2_sum, s2_sq, s3_sum, s3_sq,
                      *, batch_total):
    p = pl.program_id(0)                       # phase (layer)
    i = pl.program_id(1)                       # batch tile
    tile_b = x_ref.shape[0]
    rows = pl.ds(pl.multiple_of(i * tile_b, tile_b), tile_b)
    inv_n = 1.0 / batch_total

    def accumulate(sum_scr, sq_scr, h):
        @pl.when(i == 0)
        def _():
            sum_scr[...] = jnp.zeros_like(sum_scr)
            sq_scr[...] = jnp.zeros_like(sq_scr)
        sum_scr[...] += jnp.sum(h, axis=0, keepdims=True)
        sq_scr[...] += jnp.sum(h * h, axis=0, keepdims=True)

    # Phase 0: h1 = x @ W1 (bf16 MXU operands, f32 accumulation); layer-1 batch stats.
    @pl.when(p == 0)
    def _():
        h = jnp.dot(x_ref[...].astype(jnp.bfloat16), w1_ref[...],
                    preferred_element_type=jnp.float32)
        h1_scr[rows, :] = h
        accumulate(s1_sum, s1_sq, h)

    # Phase 1: a1 = relu(bn(h1)); h2 = a1 @ W2; layer-2 batch stats.
    @pl.when(p == 1)
    def _():
        scale, shift = _bn_scale_shift(s1_sum[...], s1_sq[...],
                                       pp_ref[0:1, :], pp_ref[1:2, :], inv_n)
        a = jnp.maximum(h1_scr[rows, :] * scale + shift, 0.0).astype(jnp.bfloat16)
        h = jnp.dot(a, w2_ref[...], preferred_element_type=jnp.float32)
        h2_scr[rows, :] = h
        accumulate(s2_sum, s2_sq, h)

    # Phase 2: a2 = relu(bn(h2)); h3 = a2 @ W3; layer-3 batch stats.
    @pl.when(p == 2)
    def _():
        scale, shift = _bn_scale_shift(s2_sum[...], s2_sq[...],
                                       pp_ref[2:3, 0:H2], pp_ref[3:4, 0:H2], inv_n)
        a = jnp.maximum(h2_scr[rows, :] * scale + shift, 0.0).astype(jnp.bfloat16)
        h = jnp.dot(a, w3_ref[...], preferred_element_type=jnp.float32)
        h3_scr[rows, :] = h
        accumulate(s3_sum, s3_sq, h)

    # Phase 3: a3 = relu(bn(h3)); logits = w4·a3 + b4 (lane-dense (1, TILE_B)); sigmoid.
    @pl.when(p == 3)
    def _():
        scale, shift = _bn_scale_shift(s3_sum[...], s3_sq[...],
                                       pp_ref[4:5, 0:H3], pp_ref[5:6, 0:H3], inv_n)
        a = jnp.maximum(h3_scr[rows, :] * scale + shift, 0.0)        # (TILE_B, 64) f32
        w4 = pp_ref[6:7, 0:H3]                                       # (1, 64) f32
        logits = lax.dot_general(w4, a,
                                 dimension_numbers=(((1,), (1,)), ((), ())),
                                 preferred_element_type=jnp.float32)  # (1, TILE_B)
        logits = logits + pp_ref[7:8, 0:1]                            # final bias b4
        # exp + reciprocal both go to the EUP slot.
        out = pl.reciprocal(1.0 + jnp.exp(-logits), approx=True)
        o_ref[...] = out.astype(o_ref.dtype)


def _choose_tile_b(batch):
    """Largest batch tile <= MAX_TILE_B that divides batch and is a multiple of 128
    (lane-dense output tiles).  Falls back to one whole-batch tile."""
    if batch <= MAX_TILE_B:
        return batch
    for t in range(MAX_TILE_B, 127, -128):
        if batch % t == 0:
            return t
    return batch   # TODO(synk): pad + mask instead of a single whole-batch tile.


@functools.partial(jax.jit, static_argnames=("tile_b",))
def weight_net_forward(x, w1, w2, w3, packed_params, *, tile_b=None):
    """x: (B, C) f32 (or bf16 from an upstream producer — the in-kernel cast is then a
    no-op and the dominant HBM stream is halved).  Returns (B, 1) f32."""
    batch, in_feats = x.shape
    if tile_b is None:
        tile_b = _choose_tile_b(batch)
    assert batch % tile_b == 0, (batch, tile_b)
    num_tiles = batch // tile_b

    grid_spec = pltpu.PrefetchScalarGridSpec(
        num_scalar_prefetch=0,
        grid=(NUM_PHASES, num_tiles),
        in_specs=[
            # x: only phase 0 reads it; pin its block index during phases 1-3 so every
            # tile is DMA'd from HBM exactly once.
            pl.BlockSpec((tile_b, in_feats),
                         lambda p, i: (jnp.where(p == 0, i, 0), 0)),
            # Matmul weights: VMEM-resident across the whole grid (constant index_map).
            pl.BlockSpec((in_feats, H1), lambda p, i: (0, 0)),
            pl.BlockSpec((H1, H2), lambda p, i: (0, 0)),
            pl.BlockSpec((H2, H3), lambda p, i: (0, 0)),
            # All small per-layer params packed into one (8, 512) f32 array -> one DMA.
            pl.BlockSpec((8, H1), lambda p, i: (0, 0)),
        ],
        # Lane-dense (1, B) output; only the final phase writes it.
        out_specs=pl.BlockSpec(
            (1, tile_b), lambda p, i: (0, jnp.where(p == NUM_PHASES - 1, i, 0))),
        scratch_shapes=[
            pltpu.VMEM((batch, H1), jnp.float32),   # h1 (pre-BN), whole batch
            pltpu.VMEM((batch, H2), jnp.float32),   # h2
            pltpu.VMEM((batch, H3), jnp.float32),   # h3
            pltpu.VMEM((1, H1), jnp.float32),       # layer-1 sum
            pltpu.VMEM((1, H1), jnp.float32),       # layer-1 sum of squares
            pltpu.VMEM((1, H2), jnp.float32),
            pltpu.VMEM((1, H2), jnp.float32),
            pltpu.VMEM((1, H3), jnp.float32),
            pltpu.VMEM((1, H3), jnp.float32),
        ],
    )

    out_1b = pl.pallas_call(
        functools.partial(weight_net_kernel, batch_total=batch),
        out_shape=jax.ShapeDtypeStruct((1, batch), jnp.float32),
        grid_spec=grid_spec,
        compiler_params=pltpu.CompilerParams(
            # Phases carry BN stats and tiles accumulate into them -> both sequential.
            dimension_semantics=("arbitrary", "arbitrary"),
            vmem_limit_bytes=VMEM_LIMIT_BYTES,
        ),
    )(x, w1, w2, w3, packed_params)
    return out_1b.T    # (B, 1), matches the module contract


def init_raw_params(key, inp_len=2048):
    """PyTorch-style default init (U(±1/sqrt(fan_in))).  BN gamma/beta are randomized
    (instead of PyTorch's 1/0 defaults) so the test exercises the affine path."""
    dims = [(inp_len, H1), (H1, H2), (H2, H3), (H3, 1)]
    keys = iter(jax.random.split(key, 16))
    p = {}
    for li, (fin, fout) in enumerate(dims, start=1):
        lim = fin ** -0.5
        p[f"w{li}"] = jax.random.uniform(next(keys), (fin, fout), jnp.float32, -lim, lim)
        p[f"b{li}"] = jax.random.uniform(next(keys), (fout,), jnp.float32, -lim, lim)
        if li <= 3:
            p[f"gamma{li}"] = 1.0 + 0.1 * jax.random.normal(next(keys), (fout,), jnp.float32)
            p[f"beta{li}"] = 0.1 * jax.random.normal(next(keys), (fout,), jnp.float32)
    return p


def pack_for_kernel(p):
    """bf16 matmul weights + one packed (8, 512) f32 array of all small params.

    b1/b2/b3 are intentionally dropped: under training-mode BatchNorm the pre-BN bias
    cancels exactly (batch mean subtracts it back out), so shipping it is dead work."""
    packed = jnp.zeros((8, H1), jnp.float32)
    packed = packed.at[0, :H1].set(p["gamma1"])
    packed = packed.at[1, :H1].set(p["beta1"])
    packed = packed.at[2, :H2].set(p["gamma2"])
    packed = packed.at[3, :H2].set(p["beta2"])
    packed = packed.at[4, :H3].set(p["gamma3"])
    packed = packed.at[5, :H3].set(p["beta3"])
    packed = packed.at[6, :H3].set(p["w4"][:, 0])
    packed = packed.at[7, 0].set(p["b4"][0])
    return (p["w1"].astype(jnp.bfloat16), p["w2"].astype(jnp.bfloat16),
            p["w3"].astype(jnp.bfloat16), packed)


def reference_forward(x, p):
    """Pure-JAX f32 reference faithful to the PyTorch module (keeps b1..b3, two-pass BN).
    Matmul weights use the same bf16-rounded values the kernel consumes."""
    def block(h, w, b, g, be):
        h = h @ w.astype(jnp.bfloat16).astype(jnp.float32) + b
        m = jnp.mean(h, axis=0, keepdims=True)
        v = jnp.mean((h - m) ** 2, axis=0, keepdims=True)
        return jnp.maximum((h - m) * lax.rsqrt(v + BN_EPS) * g + be, 0.0)

    h = block(x, p["w1"], p["b1"], p["gamma1"], p["beta1"])
    h = block(h, p["w2"], p["b2"], p["gamma2"], p["beta2"])
    h = block(h, p["w3"], p["b3"], p["gamma3"], p["beta3"])
    logits = h @ p["w4"] + p["b4"]
    return jax.nn.sigmoid(logits)


if __name__ == "__main__":
    INP_LEN = 2048    # module default in_features
    BATCH = 256       # small, but >1 (training-mode BN) and splittable into batch tiles

    key = jax.random.PRNGKey(0)
    kx, kp = jax.random.split(key)
    x = jax.random.normal(kx, (BATCH, INP_LEN), jnp.float32)
    raw = init_raw_params(kp, INP_LEN)
    w1, w2, w3, packed = pack_for_kernel(raw)

    ref = reference_forward(x, raw)

    # Multi-tile path (2 batch tiles of 128 -> exercises cross-tile BN stats + pipelining).
    out_tiled = jax.block_until_ready(
        weight_net_forward(x, w1, w2, w3, packed, tile_b=128))
    assert out_tiled.shape == (BATCH, 1), out_tiled.shape
    diff_tiled = float(jnp.max(jnp.abs(out_tiled - ref)))
    # Loosened tolerance: kernel matmuls use bf16 operands vs the f32 reference math.
    assert jnp.allclose(out_tiled, ref, atol=2e-2, rtol=2e-2), (
        f"tiled Pallas result mismatch vs reference (max abs diff {diff_tiled})")

    # Auto tile size (single whole-batch tile at this size) — same kernel code path.
    out_auto = jax.block_until_ready(weight_net_forward(x, w1, w2, w3, packed))
    assert out_auto.shape == (BATCH, 1), out_auto.shape
    diff_auto = float(jnp.max(jnp.abs(out_auto - ref)))
    assert jnp.allclose(out_auto, ref, atol=2e-2, rtol=2e-2), (
        f"auto-tile Pallas result mismatch vs reference (max abs diff {diff_auto})")

    print("KERNEL_OK")
</pallas_src>

<mosaic_0001>
module attributes {stable_mosaic.version = 11 : i64} {
  func.func @weight_net_kernel(%arg0: i32, %arg1: i32, %arg2: memref<128x2048xf32, #tpu.memory_space<vmem>>, %arg3: memref<2048x512xbf16, #tpu.memory_space<vmem>>, %arg4: memref<512x256xbf16, #tpu.memory_space<vmem>>, %arg5: memref<256x64xbf16, #tpu.memory_space<vmem>>, %arg6: memref<8x512xf32, #tpu.memory_space<vmem>>, %arg7: memref<1x128xf32, #tpu.memory_space<vmem>>, %arg8: memref<256x512xf32, #tpu.memory_space<vmem>>, %arg9: memref<256x256xf32, #tpu.memory_space<vmem>>, %arg10: memref<256x64xf32, #tpu.memory_space<vmem>>, %arg11: memref<1x512xf32, #tpu.memory_space<vmem>>, %arg12: memref<1x512xf32, #tpu.memory_space<vmem>>, %arg13: memref<1x256xf32, #tpu.memory_space<vmem>>, %arg14: memref<1x256xf32, #tpu.memory_space<vmem>>, %arg15: memref<1x64xf32, #tpu.memory_space<vmem>>, %arg16: memref<1x64xf32, #tpu.memory_space<vmem>>) attributes {dimension_semantics = [#tpu.dimension_semantics<arbitrary>, #tpu.dimension_semantics<arbitrary>], iteration_bounds = array<i64: 4, 2>, scalar_prefetch = 0 : i64, scratch_operands = 9 : i64, tpu.core_type = #tpu.core_type<tc>, window_params = [{transform_indices = @transform_0, window_bounds = array<i64: 128, 2048>}, {pipeline_mode = #tpu.pipeline_mode<synchronous>, transform_indices = @transform_1, window_bounds = array<i64: 2048, 512>}, {pipeline_mode = #tpu.pipeline_mode<synchronous>, transform_indices = @transform_2, window_bounds = array<i64: 512, 256>}, {pipeline_mode = #tpu.pipeline_mode<synchronous>, transform_indices = @transform_3, window_bounds = array<i64: 256, 64>}, {pipeline_mode = #tpu.pipeline_mode<synchronous>, transform_indices = @transform_4, window_bounds = array<i64: 8, 512>}, {transform_indices = @transform_5, window_bounds = array<i64: 1, 128>}]} {
    %c128_i32 = arith.constant 128 : i32
    %0 = arith.muli %arg1, %c128_i32 : i32
    %1 = tpu.assume_multiple %0, 128 : i32
    %c0_i32 = arith.constant 0 : i32
    %2 = arith.cmpi eq, %arg0, %c0_i32 : i32
    %3 = arith.extui %2 : i1 to i32
    %c0_i32_0 = arith.constant 0 : i32
    %4 = arith.cmpi ne, %3, %c0_i32_0 : i32
    scf.if %4 {
      %c0 = arith.constant 0 : index
      %c0_4 = arith.constant 0 : index
      %14 = vector.load %arg2[%c0, %c0_4] : memref<128x2048xf32, #tpu.memory_space<vmem>>, vector<128x2048xf32>
      %15 = arith.truncf %14 : vector<128x2048xf32> to vector<128x2048xbf16>
      %c0_5 = arith.constant 0 : index
      %c0_6 = arith.constant 0 : index
      %16 = vector.load %arg3[%c0_5, %c0_6] : memref<2048x512xbf16, #tpu.memory_space<vmem>>, vector<2048x512xbf16>
      %cst = arith.constant dense<0.000000e+00> : vector<128x512xf32>
      %17 = tpu.matmul %15, %16, %cst {dimension_numbers = #tpu.dot_dimension_numbers<[1], [0], [0], [1], [0, 0, 1, 1], [], []>} : vector<128x2048xbf16>, vector<2048x512xbf16>, vector<128x512xf32> -> vector<128x512xf32>
      %18 = arith.index_cast %1 : i32 to index
      %c0_7 = arith.constant 0 : index
      %19 = vector.load %arg8[%18, %c0_7] : memref<256x512xf32, #tpu.memory_space<vmem>>, vector<128x512xf32>
      tpu.vector_store %arg8[%18, %c0_7], %17 {strides = array<i32>} : memref<256x512xf32, #tpu.memory_space<vmem>>, vector<128x512xf32>,
      %c0_i32_8 = arith.constant 0 : i32
      %20 = arith.cmpi eq, %arg1, %c0_i32_8 : i32
      %21 = arith.extui %20 : i1 to i32
      %c0_i32_9 = arith.constant 0 : i32
      %22 = arith.cmpi ne, %21, %c0_i32_9 : i32
      scf.if %22 {
        %cst_20 = arith.constant 0.000000e+00 : f32
        %34 = vector.broadcast %cst_20 : f32 to vector<1x512xf32>
        %c0_21 = arith.constant 0 : index
        %c0_22 = arith.constant 0 : index
        %35 = vector.load %arg11[%c0_21, %c0_22] : memref<1x512xf32, #tpu.memory_space<vmem>>, vector<1x512xf32>
        tpu.vector_store %arg11[%c0_21, %c0_22], %34 {strides = array<i32>} : memref<1x512xf32, #tpu.memory_space<vmem>>, vector<1x512xf32>,
        %cst_23 = arith.constant 0.000000e+00 : f32
        %36 = vector.broadcast %cst_23 : f32 to vector<1x512xf32>
        %c0_24 = arith.constant 0 : index
        %c0_25 = arith.constant 0 : index
        %37 = vector.load %arg12[%c0_24, %c0_25] : memref<1x512xf32, #tpu.memory_space<vmem>>, vector<1x512xf32>
        tpu.vector_store %arg12[%c0_24, %c0_25], %36 {strides = array<i32>} : memref<1x512xf32, #tpu.memory_space<vmem>>, vector<1x512xf32>,
      } else {
      }
      %c0_10 = arith.constant 0 : index
      %c0_11 = arith.constant 0 : index
      %23 = vector.load %arg11[%c0_10, %c0_11] : memref<1x512xf32, #tpu.memory_space<vmem>>, vector<1x512xf32>
      %cst_12 = arith.constant dense<0.000000e+00> : vector<512xf32>
      %24 = vector.multi_reduction <add>, %17, %cst_12 [0] : vector<128x512xf32> to vector<512xf32>
      %25 = vector.shape_cast %24 : vector<512xf32> to vector<1x512xf32>
      %26 = arith.addf %23, %25 : vector<1x512xf32>
      %c0_13 = arith.constant 0 : index
      %c0_14 = arith.constant 0 : index
      %27 = vector.load %arg11[%c0_13, %c0_14] : memref<1x512xf32, #tpu.memory_space<vmem>>, vector<1x512xf32>
      tpu.vector_store %arg11[%c0_13, %c0_14], %26 {strides = array<i32>} : memref<1x512xf32, #tpu.memory_space<vmem>>, vector<1x512xf32>,
      %c0_15 = arith.constant 0 : index
      %c0_16 = arith.constant 0 : index
      %28 = vector.load %arg12[%c0_15, %c0_16] : memref<1x512xf32, #tpu.memory_space<vmem>>, vector<1x512xf32>
      %29 = arith.mulf %17, %17 : vector<128x512xf32>
      %cst_17 = arith.constant dense<0.000000e+00> : vector<512xf32>
      %30 = vector.multi_reduction <add>, %29, %cst_17 [0] : vector<128x512xf32> to vector<512xf32>
      %31 = vector.shape_cast %30 : vector<512xf32> to vector<1x512xf32>
      %32 = arith.addf %28, %31 : vector<1x512xf32>
      %c0_18 = arith.constant 0 : index
      %c0_19 = arith.constant 0 : index
      %33 = vector.load %arg12[%c0_18, %c0_19] : memref<1x512xf32, #tpu.memory_space<vmem>>, vector<1x512xf32>
      tpu.vector_store %arg12[%c0_18, %c0_19], %32 {strides = array<i32>} : memref<1x512xf32, #tpu.memory_space<vmem>>, vector<1x512xf32>,
    } else {
    }
    %c1_i32 = arith.constant 1 : i32
    %5 = arith.cmpi eq, %arg0, %c1_i32 : i32
    %6 = arith.extui %5 : i1 to i32
    %c0_i32_1 = arith.constant 0 : i32
    %7 = arith.cmpi ne, %6, %c0_i32_1 : i32
    scf.if %7 {
      %c0 = arith.constant 0 : index
      %c0_4 = arith.constant 0 : index
      %14 = vector.load %arg11[%c0, %c0_4] : memref<1x512xf32, #tpu.memory_space<vmem>>, vector<1x512xf32>
      %c0_5 = arith.constant 0 : index
      %c0_6 = arith.constant 0 : index
      %15 = vector.load %arg12[%c0_5, %c0_6] : memref<1x512xf32, #tpu.memory_space<vmem>>, vector<1x512xf32>
      %c0_7 = arith.constant 0 : index
      %c0_8 = arith.constant 0 : index
      %16 = vector.load %arg6[%c0_7, %c0_8] : memref<8x512xf32, #tpu.memory_space<vmem>>, vector<1x512xf32>
      %c1 = arith.constant 1 : index
      %c0_9 = arith.constant 0 : index
      %17 = vector.load %arg6[%c1, %c0_9] : memref<8x512xf32, #tpu.memory_space<vmem>>, vector<1x512xf32>
      %cst = arith.constant 3.906250e-03 : f32
      %18 = vector.broadcast %cst : f32 to vector<1x512xf32>
      %19 = arith.mulf %14, %18 : vector<1x512xf32>
      %cst_10 = arith.constant 3.906250e-03 : f32
      %20 = vector.broadcast %cst_10 : f32 to vector<1x512xf32>
      %21 = arith.mulf %15, %20 : vector<1x512xf32>
      %22 = arith.mulf %19, %19 : vector<1x512xf32>
      %23 = arith.subf %21, %22 : vector<1x512xf32>
      %cst_11 = arith.constant 0.000000e+00 : f32
      %24 = vector.broadcast %cst_11 : f32 to vector<1x512xf32>
      %25 = arith.maximumf %23, %24 : vector<1x512xf32>
      %cst_12 = arith.constant 9.99999974E-6 : f32
      %26 = vector.broadcast %cst_12 : f32 to vector<1x512xf32>
      %27 = arith.addf %25, %26 : vector<1x512xf32>
      %28 = math.rsqrt %27 : vector<1x512xf32>
      %29 = arith.mulf %16, %28 : vector<1x512xf32>
      %30 = arith.mulf %19, %29 : vector<1x512xf32>
      %31 = arith.subf %17, %30 : vector<1x512xf32>
      %32 = arith.index_cast %1 : i32 to index
      %c0_13 = arith.constant 0 : index
      %33 = vector.load %arg8[%32, %c0_13] : memref<256x512xf32, #tpu.memory_space<vmem>>, vector<128x512xf32>
      %34 = vector.broadcast %29 : vector<1x512xf32> to vector<128x512xf32>
      %35 = arith.mulf %33, %34 : vector<128x512xf32>
      %36 = vector.broadcast %31 : vector<1x512xf32> to vector<128x512xf32>
      %37 = arith.addf %35, %36 : vector<128x512xf32>
      %cst_14 = arith.constant 0.000000e+00 : f32
      %38 = vector.broadcast %cst_14 : f32 to vector<128x512xf32>
      %39 = arith.maximumf %37, %38 : vector<128x512xf32>
      %40 = arith.truncf %39 : vector<128x512xf32> to vector<128x512xbf16>
      %c0_15 = arith.constant 0 : index
      %c0_16 = arith.constant 0 : index
      %41 = vector.load %arg4[%c0_15, %c0_16] : memref<512x256xbf16, #tpu.memory_space<vmem>>, vector<512x256xbf16>
      %cst_17 = arith.constant dense<0.000000e+00> : vector<128x256xf32>
      %42 = tpu.matmul %40, %41, %cst_17 {dimension_numbers = #tpu.dot_dimension_numbers<[1], [0], [0], [1], [0, 0, 1, 1], [], []>} : vector<128x512xbf16>, vector<512x256xbf16>, vector<128x256xf32> -> vector<128x256xf32>
      %43 = arith.index_cast %1 : i32 to index
      %c0_18 = arith.constant 0 : index
      %44 = vector.load %arg9[%43, %c0_18] : memref<256x256xf32, #tpu.memory_space<vmem>>, vector<128x256xf32>
      tpu.vector_store %arg9[%43, %c0_18], %42 {strides = array<i32>} : memref<256x256xf32, #tpu.memory_space<vmem>>, vector<128x256xf32>,
      %c0_i32_19 = arith.constant 0 : i32
      %45 = arith.cmpi eq, %arg1, %c0_i32_19 : i32
      %46 = arith.extui %45 : i1 to i32
      %c0_i32_20 = arith.constant 0 : i32
      %47 = arith.cmpi ne, %46, %c0_i32_20 : i32
      scf.if %47 {
        %cst_31 = arith.constant 0.000000e+00 : f32
        %59 = vector.broadcast %cst_31 : f32 to vector<1x256xf32>
        %c0_32 = arith.constant 0 : index
        %c0_33 = arith.constant 0 : index
        %60 = vector.load %arg13[%c0_32, %c0_33] : memref<1x256xf32, #tpu.memory_space<vmem>>, vector<1x256xf32>
        tpu.vector_store %arg13[%c0_32, %c0_33], %59 {strides = array<i32>} : memref<1x256xf32, #tpu.memory_space<vmem>>, vector<1x256xf32>,
        %cst_34 = arith.constant 0.000000e+00 : f32
        %61 = vector.broadcast %cst_34 : f32 to vector<1x256xf32>
        %c0_35 = arith.constant 0 : index
        %c0_36 = arith.constant 0 : index
        %62 = vector.load %arg14[%c0_35, %c0_36] : memref<1x256xf32, #tpu.memory_space<vmem>>, vector<1x256xf32>
        tpu.vector_store %arg14[%c0_35, %c0_36], %61 {strides = array<i32>} : memref<1x256xf32, #tpu.memory_space<vmem>>, vector<1x256xf32>,
      } else {
      }
      %c0_21 = arith.constant 0 : index
      %c0_22 = arith.constant 0 : index
      %48 = vector.load %arg13[%c0_21, %c0_22] : memref<1x256xf32, #tpu.memory_space<vmem>>, vector<1x256xf32>
      %cst_23 = arith.constant dense<0.000000e+00> : vector<256xf32>
      %49 = vector.multi_reduction <add>, %42, %cst_23 [0] : vector<128x256xf32> to vector<256xf32>
      %50 = vector.shape_cast %49 : vector<256xf32> to vector<1x256xf32>
      %51 = arith.addf %48, %50 : vector<1x256xf32>
      %c0_24 = arith.constant 0 : index
      %c0_25 = arith.constant 0 : index
      %52 = vector.load %arg13[%c0_24, %c0_25] : memref<1x256xf32, #tpu.memory_space<vmem>>, vector<1x256xf32>
      tpu.vector_store %arg13[%c0_24, %c0_25], %51 {strides = array<i32>} : memref<1x256xf32, #tpu.memory_space<vmem>>, vector<1x256xf32>,
      %c0_26 = arith.constant 0 : index
      %c0_27 = arith.constant 0 : index
      %53 = vector.load %arg14[%c0_26, %c0_27] : memref<1x256xf32, #tpu.memory_space<vmem>>, vector<1x256xf32>
      %54 = arith.mulf %42, %42 : vector<128x256xf32>
      %cst_28 = arith.constant dense<0.000000e+00> : vector<256xf32>
      %55 = vector.multi_reduction <add>, %54, %cst_28 [0] : vector<128x256xf32> to vector<256xf32>
      %56 = vector.shape_cast %55 : vector<256xf32> to vector<1x256xf32>
      %57 = arith.addf %53, %56 : vector<1x256xf32>
      %c0_29 = arith.constant 0 : index
      %c0_30 = arith.constant 0 : index
      %58 = vector.load %arg14[%c0_29, %c0_30] : memref<1x256xf32, #tpu.memory_space<vmem>>, vector<1x256xf32>
      tpu.vector_store %arg14[%c0_29, %c0_30], %57 {strides = array<i32>} : memref<1x256xf32, #tpu.memory_space<vmem>>, vector<1x256xf32>,
    } else {
    }
    %c2_i32 = arith.constant 2 : i32
    %8 = arith.cmpi eq, %arg0, %c2_i32 : i32
    %9 = arith.extui %8 : i1 to i32
    %c0_i32_2 = arith.constant 0 : i32
    %10 = arith.cmpi ne, %9, %c0_i32_2 : i32
    scf.if %10 {
      %c0 = arith.constant 0 : index
      %c0_4 = arith.constant 0 : index
      %14 = vector.load %arg13[%c0, %c0_4] : memref<1x256xf32, #tpu.memory_space<vmem>>, vector<1x256xf32>
      %c0_5 = arith.constant 0 : index
      %c0_6 = arith.constant 0 : index
      %15 = vector.load %arg14[%c0_5, %c0_6] : memref<1x256xf32, #tpu.memory_space<vmem>>, vector<1x256xf32>
      %c2 = arith.constant 2 : index
      %c0_7 = arith.constant 0 : index
      %16 = vector.load %arg6[%c2, %c0_7] : memref<8x512xf32, #tpu.memory_space<vmem>>, vector<1x256xf32>
      %c3 = arith.constant 3 : index
      %c0_8 = arith.constant 0 : index
      %17 = vector.load %arg6[%c3, %c0_8] : memref<8x512xf32, #tpu.memory_space<vmem>>, vector<1x256xf32>
      %cst = arith.constant 3.906250e-03 : f32
      %18 = vector.broadcast %cst : f32 to vector<1x256xf32>
      %19 = arith.mulf %14, %18 : vector<1x256xf32>
      %cst_9 = arith.constant 3.906250e-03 : f32
      %20 = vector.broadcast %cst_9 : f32 to vector<1x256xf32>
      %21 = arith.mulf %15, %20 : vector<1x256xf32>
      %22 = arith.mulf %19, %19 : vector<1x256xf32>
      %23 = arith.subf %21, %22 : vector<1x256xf32>
      %cst_10 = arith.constant 0.000000e+00 : f32
      %24 = vector.broadcast %cst_10 : f32 to vector<1x256xf32>
      %25 = arith.maximumf %23, %24 : vector<1x256xf32>
      %cst_11 = arith.constant 9.99999974E-6 : f32
      %26 = vector.broadcast %cst_11 : f32 to vector<1x256xf32>
      %27 = arith.addf %25, %26 : vector<1x256xf32>
      %28 = math.rsqrt %27 : vector<1x256xf32>
      %29 = arith.mulf %16, %28 : vector<1x256xf32>
      %30 = arith.mulf %19, %29 : vector<1x256xf32>
      %31 = arith.subf %17, %30 : vector<1x256xf32>
      %32 = arith.index_cast %1 : i32 to index
      %c0_12 = arith.constant 0 : index
      %33 = vector.load %arg9[%32, %c0_12] : memref<256x256xf32, #tpu.memory_space<vmem>>, vector<128x256xf32>
      %34 = vector.broadcast %29 : vector<1x256xf32> to vector<128x256xf32>
      %35 = arith.mulf %33, %34 : vector<128x256xf32>
      %36 = vector.broadcast %31 : vector<1x256xf32> to vector<128x256xf32>
      %37 = arith.addf %35, %36 : vector<128x256xf32>
      %cst_13 = arith.constant 0.000000e+00 : f32
      %38 = vector.broadcast %cst_13 : f32 to vector<128x256xf32>
      %39 = arith.maximumf %37, %38 : vector<128x256xf32>
      %40 = arith.truncf %39 : vector<128x256xf32> to vector<128x256xbf16>
      %c0_14 = arith.constant 0 : index
      %c0_15 = arith.constant 0 : index
      %41 = vector.load %arg5[%c0_14, %c0_15] : memref<256x64xbf16, #tpu.memory_space<vmem>>, vector<256x64xbf16>
      %cst_16 = arith.constant dense<0.000000e+00> : vector<128x64xf32>
      %42 = tpu.matmul %40, %41, %cst_16 {dimension_numbers = #tpu.dot_dimension_numbers<[1], [0], [0], [1], [0, 0, 1, 1], [], []>} : vector<128x256xbf16>, vector<256x64xbf16>, vector<128x64xf32> -> vector<128x64xf32>
      %43 = arith.index_cast %1 : i32 to index
      %c0_17 = arith.constant 0 : index
      %44 = vector.load %arg10[%43, %c0_17] : memref<256x64xf32, #tpu.memory_space<vmem>>, vector<128x64xf32>
      tpu.vector_store %arg10[%43, %c0_17], %42 {strides = array<i32>} : memref<256x64xf32, #tpu.memory_space<vmem>>, vector<128x64xf32>,
      %c0_i32_18 = arith.constant 0 : i32
      %45 = arith.cmpi eq, %arg1, %c0_i32_18 : i32
      %46 = arith.extui %45 : i1 to i32
      %c0_i32_19 = arith.constant 0 : i32
      %47 = arith.cmpi ne, %46, %c0_i32_19 : i32
      scf.if %47 {
        %cst_30 = arith.constant 0.000000e+00 : f32
        %59 = vector.broadcast %cst_30 : f32 to vector<1x64xf32>
        %c0_31 = arith.constant 0 : index
        %c0_32 = arith.constant 0 : index
        %60 = vector.load %arg15[%c0_31, %c0_32] : memref<1x64xf32, #tpu.memory_space<vmem>>, vector<1x64xf32>
        tpu.vector_store %arg15[%c0_31, %c0_32], %59 {strides = array<i32>} : memref<1x64xf32, #tpu.memory_space<vmem>>, vector<1x64xf32>,
        %cst_33 = arith.constant 0.000000e+00 : f32
        %61 = vector.broadcast %cst_33 : f32 to vector<1x64xf32>
        %c0_34 = arith.constant 0 : index
        %c0_35 = arith.constant 0 : index
        %62 = vector.load %arg16[%c0_34, %c0_35] : memref<1x64xf32, #tpu.memory_space<vmem>>, vector<1x64xf32>
        tpu.vector_store %arg16[%c0_34, %c0_35], %61 {strides = array<i32>} : memref<1x64xf32, #tpu.memory_space<vmem>>, vector<1x64xf32>,
      } else {
      }
      %c0_20 = arith.constant 0 : index
      %c0_21 = arith.constant 0 : index
      %48 = vector.load %arg15[%c0_20, %c0_21] : memref<1x64xf32, #tpu.memory_space<vmem>>, vector<1x64xf32>
      %cst_22 = arith.constant dense<0.000000e+00> : vector<64xf32>
      %49 = vector.multi_reduction <add>, %42, %cst_22 [0] : vector<128x64xf32> to vector<64xf32>
      %50 = vector.shape_cast %49 : vector<64xf32> to vector<1x64xf32>
      %51 = arith.addf %48, %50 : vector<1x64xf32>
      %c0_23 = arith.constant 0 : index
      %c0_24 = arith.constant 0 : index
      %52 = vector.load %arg15[%c0_23, %c0_24] : memref<1x64xf32, #tpu.memory_space<vmem>>, vector<1x64xf32>
      tpu.vector_store %arg15[%c0_23, %c0_24], %51 {strides = array<i32>} : memref<1x64xf32, #tpu.memory_space<vmem>>, vector<1x64xf32>,
      %c0_25 = arith.constant 0 : index
      %c0_26 = arith.constant 0 : index
      %53 = vector.load %arg16[%c0_25, %c0_26] : memref<1x64xf32, #tpu.memory_space<vmem>>, vector<1x64xf32>
      %54 = arith.mulf %42, %42 : vector<128x64xf32>
      %cst_27 = arith.constant dense<0.000000e+00> : vector<64xf32>
      %55 = vector.multi_reduction <add>, %54, %cst_27 [0] : vector<128x64xf32> to vector<64xf32>
      %56 = vector.shape_cast %55 : vector<64xf32> to vector<1x64xf32>
      %57 = arith.addf %53, %56 : vector<1x64xf32>
      %c0_28 = arith.constant 0 : index
      %c0_29 = arith.constant 0 : index
      %58 = vector.load %arg16[%c0_28, %c0_29] : memref<1x64xf32, #tpu.memory_space<vmem>>, vector<1x64xf32>
      tpu.vector_store %arg16[%c0_28, %c0_29], %57 {strides = array<i32>} : memref<1x64xf32, #tpu.memory_space<vmem>>, vector<1x64xf32>,
    } else {
    }
    %c3_i32 = arith.constant 3 : i32
    %11 = arith.cmpi eq, %arg0, %c3_i32 : i32
    %12 = arith.extui %11 : i1 to i32
    %c0_i32_3 = arith.constant 0 : i32
    %13 = arith.cmpi ne, %12, %c0_i32_3 : i32
    scf.if %13 {
      %c0 = arith.constant 0 : index
      %c0_4 = arith.constant 0 : index
      %14 = vector.load %arg15[%c0, %c0_4] : memref<1x64xf32, #tpu.memory_space<vmem>>, vector<1x64xf32>
      %c0_5 = arith.constant 0 : index
      %c0_6 = arith.constant 0 : index
      %15 = vector.load %arg16[%c0_5, %c0_6] : memref<1x64xf32, #tpu.memory_space<vmem>>, vector<1x64xf32>
      %c4 = arith.constant 4 : index
      %c0_7 = arith.constant 0 : index
      %16 = vector.load %arg6[%c4, %c0_7] : memref<8x512xf32, #tpu.memory_space<vmem>>, vector<1x64xf32>
      %c5 = arith.constant 5 : index
      %c0_8 = arith.constant 0 : index
      %17 = vector.load %arg6[%c5, %c0_8] : memref<8x512xf32, #tpu.memory_space<vmem>>, vector<1x64xf32>
      %cst = arith.constant 3.906250e-03 : f32
      %18 = vector.broadcast %cst : f32 to vector<1x64xf32>
      %19 = arith.mulf %14, %18 : vector<1x64xf32>
      %cst_9 = arith.constant 3.906250e-03 : f32
      %20 = vector.broadcast %cst_9 : f32 to vector<1x64xf32>
      %21 = arith.mulf %15, %20 : vector<1x64xf32>
      %22 = arith.mulf %19, %19 : vector<1x64xf32>
      %23 = arith.subf %21, %22 : vector<1x64xf32>
      %cst_10 = arith.constant 0.000000e+00 : f32
      %24 = vector.broadcast %cst_10 : f32 to vector<1x64xf32>
      %25 = arith.maximumf %23, %24 : vector<1x64xf32>
      %cst_11 = arith.constant 9.99999974E-6 : f32
      %26 = vector.broadcast %cst_11 : f32 to vector<1x64xf32>
      %27 = arith.addf %25, %26 : vector<1x64xf32>
      %28 = math.rsqrt %27 : vector<1x64xf32>
      %29 = arith.mulf %16, %28 : vector<1x64xf32>
      %30 = arith.mulf %19, %29 : vector<1x64xf32>
      %31 = arith.subf %17, %30 : vector<1x64xf32>
      %32 = arith.index_cast %1 : i32 to index
      %c0_12 = arith.constant 0 : index
      %33 = vector.load %arg10[%32, %c0_12] : memref<256x64xf32, #tpu.memory_space<vmem>>, vector<128x64xf32>
      %34 = vector.broadcast %29 : vector<1x64xf32> to vector<128x64xf32>
      %35 = arith.mulf %33, %34 : vector<128x64xf32>
      %36 = vector.broadcast %31 : vector<1x64xf32> to vector<128x64xf32>
      %37 = arith.addf %35, %36 : vector<128x64xf32>
      %cst_13 = arith.constant 0.000000e+00 : f32
      %38 = vector.broadcast %cst_13 : f32 to vector<128x64xf32>
      %39 = arith.maximumf %37, %38 : vector<128x64xf32>
      %c6 = arith.constant 6 : index
      %c0_14 = arith.constant 0 : index
      %40 = vector.load %arg6[%c6, %c0_14] : memref<8x512xf32, #tpu.memory_space<vmem>>, vector<1x64xf32>
      %cst_15 = arith.constant dense<0.000000e+00> : vector<1x128xf32>
      %41 = tpu.matmul %40, %39, %cst_15 {dimension_numbers = #tpu.dot_dimension_numbers<[1], [1], [0], [0], [0, 0, 1, 0], [], []>} : vector<1x64xf32>, vector<128x64xf32>, vector<1x128xf32> -> vector<1x128xf32>
      %c7 = arith.constant 7 : index
      %c0_16 = arith.constant 0 : index
      %42 = vector.load %arg6[%c7, %c0_16] : memref<8x512xf32, #tpu.memory_space<vmem>>, vector<1x1xf32>
      %43 = vector.broadcast %42 : vector<1x1xf32> to vector<1x128xf32>
      %44 = arith.addf %41, %43 : vector<1x128xf32>
      %cst_17 = arith.constant 0.000000e+00 : f32
      %45 = vector.broadcast %cst_17 : f32 to vector<1x128xf32>
      %46 = arith.subf %45, %44 : vector<1x128xf32>
      %47 = math.exp %46 : vector<1x128xf32>
      %cst_18 = arith.constant 1.000000e+00 : f32
      %48 = vector.broadcast %cst_18 : f32 to vector<1x128xf32>
      %49 = arith.addf %48, %47 : vector<1x128xf32>
      %50 = tpu.reciprocal %49 {approx = true} : vector<1x128xf32> -> vector<1x128xf32>
      %c0_19 = arith.constant 0 : index
      %c0_20 = arith.constant 0 : index
      %51 = vector.load %arg7[%c0_19, %c0_20] : memref<1x128xf32, #tpu.memory_space<vmem>>, vector<1x128xf32>
      tpu.vector_store %arg7[%c0_19, %c0_20], %50 {strides = array<i32>} : memref<1x128xf32, #tpu.memory_space<vmem>>, vector<1x128xf32>,
    } else {
    }
    return
  }
  func.func @transform_0(%arg0: i32, %arg1: i32) -> (i32, i32) {
    %c0_i32 = arith.constant 0 : i32
    %0 = arith.cmpi eq, %arg0, %c0_i32 : i32
    %c0_i32_0 = arith.constant 0 : i32
    %1 = arith.select %0, %arg1, %c0_i32_0 : i32
    %c0_i32_1 = arith.constant 0 : i32
    %c0_i32_2 = arith.constant 0 : i32
    return %1, %c0_i32_1 : i32, i32
  }
  func.func @transform_1(%arg0: i32, %arg1: i32) -> (i32, i32) {
    %c0_i32 = arith.constant 0 : i32
    %c0_i32_0 = arith.constant 0 : i32
    %c0_i32_1 = arith.constant 0 : i32
    return %c0_i32, %c0_i32_0 : i32, i32
  }
  func.func @transform_2(%arg0: i32, %arg1: i32) -> (i32, i32) {
    %c0_i32 = arith.constant 0 : i32
    %c0_i32_0 = arith.constant 0 : i32
    %c0_i32_1 = arith.constant 0 : i32
    return %c0_i32, %c0_i32_0 : i32, i32
  }
  func.func @transform_3(%arg0: i32, %arg1: i32) -> (i32, i32) {
    %c0_i32 = arith.constant 0 : i32
    %c0_i32_0 = arith.constant 0 : i32
    %c0_i32_1 = arith.constant 0 : i32
    return %c0_i32, %c0_i32_0 : i32, i32
  }
  func.func @transform_4(%arg0: i32, %arg1: i32) -> (i32, i32) {
    %c0_i32 = arith.constant 0 : i32
    %c0_i32_0 = arith.constant 0 : i32
    %c0_i32_1 = arith.constant 0 : i32
    return %c0_i32, %c0_i32_0 : i32, i32
  }
  func.func @transform_5(%arg0: i32, %arg1: i32) -> (i32, i32) {
    %c3_i32 = arith.constant 3 : i32
    %0 = arith.cmpi eq, %arg0, %c3_i32 : i32
    %c0_i32 = arith.constant 0 : i32
    %1 = arith.select %0, %arg1, %c0_i32 : i32
    %c0_i32_0 = arith.constant 0 : i32
    %c0_i32_1 = arith.constant 0 : i32
    return %c0_i32_0, %1 : i32, i32
  }
}

</mosaic_0001>

<bundles_post_ra>
// kernel: weight_net_forward.1
= control target key start
LH: loop header
LB: loop body
LE: loop exit
PB: predicated region body
PF: predicated region fallthrough
CT: control target
= control target key end

     0   :  { %s13230_s0 = inlined_call_operand.hbm [shape: f32[256,2048], index: 0, kind: input, shape index: {}]   ;;  %s13231_s1 = inlined_call_operand.hbm [shape: bf16[2048,512], index: 1, kind: input, shape index: {}]   ;;  %s13232_s2 = inlined_call_operand.hbm [shape: bf16[512,256], index: 2, kind: input, shape index: {}]   ;;  %s13233_s3 = inlined_call_operand.vmem [shape: bf16[256,64], index: 3, kind: input, shape index: {}]   ;;  %s13234_s4 = inlined_call_operand.hbm [shape: f32[8,512], index: 4, kind: input, shape index: {}]   ;;  %s13235_s5 = inlined_call_operand.hbm [shape: f32[1,256], index: 5, kind: output, shape index: {}]  }
   0x1   :  { %13436 = sst [smem:[#allocation143_spill]] %s13231_s1 }
   0x2   :  { %13437 = sst [smem:[#allocation144_spill]] %s13232_s2 }
   0x3   :  { %13438 = sst [smem:[#allocation145_spill]] %s13233_s3 }
   0x4   :  { %13439 = sst [smem:[#allocation146_spill]] %s13234_s4 }
   0x5   :  { %13440 = sst [smem:[#allocation147_spill]] %s13235_s5 }
   0x6   :  { %10 = vsyncpa [#allocation12], 0 }
   0x7   :  { %12 = vsyncpa [#allocation12 + $0x1], 0 }
   0x8   :  { %13 = vsyncpa [#allocation15], 0 }
   0x9   :  { %14 = vsyncpa [#allocation18], 0 }
   0xa   :  { %15 = vsyncpa [#allocation13], 0 }
   0xb   :  { %17 = vsyncpa [#allocation13 + $0x1], 0  ;;  %s10132_s18 = smov 0   ;;  %s10134_s19 = smov 0  }
   0xc   :  { %s10136_s20 = smov 0   ;;  %s10138_s21 = smov 0  }
   0xd   :  { %s10140_s22 = smov 0   ;;  %s10142_s23 = smov 0  }
   0xe   :  { %s10144_s24 = smov 0   ;;  %s10146_s25 = smov 0  }
   0xf   :  { %s10148_s26 = smov 0   ;;  %s10150_s27 = smov 0  }
  0x10   :  { %s10152_s28 = smov 0  }
  0x11 LB: > { %13441 = sst [smem:[#allocation24_spill]] %s10042_s18  ;;  %s8029_s29 = sadd.s32 4294967295, %s10082_s28   ;;  %s10082_s28 = sphi %s10152_s28, %s23_s28   ;;  %s10078_s27 = sphi %s10150_s27, %s13991_s27   ;;  %s10074_s26 = sphi %s10148_s26, %s13990_s26   ;;  %s10070_s25 = sphi %s10146_s25, %s13982_s25   ;;  %s10066_s24 = sphi %s10144_s24, %s13981_s24   ;;  %s10062_s23 = sphi %s10142_s23, %s13989_s23   ;;  %s10058_s22 = sphi %s10140_s22, %s13988_s22   ;;  %s10054_s21 = sphi %s10138_s21, %s13987_s21   ;;  %s10050_s20 = sphi %s10136_s20, %s13986_s20   ;;  %s10046_s19 = sphi %s10134_s19, %s13985_s19   ;;  %s10042_s18 = sphi %s10132_s18, %s13984_s18  }
  0x12   : > { %13442 = sst [smem:[#allocation25_spill]] %s10074_s26  ;;  %s8030_s30 = sadd.s32 4294967294, %s10082_s28  }
  0x13   : > { %13443 = sst [smem:[#allocation26_spill]] %s10078_s27  ;;  %p59_p0 = scmp.ne.s32.totalorder %s10058_s22, %s10054_s21 }
  0x14   : > { %p10188_p1 = scmp.eq.s32.totalorder %s8029_s29, 0  ;;  %p170_p2 = scmp.ne.s32.totalorder %s10050_s20, %s10046_s19 }
  0x15   : > { %p171_p4 = scmp.eq.s32.totalorder %s8029_s29, 7  ;;  %p176_p5 = scmp.ne.s32.totalorder %s10046_s19, %s10042_s18 }
  0x16   : > { %s13444_s6 = scalar_select %p10188_p1, 1, 0 }
  0x17   : > { %p10197_p3 = por %p10188_p1, %p59_p0  ;;  %p177_p6 = scmp.eq.s32.totalorder %s8030_s30, 7 }
  0x18   : > { %p10203_p7 = por %p171_p4, %p170_p2  ;;  %p8031_p8 = scmp.ge.s32.totalorder %s10082_s28, 1 }
  0x19   : > { %p10208_p9 = por %p177_p6, %p176_p5  ;;  %p184_p10 = scmp.lt.s32.totalorder %s10082_s28, 9 }
  0x1a   : > { %s13446_s9 = scalar_select %p10203_p7, 1, 0 }
  0x1b   : > { %s13448_s10 = scalar_select %p10208_p9, 1, 0 }
  0x1c   : > { %13447 = sst [smem:[#allocation27_spill]] %s13446_s9  ;;  %p10213_p11 = pnand %p8031_p8, %p184_p10 }
  0x1d   : > { %13449 = sst [smem:[#allocation28_spill]] %s13448_s10  ;;  %s10084_s12 = smov [#allocation14]  }
  0x1e   : > { %s196_s13 = sshll.u32 %s10084_s12, 4  ;;  %p8827_p12 = pneg %p10213_p11  ;;  %s197_s13 = int_to_ptr.vmem [resolvable:$true] %s196_s13 }
  0x1f   : > { %s10085_s15 = smov [#allocation16]   ;;  %s9859_s17 = scalar_lea.vmem %s197_s13, 65536 }
  0x20   : > { %p10221_p13 = pnand %p8827_p12, %p10188_p1  ;;  %s209_s16 = sshll.u32 %s10085_s15, 4  ;;  %s210_s16 = int_to_ptr.vmem [resolvable:$true] %s209_s16 }
  0x21   : > { %p9860_p2 = scmp.ne.s32.totalorder %s197_s13, %s9859_s17  ;;  %p9867_p6 = scmp.lt.s32.totalorder %s197_s13, %s197_s13 }
  0x22   : > { %p9850_p0 = pneg %p10221_p13  ;;  %p9868_p8 = scmp.lt.s32.totalorder %s9859_s17, %s9859_s17 }
  0x24   : > { %p9862_p4 = pnand %p9860_p2, %p9850_p0  ;;  %p9869_p10 = por %p9868_p8, %p9867_p6 }
  0x26   : > { %p9863_p5 = pneg %p9862_p4 }
  0x28   : > { %p9870_p12 = pnand %p9869_p10, %p9863_p5 }
  0x2a   : > { %9873 = shalt.err (!%p9870_p12)
}
  0x2b   : > { %s10086_s21 = smov 256   ;;  %s10087_s29 = smov 16  }
  0x2c   : > { %s13452_s1 = sld [smem:[#allocation143_spill]]  ;;  %s9885_s15 = scalar_lea.vmem %s210_s16, 8192 }
  0x2d   : > { %p9886_p9 = scmp.ne.s32.totalorder %s210_s16, %s9885_s15  ;;  %p9893_p7 = scmp.lt.s32.totalorder %s210_s16, %s210_s16 }
  0x2e   : > { %p9894_p1 = scmp.lt.s32.totalorder %s9885_s15, %s9885_s15 }
  0x2f   : > { %p9888_p2 = pnand %p9886_p9, %p9850_p0 }
  0x30   : > { %p9895_p6 = por %p9894_p1, %p9893_p7 }
  0x31   : > { %p9889_p4 = pneg %p9888_p2 }
  0x32   : > { %8830 = dma.hbm_to_vmem [thread:$0]  (!%p10221_p13), %s13452_s1, 65536, %s197_s13, [#allocation15], %s10086_s21, %s10086_s21, %s10087_s29  }
  0x33   : > { %p9896_p5 = pnand %p9895_p6, %p9889_p4 }
  0x35   : > { %9899 = shalt.err (!%p9896_p5)
}
  0x36   : > { %s13239_s17 = smov 128   ;;  %s10089_s7 = smov 8  }
  0x37   : > { %s13453_s2 = sld [smem:[#allocation144_spill]]  ;;  %s10090_s21 = smov [#allocation17]  }
  0x38   : > { %s226_s29 = sshll.u32 %s10090_s21, 4  ;;  %s227_s29 = int_to_ptr.vmem [resolvable:$true] %s226_s29 }
  0x39   : > { %s9911_s12 = scalar_lea.vmem %s227_s29, 512  ;;  %p9919_p8 = scmp.lt.s32.totalorder %s227_s29, %s227_s29 }
  0x3a   : > { %p9912_p9 = scmp.ne.s32.totalorder %s227_s29, %s9911_s12  ;;  %p9920_p10 = scmp.lt.s32.totalorder %s9911_s12, %s9911_s12 }
  0x3c   : > { %p9914_p1 = pnand %p9912_p9, %p9850_p0  ;;  %p9921_p12 = por %p9920_p10, %p9919_p8 }
  0x3d   : > { %8833 = dma.hbm_to_vmem [thread:$0]  (!%p10221_p13), %s13453_s2, 8192, %s210_s16, [#allocation15], %s13239_s17, %s13239_s17, %s10089_s7  }
  0x3e   : > { %p9915_p7 = pneg %p9914_p1 }
  0x40   : > { %p9922_p2 = pnand %p9921_p12, %p9915_p7 }
  0x42   : > { %9925 = shalt.err (!%p9922_p2)
}
  0x43   : > { %s13454_s4 = sld [smem:[#allocation146_spill]]  ;;  %s32_s7 = sadd.s32 1, %s10074_s26 }
  0x44   : > { %p33_p0 = scmp.ge.s32.totalorder %s32_s7, 2  ;;  %s35_s16 = sadd.s32 1, %s10078_s27 }
  0x45   : > { %p39_p4 = scmp.eq.s32.totalorder %s10078_s27, 0  ;;  %s46_s14 = sadd.s32 1, %s10062_s23 }
  0x46   : > { %s13993_s7 = smov (%p33_p0, %s32_s7), 0  ;;  %s13995_s16 = smov (!%p33_p0, %s35_s16), %s10078_s27 }
  0x47   : > { %s40_s1 = scalar_select %p39_p4, %s10074_s26, 0 }
  0x48   : > { %p37_p6 = scmp.ge.s32.totalorder %s13995_s16, 4  ;;  %p53_p5 = scmp.ne.s32.totalorder %s10062_s23, %s10058_s22 }
  0x49   : > { %8836 = dma.hbm_to_vmem [thread:$0]  (!%p10221_p13), %s13454_s4, 512, %s227_s29, [#allocation18]  }
  0x4a   : > { %p54_p9 = scmp.eq.s32.totalorder %s10082_s28, 0  ;;  %p153_p13 = scmp.eq.s32.totalorder %s10078_s27, 3 }
  0x4b   : > { %s13997_s16 = smov (%p37_p6, %s13995_s16), 0  ;;  %p8848_p7 = scmp.lt.s32.totalorder %s10082_s28, 8 }
  0x4c   : > { %13455 = sst [smem:[#allocation29_spill]] %s13997_s16  ;;  %p10267_p1 = por %p54_p9, %p53_p5 }
  0x4d   : > { %p41_p8 = scmp.eq.s32.totalorder %s13997_s16, 0  ;;  %p155_p10 = scmp.eq.s32.totalorder %s13997_s16, 3 }
  0x4e   : > { %s154_s13 = scalar_select %p153_p13, %s10074_s26, 0 }
  0x4f   : > { %s42_s21 = scalar_select %p41_p8, %s13993_s7, 0 }
  0x50   : > { %s156_s29 = scalar_select %p155_p10, %s13993_s7, 0 }
  0x51   : > { %s43_s12 = ssub.s32 %s40_s1, %s42_s21  ;;  %s237_s15 = sand.u32 1, %s10062_s23  }
  0x52   : > { %p44_p12 = scmp.eq.s32.totalorder %s43_s12, 0  ;;  %s157_s17 = ssub.s32 %s154_s13, %s156_s29 }
  0x53   : > { %p158_p2 = scmp.eq.s32.totalorder %s157_s17, 0  ;;  %s13457_s4 = sadd.s32 1, %s10050_s20 }
  0x54   : > { %s10279_s2 = scalar_select %p44_p12, %s10062_s23, %s46_s14  }
  0x55   : > { %s10284_s27 = scalar_select %p158_p2, %s10050_s20, %s13457_s4  }
  0x56   : > { %s8036_s10 = sshll.u32 %s237_s15, 11  ;;  %s8674_s18 = sshll.u32 %s40_s1, 15 }
  0x57   : > { %s250_s16 = scalar_lea.hbm %s13230_s0, %s8674_s18  ;;  %s241_s3 = scalar_lea.vmem [#allocation11], %s8036_s10 }
  0x58   : > { %s251_s26 = sshll.u32 %s241_s3, 4  ;;  %p10293_p0 = pnand %p8848_p7, %p10267_p1  ;;  %s252_s26 = int_to_ptr.vmem [resolvable:$true] %s251_s26 }
  0x59   : > { %s238_s17 = scalar_lea.sflag [#allocation12], %s237_s15  ;;  %s9939_s4 = scalar_lea.vmem %s252_s26, 32768 }
  0x5a   : > { %p9928_p4 = pneg %p10293_p0  ;;  %p9940_p6 = scmp.ne.s32.totalorder %s252_s26, %s9939_s4 }
  0x5b   : > { %s10091_s14 = smov [#allocation11]  }
  0x5c   : > { %p9942_p5 = pnand %p9940_p6, %p9928_p4  ;;  %s9944_s5 = sshll.u32 %s10091_s14, 4  ;;  %s9945_s5 = int_to_ptr.vmem [resolvable:$false] %s9944_s5 }
  0x5d   : > { %s9946_s18 = scalar_lea.vmem %s9945_s5, 65536  ;;  %p9947_p13 = scmp.lt.s32.totalorder %s252_s26, %s9945_s5 }
  0x5e   : > { %p9943_p9 = pneg %p9942_p5  ;;  %p9948_p8 = scmp.lt.s32.totalorder %s9946_s18, %s9939_s4 }
  0x60   : > { %p9949_p10 = por %p9948_p8, %p9947_p13 }
  0x62   : > { %p9950_p1 = pnand %p9949_p10, %p9943_p9 }
  0x64   : > { %9953 = shalt.err (!%p9950_p1)
}
  0x65   : > { %s10092_s3 = smov 2048   ;;  %s13459_s9 = smov 128  }
  0x66   : > { %8840 = dma.hbm_to_vmem [thread:$0]  (!%p10293_p0), %s250_s16, 32768, %s252_s26, %s238_s17, %s10092_s3, %s10092_s3, %s13459_s9  }
  0x67   : > { %263 = sbr.rel (%p10213_p11) target bundleno = 2065 (0x811), region = 40  ;;  %s265_s10 = sand.u32 (!%p10213_p11), 1, %s10058_s22  }
  0x68   : > { %s8041_s1 = sshll.u32 (!%p10213_p11), %s265_s10, 11  ;;  %s266_s30 = scalar_lea.sflag (!%p10213_p11), [#allocation12], %s265_s10 }
  0x69   : > { %s10305_s13 = scalar_lea.vmem (!%p10213_p11), [#allocation11], %s8041_s1 }
  0x6c   : > { %10025 = dma.done.wait (%p10197_p3), %s266_s30, 32768  }
  0x6d   : > { %10027 = vsyncadd (%p10197_p3), %s266_s30, 4294934528  ;;  %p13460_p7 = scmp.ne.s32.totalorder %s13444_s6, 0 }
  0x6f   : > { %10029 = dma.done.wait (%p13460_p7), [#allocation15], 73728  }
  0x70   : > { %10031 = vsyncadd (%p13460_p7), [#allocation15], 4294893568 }
  0x71   : > { %10033 = dma.done.wait (%p13460_p7), [#allocation18], 512  }
  0x72   : > { %10035 = vsyncadd (%p13460_p7), [#allocation18], 4294966784  ;;  %s305_s26 = sand.u32 1, %s10046_s19   ;;  %s10321_s11 = sshll.u32 %s10066_s24, 7 }
  0x73   : > { %s10325_s8 = scalar_lea.vmem [#allocation19], %s305_s26  ;;  %p8046_p3 = scmp.ne.s32.totalorder %s10070_s25, 0 }
  0x75   : > { %317 = sbr.rel (%p8046_p3) target bundleno = 990 (0x3de), region = 60 }
  0x7a   : > { %v8957_v0 = vld [vmem:[#allocation14 + $0xe4] ss:$16 sps:$4 sm:$0xff]   ;;  %v8961_v2 = vld [vmem:[#allocation14 + $0xe0] ss:$16 sps:$4 sm:$0xff]   ;;  %v319_v46 = vld [vmem:[%s10305_s13 + $0x8] sm:$0xff]  ;;  %s5582_s6 = sshra.s32 %s10321_s11, 3 }
  0x7b   : > { %v8959_v1 = vld [vmem:[#allocation14 + $0x2e4] ss:$16 sps:$4 sm:$0xff]   ;;  %3774 = vmatprep.subr.bf16.mxu0 %v8957_v0  ;;  %v8962_v3 = vld [vmem:[#allocation14 + $0x2e0] ss:$16 sps:$4 sm:$0xff]   ;;  %v335_v47 = vld [vmem:[%s10305_s13 + $0x88] sm:$0xff]  ;;  %s8675_s16 = sshll.u32 %s5582_s6, 5 }
  0x7c   : > { %3887 = vmatprep.subr.bf16.mxu1 %v8959_v1  ;;  %v8963_v4 = vld [vmem:[#allocation14 + $0xc4] ss:$16 sps:$4 sm:$0xff]   ;;  %3775 = vmatpush1.bf16.msra.mxu0 %v8961_v2  ;;  %v8967_v6 = vld [vmem:[#allocation14 + $0xc0] ss:$16 sps:$4 sm:$0xff]   ;;  %v321_v48 = vld [vmem:[%s10305_s13 + $0x18] sm:$0xff]  ;;  %v10332_v53 = vpack.c.bf16 %v335_v47, %v319_v46  ;;  %s11345_s29 = scalar_lea.vmem [#allocation2], %s8675_s16 }
  0x7d   : > { %3888 = vmatpush1.bf16.msra.mxu1 %v8962_v3  ;;  %v8965_v5 = vld [vmem:[#allocation14 + $0x2c4] ss:$16 sps:$4 sm:$0xff]   ;;  %3776 = vmatprep.subr.bf16.mxu0 %v8963_v4  ;;  %v8968_v7 = vld [vmem:[#allocation14 + $0x2c0] ss:$16 sps:$4 sm:$0xff]   ;;  %v337_v49 = vld [vmem:[%s10305_s13 + $0x98] sm:$0xff]  ;;  %p8561_p11 = scmp.ne.s32.totalorder %s10066_s24, 0 }
  0x7e   : > { %3889 = vmatprep.subr.bf16.mxu1 %v8965_v5  ;;  %v8969_v8 = vld [vmem:[#allocation14 + $0xa4] ss:$16 sps:$4 sm:$0xff]   ;;  %v8973_v10 = vld [vmem:[#allocation14 + $0xa0] ss:$16 sps:$4 sm:$0xff]   ;;  %v10334_v54 = vpack.c.bf16 %v337_v49, %v321_v48  ;;  %3806 = vmatprep.mubr.bf16.mxu0 %v10332_v53 }
  0x7f   : > { %v8971_v9 = vld [vmem:[#allocation14 + $0x2a4] ss:$16 sps:$4 sm:$0xff]   ;;  %v8974_v11 = vld [vmem:[#allocation14 + $0x2a0] ss:$16 sps:$4 sm:$0xff]  }
  0x80   : > { %3777 = vmatpush1.bf16.msra.mxu0 %v8967_v6  ;;  %v8975_v12 = vld [vmem:[#allocation14 + $0x84] ss:$16 sps:$4 sm:$0xff]   ;;  %v8979_v14 = vld [vmem:[#allocation14 + $0x80] ss:$16 sps:$4 sm:$0xff]   ;;  %3919 = vmatprep.mubr.bf16.mxu1 %v10334_v54 }
  0x81   : > { %3890 = vmatpush1.bf16.msra.mxu1 %v8968_v7  ;;  %3778 = vmatprep.subr.bf16.mxu0 %v8969_v8  ;;  %v8977_v13 = vld [vmem:[#allocation14 + $0x284] ss:$16 sps:$4 sm:$0xff]   ;;  %v8980_v15 = vld [vmem:[#allocation14 + $0x280] ss:$16 sps:$4 sm:$0xff]  }
  0x82   : > { %3891 = vmatprep.subr.bf16.mxu1 %v8971_v9  ;;  %v8981_v16 = vld [vmem:[#allocation14 + $0x64] ss:$16 sps:$4 sm:$0xff]   ;;  %v8985_v18 = vld [vmem:[#allocation14 + $0x60] ss:$16 sps:$4 sm:$0xff]  }
  0x83   : > { %v8983_v17 = vld [vmem:[#allocation14 + $0x264] ss:$16 sps:$4 sm:$0xff]   ;;  %v8986_v19 = vld [vmem:[#allocation14 + $0x260] ss:$16 sps:$4 sm:$0xff]  }
  0x84   : > { %3779 = vmatpush1.bf16.msra.mxu0 %v8973_v10  ;;  %v8987_v20 = vld [vmem:[#allocation14 + $0x44] ss:$16 sps:$4 sm:$0xff]   ;;  %v8991_v22 = vld [vmem:[#allocation14 + $0x40] ss:$16 sps:$4 sm:$0xff]  }
  0x85   : > { %3892 = vmatpush1.bf16.msra.mxu1 %v8974_v11  ;;  %3780 = vmatprep.subr.bf16.mxu0 %v8975_v12  ;;  %v8989_v21 = vld [vmem:[#allocation14 + $0x244] ss:$16 sps:$4 sm:$0xff]   ;;  %v8992_v23 = vld [vmem:[#allocation14 + $0x240] ss:$16 sps:$4 sm:$0xff]  }
  0x86   : > { %3893 = vmatprep.subr.bf16.mxu1 %v8977_v13  ;;  %v8993_v24 = vld [vmem:[#allocation14 + $0x24] ss:$16 sps:$4 sm:$0xff]   ;;  %v8997_v26 = vld [vmem:[#allocation14 + $0x20] ss:$16 sps:$4 sm:$0xff]  }
  0x87   : > { %v8995_v25 = vld [vmem:[#allocation14 + $0x224] ss:$16 sps:$4 sm:$0xff]   ;;  %v8998_v27 = vld [vmem:[#allocation14 + $0x220] ss:$16 sps:$4 sm:$0xff]  }
  0x88   : > { %3781 = vmatpush1.bf16.msra.mxu0 %v8979_v14  ;;  %v8999_v28 = vld [vmem:[#allocation14 + $0x4] ss:$16 sps:$4 sm:$0xff]   ;;  %v9003_v30 = vld [vmem:[#allocation14] ss:$16 sps:$4 sm:$0xff]   ;;  %v351_v14 = vld [vmem:[%s10305_s13 + $0x108] sm:$0xff] }
  0x89   : > { %3894 = vmatpush1.bf16.msra.mxu1 %v8980_v15  ;;  %3782 = vmatprep.subr.bf16.mxu0 %v8981_v16  ;;  %v9001_v29 = vld [vmem:[#allocation14 + $0x204] ss:$16 sps:$4 sm:$0xff]   ;;  %v9004_v31 = vld [vmem:[#allocation14 + $0x200] ss:$16 sps:$4 sm:$0xff]   ;;  %v367_v15 = vld [vmem:[%s10305_s13 + $0x188] sm:$0xff] }
  0x8a   : > { %3895 = vmatprep.subr.bf16.mxu1 %v8983_v17  ;;  %v9005_v32 = vld [vmem:[#allocation14 + $0x1e4] ss:$16 sps:$4 sm:$0xff]   ;;  %v9009_v34 = vld [vmem:[#allocation14 + $0x1e0] ss:$16 sps:$4 sm:$0xff]  }
  0x8b   : > { %v9007_v33 = vld [vmem:[#allocation14 + $0x3e4] ss:$16 sps:$4 sm:$0xff]   ;;  %v9010_v35 = vld [vmem:[#allocation14 + $0x3e0] ss:$16 sps:$4 sm:$0xff]  }
  0x8c   : > { %3783 = vmatpush1.bf16.msra.mxu0 %v8985_v18  ;;  %v9011_v36 = vld [vmem:[#allocation14 + $0x1c4] ss:$16 sps:$4 sm:$0xff]   ;;  %v9015_v38 = vld [vmem:[#allocation14 + $0x1c0] ss:$16 sps:$4 sm:$0xff]   ;;  %v353_v18 = vld [vmem:[%s10305_s13 + $0x118] sm:$0xff] }
  0x8d   : > { %3896 = vmatpush1.bf16.msra.mxu1 %v8986_v19  ;;  %3784 = vmatprep.subr.bf16.mxu0 %v8987_v20  ;;  %v9013_v37 = vld [vmem:[#allocation14 + $0x3c4] ss:$16 sps:$4 sm:$0xff]   ;;  %v9016_v39 = vld [vmem:[#allocation14 + $0x3c0] ss:$16 sps:$4 sm:$0xff]   ;;  %v369_v19 = vld [vmem:[%s10305_s13 + $0x198] sm:$0xff] }
  0x8e   : > { %3897 = vmatprep.subr.bf16.mxu1 %v8989_v21  ;;  %v9017_v40 = vld [vmem:[#allocation14 + $0x1a4] ss:$16 sps:$4 sm:$0xff]   ;;  %v9021_v42 = vld [vmem:[#allocation14 + $0x1a0] ss:$16 sps:$4 sm:$0xff]  }
  0x8f   : > { %v9019_v41 = vld [vmem:[#allocation14 + $0x3a4] ss:$16 sps:$4 sm:$0xff]   ;;  %v9022_v43 = vld [vmem:[#allocation14 + $0x3a0] ss:$16 sps:$4 sm:$0xff]  }
  0x90   : > { %3785 = vmatpush1.bf16.msra.mxu0 %v8991_v22  ;;  %v9023_v44 = vld [vmem:[#allocation14 + $0x184] ss:$16 sps:$4 sm:$0xff]   ;;  %v9027_v50 = vld [vmem:[#allocation14 + $0x180] ss:$16 sps:$4 sm:$0xff]  }
  0x91   : > { %3898 = vmatpush1.bf16.msra.mxu1 %v8992_v23  ;;  %3786 = vmatprep.subr.bf16.mxu0 %v8993_v24  ;;  %v9025_v45 = vld [vmem:[#allocation14 + $0x384] ss:$16 sps:$4 sm:$0xff]   ;;  %v9028_v51 = vld [vmem:[#allocation14 + $0x380] ss:$16 sps:$4 sm:$0xff]   ;;  %v10350_v23 = vpack.c.bf16 %v367_v15, %v351_v14  ;;  %v10352_v24 = vpack.c.bf16 %v369_v19, %v353_v18  ;;  %v449_v18 = vld [vmem:[%s10305_s13 + $0x418] sm:$0xff] }
  0x92   : > { %3899 = vmatprep.subr.bf16.mxu1 %v8995_v25  ;;  %v9029_v52 = vld [vmem:[#allocation14 + $0x164] ss:$16 sps:$4 sm:$0xff]   ;;  %v9033_v56 = vld [vmem:[#allocation14 + $0x160] ss:$16 sps:$4 sm:$0xff]   ;;  %v465_v19 = vld [vmem:[%s10305_s13 + $0x498] sm:$0xff] }
  0x93   : > { %v9031_v55 = vld [vmem:[#allocation14 + $0x364] ss:$16 sps:$4 sm:$0xff]   ;;  %v9034_v57 = vld [vmem:[#allocation14 + $0x360] ss:$16 sps:$4 sm:$0xff]  }
  0x94   : > { %3787 = vmatpush1.bf16.msra.mxu0 %v8997_v26  ;;  %v9035_v58 = vld [vmem:[#allocation14 + $0x144] ss:$16 sps:$4 sm:$0xff]   ;;  %v9039_v60 = vld [vmem:[#allocation14 + $0x140] ss:$16 sps:$4 sm:$0xff]  }
  0x95   : > { %3900 = vmatpush1.bf16.msra.mxu1 %v8998_v27  ;;  %3788 = vmatprep.subr.bf16.mxu0 %v8999_v28  ;;  %v9037_v59 = vld [vmem:[#allocation14 + $0x344] ss:$16 sps:$4 sm:$0xff]   ;;  %v9040_v61 = vld [vmem:[#allocation14 + $0x340] ss:$16 sps:$4 sm:$0xff]  }
  0x96   : > { %3901 = vmatprep.subr.bf16.mxu1 %v9001_v29  ;;  %v9041_v62 = vld [vmem:[#allocation14 + $0x124] ss:$16 sps:$4 sm:$0xff]   ;;  %v9045_v0 = vld [vmem:[#allocation14 + $0x120] ss:$16 sps:$4 sm:$0xff]  }
  0x97   : > { %v9043_v63 = vld [vmem:[#allocation14 + $0x324] ss:$16 sps:$4 sm:$0xff]   ;;  %v9046_v1 = vld [vmem:[#allocation14 + $0x320] ss:$16 sps:$4 sm:$0xff]  }
  0x98   : > { %3789 = vmatpush1.bf16.msra.mxu0 %v9003_v30  ;;  %v9047_v2 = vld [vmem:[#allocation14 + $0x104] ss:$16 sps:$4 sm:$0xff]   ;;  %v9051_v4 = vld [vmem:[#allocation14 + $0x100] ss:$16 sps:$4 sm:$0xff]  }
  0x99   : > { %3902 = vmatpush1.bf16.msra.mxu1 %v9004_v31  ;;  %3790 = vmatprep.subr.bf16.mxu0 %v9005_v32  ;;  %v9049_v3 = vld [vmem:[#allocation14 + $0x304] ss:$16 sps:$4 sm:$0xff]   ;;  %v9052_v5 = vld [vmem:[#allocation14 + $0x300] ss:$16 sps:$4 sm:$0xff]  }
  0x9a   : > { %3903 = vmatprep.subr.bf16.mxu1 %v9007_v33  ;;  %v318_v6 = vld [vmem:[%s10305_s13] sm:$0xff]  ;;  %v320_v8 = vld [vmem:[%s10305_s13 + $0x10] sm:$0xff] }
  0x9b   : > { %v334_v7 = vld [vmem:[%s10305_s13 + $0x80] sm:$0xff]  ;;  %v336_v9 = vld [vmem:[%s10305_s13 + $0x90] sm:$0xff] }
  0x9c   : > { %3791 = vmatpush2.bf16.msra.mxu0 %v9009_v34  ;;  %v9055_v10 = vld [vmem:[#allocation14 + $0x4e4] ss:$16 sps:$4 sm:$0xff]   ;;  %v9053_v12 = vld [vmem:[#allocation14 + $0x4e0] ss:$16 sps:$4 sm:$0xff]   ;;  %v10344_v16 = vpack.c.bf16 %v334_v7, %v318_v6  ;;  %v10346_v17 = vpack.c.bf16 %v336_v9, %v320_v8  ;;  %v383_v34 = vld [vmem:[%s10305_s13 + $0x208] sm:$0xff] }
  0x9d   : > { %3904 = vmatpush2.bf16.msra.mxu1 %v9010_v35  ;;  %3792 = vmatprep.subr.bf16.mxu0 %v9011_v36  ;;  %v9058_v11 = vld [vmem:[#allocation14 + $0x6e4] ss:$16 sps:$4 sm:$0xff]   ;;  %v9056_v13 = vld [vmem:[#allocation14 + $0x6e0] ss:$16 sps:$4 sm:$0xff]   ;;  %v399_v35 = vld [vmem:[%s10305_s13 + $0x288] sm:$0xff] }
  0x9e   : > { %3905 = vmatprep.subr.bf16.mxu1 %v9013_v37  ;;  %v9061_v20 = vld [vmem:[#allocation14 + $0x4c4] ss:$16 sps:$4 sm:$0xff]   ;;  %v9059_v22 = vld [vmem:[#allocation14 + $0x4c0] ss:$16 sps:$4 sm:$0xff]  }
  0x9f   : > { %v9064_v21 = vld [vmem:[#allocation14 + $0x6c4] ss:$16 sps:$4 sm:$0xff]   ;;  %v9062_v25 = vld [vmem:[#allocation14 + $0x6c0] ss:$16 sps:$4 sm:$0xff]  }
  0xa0   : > { %3793 = vmatpush2.bf16.msra.mxu0 %v9015_v38  ;;  %v350_v26 = vld [vmem:[%s10305_s13 + $0x100] sm:$0xff]  ;;  %v352_v28 = vld [vmem:[%s10305_s13 + $0x110] sm:$0xff]  ;;  %v385_v38 = vld [vmem:[%s10305_s13 + $0x218] sm:$0xff] }
  0xa1   : > { %3906 = vmatpush2.bf16.msra.mxu1 %v9016_v39  ;;  %3794 = vmatprep.subr.bf16.mxu0 %v9017_v40  ;;  %v366_v27 = vld [vmem:[%s10305_s13 + $0x180] sm:$0xff]  ;;  %v368_v29 = vld [vmem:[%s10305_s13 + $0x190] sm:$0xff]  ;;  %v401_v39 = vld [vmem:[%s10305_s13 + $0x298] sm:$0xff] }
  0xa2   : > { %3907 = vmatprep.subr.bf16.mxu1 %v9019_v41  ;;  %v9067_v30 = vld [vmem:[#allocation14 + $0x4a4] ss:$16 sps:$4 sm:$0xff]   ;;  %v9065_v32 = vld [vmem:[#allocation14 + $0x4a0] ss:$16 sps:$4 sm:$0xff]   ;;  %v10364_v36 = vpack.c.bf16 %v366_v27, %v350_v26  ;;  %v10366_v37 = vpack.c.bf16 %v368_v29, %v352_v28  ;;  %v10412_v26 = vpack.c.bf16 %v465_v19, %v449_v18 }
  0xa3   : > { %v9070_v31 = vld [vmem:[#allocation14 + $0x6a4] ss:$16 sps:$4 sm:$0xff]   ;;  %v9068_v33 = vld [vmem:[#allocation14 + $0x6a0] ss:$16 sps:$4 sm:$0xff]  }
  0xa4   : > { %3795 = vmatpush2.bf16.msra.mxu0 %v9021_v42  ;;  %v9073_v40 = vld [vmem:[#allocation14 + $0x484] ss:$16 sps:$4 sm:$0xff]   ;;  %v9071_v42 = vld [vmem:[#allocation14 + $0x480] ss:$16 sps:$4 sm:$0xff]  }
  0xa5   : > { %3908 = vmatpush2.bf16.msra.mxu1 %v9022_v43  ;;  %3796 = vmatprep.subr.bf16.mxu0 %v9023_v44  ;;  %v9076_v41 = vld [vmem:[#allocation14 + $0x684] ss:$16 sps:$4 sm:$0xff]   ;;  %v10370_v43 = vpack.c.bf16 %v399_v35, %v383_v34  ;;  %v10372_v44 = vpack.c.bf16 %v401_v39, %v385_v38  ;;  %v9098_v27 = vld [vmem:[#allocation14 + $0x600] ss:$16 sps:$4 sm:$0xff]   ;;  %v479_v38 = vld [vmem:[%s10305_s13 + $0x508] sm:$0xff] }
  0xa6   : > { %3909 = vmatprep.subr.bf16.mxu1 %v9025_v45  ;;  %v9074_v45 = vld [vmem:[#allocation14 + $0x680] ss:$16 sps:$4 sm:$0xff]   ;;  %v9091_v8 = vld [vmem:[#allocation14 + $0x424] ss:$16 sps:$4 sm:$0xff]   ;;  %v495_v39 = vld [vmem:[%s10305_s13 + $0x588] sm:$0xff] }
  0xa7   : > { %v382_v46 = vld [vmem:[%s10305_s13 + $0x200] sm:$0xff]  ;;  %v384_v48 = vld [vmem:[%s10305_s13 + $0x210] sm:$0xff] }
  0xa8   : > { %3797 = vmatpush2.bf16.msra.mxu0 %v9027_v50  ;;  %v398_v47 = vld [vmem:[%s10305_s13 + $0x280] sm:$0xff]  ;;  %v400_v49 = vld [vmem:[%s10305_s13 + $0x290] sm:$0xff] }
  0xa9   : > { %3910 = vmatpush2.bf16.msra.mxu1 %v9028_v51  ;;  %3798 = vmatprep.subr.bf16.mxu0 %v9029_v52  ;;  %v9079_v50 = vld [vmem:[#allocation14 + $0x464] ss:$16 sps:$4 sm:$0xff]   ;;  %v9077_v52 = vld [vmem:[#allocation14 + $0x460] ss:$16 sps:$4 sm:$0xff]  }
  0xaa   : > { %3911 = vmatprep.subr.bf16.mxu1 %v9031_v55  ;;  %v9082_v51 = vld [vmem:[#allocation14 + $0x664] ss:$16 sps:$4 sm:$0xff]   ;;  %v9080_v55 = vld [vmem:[#allocation14 + $0x660] ss:$16 sps:$4 sm:$0xff]  }
  0xab   : > { %v416_v6 = vld [vmem:[%s10305_s13 + $0x310] sm:$0xff]  ;;  %v446_v28 = vld [vmem:[%s10305_s13 + $0x400] sm:$0xff] }
  0xac   : > { %3799 = vmatpush2.bf16.msra.mxu0 %v9033_v56  ;;  %v415_v56 = vld [vmem:[%s10305_s13 + $0x308] sm:$0xff]  ;;  %v432_v7 = vld [vmem:[%s10305_s13 + $0x390] sm:$0xff]  ;;  %v462_v29 = vld [vmem:[%s10305_s13 + $0x480] sm:$0xff] }
  0xad   : > { %3912 = vmatpush2.bf16.msra.mxu1 %v9034_v57  ;;  %3800 = vmatprep.subr.bf16.mxu0 %v9035_v58  ;;  %v431_v57 = vld [vmem:[%s10305_s13 + $0x388] sm:$0xff]  ;;  %v10384_v58 = vpack.c.bf16 %v398_v47, %v382_v46  ;;  %v9094_v9 = vld [vmem:[#allocation14 + $0x624] ss:$16 sps:$4 sm:$0xff]   ;;  %v10406_v15 = vpack.c.bf16 %v432_v7, %v416_v6  ;;  %v9101_v34 = vld [vmem:[#allocation14 + $0x5e0] ss:$16 sps:$4 sm:$0xff]  }
  0xae   : > { %3913 = vmatprep.subr.bf16.mxu1 %v9037_v59  ;;  %v10386_v59 = vpack.c.bf16 %v400_v49, %v384_v48  ;;  %v9104_v35 = vld [vmem:[#allocation14 + $0x7e0] ss:$16 sps:$4 sm:$0xff]   ;;  %v9109_v46 = vld [vmem:[#allocation14 + $0x5c4] ss:$16 sps:$4 sm:$0xff]   ;;  %v10430_v49 = vpack.c.bf16 %v495_v39, %v479_v38  ;;  %v513_v6 = vld [vmem:[%s10305_s13 + $0x618] sm:$0xff] }
  0xaf   : > { %v9112_v47 = vld [vmem:[#allocation14 + $0x7c4] ss:$16 sps:$4 sm:$0xff]   ;;  %v9107_v48 = vld [vmem:[#allocation14 + $0x5c0] ss:$16 sps:$4 sm:$0xff]   ;;  %v529_v7 = vld [vmem:[%s10305_s13 + $0x698] sm:$0xff] }
  0xb0   : > { %3801 = vmatpush2.bf16.msra.mxu0 %v9039_v60  ;;  %v417_v60 = vld [vmem:[%s10305_s13 + $0x318] sm:$0xff]  ;;  %v510_v18 = vld [vmem:[%s10305_s13 + $0x600] sm:$0xff] }
  0xb1   : > { %3914 = vmatpush2.bf16.msra.mxu1 %v9040_v61  ;;  %3802 = vmatprep.subr.bf16.mxu0 %v9041_v62  ;;  %v433_v61 = vld [vmem:[%s10305_s13 + $0x398] sm:$0xff]  ;;  %v9085_v62 = vld [vmem:[#allocation14 + $0x444] ss:$16 sps:$4 sm:$0xff]  }
  0xb2   : > { %3915 = vmatprep.subr.bf16.mxu1 %v9043_v63  ;;  %v9088_v63 = vld [vmem:[#allocation14 + $0x644] ss:$16 sps:$4 sm:$0xff]  }
  0xb3   : > { %v526_v19 = vld [vmem:[%s10305_s13 + $0x680] sm:$0xff] }
  0xb4   : > { %3803 = vmatpush2.bf16.msra.mxu0 %v9045_v0  ;;  %v9083_v0 = vld [vmem:[#allocation14 + $0x440] ss:$16 sps:$4 sm:$0xff]   ;;  %v9133_v38 = vld [vmem:[#allocation14 + $0x544] ss:$16 sps:$4 sm:$0xff]  }
  0xb5   : > { %3916 = vmatpush2.bf16.msra.mxu1 %v9046_v1  ;;  %3804 = vmatprep.subr.bf16.mxu0 %v9047_v2  ;;  %v10390_v1 = vpack.c.bf16 %v431_v57, %v415_v56  ;;  %v10392_v2 = vpack.c.bf16 %v433_v61, %v417_v60  ;;  %v480_v56 = vld [vmem:[%s10305_s13 + $0x510] sm:$0xff] }
  0xb6   : > { %3917 = vmatprep.subr.bf16.mxu1 %v9049_v3  ;;  %v9086_v3 = vld [vmem:[#allocation14 + $0x640] ss:$16 sps:$4 sm:$0xff]   ;;  %v9115_v60 = vld [vmem:[#allocation14 + $0x5a4] ss:$16 sps:$4 sm:$0xff]  }
  0xb7   : > { %v496_v57 = vld [vmem:[%s10305_s13 + $0x590] sm:$0xff] }
  0xb8   : > { %3805 = vmatpush2.bf16.msra.mxu0 %v9051_v4  ;;  %v414_v4 = vld [vmem:[%s10305_s13 + $0x300] sm:$0xff] }
  0xb9   : > { %3918 = vmatpush2.bf16.msra.mxu1 %v9052_v5  ;;  %4000 = vmatprep.subr.bf16.mxu0 %v9055_v10  ;;  %v430_v5 = vld [vmem:[%s10305_s13 + $0x380] sm:$0xff] }
  0xba   : > { %4113 = vmatprep.subr.bf16.mxu1 %v9058_v11  ;;  %v9089_v10 = vld [vmem:[#allocation14 + $0x420] ss:$16 sps:$4 sm:$0xff]   ;;  %v10404_v14 = vpack.c.bf16 %v430_v5, %v414_v4  ;;  %v9118_v61 = vld [vmem:[#allocation14 + $0x7a4] ss:$16 sps:$4 sm:$0xff]   ;;  %v10446_v5 = vpack.c.bf16 %v496_v57, %v480_v56 }
  0xbb   : > { %3807 = vmatmul.mubr.bf16.vlgmr.msra.gmra.mxu0 %v10344_v16  ;;  %v9092_v11 = vld [vmem:[#allocation14 + $0x620] ss:$16 sps:$4 sm:$0xff]   ;;  %v9136_v39 = vld [vmem:[#allocation14 + $0x744] ss:$16 sps:$4 sm:$0xff]  }
  0xbc   : > { %3920 = vmatmul.mubr.bf16.vlgmr.msra.gmra.mxu1 %v10346_v17  ;;  %4001 = vmatpush1.bf16.msra.mxu0 %v9053_v12  ;;  %v447_v12 = vld [vmem:[%s10305_s13 + $0x408] sm:$0xff]  ;;  %13462 = vst [vmem:[#allocation31_spill] sm:$0xff] %v10446_v5  ;;  %v9139_v56 = vld [vmem:[#allocation14 + $0x524] ss:$16 sps:$4 sm:$0xff]  }
  0xbd   : > { %4114 = vmatpush1.bf16.msra.mxu1 %v9056_v13  ;;  %4002 = vmatprep.subr.bf16.mxu0 %v9061_v20  ;;  %v463_v13 = vld [vmem:[%s10305_s13 + $0x488] sm:$0xff]  ;;  %v9097_v20 = vld [vmem:[#allocation14 + $0x404] ss:$16 sps:$4 sm:$0xff]  }
  0xbe   : > { %4115 = vmatprep.subr.bf16.mxu1 %v9064_v21  ;;  %3816 = vmatprep.mubr.bf16.mxu0 %v10350_v23  ;;  %v9100_v21 = vld [vmem:[#allocation14 + $0x604] ss:$16 sps:$4 sm:$0xff]  }
  0xbf   : > { %3929 = vmatprep.mubr.bf16.mxu1 %v10352_v24  ;;  %v9142_v57 = vld [vmem:[#allocation14 + $0x724] ss:$16 sps:$4 sm:$0xff]  }
  0xc0   : > { %4003 = vmatpush1.bf16.msra.mxu0 %v9059_v22  ;;  %v9095_v22 = vld [vmem:[#allocation14 + $0x400] ss:$16 sps:$4 sm:$0xff]  }
  0xc1   : > { %4116 = vmatpush1.bf16.msra.mxu1 %v9062_v25  ;;  %4004 = vmatprep.subr.bf16.mxu0 %v9067_v30  ;;  %v10410_v25 = vpack.c.bf16 %v463_v13, %v447_v12  ;;  %v448_v30 = vld [vmem:[%s10305_s13 + $0x410] sm:$0xff]  ;;  %v10452_v12 = vpack.c.bf16 %v529_v7, %v513_v6  ;;  %v325_v6 = vld [vmem:[%s10305_s13 + $0x38] sm:$0xff] }
  0xc2   : > { %4117 = vmatprep.subr.bf16.mxu1 %v9070_v31  ;;  %v464_v31 = vld [vmem:[%s10305_s13 + $0x490] sm:$0xff]  ;;  %v341_v7 = vld [vmem:[%s10305_s13 + $0xb8] sm:$0xff] }
  0xc3   : > { %3817 = vmatmul.mubr.bf16.gmra.mxu0 %v10364_v36  ;;  %13464 = vst [vmem:[#allocation33_spill] sm:$0xff] %v10452_v12  ;;  %v9122_v13 = vld [vmem:[#allocation14 + $0x780] ss:$16 sps:$4 sm:$0xff]  }
  0xc4   : > { %3930 = vmatmul.mubr.bf16.gmra.mxu1 %v10366_v37  ;;  %4005 = vmatpush1.bf16.msra.mxu0 %v9065_v32  ;;  %v9103_v32 = vld [vmem:[#allocation14 + $0x5e4] ss:$16 sps:$4 sm:$0xff]  }
  0xc5   : > { %4118 = vmatpush1.bf16.msra.mxu1 %v9068_v33  ;;  %4006 = vmatprep.subr.bf16.mxu0 %v9073_v40  ;;  %v9106_v33 = vld [vmem:[#allocation14 + $0x7e4] ss:$16 sps:$4 sm:$0xff]   ;;  %v10424_v40 = vpack.c.bf16 %v462_v29, %v446_v28  ;;  %v9125_v28 = vld [vmem:[#allocation14 + $0x560] ss:$16 sps:$4 sm:$0xff]  }
  0xc6   : > { %4119 = vmatprep.subr.bf16.mxu1 %v9076_v41  ;;  %3826 = vmatprep.mubr.bf16.mxu0 %v10370_v43  ;;  %v10426_v41 = vpack.c.bf16 %v464_v31, %v448_v30  ;;  %v9128_v29 = vld [vmem:[#allocation14 + $0x760] ss:$16 sps:$4 sm:$0xff]   ;;  %v543_v30 = vld [vmem:[%s10305_s13 + $0x708] sm:$0xff] }
  0xc7   : > { %3939 = vmatprep.mubr.bf16.mxu1 %v10372_v44  ;;  %v559_v31 = vld [vmem:[%s10305_s13 + $0x788] sm:$0xff] }
  0xc8   : > { %4007 = vmatpush1.bf16.msra.mxu0 %v9071_v42  ;;  %v481_v42 = vld [vmem:[%s10305_s13 + $0x518] sm:$0xff] }
  0xc9   : > { %4120 = vmatpush1.bf16.msra.mxu1 %v9074_v45  ;;  %4008 = vmatprep.subr.bf16.mxu0 %v9079_v50  ;;  %v497_v45 = vld [vmem:[%s10305_s13 + $0x598] sm:$0xff] }
  0xca   : > { %4121 = vmatprep.subr.bf16.mxu1 %v9082_v51  ;;  %v10432_v50 = vpack.c.bf16 %v497_v45, %v481_v42  ;;  %v9110_v51 = vld [vmem:[#allocation14 + $0x7c0] ss:$16 sps:$4 sm:$0xff]   ;;  %v10470_v45 = vpack.c.bf16 %v559_v31, %v543_v30 }
  0xcb   : > { %3827 = vmatmul.mubr.bf16.gmra.mxu0 %v10384_v58  ;;  %v9131_v42 = vld [vmem:[#allocation14 + $0x540] ss:$16 sps:$4 sm:$0xff]  }
  0xcc   : > { %3940 = vmatmul.mubr.bf16.gmra.mxu1 %v10386_v59  ;;  %4009 = vmatpush1.bf16.msra.mxu0 %v9077_v52  ;;  %v478_v52 = vld [vmem:[%s10305_s13 + $0x500] sm:$0xff]  ;;  %13467 = vst [vmem:[#allocation36_spill] sm:$0xff] %v10470_v45 }
  0xcd   : > { %4122 = vmatpush1.bf16.msra.mxu1 %v9080_v55  ;;  %4010 = vmatprep.subr.bf16.mxu0 %v9085_v62  ;;  %v494_v55 = vld [vmem:[%s10305_s13 + $0x580] sm:$0xff] }
  0xce   : > { %4123 = vmatprep.subr.bf16.mxu1 %v9088_v63  ;;  %3836 = vmatprep.mubr.bf16.mxu0 %v10390_v1  ;;  %v9113_v62 = vld [vmem:[#allocation14 + $0x5a0] ss:$16 sps:$4 sm:$0xff]   ;;  %v10444_v4 = vpack.c.bf16 %v494_v55, %v478_v52 }
  0xcf   : > { %3949 = vmatprep.mubr.bf16.mxu1 %v10392_v2  ;;  %v9116_v63 = vld [vmem:[#allocation14 + $0x7a0] ss:$16 sps:$4 sm:$0xff]  }
  0xd0   : > { %4011 = vmatpush1.bf16.msra.mxu0 %v9083_v0  ;;  %v511_v0 = vld [vmem:[%s10305_s13 + $0x608] sm:$0xff]  ;;  %13461 = vst [vmem:[#allocation30_spill] sm:$0xff] %v10444_v4  ;;  %v544_v52 = vld [vmem:[%s10305_s13 + $0x710] sm:$0xff] }
  0xd1   : > { %4124 = vmatpush1.bf16.msra.mxu1 %v9086_v3  ;;  %4012 = vmatprep.subr.bf16.mxu0 %v9091_v8  ;;  %v527_v3 = vld [vmem:[%s10305_s13 + $0x688] sm:$0xff]  ;;  %v9121_v8 = vld [vmem:[#allocation14 + $0x584] ss:$16 sps:$4 sm:$0xff]   ;;  %v9149_v30 = vld [vmem:[#allocation14 + $0x8e0] ss:$16 sps:$4 sm:$0xff]  }
  0xd2   : > { %4125 = vmatprep.subr.bf16.mxu1 %v9094_v9  ;;  %v9124_v9 = vld [vmem:[#allocation14 + $0x784] ss:$16 sps:$4 sm:$0xff]   ;;  %v9152_v31 = vld [vmem:[#allocation14 + $0xae0] ss:$16 sps:$4 sm:$0xff]  }
  0xd3   : > { %3837 = vmatmul.mubr.bf16.gmra.mxu0 %v10404_v14  ;;  %v560_v55 = vld [vmem:[%s10305_s13 + $0x790] sm:$0xff] }
  0xd4   : > { %3950 = vmatmul.mubr.bf16.gmra.mxu1 %v10406_v15  ;;  %4013 = vmatpush1.bf16.msra.mxu0 %v9089_v10  ;;  %v9119_v10 = vld [vmem:[#allocation14 + $0x580] ss:$16 sps:$4 sm:$0xff]  }
  0xd5   : > { %4126 = vmatpush1.bf16.msra.mxu1 %v9092_v11  ;;  %4014 = vmatprep.subr.bf16.mxu0 %v9097_v20  ;;  %v10450_v11 = vpack.c.bf16 %v527_v3, %v511_v0  ;;  %v512_v20 = vld [vmem:[%s10305_s13 + $0x610] sm:$0xff]  ;;  %v10486_v3 = vpack.c.bf16 %v560_v55, %v544_v52 }
  0xd6   : > { %4127 = vmatprep.subr.bf16.mxu1 %v9100_v21  ;;  %3846 = vmatprep.mubr.bf16.mxu0 %v10410_v25  ;;  %v528_v21 = vld [vmem:[%s10305_s13 + $0x690] sm:$0xff] }
  0xd7   : > { %3959 = vmatprep.mubr.bf16.mxu1 %v10412_v26  ;;  %13463 = vst [vmem:[#allocation32_spill] sm:$0xff] %v10450_v11  ;;  %13470 = vst [vmem:[#allocation39_spill] sm:$0xff] %v10486_v3  ;;  %v9155_v52 = vld [vmem:[#allocation14 + $0x8c0] ss:$16 sps:$4 sm:$0xff]  }
  0xd8   : > { %4015 = vmatpush1.bf16.msra.mxu0 %v9095_v22  ;;  %v9127_v22 = vld [vmem:[#allocation14 + $0x564] ss:$16 sps:$4 sm:$0xff]  }
  0xd9   : > { %4128 = vmatpush1.bf16.msra.mxu1 %v9098_v27  ;;  %4016 = vmatprep.subr.bf16.mxu0 %v9103_v32  ;;  %v9130_v27 = vld [vmem:[#allocation14 + $0x764] ss:$16 sps:$4 sm:$0xff]   ;;  %v10464_v32 = vpack.c.bf16 %v526_v19, %v510_v18  ;;  %v10492_v18 = vpack.c.bf16 %v341_v7, %v325_v6  ;;  %v9146_v19 = vld [vmem:[#allocation14 + $0x700] ss:$16 sps:$4 sm:$0xff]  }
  0xda   : > { %4129 = vmatprep.subr.bf16.mxu1 %v9106_v33  ;;  %v10466_v33 = vpack.c.bf16 %v528_v21, %v512_v20  ;;  %v322_v20 = vld [vmem:[%s10305_s13 + $0x20] sm:$0xff] }
  0xdb   : > { %3847 = vmatmul.mubr.bf16.gmra.mxu0 %v10424_v40  ;;  %13465 = vst [vmem:[#allocation34_spill] sm:$0xff] %v10464_v32  ;;  %13472 = vst [vmem:[#allocation41_spill] sm:$0xff] %v10492_v18  ;;  %v338_v21 = vld [vmem:[%s10305_s13 + $0xa0] sm:$0xff] }
  0xdc   : > { %3960 = vmatmul.mubr.bf16.gmra.mxu1 %v10426_v41  ;;  %4017 = vmatpush2.bf16.msra.mxu0 %v9101_v34  ;;  %13466 = vst [vmem:[#allocation35_spill] sm:$0xff] %v10466_v33  ;;  %v545_v34 = vld [vmem:[%s10305_s13 + $0x718] sm:$0xff]  ;;  %v9163_v6 = vld [vmem:[#allocation14 + $0x8a4] ss:$16 sps:$4 sm:$0xff]  }
  0xdd   : > { %4130 = vmatpush2.bf16.msra.mxu1 %v9104_v35  ;;  %4018 = vmatprep.subr.bf16.mxu0 %v9109_v46  ;;  %v561_v35 = vld [vmem:[%s10305_s13 + $0x798] sm:$0xff]  ;;  %v9166_v7 = vld [vmem:[#allocation14 + $0xaa4] ss:$16 sps:$4 sm:$0xff]  }
  0xde   : > { %4131 = vmatprep.subr.bf16.mxu1 %v9112_v47  ;;  %3856 = vmatprep.mubr.bf16.mxu0 %v10430_v49  ;;  %v10472_v46 = vpack.c.bf16 %v561_v35, %v545_v34  ;;  %v9134_v47 = vld [vmem:[#allocation14 + $0x740] ss:$16 sps:$4 sm:$0xff]   ;;  %v355_v34 = vld [vmem:[%s10305_s13 + $0x128] sm:$0xff] }
  0xdf   : > { %3969 = vmatprep.mubr.bf16.mxu1 %v10432_v50  ;;  %v371_v35 = vld [vmem:[%s10305_s13 + $0x1a8] sm:$0xff] }
  0xe0   : > { %4019 = vmatpush2.bf16.msra.mxu0 %v9107_v48  ;;  %13468 = vst [vmem:[#allocation37_spill] sm:$0xff] %v10472_v46  ;;  %v542_v48 = vld [vmem:[%s10305_s13 + $0x700] sm:$0xff]  ;;  %v10510_v55 = vpack.c.bf16 %v371_v35, %v355_v34 }
  0xe1   : > { %4132 = vmatpush2.bf16.msra.mxu1 %v9110_v51  ;;  %4020 = vmatprep.subr.bf16.mxu0 %v9115_v60  ;;  %v558_v51 = vld [vmem:[%s10305_s13 + $0x780] sm:$0xff] }
  0xe2   : > { %4133 = vmatprep.subr.bf16.mxu1 %v9118_v61  ;;  %v9137_v60 = vld [vmem:[#allocation14 + $0x520] ss:$16 sps:$4 sm:$0xff]   ;;  %v10484_v0 = vpack.c.bf16 %v558_v51, %v542_v48  ;;  %v9157_v48 = vld [vmem:[#allocation14 + $0x8c4] ss:$16 sps:$4 sm:$0xff]   ;;  %13475 = vst [vmem:[#allocation44_spill] sm:$0xff] %v10510_v55 }
  0xe3   : > { %3857 = vmatmul.mubr.bf16.gmra.mxu0 %v10444_v4  ;;  %v9140_v61 = vld [vmem:[#allocation14 + $0x720] ss:$16 sps:$4 sm:$0xff]   ;;  %v9160_v51 = vld [vmem:[#allocation14 + $0xac4] ss:$16 sps:$4 sm:$0xff]  }
  0xe4   : > { %3970 = vmatmul.mubr.bf16.gmra.mxu1 %v10446_v5  ;;  %4021 = vmatpush2.bf16.msra.mxu0 %v9113_v62  ;;  %v323_v62 = vld [vmem:[%s10305_s13 + $0x28] sm:$0xff]  ;;  %13469 = vst [vmem:[#allocation38_spill] sm:$0xff] %v10484_v0  ;;  %v9170_v35 = vld [vmem:[#allocation14 + $0xa80] ss:$16 sps:$4 sm:$0xff]   ;;  %v525_v5 = vld [vmem:[%s10305_s13 + $0x678] sm:$0xff] }
  0xe5   : > { %4134 = vmatpush2.bf16.msra.mxu1 %v9116_v63  ;;  %4022 = vmatprep.subr.bf16.mxu0 %v9121_v8  ;;  %v339_v63 = vld [vmem:[%s10305_s13 + $0xa8] sm:$0xff]  ;;  %v9145_v8 = vld [vmem:[#allocation14 + $0x504] ss:$16 sps:$4 sm:$0xff]  }
  0xe6   : > { %4135 = vmatprep.subr.bf16.mxu1 %v9124_v9  ;;  %3866 = vmatprep.mubr.bf16.mxu0 %v10450_v11  ;;  %v9148_v9 = vld [vmem:[#allocation14 + $0x704] ss:$16 sps:$4 sm:$0xff]  }
  0xe7   : > { %3979 = vmatprep.mubr.bf16.mxu1 %v10452_v12 }
  0xe8   : > { %4023 = vmatpush2.bf16.msra.mxu0 %v9119_v10  ;;  %v9143_v10 = vld [vmem:[#allocation14 + $0x500] ss:$16 sps:$4 sm:$0xff]  }
  0xe9   : > { %4136 = vmatpush2.bf16.msra.mxu1 %v9122_v13  ;;  %4024 = vmatprep.subr.bf16.mxu0 %v9127_v22  ;;  %v10490_v13 = vpack.c.bf16 %v339_v63, %v323_v62  ;;  %v324_v22 = vld [vmem:[%s10305_s13 + $0x30] sm:$0xff] }
  0xea   : > { %4137 = vmatprep.subr.bf16.mxu1 %v9130_v27  ;;  %v340_v27 = vld [vmem:[%s10305_s13 + $0xb0] sm:$0xff] }
  0xeb   : > { %3867 = vmatmul.mubr.bf16.gmra.mxu0 %v10464_v32  ;;  %13471 = vst [vmem:[#allocation40_spill] sm:$0xff] %v10490_v13  ;;  %v356_v62 = vld [vmem:[%s10305_s13 + $0x130] sm:$0xff] }
  0xec   : > { %3980 = vmatmul.mubr.bf16.gmra.mxu1 %v10466_v33  ;;  %4025 = vmatpush2.bf16.msra.mxu0 %v9125_v28  ;;  %v9151_v28 = vld [vmem:[#allocation14 + $0x8e4] ss:$16 sps:$4 sm:$0xff]   ;;  %v493_v33 = vld [vmem:[%s10305_s13 + $0x578] sm:$0xff] }
  0xed   : > { %4138 = vmatpush2.bf16.msra.mxu1 %v9128_v29  ;;  %4026 = vmatprep.subr.bf16.mxu0 %v9133_v38  ;;  %v9154_v29 = vld [vmem:[#allocation14 + $0xae4] ss:$16 sps:$4 sm:$0xff]   ;;  %v10504_v38 = vpack.c.bf16 %v338_v21, %v322_v20 }
  0xee   : > { %4139 = vmatprep.subr.bf16.mxu1 %v9136_v39  ;;  %3876 = vmatprep.mubr.bf16.mxu0 %v10470_v45  ;;  %v10506_v39 = vpack.c.bf16 %v340_v27, %v324_v22  ;;  %v372_v63 = vld [vmem:[%s10305_s13 + $0x1b0] sm:$0xff]  ;;  %v389_v22 = vld [vmem:[%s10305_s13 + $0x238] sm:$0xff] }
  0xef   : > { %3989 = vmatprep.mubr.bf16.mxu1 %v10472_v46  ;;  %13473 = vst [vmem:[#allocation42_spill] sm:$0xff] %v10504_v38  ;;  %v10526_v21 = vpack.c.bf16 %v372_v63, %v356_v62  ;;  %v405_v27 = vld [vmem:[%s10305_s13 + $0x2b8] sm:$0xff]  ;;  %v419_v62 = vld [vmem:[%s10305_s13 + $0x328] sm:$0xff] }
  0xf0   : > { %4027 = vmatpush2.bf16.msra.mxu0 %v9131_v42  ;;  %13474 = vst [vmem:[#allocation43_spill] sm:$0xff] %v10506_v39  ;;  %v357_v42 = vld [vmem:[%s10305_s13 + $0x138] sm:$0xff]  ;;  %v10532_v34 = vpack.c.bf16 %v405_v27, %v389_v22  ;;  %v435_v63 = vld [vmem:[%s10305_s13 + $0x3a8] sm:$0xff]  ;;  %v9179_v22 = vld [vmem:[#allocation14 + $0x840] ss:$16 sps:$4 sm:$0xff]  }
  0xf1   : > { %4140 = vmatpush2.bf16.msra.mxu1 %v9134_v47  ;;  %4028 = vmatprep.subr.bf16.mxu0 %v9139_v56  ;;  %v373_v47 = vld [vmem:[%s10305_s13 + $0x1b8] sm:$0xff]  ;;  %13478 = vst [vmem:[#allocation47_spill] sm:$0xff] %v10526_v21  ;;  %v10550_v27 = vpack.c.bf16 %v435_v63, %v419_v62  ;;  %v451_v62 = vld [vmem:[%s10305_s13 + $0x428] sm:$0xff] }
  0xf2   : > { %4141 = vmatprep.subr.bf16.mxu1 %v9142_v57  ;;  %v10512_v56 = vpack.c.bf16 %v373_v47, %v357_v42  ;;  %v9158_v57 = vld [vmem:[#allocation14 + $0xac0] ss:$16 sps:$4 sm:$0xff]   ;;  %13480 = vst [vmem:[#allocation49_spill] sm:$0xff] %v10532_v34  ;;  %v467_v63 = vld [vmem:[%s10305_s13 + $0x4a8] sm:$0xff] }
  0xf3   : > { %3877 = vmatmul.mubr.bf16.gmra.mxu0 %v10484_v0  ;;  %v386_v42 = vld [vmem:[%s10305_s13 + $0x220] sm:$0xff]  ;;  %13483 = vst [vmem:[#allocation52_spill] sm:$0xff] %v10550_v27 }
  0xf4   : > { %3990 = vmatmul.mubr.bf16.gmra.mxu1 %v10486_v3  ;;  %4029 = vmatpush2.bf16.msra.mxu0 %v9137_v60  ;;  %13476 = vst [vmem:[#allocation45_spill] sm:$0xff] %v10512_v56  ;;  %v354_v60 = vld [vmem:[%s10305_s13 + $0x120] sm:$0xff]  ;;  %v461_v3 = vld [vmem:[%s10305_s13 + $0x478] sm:$0xff] }
  0xf5   : > { %4142 = vmatpush2.bf16.msra.mxu1 %v9140_v61  ;;  %4030 = vmatprep.subr.bf16.mxu0 %v9145_v8  ;;  %v370_v61 = vld [vmem:[%s10305_s13 + $0x1a0] sm:$0xff] }
  0xf6   : > { %4143 = vmatprep.subr.bf16.mxu1 %v9148_v9  ;;  %4032 = vmatprep.mubr.bf16.mxu0 %v10490_v13  ;;  %v9161_v8 = vld [vmem:[#allocation14 + $0x8a0] ss:$16 sps:$4 sm:$0xff]   ;;  %v10524_v20 = vpack.c.bf16 %v370_v61, %v354_v60 }
  0xf7   : > { %4145 = vmatprep.mubr.bf16.mxu1 %v10492_v18  ;;  %v9164_v9 = vld [vmem:[#allocation14 + $0xaa0] ss:$16 sps:$4 sm:$0xff]  }
  0xf8   : > { %4031 = vmatpush2.bf16.msra.mxu0 %v9143_v10  ;;  %v387_v10 = vld [vmem:[%s10305_s13 + $0x228] sm:$0xff]  ;;  %13477 = vst [vmem:[#allocation46_spill] sm:$0xff] %v10524_v20  ;;  %v402_v47 = vld [vmem:[%s10305_s13 + $0x2a0] sm:$0xff] }
  0xf9   : > { %4144 = vmatpush2.bf16.msra.mxu1 %v9146_v19  ;;  %4226 = vmatprep.subr.bf16.mxu0 %v9151_v28  ;;  %v403_v19 = vld [vmem:[%s10305_s13 + $0x2a8] sm:$0xff]  ;;  %v9169_v28 = vld [vmem:[#allocation14 + $0x884] ss:$16 sps:$4 sm:$0xff]   ;;  %v9173_v60 = vld [vmem:[#allocation14 + $0x860] ss:$16 sps:$4 sm:$0xff]  }
  0xfa   : > { %4339 = vmatprep.subr.bf16.mxu1 %v9154_v29  ;;  %v9172_v29 = vld [vmem:[#allocation14 + $0xa84] ss:$16 sps:$4 sm:$0xff]   ;;  %v9176_v61 = vld [vmem:[#allocation14 + $0xa60] ss:$16 sps:$4 sm:$0xff]  }
  0xfb   : > { %4033 = vmatmul.mubr.bf16.vlgmr.msra.gmra.mxu0 %v10504_v38 }
  0xfc   : > { %4146 = vmatmul.mubr.bf16.vlgmr.msra.gmra.mxu1 %v10506_v39  ;;  %4227 = vmatpush1.bf16.msra.mxu0 %v9149_v30  ;;  %v9167_v30 = vld [vmem:[#allocation14 + $0x880] ss:$16 sps:$4 sm:$0xff]   ;;  %v429_v39 = vld [vmem:[%s10305_s13 + $0x378] sm:$0xff] }
  0xfd   : > { %4340 = vmatpush1.bf16.msra.mxu1 %v9152_v31  ;;  %4228 = vmatprep.subr.bf16.mxu0 %v9157_v48  ;;  %v10530_v31 = vpack.c.bf16 %v403_v19, %v387_v10  ;;  %v388_v48 = vld [vmem:[%s10305_s13 + $0x230] sm:$0xff] }
  0xfe   : > { %4341 = vmatprep.subr.bf16.mxu1 %v9160_v51  ;;  %4042 = vmatprep.mubr.bf16.mxu0 %v10510_v55  ;;  %v404_v51 = vld [vmem:[%s10305_s13 + $0x2b0] sm:$0xff] }
  0xff   : > { %4155 = vmatprep.mubr.bf16.mxu1 %v10512_v56  ;;  %13479 = vst [vmem:[#allocation48_spill] sm:$0xff] %v10530_v31  ;;  %v9181_v10 = vld [vmem:[#allocation14 + $0x844] ss:$16 sps:$4 sm:$0xff]  }
 0x100   : > { %4229 = vmatpush1.bf16.msra.mxu0 %v9155_v52  ;;  %v9175_v52 = vld [vmem:[#allocation14 + $0x864] ss:$16 sps:$4 sm:$0xff]  }
 0x101   : > { %4342 = vmatpush1.bf16.msra.mxu1 %v9158_v57  ;;  %4230 = vmatprep.subr.bf16.mxu0 %v9163_v6  ;;  %v9178_v57 = vld [vmem:[#allocation14 + $0xa64] ss:$16 sps:$4 sm:$0xff]   ;;  %v10544_v6 = vpack.c.bf16 %v402_v47, %v386_v42 }
 0x102   : > { %4343 = vmatprep.subr.bf16.mxu1 %v9166_v7  ;;  %v10546_v7 = vpack.c.bf16 %v404_v51, %v388_v48  ;;  %v9184_v19 = vld [vmem:[#allocation14 + $0xa44] ss:$16 sps:$4 sm:$0xff]  }
 0x103   : > { %4043 = vmatmul.mubr.bf16.gmra.mxu0 %v10524_v20  ;;  %13481 = vst [vmem:[#allocation50_spill] sm:$0xff] %v10544_v6  ;;  %v434_v42 = vld [vmem:[%s10305_s13 + $0x3a0] sm:$0xff]  ;;  %v436_v47 = vld [vmem:[%s10305_s13 + $0x3b0] sm:$0xff] }
 0x104   : > { %4156 = vmatmul.mubr.bf16.gmra.mxu1 %v10526_v21  ;;  %4231 = vmatpush1.bf16.msra.mxu0 %v9161_v8  ;;  %13482 = vst [vmem:[#allocation51_spill] sm:$0xff] %v10546_v7  ;;  %v421_v8 = vld [vmem:[%s10305_s13 + $0x338] sm:$0xff]  ;;  %v9187_v48 = vld [vmem:[#allocation14 + $0x824] ss:$16 sps:$4 sm:$0xff]  }
 0x105   : > { %4344 = vmatpush1.bf16.msra.mxu1 %v9164_v9  ;;  %4232 = vmatprep.subr.bf16.mxu0 %v9169_v28  ;;  %v437_v9 = vld [vmem:[%s10305_s13 + $0x3b8] sm:$0xff]  ;;  %v9190_v51 = vld [vmem:[#allocation14 + $0xa24] ss:$16 sps:$4 sm:$0xff]  }
 0x106   : > { %4345 = vmatprep.subr.bf16.mxu1 %v9172_v29  ;;  %4052 = vmatprep.mubr.bf16.mxu0 %v10530_v31  ;;  %v10552_v28 = vpack.c.bf16 %v437_v9, %v421_v8  ;;  %v9182_v29 = vld [vmem:[#allocation14 + $0xa40] ss:$16 sps:$4 sm:$0xff]   ;;  %v469_v9 = vld [vmem:[%s10305_s13 + $0x4b8] sm:$0xff] }
 0x107   : > { %4165 = vmatprep.mubr.bf16.mxu1 %v10532_v34  ;;  %v397_v21 = vld [vmem:[%s10305_s13 + $0x278] sm:$0xff] }
 0x108   : > { %4233 = vmatpush1.bf16.msra.mxu0 %v9167_v30  ;;  %13484 = vst [vmem:[#allocation53_spill] sm:$0xff] %v10552_v28  ;;  %v418_v30 = vld [vmem:[%s10305_s13 + $0x320] sm:$0xff] }
 0x109   : > { %4346 = vmatpush1.bf16.msra.mxu1 %v9170_v35  ;;  %4234 = vmatprep.subr.bf16.mxu0 %v9175_v52  ;;  %v420_v35 = vld [vmem:[%s10305_s13 + $0x330] sm:$0xff]  ;;  %v10564_v8 = vpack.c.bf16 %v434_v42, %v418_v30  ;;  %v466_v42 = vld [vmem:[%s10305_s13 + $0x4a0] sm:$0xff] }
 0x10a   : > { %4347 = vmatprep.subr.bf16.mxu1 %v9178_v57  ;;  %v9185_v52 = vld [vmem:[#allocation14 + $0x820] ss:$16 sps:$4 sm:$0xff]  }
 0x10b   : > { %4053 = vmatmul.mubr.bf16.gmra.mxu0 %v10544_v6  ;;  %v9188_v57 = vld [vmem:[#allocation14 + $0xa20] ss:$16 sps:$4 sm:$0xff]   ;;  %13485 = vst [vmem:[#allocation54_spill] sm:$0xff] %v10564_v8 }
 0x10c   : > { %4166 = vmatmul.mubr.bf16.gmra.mxu1 %v10546_v7  ;;  %4235 = vmatpush1.bf16.msra.mxu0 %v9173_v60  ;;  %v10566_v60 = vpack.c.bf16 %v436_v47, %v420_v35  ;;  %v9194_v30 = vld [vmem:[#allocation14 + $0xa00] ss:$16 sps:$4 sm:$0xff]   ;;  %v9199_v47 = vld [vmem:[#allocation14 + $0x9e4] ss:$16 sps:$4 sm:$0xff]  }
 0x10d   : > { %4348 = vmatpush1.bf16.msra.mxu1 %v9176_v61  ;;  %4236 = vmatprep.subr.bf16.mxu0 %v9181_v10  ;;  %v453_v61 = vld [vmem:[%s10305_s13 + $0x438] sm:$0xff]  ;;  %v9193_v10 = vld [vmem:[#allocation14 + $0x804] ss:$16 sps:$4 sm:$0xff]  }
 0x10e   : > { %4349 = vmatprep.subr.bf16.mxu1 %v9184_v19  ;;  %4062 = vmatprep.mubr.bf16.mxu0 %v10550_v27  ;;  %13486 = vst [vmem:[#allocation55_spill] sm:$0xff] %v10566_v60  ;;  %v9196_v19 = vld [vmem:[#allocation14 + $0xa04] ss:$16 sps:$4 sm:$0xff]   ;;  %v10570_v27 = vpack.c.bf16 %v467_v63, %v451_v62  ;;  %v10572_v7 = vpack.c.bf16 %v469_v9, %v453_v61  ;;  %v9200_v62 = vld [vmem:[#allocation14 + $0xbe0] ss:$16 sps:$4 sm:$0xff]   ;;  %v483_v63 = vld [vmem:[%s10305_s13 + $0x528] sm:$0xff] }
 0x10f   : > { %4175 = vmatprep.mubr.bf16.mxu1 %v10552_v28  ;;  %v9191_v28 = vld [vmem:[#allocation14 + $0x800] ss:$16 sps:$4 sm:$0xff]   ;;  %v499_v61 = vld [vmem:[%s10305_s13 + $0x5a8] sm:$0xff] }
 0x110   : > { %4237 = vmatpush1.bf16.msra.mxu0 %v9179_v22  ;;  %13487 = vst [vmem:[#allocation56_spill] sm:$0xff] %v10570_v27  ;;  %13488 = vst [vmem:[#allocation57_spill] sm:$0xff] %v10572_v7  ;;  %v450_v22 = vld [vmem:[%s10305_s13 + $0x420] sm:$0xff]  ;;  %v468_v35 = vld [vmem:[%s10305_s13 + $0x4b0] sm:$0xff] }
 0x111   : > { %4350 = vmatpush1.bf16.msra.mxu1 %v9182_v29  ;;  %4238 = vmatprep.subr.bf16.mxu0 %v9187_v48  ;;  %v452_v29 = vld [vmem:[%s10305_s13 + $0x430] sm:$0xff]  ;;  %v10584_v9 = vpack.c.bf16 %v466_v42, %v450_v22  ;;  %v498_v42 = vld [vmem:[%s10305_s13 + $0x5a0] sm:$0xff] }
 0x112   : > { %4351 = vmatprep.subr.bf16.mxu1 %v9190_v51  ;;  %v9202_v48 = vld [vmem:[#allocation14 + $0xbe4] ss:$16 sps:$4 sm:$0xff]   ;;  %v9197_v51 = vld [vmem:[#allocation14 + $0x9e0] ss:$16 sps:$4 sm:$0xff]  }
 0x113   : > { %4063 = vmatmul.mubr.bf16.gmra.mxu0 %v10564_v8  ;;  %13489 = vst [vmem:[#allocation58_spill] sm:$0xff] %v10584_v9  ;;  %v9206_v22 = vld [vmem:[#allocation14 + $0xbc0] ss:$16 sps:$4 sm:$0xff]  }
 0x114   : > { %4176 = vmatmul.mubr.bf16.gmra.mxu1 %v10566_v60  ;;  %4239 = vmatpush1.bf16.msra.mxu0 %v9185_v52  ;;  %v10586_v52 = vpack.c.bf16 %v468_v35, %v452_v29  ;;  %v501_v60 = vld [vmem:[%s10305_s13 + $0x5b8] sm:$0xff]  ;;  %v500_v29 = vld [vmem:[%s10305_s13 + $0x5b0] sm:$0xff] }
 0x115   : > { %4352 = vmatpush1.bf16.msra.mxu1 %v9188_v57  ;;  %4240 = vmatprep.subr.bf16.mxu0 %v9193_v10  ;;  %v485_v57 = vld [vmem:[%s10305_s13 + $0x538] sm:$0xff]  ;;  %v9205_v10 = vld [vmem:[#allocation14 + $0x9c4] ss:$16 sps:$4 sm:$0xff]  }
 0x116   : > { %4353 = vmatprep.subr.bf16.mxu1 %v9196_v19  ;;  %4072 = vmatprep.mubr.bf16.mxu0 %v10570_v27  ;;  %13490 = vst [vmem:[#allocation59_spill] sm:$0xff] %v10586_v52  ;;  %v9208_v19 = vld [vmem:[#allocation14 + $0xbc4] ss:$16 sps:$4 sm:$0xff]   ;;  %v10590_v27 = vpack.c.bf16 %v499_v61, %v483_v63  ;;  %v10592_v8 = vpack.c.bf16 %v501_v60, %v485_v57  ;;  %v515_v63 = vld [vmem:[%s10305_s13 + $0x628] sm:$0xff] }
 0x117   : > { %4185 = vmatprep.mubr.bf16.mxu1 %v10572_v7  ;;  %v9203_v7 = vld [vmem:[#allocation14 + $0x9c0] ss:$16 sps:$4 sm:$0xff]   ;;  %v9211_v35 = vld [vmem:[#allocation14 + $0x9a4] ss:$16 sps:$4 sm:$0xff]   ;;  %v531_v61 = vld [vmem:[%s10305_s13 + $0x6a8] sm:$0xff] }
 0x118   : > { %4241 = vmatpush1.bf16.msra.mxu0 %v9191_v28  ;;  %13491 = vst [vmem:[#allocation60_spill] sm:$0xff] %v10590_v27  ;;  %13492 = vst [vmem:[#allocation61_spill] sm:$0xff] %v10592_v8  ;;  %v482_v28 = vld [vmem:[%s10305_s13 + $0x520] sm:$0xff] }
 0x119   : > { %4354 = vmatpush1.bf16.msra.mxu1 %v9194_v30  ;;  %4242 = vmatprep.subr.bf16.mxu0 %v9199_v47  ;;  %v484_v30 = vld [vmem:[%s10305_s13 + $0x530] sm:$0xff]  ;;  %v10604_v57 = vpack.c.bf16 %v498_v42, %v482_v28  ;;  %v530_v42 = vld [vmem:[%s10305_s13 + $0x6a0] sm:$0xff] }
 0x11a   : > { %4355 = vmatprep.subr.bf16.mxu1 %v9202_v48  ;;  %v9214_v60 = vld [vmem:[#allocation14 + $0xba4] ss:$16 sps:$4 sm:$0xff]   ;;  %v9209_v47 = vld [vmem:[#allocation14 + $0x9a0] ss:$16 sps:$4 sm:$0xff]  }
 0x11b   : > { %4073 = vmatmul.mubr.bf16.gmra.mxu0 %v10584_v9  ;;  %v9212_v48 = vld [vmem:[#allocation14 + $0xba0] ss:$16 sps:$4 sm:$0xff]   ;;  %13493 = vst [vmem:[#allocation62_spill] sm:$0xff] %v10604_v57 }
 0x11c   : > { %4186 = vmatmul.mubr.bf16.gmra.mxu1 %v10586_v52  ;;  %4243 = vmatpush2.bf16.msra.mxu0 %v9197_v51  ;;  %v10606_v51 = vpack.c.bf16 %v500_v29, %v484_v30  ;;  %v533_v52 = vld [vmem:[%s10305_s13 + $0x6b8] sm:$0xff]  ;;  %v9218_v28 = vld [vmem:[#allocation14 + $0xb80] ss:$16 sps:$4 sm:$0xff]   ;;  %v9223_v29 = vld [vmem:[#allocation14 + $0x964] ss:$16 sps:$4 sm:$0xff]  }
 0x11d   : > { %4356 = vmatpush2.bf16.msra.mxu1 %v9200_v62  ;;  %4244 = vmatprep.subr.bf16.mxu0 %v9205_v10  ;;  %v517_v62 = vld [vmem:[%s10305_s13 + $0x638] sm:$0xff]  ;;  %v9217_v10 = vld [vmem:[#allocation14 + $0x984] ss:$16 sps:$4 sm:$0xff]  }
 0x11e   : > { %4357 = vmatprep.subr.bf16.mxu1 %v9208_v19  ;;  %4082 = vmatprep.mubr.bf16.mxu0 %v10590_v27  ;;  %13494 = vst [vmem:[#allocation63_spill] sm:$0xff] %v10606_v51  ;;  %v9220_v19 = vld [vmem:[#allocation14 + $0xb84] ss:$16 sps:$4 sm:$0xff]   ;;  %v10610_v27 = vpack.c.bf16 %v531_v61, %v515_v63  ;;  %v10612_v9 = vpack.c.bf16 %v533_v52, %v517_v62  ;;  %v547_v63 = vld [vmem:[%s10305_s13 + $0x728] sm:$0xff] }
 0x11f   : > { %4195 = vmatprep.mubr.bf16.mxu1 %v10592_v8  ;;  %v9215_v8 = vld [vmem:[#allocation14 + $0x980] ss:$16 sps:$4 sm:$0xff]   ;;  %v9226_v52 = vld [vmem:[#allocation14 + $0xb64] ss:$16 sps:$4 sm:$0xff]   ;;  %v563_v61 = vld [vmem:[%s10305_s13 + $0x7a8] sm:$0xff] }
 0x120   : > { %4245 = vmatpush2.bf16.msra.mxu0 %v9203_v7  ;;  %13495 = vst [vmem:[#allocation64_spill] sm:$0xff] %v10610_v27  ;;  %13496 = vst [vmem:[#allocation65_spill] sm:$0xff] %v10612_v9  ;;  %v514_v7 = vld [vmem:[%s10305_s13 + $0x620] sm:$0xff]  ;;  %v532_v30 = vld [vmem:[%s10305_s13 + $0x6b0] sm:$0xff] }
 0x121   : > { %4358 = vmatpush2.bf16.msra.mxu1 %v9206_v22  ;;  %4246 = vmatprep.subr.bf16.mxu0 %v9211_v35  ;;  %v516_v22 = vld [vmem:[%s10305_s13 + $0x630] sm:$0xff]  ;;  %v10624_v62 = vpack.c.bf16 %v530_v42, %v514_v7  ;;  %v562_v42 = vld [vmem:[%s10305_s13 + $0x7a0] sm:$0xff] }
 0x122   : > { %4359 = vmatprep.subr.bf16.mxu1 %v9214_v60  ;;  %v9221_v35 = vld [vmem:[#allocation14 + $0x960] ss:$16 sps:$4 sm:$0xff]  }
 0x123   : > { %4083 = vmatmul.mubr.bf16.gmra.mxu0 %v10604_v57  ;;  %v9224_v60 = vld [vmem:[#allocation14 + $0xb60] ss:$16 sps:$4 sm:$0xff]   ;;  %13497 = vst [vmem:[#allocation66_spill] sm:$0xff] %v10624_v62 }
 0x124   : > { %4196 = vmatmul.mubr.bf16.gmra.mxu1 %v10606_v51  ;;  %4247 = vmatpush2.bf16.msra.mxu0 %v9209_v47  ;;  %v10626_v47 = vpack.c.bf16 %v532_v30, %v516_v22  ;;  %v565_v51 = vld [vmem:[%s10305_s13 + $0x7b8] sm:$0xff]  ;;  %v9230_v7 = vld [vmem:[#allocation14 + $0xb40] ss:$16 sps:$4 sm:$0xff]   ;;  %v9235_v30 = vld [vmem:[#allocation14 + $0x924] ss:$16 sps:$4 sm:$0xff]  }
 0x125   : > { %4360 = vmatpush2.bf16.msra.mxu1 %v9212_v48  ;;  %4248 = vmatprep.subr.bf16.mxu0 %v9217_v10  ;;  %v549_v48 = vld [vmem:[%s10305_s13 + $0x738] sm:$0xff]  ;;  %v9229_v10 = vld [vmem:[#allocation14 + $0x944] ss:$16 sps:$4 sm:$0xff]  }
 0x126   : > { %4361 = vmatprep.subr.bf16.mxu1 %v9220_v19  ;;  %4092 = vmatprep.mubr.bf16.mxu0 %v10610_v27  ;;  %13498 = vst [vmem:[#allocation67_spill] sm:$0xff] %v10626_v47  ;;  %v9232_v19 = vld [vmem:[#allocation14 + $0xb44] ss:$16 sps:$4 sm:$0xff]   ;;  %v10630_v27 = vpack.c.bf16 %v563_v61, %v547_v63  ;;  %v10632_v57 = vpack.c.bf16 %v565_v51, %v549_v48  ;;  %v327_v63 = vld [vmem:[%s10305_s13 + $0x48] sm:$0xff] }
 0x127   : > { %4205 = vmatprep.mubr.bf16.mxu1 %v10612_v9  ;;  %v9227_v9 = vld [vmem:[#allocation14 + $0x940] ss:$16 sps:$4 sm:$0xff]   ;;  %v9238_v51 = vld [vmem:[#allocation14 + $0xb24] ss:$16 sps:$4 sm:$0xff]   ;;  %v343_v61 = vld [vmem:[%s10305_s13 + $0xc8] sm:$0xff] }
 0x128   : > { %4249 = vmatpush2.bf16.msra.mxu0 %v9215_v8  ;;  %13499 = vst [vmem:[#allocation68_spill] sm:$0xff] %v10630_v27  ;;  %13500 = vst [vmem:[#allocation69_spill] sm:$0xff] %v10632_v57  ;;  %v546_v8 = vld [vmem:[%s10305_s13 + $0x720] sm:$0xff]  ;;  %v564_v22 = vld [vmem:[%s10305_s13 + $0x7b0] sm:$0xff] }
 0x129   : > { %4362 = vmatpush2.bf16.msra.mxu1 %v9218_v28  ;;  %4250 = vmatprep.subr.bf16.mxu0 %v9223_v29  ;;  %v548_v28 = vld [vmem:[%s10305_s13 + $0x730] sm:$0xff]  ;;  %v10644_v48 = vpack.c.bf16 %v562_v42, %v546_v8  ;;  %v342_v42 = vld [vmem:[%s10305_s13 + $0xc0] sm:$0xff] }
 0x12a   : > { %4363 = vmatprep.subr.bf16.mxu1 %v9226_v52  ;;  %v9233_v29 = vld [vmem:[#allocation14 + $0x920] ss:$16 sps:$4 sm:$0xff]  }
 0x12b   : > { %4093 = vmatmul.mubr.bf16.gmra.mxu0 %v10624_v62  ;;  %v9236_v52 = vld [vmem:[#allocation14 + $0xb20] ss:$16 sps:$4 sm:$0xff]   ;;  %13501 = vst [vmem:[#allocation70_spill] sm:$0xff] %v10644_v48 }
 0x12c   : > { %4206 = vmatmul.mubr.bf16.gmra.mxu1 %v10626_v47  ;;  %4251 = vmatpush2.bf16.msra.mxu0 %v9221_v35  ;;  %v10646_v35 = vpack.c.bf16 %v564_v22, %v548_v28  ;;  %v345_v47 = vld [vmem:[%s10305_s13 + $0xd8] sm:$0xff]  ;;  %v9242_v8 = vld [vmem:[#allocation14 + $0xb00] ss:$16 sps:$4 sm:$0xff]   ;;  %v9247_v22 = vld [vmem:[#allocation14 + $0xce4] ss:$16 sps:$4 sm:$0xff]  }
 0x12d   : > { %4364 = vmatpush2.bf16.msra.mxu1 %v9224_v60  ;;  %4252 = vmatprep.subr.bf16.mxu0 %v9229_v10  ;;  %v329_v60 = vld [vmem:[%s10305_s13 + $0x58] sm:$0xff]  ;;  %v9241_v10 = vld [vmem:[#allocation14 + $0x904] ss:$16 sps:$4 sm:$0xff]  }
 0x12e   : > { %4365 = vmatprep.subr.bf16.mxu1 %v9232_v19  ;;  %4102 = vmatprep.mubr.bf16.mxu0 %v10630_v27  ;;  %13502 = vst [vmem:[#allocation71_spill] sm:$0xff] %v10646_v35  ;;  %v9244_v19 = vld [vmem:[#allocation14 + $0xb04] ss:$16 sps:$4 sm:$0xff]   ;;  %v10650_v27 = vpack.c.bf16 %v343_v61, %v327_v63  ;;  %v10652_v62 = vpack.c.bf16 %v345_v47, %v329_v60  ;;  %v359_v63 = vld [vmem:[%s10305_s13 + $0x148] sm:$0xff] }
 0x12f   : > { %4215 = vmatprep.mubr.bf16.mxu1 %v10632_v57  ;;  %v9239_v57 = vld [vmem:[#allocation14 + $0x900] ss:$16 sps:$4 sm:$0xff]   ;;  %v9250_v47 = vld [vmem:[#allocation14 + $0xee4] ss:$16 sps:$4 sm:$0xff]   ;;  %v375_v61 = vld [vmem:[%s10305_s13 + $0x1c8] sm:$0xff] }
 0x130   : > { %4253 = vmatpush2.bf16.msra.mxu0 %v9227_v9  ;;  %13503 = vst [vmem:[#allocation72_spill] sm:$0xff] %v10650_v27  ;;  %13504 = vst [vmem:[#allocation73_spill] sm:$0xff] %v10652_v62  ;;  %v326_v9 = vld [vmem:[%s10305_s13 + $0x40] sm:$0xff]  ;;  %v344_v28 = vld [vmem:[%s10305_s13 + $0xd0] sm:$0xff] }
 0x131   : > { %4366 = vmatpush2.bf16.msra.mxu1 %v9230_v7  ;;  %4254 = vmatprep.subr.bf16.mxu0 %v9235_v30  ;;  %v328_v7 = vld [vmem:[%s10305_s13 + $0x50] sm:$0xff]  ;;  %v10664_v60 = vpack.c.bf16 %v342_v42, %v326_v9  ;;  %v374_v42 = vld [vmem:[%s10305_s13 + $0x1c0] sm:$0xff] }
 0x132   : > { %4367 = vmatprep.subr.bf16.mxu1 %v9238_v51  ;;  %v9245_v30 = vld [vmem:[#allocation14 + $0xce0] ss:$16 sps:$4 sm:$0xff]  }
 0x133   : > { %4103 = vmatmul.mubr.bf16.gmra.mxu0 %v10644_v48  ;;  %v9248_v51 = vld [vmem:[#allocation14 + $0xee0] ss:$16 sps:$4 sm:$0xff]   ;;  %13505 = vst [vmem:[#allocation74_spill] sm:$0xff] %v10664_v60 }
 0x134   : > { %4216 = vmatmul.mubr.bf16.gmra.mxu1 %v10646_v35  ;;  %4255 = vmatpush2.bf16.msra.mxu0 %v9233_v29  ;;  %v10666_v29 = vpack.c.bf16 %v344_v28, %v328_v7  ;;  %v377_v35 = vld [vmem:[%s10305_s13 + $0x1d8] sm:$0xff]  ;;  %v9254_v9 = vld [vmem:[#allocation14 + $0xec0] ss:$16 sps:$4 sm:$0xff]   ;;  %v9259_v28 = vld [vmem:[#allocation14 + $0xca4] ss:$16 sps:$4 sm:$0xff]  }
 0x135   : > { %4368 = vmatpush2.bf16.msra.mxu1 %v9236_v52  ;;  %4256 = vmatprep.subr.bf16.mxu0 %v9241_v10  ;;  %v361_v52 = vld [vmem:[%s10305_s13 + $0x158] sm:$0xff]  ;;  %v9253_v10 = vld [vmem:[#allocation14 + $0xcc4] ss:$16 sps:$4 sm:$0xff]  }
 0x136   : > { %4369 = vmatprep.subr.bf16.mxu1 %v9244_v19  ;;  %4258 = vmatprep.mubr.bf16.mxu0 %v10650_v27  ;;  %13506 = vst [vmem:[#allocation75_spill] sm:$0xff] %v10666_v29  ;;  %v9256_v19 = vld [vmem:[#allocation14 + $0xec4] ss:$16 sps:$4 sm:$0xff]   ;;  %v10670_v27 = vpack.c.bf16 %v375_v61, %v359_v63  ;;  %v10672_v48 = vpack.c.bf16 %v377_v35, %v361_v52  ;;  %v391_v63 = vld [vmem:[%s10305_s13 + $0x248] sm:$0xff] }
 0x137   : > { %4371 = vmatprep.mubr.bf16.mxu1 %v10652_v62  ;;  %v9251_v62 = vld [vmem:[#allocation14 + $0xcc0] ss:$16 sps:$4 sm:$0xff]   ;;  %v9262_v35 = vld [vmem:[#allocation14 + $0xea4] ss:$16 sps:$4 sm:$0xff]   ;;  %v407_v61 = vld [vmem:[%s10305_s13 + $0x2c8] sm:$0xff] }
 0x138   : > { %4257 = vmatpush2.bf16.msra.mxu0 %v9239_v57  ;;  %13507 = vst [vmem:[#allocation76_spill] sm:$0xff] %v10670_v27  ;;  %13508 = vst [vmem:[#allocation77_spill] sm:$0xff] %v10672_v48  ;;  %v358_v57 = vld [vmem:[%s10305_s13 + $0x140] sm:$0xff]  ;;  %v376_v7 = vld [vmem:[%s10305_s13 + $0x1d0] sm:$0xff] }
 0x139   : > { %4370 = vmatpush2.bf16.msra.mxu1 %v9242_v8  ;;  %4452 = vmatprep.subr.bf16.mxu0 %v9247_v22  ;;  %v360_v8 = vld [vmem:[%s10305_s13 + $0x150] sm:$0xff]  ;;  %v10684_v52 = vpack.c.bf16 %v374_v42, %v358_v57  ;;  %v406_v42 = vld [vmem:[%s10305_s13 + $0x2c0] sm:$0xff] }
 0x13a   : > { %4565 = vmatprep.subr.bf16.mxu1 %v9250_v47  ;;  %v9257_v22 = vld [vmem:[#allocation14 + $0xca0] ss:$16 sps:$4 sm:$0xff]  }
 0x13b   : > { %4259 = vmatmul.mubr.bf16.vlgmr.msra.gmra.mxu0 %v10664_v60  ;;  %v9260_v47 = vld [vmem:[#allocation14 + $0xea0] ss:$16 sps:$4 sm:$0xff]   ;;  %13509 = vst [vmem:[#allocation78_spill] sm:$0xff] %v10684_v52 }
 0x13c   : > { %4372 = vmatmul.mubr.bf16.vlgmr.msra.gmra.mxu1 %v10666_v29  ;;  %4453 = vmatpush1.bf16.msra.mxu0 %v9245_v30  ;;  %v10686_v30 = vpack.c.bf16 %v376_v7, %v360_v8  ;;  %v409_v29 = vld [vmem:[%s10305_s13 + $0x2d8] sm:$0xff]  ;;  %v9266_v57 = vld [vmem:[#allocation14 + $0xe80] ss:$16 sps:$4 sm:$0xff]   ;;  %v9271_v7 = vld [vmem:[#allocation14 + $0xc64] ss:$16 sps:$4 sm:$0xff]  }
 0x13d   : > { %4566 = vmatpush1.bf16.msra.mxu1 %v9248_v51  ;;  %4454 = vmatprep.subr.bf16.mxu0 %v9253_v10  ;;  %v393_v51 = vld [vmem:[%s10305_s13 + $0x258] sm:$0xff]  ;;  %v9265_v10 = vld [vmem:[#allocation14 + $0xc84] ss:$16 sps:$4 sm:$0xff]  }
 0x13e   : > { %4567 = vmatprep.subr.bf16.mxu1 %v9256_v19  ;;  %4268 = vmatprep.mubr.bf16.mxu0 %v10670_v27  ;;  %13510 = vst [vmem:[#allocation79_spill] sm:$0xff] %v10686_v30  ;;  %v9268_v19 = vld [vmem:[#allocation14 + $0xe84] ss:$16 sps:$4 sm:$0xff]   ;;  %v10690_v27 = vpack.c.bf16 %v407_v61, %v391_v63  ;;  %v10692_v60 = vpack.c.bf16 %v409_v29, %v393_v51  ;;  %v423_v63 = vld [vmem:[%s10305_s13 + $0x348] sm:$0xff] }
 0x13f   : > { %4381 = vmatprep.mubr.bf16.mxu1 %v10672_v48  ;;  %v9263_v48 = vld [vmem:[#allocation14 + $0xc80] ss:$16 sps:$4 sm:$0xff]   ;;  %v9274_v29 = vld [vmem:[#allocation14 + $0xe64] ss:$16 sps:$4 sm:$0xff]   ;;  %v439_v61 = vld [vmem:[%s10305_s13 + $0x3c8] sm:$0xff] }
 0x140   : > { %4455 = vmatpush1.bf16.msra.mxu0 %v9251_v62  ;;  %13511 = vst [vmem:[#allocation80_spill] sm:$0xff] %v10690_v27  ;;  %13512 = vst [vmem:[#allocation81_spill] sm:$0xff] %v10692_v60  ;;  %v390_v62 = vld [vmem:[%s10305_s13 + $0x240] sm:$0xff]  ;;  %v408_v8 = vld [vmem:[%s10305_s13 + $0x2d0] sm:$0xff] }
 0x141   : > { %4568 = vmatpush1.bf16.msra.mxu1 %v9254_v9  ;;  %4456 = vmatprep.subr.bf16.mxu0 %v9259_v28  ;;  %v392_v9 = vld [vmem:[%s10305_s13 + $0x250] sm:$0xff]  ;;  %v10704_v51 = vpack.c.bf16 %v406_v42, %v390_v62  ;;  %v438_v42 = vld [vmem:[%s10305_s13 + $0x3c0] sm:$0xff] }
 0x142   : > { %4569 = vmatprep.subr.bf16.mxu1 %v9262_v35  ;;  %v9269_v28 = vld [vmem:[#allocation14 + $0xc60] ss:$16 sps:$4 sm:$0xff]  }
 0x143   : > { %4269 = vmatmul.mubr.bf16.gmra.mxu0 %v10684_v52  ;;  %v9272_v35 = vld [vmem:[#allocation14 + $0xe60] ss:$16 sps:$4 sm:$0xff]   ;;  %13513 = vst [vmem:[#allocation82_spill] sm:$0xff] %v10704_v51 }
 0x144   : > { %4382 = vmatmul.mubr.bf16.gmra.mxu1 %v10686_v30  ;;  %4457 = vmatpush1.bf16.msra.mxu0 %v9257_v22  ;;  %v10706_v22 = vpack.c.bf16 %v408_v8, %v392_v9  ;;  %v441_v30 = vld [vmem:[%s10305_s13 + $0x3d8] sm:$0xff]  ;;  %v9278_v62 = vld [vmem:[#allocation14 + $0xe40] ss:$16 sps:$4 sm:$0xff]   ;;  %v9283_v8 = vld [vmem:[#allocation14 + $0xc24] ss:$16 sps:$4 sm:$0xff]  }
 0x145   : > { %4570 = vmatpush1.bf16.msra.mxu1 %v9260_v47  ;;  %4458 = vmatprep.subr.bf16.mxu0 %v9265_v10  ;;  %v425_v47 = vld [vmem:[%s10305_s13 + $0x358] sm:$0xff]  ;;  %v9277_v10 = vld [vmem:[#allocation14 + $0xc44] ss:$16 sps:$4 sm:$0xff]  }
 0x146   : > { %4571 = vmatprep.subr.bf16.mxu1 %v9268_v19  ;;  %4278 = vmatprep.mubr.bf16.mxu0 %v10690_v27  ;;  %13514 = vst [vmem:[#allocation83_spill] sm:$0xff] %v10706_v22  ;;  %v9280_v19 = vld [vmem:[#allocation14 + $0xe44] ss:$16 sps:$4 sm:$0xff]   ;;  %v10710_v27 = vpack.c.bf16 %v439_v61, %v423_v63  ;;  %v10712_v52 = vpack.c.bf16 %v441_v30, %v425_v47  ;;  %v455_v63 = vld [vmem:[%s10305_s13 + $0x448] sm:$0xff] }
 0x147   : > { %4391 = vmatprep.mubr.bf16.mxu1 %v10692_v60  ;;  %v9275_v60 = vld [vmem:[#allocation14 + $0xc40] ss:$16 sps:$4 sm:$0xff]   ;;  %v9286_v30 = vld [vmem:[#allocation14 + $0xe24] ss:$16 sps:$4 sm:$0xff]   ;;  %v471_v61 = vld [vmem:[%s10305_s13 + $0x4c8] sm:$0xff] }
 0x148   : > { %4459 = vmatpush1.bf16.msra.mxu0 %v9263_v48  ;;  %13515 = vst [vmem:[#allocation84_spill] sm:$0xff] %v10710_v27  ;;  %13516 = vst [vmem:[#allocation85_spill] sm:$0xff] %v10712_v52  ;;  %v422_v48 = vld [vmem:[%s10305_s13 + $0x340] sm:$0xff]  ;;  %v440_v9 = vld [vmem:[%s10305_s13 + $0x3d0] sm:$0xff] }
 0x149   : > { %4572 = vmatpush1.bf16.msra.mxu1 %v9266_v57  ;;  %4460 = vmatprep.subr.bf16.mxu0 %v9271_v7  ;;  %v424_v57 = vld [vmem:[%s10305_s13 + $0x350] sm:$0xff]  ;;  %v10724_v47 = vpack.c.bf16 %v438_v42, %v422_v48  ;;  %v470_v42 = vld [vmem:[%s10305_s13 + $0x4c0] sm:$0xff] }
 0x14a   : > { %4573 = vmatprep.subr.bf16.mxu1 %v9274_v29  ;;  %v9281_v7 = vld [vmem:[#allocation14 + $0xc20] ss:$16 sps:$4 sm:$0xff]  }
 0x14b   : > { %4279 = vmatmul.mubr.bf16.gmra.mxu0 %v10704_v51  ;;  %v9284_v29 = vld [vmem:[#allocation14 + $0xe20] ss:$16 sps:$4 sm:$0xff]   ;;  %13517 = vst [vmem:[#allocation86_spill] sm:$0xff] %v10724_v47 }
 0x14c   : > { %4392 = vmatmul.mubr.bf16.gmra.mxu1 %v10706_v22  ;;  %4461 = vmatpush1.bf16.msra.mxu0 %v9269_v28  ;;  %v10726_v28 = vpack.c.bf16 %v440_v9, %v424_v57  ;;  %v473_v22 = vld [vmem:[%s10305_s13 + $0x4d8] sm:$0xff]  ;;  %v9290_v48 = vld [vmem:[#allocation14 + $0xe00] ss:$16 sps:$4 sm:$0xff]   ;;  %v9295_v9 = vld [vmem:[#allocation14 + $0xde4] ss:$16 sps:$4 sm:$0xff]  }
 0x14d   : > { %4574 = vmatpush1.bf16.msra.mxu1 %v9272_v35  ;;  %4462 = vmatprep.subr.bf16.mxu0 %v9277_v10  ;;  %v457_v35 = vld [vmem:[%s10305_s13 + $0x458] sm:$0xff]  ;;  %v9289_v10 = vld [vmem:[#allocation14 + $0xc04] ss:$16 sps:$4 sm:$0xff]  }
 0x14e   : > { %4575 = vmatprep.subr.bf16.mxu1 %v9280_v19  ;;  %4288 = vmatprep.mubr.bf16.mxu0 %v10710_v27  ;;  %13518 = vst [vmem:[#allocation87_spill] sm:$0xff] %v10726_v28  ;;  %v9292_v19 = vld [vmem:[#allocation14 + $0xe04] ss:$16 sps:$4 sm:$0xff]   ;;  %v10730_v27 = vpack.c.bf16 %v471_v61, %v455_v63  ;;  %v10732_v51 = vpack.c.bf16 %v473_v22, %v457_v35  ;;  %v487_v63 = vld [vmem:[%s10305_s13 + $0x548] sm:$0xff] }
 0x14f   : > { %4401 = vmatprep.mubr.bf16.mxu1 %v10712_v52  ;;  %v9287_v52 = vld [vmem:[#allocation14 + $0xc00] ss:$16 sps:$4 sm:$0xff]   ;;  %v9298_v22 = vld [vmem:[#allocation14 + $0xfe4] ss:$16 sps:$4 sm:$0xff]   ;;  %v503_v61 = vld [vmem:[%s10305_s13 + $0x5c8] sm:$0xff] }
 0x150   : > { %4463 = vmatpush1.bf16.msra.mxu0 %v9275_v60  ;;  %13519 = vst [vmem:[#allocation88_spill] sm:$0xff] %v10730_v27  ;;  %13520 = vst [vmem:[#allocation89_spill] sm:$0xff] %v10732_v51  ;;  %v454_v60 = vld [vmem:[%s10305_s13 + $0x440] sm:$0xff]  ;;  %v472_v57 = vld [vmem:[%s10305_s13 + $0x4d0] sm:$0xff] }
 0x151   : > { %4576 = vmatpush1.bf16.msra.mxu1 %v9278_v62  ;;  %4464 = vmatprep.subr.bf16.mxu0 %v9283_v8  ;;  %v456_v62 = vld [vmem:[%s10305_s13 + $0x450] sm:$0xff]  ;;  %v10744_v35 = vpack.c.bf16 %v470_v42, %v454_v60  ;;  %v502_v42 = vld [vmem:[%s10305_s13 + $0x5c0] sm:$0xff] }
 0x152   : > { %4577 = vmatprep.subr.bf16.mxu1 %v9286_v30  ;;  %v9293_v8 = vld [vmem:[#allocation14 + $0xde0] ss:$16 sps:$4 sm:$0xff]  }
 0x153   : > { %4289 = vmatmul.mubr.bf16.gmra.mxu0 %v10724_v47  ;;  %v9296_v30 = vld [vmem:[#allocation14 + $0xfe0] ss:$16 sps:$4 sm:$0xff]   ;;  %13521 = vst [vmem:[#allocation90_spill] sm:$0xff] %v10744_v35 }
 0x154   : > { %4402 = vmatmul.mubr.bf16.gmra.mxu1 %v10726_v28  ;;  %4465 = vmatpush1.bf16.msra.mxu0 %v9281_v7  ;;  %v10746_v7 = vpack.c.bf16 %v472_v57, %v456_v62  ;;  %v505_v28 = vld [vmem:[%s10305_s13 + $0x5d8] sm:$0xff]  ;;  %v9302_v60 = vld [vmem:[#allocation14 + $0xfc0] ss:$16 sps:$4 sm:$0xff]   ;;  %v9307_v57 = vld [vmem:[#allocation14 + $0xda4] ss:$16 sps:$4 sm:$0xff]  }
 0x155   : > { %4578 = vmatpush1.bf16.msra.mxu1 %v9284_v29  ;;  %4466 = vmatprep.subr.bf16.mxu0 %v9289_v10  ;;  %v489_v29 = vld [vmem:[%s10305_s13 + $0x558] sm:$0xff]  ;;  %v9301_v10 = vld [vmem:[#allocation14 + $0xdc4] ss:$16 sps:$4 sm:$0xff]  }
 0x156   : > { %4579 = vmatprep.subr.bf16.mxu1 %v9292_v19  ;;  %4298 = vmatprep.mubr.bf16.mxu0 %v10730_v27  ;;  %13522 = vst [vmem:[#allocation91_spill] sm:$0xff] %v10746_v7  ;;  %v9304_v19 = vld [vmem:[#allocation14 + $0xfc4] ss:$16 sps:$4 sm:$0xff]   ;;  %v10750_v27 = vpack.c.bf16 %v503_v61, %v487_v63  ;;  %v10752_v47 = vpack.c.bf16 %v505_v28, %v489_v29  ;;  %v519_v63 = vld [vmem:[%s10305_s13 + $0x648] sm:$0xff] }
 0x157   : > { %4411 = vmatprep.mubr.bf16.mxu1 %v10732_v51  ;;  %v9299_v51 = vld [vmem:[#allocation14 + $0xdc0] ss:$16 sps:$4 sm:$0xff]   ;;  %v9310_v28 = vld [vmem:[#allocation14 + $0xfa4] ss:$16 sps:$4 sm:$0xff]   ;;  %v535_v61 = vld [vmem:[%s10305_s13 + $0x6c8] sm:$0xff] }
 0x158   : > { %4467 = vmatpush1.bf16.msra.mxu0 %v9287_v52  ;;  %13523 = vst [vmem:[#allocation92_spill] sm:$0xff] %v10750_v27  ;;  %13524 = vst [vmem:[#allocation93_spill] sm:$0xff] %v10752_v47  ;;  %v486_v52 = vld [vmem:[%s10305_s13 + $0x540] sm:$0xff]  ;;  %v504_v62 = vld [vmem:[%s10305_s13 + $0x5d0] sm:$0xff] }
 0x159   : > { %4580 = vmatpush1.bf16.msra.mxu1 %v9290_v48  ;;  %4468 = vmatprep.subr.bf16.mxu0 %v9295_v9  ;;  %v488_v48 = vld [vmem:[%s10305_s13 + $0x550] sm:$0xff]  ;;  %v10764_v29 = vpack.c.bf16 %v502_v42, %v486_v52  ;;  %v534_v42 = vld [vmem:[%s10305_s13 + $0x6c0] sm:$0xff] }
 0x15a   : > { %4581 = vmatprep.subr.bf16.mxu1 %v9298_v22  ;;  %v9305_v9 = vld [vmem:[#allocation14 + $0xda0] ss:$16 sps:$4 sm:$0xff]  }
 0x15b   : > { %4299 = vmatmul.mubr.bf16.gmra.mxu0 %v10744_v35  ;;  %v9308_v22 = vld [vmem:[#allocation14 + $0xfa0] ss:$16 sps:$4 sm:$0xff]   ;;  %13525 = vst [vmem:[#allocation94_spill] sm:$0xff] %v10764_v29 }
 0x15c   : > { %4412 = vmatmul.mubr.bf16.gmra.mxu1 %v10746_v7  ;;  %4469 = vmatpush2.bf16.msra.mxu0 %v9293_v8  ;;  %v10766_v8 = vpack.c.bf16 %v504_v62, %v488_v48  ;;  %v537_v7 = vld [vmem:[%s10305_s13 + $0x6d8] sm:$0xff]  ;;  %v9314_v52 = vld [vmem:[#allocation14 + $0xf80] ss:$16 sps:$4 sm:$0xff]   ;;  %v9319_v62 = vld [vmem:[#allocation14 + $0xd64] ss:$16 sps:$4 sm:$0xff]  }
 0x15d   : > { %4582 = vmatpush2.bf16.msra.mxu1 %v9296_v30  ;;  %4470 = vmatprep.subr.bf16.mxu0 %v9301_v10  ;;  %v521_v30 = vld [vmem:[%s10305_s13 + $0x658] sm:$0xff]  ;;  %v9313_v10 = vld [vmem:[#allocation14 + $0xd84] ss:$16 sps:$4 sm:$0xff]  }
 0x15e   : > { %4583 = vmatprep.subr.bf16.mxu1 %v9304_v19  ;;  %4308 = vmatprep.mubr.bf16.mxu0 %v10750_v27  ;;  %13526 = vst [vmem:[#allocation95_spill] sm:$0xff] %v10766_v8  ;;  %v9316_v19 = vld [vmem:[#allocation14 + $0xf84] ss:$16 sps:$4 sm:$0xff]   ;;  %v10770_v27 = vpack.c.bf16 %v535_v61, %v519_v63  ;;  %v10772_v35 = vpack.c.bf16 %v537_v7, %v521_v30  ;;  %v551_v63 = vld [vmem:[%s10305_s13 + $0x748] sm:$0xff] }
 0x15f   : > { %4421 = vmatprep.mubr.bf16.mxu1 %v10752_v47  ;;  %v9311_v47 = vld [vmem:[#allocation14 + $0xd80] ss:$16 sps:$4 sm:$0xff]   ;;  %v9322_v7 = vld [vmem:[#allocation14 + $0xf64] ss:$16 sps:$4 sm:$0xff]   ;;  %v567_v61 = vld [vmem:[%s10305_s13 + $0x7c8] sm:$0xff] }
 0x160   : > { %4471 = vmatpush2.bf16.msra.mxu0 %v9299_v51  ;;  %13527 = vst [vmem:[#allocation96_spill] sm:$0xff] %v10770_v27  ;;  %13528 = vst [vmem:[#allocation97_spill] sm:$0xff] %v10772_v35  ;;  %v518_v51 = vld [vmem:[%s10305_s13 + $0x640] sm:$0xff]  ;;  %v536_v48 = vld [vmem:[%s10305_s13 + $0x6d0] sm:$0xff] }
 0x161   : > { %4584 = vmatpush2.bf16.msra.mxu1 %v9302_v60  ;;  %4472 = vmatprep.subr.bf16.mxu0 %v9307_v57  ;;  %v520_v60 = vld [vmem:[%s10305_s13 + $0x650] sm:$0xff]  ;;  %v10784_v30 = vpack.c.bf16 %v534_v42, %v518_v51  ;;  %v566_v42 = vld [vmem:[%s10305_s13 + $0x7c0] sm:$0xff] }
 0x162   : > { %4585 = vmatprep.subr.bf16.mxu1 %v9310_v28  ;;  %v9317_v57 = vld [vmem:[#allocation14 + $0xd60] ss:$16 sps:$4 sm:$0xff]  }
 0x163   : > { %4309 = vmatmul.mubr.bf16.gmra.mxu0 %v10764_v29  ;;  %v9320_v28 = vld [vmem:[#allocation14 + $0xf60] ss:$16 sps:$4 sm:$0xff]   ;;  %13529 = vst [vmem:[#allocation98_spill] sm:$0xff] %v10784_v30 }
 0x164   : > { %4422 = vmatmul.mubr.bf16.gmra.mxu1 %v10766_v8  ;;  %4473 = vmatpush2.bf16.msra.mxu0 %v9305_v9  ;;  %v10786_v9 = vpack.c.bf16 %v536_v48, %v520_v60  ;;  %v569_v8 = vld [vmem:[%s10305_s13 + $0x7d8] sm:$0xff]  ;;  %v9326_v51 = vld [vmem:[#allocation14 + $0xf40] ss:$16 sps:$4 sm:$0xff]   ;;  %v9331_v48 = vld [vmem:[#allocation14 + $0xd24] ss:$16 sps:$4 sm:$0xff]  }
 0x165   : > { %4586 = vmatpush2.bf16.msra.mxu1 %v9308_v22  ;;  %4474 = vmatprep.subr.bf16.mxu0 %v9313_v10  ;;  %v553_v22 = vld [vmem:[%s10305_s13 + $0x758] sm:$0xff]  ;;  %v9325_v10 = vld [vmem:[#allocation14 + $0xd44] ss:$16 sps:$4 sm:$0xff]  }
 0x166   : > { %4587 = vmatprep.subr.bf16.mxu1 %v9316_v19  ;;  %4318 = vmatprep.mubr.bf16.mxu0 %v10770_v27  ;;  %13530 = vst [vmem:[#allocation99_spill] sm:$0xff] %v10786_v9  ;;  %v9328_v19 = vld [vmem:[#allocation14 + $0xf44] ss:$16 sps:$4 sm:$0xff]   ;;  %v10790_v27 = vpack.c.bf16 %v567_v61, %v551_v63  ;;  %v10792_v29 = vpack.c.bf16 %v569_v8, %v553_v22  ;;  %v331_v63 = vld [vmem:[%s10305_s13 + $0x68] sm:$0xff] }
 0x167   : > { %4431 = vmatprep.mubr.bf16.mxu1 %v10772_v35  ;;  %v9323_v35 = vld [vmem:[#allocation14 + $0xd40] ss:$16 sps:$4 sm:$0xff]   ;;  %v9334_v8 = vld [vmem:[#allocation14 + $0xf24] ss:$16 sps:$4 sm:$0xff]   ;;  %v347_v61 = vld [vmem:[%s10305_s13 + $0xe8] sm:$0xff] }
 0x168   : > { %4475 = vmatpush2.bf16.msra.mxu0 %v9311_v47  ;;  %13531 = vst [vmem:[#allocation100_spill] sm:$0xff] %v10790_v27  ;;  %13532 = vst [vmem:[#allocation101_spill] sm:$0xff] %v10792_v29  ;;  %v550_v47 = vld [vmem:[%s10305_s13 + $0x740] sm:$0xff]  ;;  %v568_v60 = vld [vmem:[%s10305_s13 + $0x7d0] sm:$0xff] }
 0x169   : > { %4588 = vmatpush2.bf16.msra.mxu1 %v9314_v52  ;;  %4476 = vmatprep.subr.bf16.mxu0 %v9319_v62  ;;  %v552_v52 = vld [vmem:[%s10305_s13 + $0x750] sm:$0xff]  ;;  %v10804_v22 = vpack.c.bf16 %v566_v42, %v550_v47  ;;  %v346_v42 = vld [vmem:[%s10305_s13 + $0xe0] sm:$0xff] }
 0x16a   : > { %4589 = vmatprep.subr.bf16.mxu1 %v9322_v7  ;;  %v9329_v62 = vld [vmem:[#allocation14 + $0xd20] ss:$16 sps:$4 sm:$0xff]  }
 0x16b   : > { %4319 = vmatmul.mubr.bf16.gmra.mxu0 %v10784_v30  ;;  %v9332_v7 = vld [vmem:[#allocation14 + $0xf20] ss:$16 sps:$4 sm:$0xff]   ;;  %13533 = vst [vmem:[#allocation102_spill] sm:$0xff] %v10804_v22 }
 0x16c   : > { %4432 = vmatmul.mubr.bf16.gmra.mxu1 %v10786_v9  ;;  %4477 = vmatpush2.bf16.msra.mxu0 %v9317_v57  ;;  %v10806_v57 = vpack.c.bf16 %v568_v60, %v552_v52  ;;  %v349_v9 = vld [vmem:[%s10305_s13 + $0xf8] sm:$0xff]  ;;  %v9338_v47 = vld [vmem:[#allocation14 + $0xf00] ss:$16 sps:$4 sm:$0xff]  }
 0x16d   : > { %4590 = vmatpush2.bf16.msra.mxu1 %v9320_v28  ;;  %4478 = vmatprep.subr.bf16.mxu0 %v9325_v10  ;;  %v333_v28 = vld [vmem:[%s10305_s13 + $0x78] sm:$0xff]  ;;  %v9337_v10 = vld [vmem:[#allocation14 + $0xd04] ss:$16 sps:$4 sm:$0xff]  }
 0x16e   : > { %4591 = vmatprep.subr.bf16.mxu1 %v9328_v19  ;;  %4328 = vmatprep.mubr.bf16.mxu0 %v10790_v27  ;;  %13534 = vst [vmem:[#allocation103_spill] sm:$0xff] %v10806_v57  ;;  %v9340_v19 = vld [vmem:[#allocation14 + $0xf04] ss:$16 sps:$4 sm:$0xff]   ;;  %v10810_v27 = vpack.c.bf16 %v347_v61, %v331_v63  ;;  %v10812_v30 = vpack.c.bf16 %v349_v9, %v333_v28  ;;  %v9343_v60 = vld [vmem:[#allocation14 + $0xec] ss:$16 sps:$4 sm:$0xff]  }
 0x16f   : > { %4441 = vmatprep.mubr.bf16.mxu1 %v10792_v29  ;;  %v9335_v29 = vld [vmem:[#allocation14 + $0xd00] ss:$16 sps:$4 sm:$0xff]   ;;  %v9346_v9 = vld [vmem:[#allocation14 + $0x2ec] ss:$16 sps:$4 sm:$0xff]  }
 0x170   : > { %4479 = vmatpush2.bf16.msra.mxu0 %v9323_v35  ;;  %13535 = vst [vmem:[#allocation104_spill] sm:$0xff] %v10810_v27  ;;  %13536 = vst [vmem:[#allocation105_spill] sm:$0xff] %v10812_v30  ;;  %v330_v35 = vld [vmem:[%s10305_s13 + $0x60] sm:$0xff]  ;;  %v348_v52 = vld [vmem:[%s10305_s13 + $0xf0] sm:$0xff] }
 0x171   : > { %4592 = vmatpush2.bf16.msra.mxu1 %v9326_v51  ;;  %4480 = vmatprep.subr.bf16.mxu0 %v9331_v48  ;;  %v332_v51 = vld [vmem:[%s10305_s13 + $0x70] sm:$0xff]  ;;  %v9341_v48 = vld [vmem:[#allocation14 + $0xe8] ss:$16 sps:$4 sm:$0xff]   ;;  %v10824_v28 = vpack.c.bf16 %v346_v42, %v330_v35 }
 0x172   : > { %4593 = vmatprep.subr.bf16.mxu1 %v9334_v8  ;;  %v9344_v8 = vld [vmem:[#allocation14 + $0x2e8] ss:$16 sps:$4 sm:$0xff]  }
 0x173   : > { %4329 = vmatmul.mubr.bf16.gmra.mxu0 %v10804_v22  ;;  %v363_v63 = vld [vmem:[%s10305_s13 + $0x168] sm:$0xff]  ;;  %13537 = vst [vmem:[#allocation106_spill] sm:$0xff] %v10824_v28 }
 0x174   : > { %4442 = vmatmul.mubr.bf16.gmra.mxu1 %v10806_v57  ;;  %4481 = vmatpush2.bf16.msra.mxu0 %v9329_v62  ;;  %v379_v61 = vld [vmem:[%s10305_s13 + $0x1e8] sm:$0xff]  ;;  %v10826_v62 = vpack.c.bf16 %v348_v52, %v332_v51  ;;  %v381_v57 = vld [vmem:[%s10305_s13 + $0x1f8] sm:$0xff] }
 0x175   : > { %4594 = vmatpush2.bf16.msra.mxu1 %v9332_v7  ;;  %4482 = vmatprep.subr.bf16.mxu0 %v9337_v10  ;;  %v365_v7 = vld [vmem:[%s10305_s13 + $0x178] sm:$0xff] }
 0x176   : > { %4595 = vmatprep.subr.bf16.mxu1 %v9340_v19  ;;  %4484 = vmatprep.mubr.bf16.mxu0 %v10810_v27  ;;  %13538 = vst [vmem:[#allocation107_spill] sm:$0xff] %v10826_v62  ;;  %v9349_v10 = vld [vmem:[#allocation14 + $0xcc] ss:$16 sps:$4 sm:$0xff]   ;;  %v10830_v27 = vpack.c.bf16 %v379_v61, %v363_v63  ;;  %v10832_v22 = vpack.c.bf16 %v381_v57, %v365_v7  ;;  %v9350_v51 = vld [vmem:[#allocation14 + $0x2c8] ss:$16 sps:$4 sm:$0xff]  }
 0x177   : > { %4597 = vmatprep.mubr.bf16.mxu1 %v10812_v30  ;;  %v9352_v19 = vld [vmem:[#allocation14 + $0x2cc] ss:$16 sps:$4 sm:$0xff]   ;;  %v9347_v30 = vld [vmem:[#allocation14 + $0xc8] ss:$16 sps:$4 sm:$0xff]  }
 0x178   : > { %4483 = vmatpush2.bf16.msra.mxu0 %v9335_v29  ;;  %13539 = vst [vmem:[#allocation108_spill] sm:$0xff] %v10830_v27  ;;  %13540 = vst [vmem:[#allocation109_spill] sm:$0xff] %v10832_v22  ;;  %v362_v29 = vld [vmem:[%s10305_s13 + $0x160] sm:$0xff]  ;;  %v9355_v63 = vld [vmem:[#allocation14 + $0xac] ss:$16 sps:$4 sm:$0xff]  }
 0x179   : > { %4596 = vmatpush2.bf16.msra.mxu1 %v9338_v47  ;;  %4678 = vmatprep.subr.bf16.mxu0 %v9343_v60  ;;  %v378_v47 = vld [vmem:[%s10305_s13 + $0x1e0] sm:$0xff]  ;;  %v364_v60 = vld [vmem:[%s10305_s13 + $0x170] sm:$0xff]  ;;  %v9358_v7 = vld [vmem:[#allocation14 + $0x2ac] ss:$16 sps:$4 sm:$0xff]  }
 0x17a   : > { %4791 = vmatprep.subr.bf16.mxu1 %v9346_v9  ;;  %v380_v9 = vld [vmem:[%s10305_s13 + $0x1f0] sm:$0xff]  ;;  %v10848_v34 = vpack.c.bf16 %v378_v47, %v362_v29  ;;  %v9359_v47 = vld [vmem:[#allocation14 + $0x88] ss:$16 sps:$4 sm:$0xff]  }
 0x17b   : > { %v3808_v35 = vpop.f32.mrf.mxu0  ;;  %4485 = vmatmul.mubr.bf16.vlgmr.msra.gmra.mxu0 %v10824_v28  ;;  %v10850_v31 = vpack.c.bf16 %v380_v9, %v364_v60 }
 0x17c   : > { %v3921_v42 = vpop.f32.mrf.mxu1  ;;  %4598 = vmatmul.mubr.bf16.vlgmr.msra.gmra.mxu1 %v10826_v62  ;;  %4679 = vmatpush1.bf16.msra.mxu0 %v9341_v48  ;;  %v9356_v48 = vld [vmem:[#allocation14 + $0x2a8] ss:$16 sps:$4 sm:$0xff]   ;;  %13541 = vst [vmem:[#allocation110_spill] sm:$0xff] %v10848_v34 }
 0x17d   : > { %v10838_v52 = vadd.f32 %v3921_v42, %v3808_v35  ;;  %4792 = vmatpush1.bf16.msra.mxu1 %v9344_v8  ;;  %v3810_v57 = vpop.f32.mrf.mxu0  ;;  %4680 = vmatprep.subr.bf16.mxu0 %v9349_v10  ;;  %v9353_v35 = vld [vmem:[#allocation14 + $0xa8] ss:$16 sps:$4 sm:$0xff]   ;;  %13542 = vst [vmem:[#allocation111_spill] sm:$0xff] %v10850_v31 }
 0x17e   : > { %v3923_v61 = vpop.f32.mrf.mxu1  ;;  %4793 = vmatprep.subr.bf16.mxu1 %v9352_v19  ;;  %4494 = vmatprep.mubr.bf16.mxu0 %v10830_v27  ;;  %v395_v42 = vld [vmem:[%s10305_s13 + $0x268] sm:$0xff]  ;;  %v413_v10 = vld [vmem:[%s10305_s13 + $0x2f8] sm:$0xff] }
 0x17f   : > { %v10842_v62 = vadd.f32 %v3923_v61, %v3810_v57  ;;  %4607 = vmatprep.mubr.bf16.mxu1 %v10832_v22  ;;  %v411_v8 = vld [vmem:[%s10305_s13 + $0x2e8] sm:$0xff]  ;;  %v3812_v28 = vpop.f32.mrf.mxu0  ;;  %v10860_v9 = vpack.c.bf16 %v413_v10, %v397_v21 }
 0x180   : > { %v3925_v6 = vpop.f32.mrf.mxu1  ;;  %4681 = vmatpush1.bf16.msra.mxu0 %v9347_v30  ;;  %v9361_v57 = vld [vmem:[#allocation14 + $0x8c] ss:$16 sps:$4 sm:$0xff]   ;;  %v10858_v60 = vpack.c.bf16 %v411_v8, %v395_v42  ;;  %v412_v42 = vld [vmem:[%s10305_s13 + $0x2f0] sm:$0xff] }
 0x181   : > { %v10854_v19 = vadd.f32 %v3925_v6, %v3812_v28  ;;  %4794 = vmatpush1.bf16.msra.mxu1 %v9350_v51  ;;  %v3814_v61 = vpop.f32.mrf.mxu0  ;;  %4682 = vmatprep.subr.bf16.mxu0 %v9355_v63  ;;  %v9364_v27 = vld [vmem:[#allocation14 + $0x28c] ss:$16 sps:$4 sm:$0xff]   ;;  %13544 = vst [vmem:[#allocation113_spill] sm:$0xff] %v10860_v9  ;;  %v9362_v28 = vld [vmem:[#allocation14 + $0x288] ss:$16 sps:$4 sm:$0xff]   ;;  %v394_v51 = vld [vmem:[%s10305_s13 + $0x260] sm:$0xff] }
 0x182   : > { %v3927_v22 = vpop.f32.mrf.mxu1  ;;  %4795 = vmatprep.subr.bf16.mxu1 %v9358_v7  ;;  %13543 = vst [vmem:[#allocation112_spill] sm:$0xff] %v10858_v60  ;;  %v410_v63 = vld [vmem:[%s10305_s13 + $0x2e0] sm:$0xff]  ;;  %v9367_v8 = vld [vmem:[#allocation14 + $0x6c] ss:$16 sps:$4 sm:$0xff]  }
 0x183   : > { %v10856_v29 = vadd.f32 %v3927_v22, %v3814_v61  ;;  %v3818_v6 = vpop.f32.mrf.mxu0  ;;  %4495 = vmatmul.mubr.bf16.gmra.mxu0 %v10848_v34  ;;  %v396_v22 = vld [vmem:[%s10305_s13 + $0x270] sm:$0xff]  ;;  %v9370_v61 = vld [vmem:[#allocation14 + $0x26c] ss:$16 sps:$4 sm:$0xff]   ;;  %v10876_v56 = vpack.c.bf16 %v410_v63, %v394_v51  ;;  %v9371_v63 = vld [vmem:[#allocation14 + $0x48] ss:$16 sps:$4 sm:$0xff]  }
 0x184   : > { %v3931_v30 = vpop.f32.mrf.mxu1  ;;  %4608 = vmatmul.mubr.bf16.gmra.mxu1 %v10850_v31  ;;  %4683 = vmatpush1.bf16.msra.mxu0 %v9353_v35  ;;  %v9368_v35 = vld [vmem:[#allocation14 + $0x268] ss:$16 sps:$4 sm:$0xff]   ;;  %v10878_v55 = vpack.c.bf16 %v412_v42, %v396_v22 }
 0x185   : > { %v10866_v7 = vadd.f32 %v3931_v30, %v3818_v6  ;;  %4796 = vmatpush1.bf16.msra.mxu1 %v9356_v48  ;;  %v3820_v21 = vpop.f32.mrf.mxu0  ;;  %4684 = vmatprep.subr.bf16.mxu0 %v9361_v57  ;;  %v9365_v6 = vld [vmem:[#allocation14 + $0x68] ss:$16 sps:$4 sm:$0xff]   ;;  %13545 = vst [vmem:[#allocation114_spill] sm:$0xff] %v10876_v56 }
 0x186   : > { %v3933_v10 = vpop.f32.mrf.mxu1  ;;  %4797 = vmatprep.subr.bf16.mxu1 %v9364_v27  ;;  %4504 = vmatprep.mubr.bf16.mxu0 %v10858_v60  ;;  %v427_v30 = vld [vmem:[%s10305_s13 + $0x368] sm:$0xff]  ;;  %13546 = vst [vmem:[#allocation115_spill] sm:$0xff] %v10878_v55  ;;  %v445_v57 = vld [vmem:[%s10305_s13 + $0x3f8] sm:$0xff] }
 0x187   : > { %v10870_v31 = vadd.f32 %v3933_v10, %v3820_v21  ;;  %4617 = vmatprep.mubr.bf16.mxu1 %v10860_v9  ;;  %v443_v48 = vld [vmem:[%s10305_s13 + $0x3e8] sm:$0xff]  ;;  %v3822_v34 = vpop.f32.mrf.mxu0  ;;  %v10888_v42 = vpack.c.bf16 %v445_v57, %v429_v39 }
 0x188   : > { %v3935_v20 = vpop.f32.mrf.mxu1  ;;  %4685 = vmatpush1.bf16.msra.mxu0 %v9359_v47  ;;  %v9373_v21 = vld [vmem:[#allocation14 + $0x4c] ss:$16 sps:$4 sm:$0xff]   ;;  %v10886_v22 = vpack.c.bf16 %v443_v48, %v427_v30  ;;  %v9374_v47 = vld [vmem:[#allocation14 + $0x248] ss:$16 sps:$4 sm:$0xff]   ;;  %v444_v30 = vld [vmem:[%s10305_s13 + $0x3f0] sm:$0xff] }
 0x189   : > { %v10882_v27 = vadd.f32 %v3935_v20, %v3822_v34  ;;  %4798 = vmatpush1.bf16.msra.mxu1 %v9362_v28  ;;  %v3824_v10 = vpop.f32.mrf.mxu0  ;;  %4686 = vmatprep.subr.bf16.mxu0 %v9367_v8  ;;  %v9376_v60 = vld [vmem:[#allocation14 + $0x24c] ss:$16 sps:$4 sm:$0xff]   ;;  %13548 = vst [vmem:[#allocation117_spill] sm:$0xff] %v10888_v42  ;;  %v426_v28 = vld [vmem:[%s10305_s13 + $0x360] sm:$0xff] }
 0x18a   : > { %v3937_v9 = vpop.f32.mrf.mxu1  ;;  %4799 = vmatprep.subr.bf16.mxu1 %v9370_v61  ;;  %13547 = vst [vmem:[#allocation116_spill] sm:$0xff] %v10886_v22  ;;  %v442_v8 = vld [vmem:[%s10305_s13 + $0x3e0] sm:$0xff]  ;;  %v9379_v48 = vld [vmem:[#allocation14 + $0x2c] ss:$16 sps:$4 sm:$0xff]  }
 0x18b   : > { %v10884_v51 = vadd.f32 %v3937_v9, %v3824_v10  ;;  %v3828_v20 = vpop.f32.mrf.mxu0  ;;  %4505 = vmatmul.mubr.bf16.gmra.mxu0 %v10876_v56  ;;  %v428_v9 = vld [vmem:[%s10305_s13 + $0x370] sm:$0xff]  ;;  %v9382_v10 = vld [vmem:[#allocation14 + $0x22c] ss:$16 sps:$4 sm:$0xff]   ;;  %v10904_v18 = vpack.c.bf16 %v442_v8, %v426_v28  ;;  %v9383_v8 = vld [vmem:[#allocation14 + $0x8] ss:$16 sps:$4 sm:$0xff]  }
 0x18c   : > { %v3941_v34 = vpop.f32.mrf.mxu1  ;;  %4618 = vmatmul.mubr.bf16.gmra.mxu1 %v10878_v55  ;;  %4687 = vmatpush1.bf16.msra.mxu0 %v9365_v6  ;;  %v9380_v6 = vld [vmem:[#allocation14 + $0x228] ss:$16 sps:$4 sm:$0xff]   ;;  %v10906_v13 = vpack.c.bf16 %v444_v30, %v428_v9 }
 0x18d   : > { %v10894_v61 = vadd.f32 %v3941_v34, %v3828_v20  ;;  %4800 = vmatpush1.bf16.msra.mxu1 %v9368_v35  ;;  %v3830_v39 = vpop.f32.mrf.mxu0  ;;  %4688 = vmatprep.subr.bf16.mxu0 %v9373_v21  ;;  %v9377_v20 = vld [vmem:[#allocation14 + $0x28] ss:$16 sps:$4 sm:$0xff]   ;;  %13549 = vst [vmem:[#allocation118_spill] sm:$0xff] %v10904_v18 }
 0x18e   : > { %v3943_v57 = vpop.f32.mrf.mxu1  ;;  %4801 = vmatprep.subr.bf16.mxu1 %v9376_v60  ;;  %4514 = vmatprep.mubr.bf16.mxu0 %v10886_v22  ;;  %v459_v34 = vld [vmem:[%s10305_s13 + $0x468] sm:$0xff]  ;;  %13550 = vst [vmem:[#allocation119_spill] sm:$0xff] %v10906_v13  ;;  %v477_v21 = vld [vmem:[%s10305_s13 + $0x4f8] sm:$0xff] }
 0x18f   : > { %v10898_v55 = vadd.f32 %v3943_v57, %v3830_v39  ;;  %4627 = vmatprep.mubr.bf16.mxu1 %v10888_v42  ;;  %v475_v35 = vld [vmem:[%s10305_s13 + $0x4e8] sm:$0xff]  ;;  %v3832_v56 = vpop.f32.mrf.mxu0  ;;  %v10916_v30 = vpack.c.bf16 %v477_v21, %v461_v3 }
 0x190   : > { %v3945_v38 = vpop.f32.mrf.mxu1  ;;  %4689 = vmatpush1.bf16.msra.mxu0 %v9371_v63  ;;  %v9385_v39 = vld [vmem:[#allocation14 + $0xc] ss:$16 sps:$4 sm:$0xff]   ;;  %v10914_v9 = vpack.c.bf16 %v475_v35, %v459_v34  ;;  %v9386_v63 = vld [vmem:[#allocation14 + $0x208] ss:$16 sps:$4 sm:$0xff]   ;;  %v476_v34 = vld [vmem:[%s10305_s13 + $0x4f0] sm:$0xff] }
 0x191   : > { %v10910_v60 = vadd.f32 %v3945_v38, %v3832_v56  ;;  %4802 = vmatpush1.bf16.msra.mxu1 %v9374_v47  ;;  %v3834_v57 = vpop.f32.mrf.mxu0  ;;  %4690 = vmatprep.subr.bf16.mxu0 %v9379_v48  ;;  %v9388_v22 = vld [vmem:[#allocation14 + $0x20c] ss:$16 sps:$4 sm:$0xff]   ;;  %13552 = vst [vmem:[#allocation121_spill] sm:$0xff] %v10916_v30  ;;  %v458_v47 = vld [vmem:[%s10305_s13 + $0x460] sm:$0xff] }
 0x192   : > { %v3947_v42 = vpop.f32.mrf.mxu1  ;;  %4803 = vmatprep.subr.bf16.mxu1 %v9382_v10  ;;  %13551 = vst [vmem:[#allocation120_spill] sm:$0xff] %v10914_v9  ;;  %v474_v48 = vld [vmem:[%s10305_s13 + $0x4e0] sm:$0xff]  ;;  %v9391_v35 = vld [vmem:[#allocation14 + $0x1ec] ss:$16 sps:$4 sm:$0xff]  }
 0x193   : > { %v10912_v28 = vadd.f32 %v3947_v42, %v3834_v57  ;;  %v3838_v38 = vpop.f32.mrf.mxu0  ;;  %4515 = vmatmul.mubr.bf16.gmra.mxu0 %v10904_v18  ;;  %v460_v42 = vld [vmem:[%s10305_s13 + $0x470] sm:$0xff]  ;;  %v9394_v57 = vld [vmem:[#allocation14 + $0x3ec] ss:$16 sps:$4 sm:$0xff]   ;;  %v10932_v46 = vpack.c.bf16 %v474_v48, %v458_v47  ;;  %v9395_v48 = vld [vmem:[#allocation14 + $0x1c8] ss:$16 sps:$4 sm:$0xff]  }
 0x194   : > { %v3951_v56 = vpop.f32.mrf.mxu1  ;;  %4628 = vmatmul.mubr.bf16.gmra.mxu1 %v10906_v13  ;;  %4691 = vmatpush1.bf16.msra.mxu0 %v9377_v20  ;;  %v9392_v20 = vld [vmem:[#allocation14 + $0x3e8] ss:$16 sps:$4 sm:$0xff]   ;;  %v10934_v45 = vpack.c.bf16 %v476_v34, %v460_v42 }
 0x195   : > { %v10922_v10 = vadd.f32 %v3951_v56, %v3838_v38  ;;  %4804 = vmatpush1.bf16.msra.mxu1 %v9380_v6  ;;  %v3840_v3 = vpop.f32.mrf.mxu0  ;;  %4692 = vmatprep.subr.bf16.mxu0 %v9385_v39  ;;  %v9389_v38 = vld [vmem:[#allocation14 + $0x1e8] ss:$16 sps:$4 sm:$0xff]   ;;  %13553 = vst [vmem:[#allocation122_spill] sm:$0xff] %v10932_v46 }
 0x196   : > { %v3953_v21 = vpop.f32.mrf.mxu1  ;;  %4805 = vmatprep.subr.bf16.mxu1 %v9388_v22  ;;  %4524 = vmatprep.mubr.bf16.mxu0 %v10914_v9  ;;  %v491_v56 = vld [vmem:[%s10305_s13 + $0x568] sm:$0xff]  ;;  %13554 = vst [vmem:[#allocation123_spill] sm:$0xff] %v10934_v45  ;;  %v509_v39 = vld [vmem:[%s10305_s13 + $0x5f8] sm:$0xff] }
 0x197   : > { %v10926_v13 = vadd.f32 %v3953_v21, %v3840_v3  ;;  %4637 = vmatprep.mubr.bf16.mxu1 %v10916_v30  ;;  %v507_v6 = vld [vmem:[%s10305_s13 + $0x5e8] sm:$0xff]  ;;  %v3842_v18 = vpop.f32.mrf.mxu0  ;;  %v10944_v34 = vpack.c.bf16 %v509_v39, %v493_v33 }
 0x198   : > { %v3955_v0 = vpop.f32.mrf.mxu1  ;;  %4693 = vmatpush1.bf16.msra.mxu0 %v9383_v8  ;;  %v9397_v3 = vld [vmem:[#allocation14 + $0x1cc] ss:$16 sps:$4 sm:$0xff]   ;;  %v10942_v42 = vpack.c.bf16 %v507_v6, %v491_v56  ;;  %v9398_v8 = vld [vmem:[#allocation14 + $0x3c8] ss:$16 sps:$4 sm:$0xff]   ;;  %v508_v56 = vld [vmem:[%s10305_s13 + $0x5f0] sm:$0xff] }
 0x199   : > { %v10938_v22 = vadd.f32 %v3955_v0, %v3842_v18  ;;  %4806 = vmatpush1.bf16.msra.mxu1 %v9386_v63  ;;  %v3844_v21 = vpop.f32.mrf.mxu0  ;;  %4694 = vmatprep.subr.bf16.mxu0 %v9391_v35  ;;  %v9400_v9 = vld [vmem:[#allocation14 + $0x3cc] ss:$16 sps:$4 sm:$0xff]   ;;  %13556 = vst [vmem:[#allocation125_spill] sm:$0xff] %v10944_v34  ;;  %v490_v63 = vld [vmem:[%s10305_s13 + $0x560] sm:$0xff] }
 0x19a   : > { %v3957_v30 = vpop.f32.mrf.mxu1  ;;  %4807 = vmatprep.subr.bf16.mxu1 %v9394_v57  ;;  %13555 = vst [vmem:[#allocation124_spill] sm:$0xff] %v10942_v42  ;;  %v506_v35 = vld [vmem:[%s10305_s13 + $0x5e0] sm:$0xff]  ;;  %v9403_v6 = vld [vmem:[#allocation14 + $0x1ac] ss:$16 sps:$4 sm:$0xff]  }
 0x19b   : > { %v10940_v47 = vadd.f32 %v3957_v30, %v3844_v21  ;;  %v3848_v0 = vpop.f32.mrf.mxu0  ;;  %4525 = vmatmul.mubr.bf16.gmra.mxu0 %v10932_v46  ;;  %v492_v30 = vld [vmem:[%s10305_s13 + $0x570] sm:$0xff]  ;;  %v9406_v21 = vld [vmem:[#allocation14 + $0x3ac] ss:$16 sps:$4 sm:$0xff]   ;;  %v10960_v12 = vpack.c.bf16 %v506_v35, %v490_v63  ;;  %v9407_v35 = vld [vmem:[#allocation14 + $0x188] ss:$16 sps:$4 sm:$0xff]  }
 0x19c   : > { %v3961_v18 = vpop.f32.mrf.mxu1  ;;  %4638 = vmatmul.mubr.bf16.gmra.mxu1 %v10934_v45  ;;  %4695 = vmatpush2.bf16.msra.mxu0 %v9389_v38  ;;  %v9404_v38 = vld [vmem:[#allocation14 + $0x3a8] ss:$16 sps:$4 sm:$0xff]   ;;  %v10962_v11 = vpack.c.bf16 %v508_v56, %v492_v30 }
 0x19d   : > { %v10950_v57 = vadd.f32 %v3961_v18, %v3848_v0  ;;  %4808 = vmatpush2.bf16.msra.mxu1 %v9392_v20  ;;  %v3850_v33 = vpop.f32.mrf.mxu0  ;;  %4696 = vmatprep.subr.bf16.mxu0 %v9397_v3  ;;  %v9401_v0 = vld [vmem:[#allocation14 + $0x1a8] ss:$16 sps:$4 sm:$0xff]   ;;  %13557 = vst [vmem:[#allocation126_spill] sm:$0xff] %v10960_v12 }
 0x19e   : > { %v3963_v39 = vpop.f32.mrf.mxu1  ;;  %4809 = vmatprep.subr.bf16.mxu1 %v9400_v9  ;;  %4534 = vmatprep.mubr.bf16.mxu0 %v10942_v42  ;;  %v523_v18 = vld [vmem:[%s10305_s13 + $0x668] sm:$0xff]  ;;  %13558 = vst [vmem:[#allocation127_spill] sm:$0xff] %v10962_v11  ;;  %v541_v9 = vld [vmem:[%s10305_s13 + $0x6f8] sm:$0xff] }
 0x19f   : > { %v10954_v45 = vadd.f32 %v3963_v39, %v3850_v33  ;;  %4647 = vmatprep.mubr.bf16.mxu1 %v10944_v34  ;;  %v539_v20 = vld [vmem:[%s10305_s13 + $0x6e8] sm:$0xff]  ;;  %v3852_v46 = vpop.f32.mrf.mxu0  ;;  %v10972_v4 = vpack.c.bf16 %v541_v9, %v525_v5 }
 0x1a0   : > { %v3965_v32 = vpop.f32.mrf.mxu1  ;;  %4697 = vmatpush2.bf16.msra.mxu0 %v9395_v48  ;;  %v9409_v33 = vld [vmem:[#allocation14 + $0x18c] ss:$16 sps:$4 sm:$0xff]   ;;  %v9410_v30 = vld [vmem:[#allocation14 + $0x388] ss:$16 sps:$4 sm:$0xff]   ;;  %v10970_v56 = vpack.c.bf16 %v539_v20, %v523_v18 }
 0x1a1   : > { %v10966_v3 = vadd.f32 %v3965_v32, %v3852_v46  ;;  %4810 = vmatpush2.bf16.msra.mxu1 %v9398_v8  ;;  %v3854_v39 = vpop.f32.mrf.mxu0  ;;  %4698 = vmatprep.subr.bf16.mxu0 %v9403_v6  ;;  %v9412_v42 = vld [vmem:[#allocation14 + $0x38c] ss:$16 sps:$4 sm:$0xff]   ;;  %13562 = vst [vmem:[#allocation131_spill] sm:$0xff] %v10972_v4  ;;  %v522_v32 = vld [vmem:[%s10305_s13 + $0x660] sm:$0xff]  ;;  %v540_v6 = vld [vmem:[%s10305_s13 + $0x6f0] sm:$0xff] }
 0x1a2   : > { %v3967_v34 = vpop.f32.mrf.mxu1  ;;  %4811 = vmatprep.subr.bf16.mxu1 %v9406_v21  ;;  %13561 = vst [vmem:[#allocation130_spill] sm:$0xff] %v10970_v56  ;;  %v538_v46 = vld [vmem:[%s10305_s13 + $0x6e0] sm:$0xff]  ;;  %v9415_v21 = vld [vmem:[#allocation14 + $0x16c] ss:$16 sps:$4 sm:$0xff]  }
 0x1a3   : > { %13559 = vst [vmem:[#allocation128_spill] sm:$0xff] %v10966_v3  ;;  %v10968_v63 = vadd.f32 %v3967_v34, %v3854_v39  ;;  %v3858_v48 = vpop.f32.mrf.mxu0  ;;  %4535 = vmatmul.mubr.bf16.gmra.mxu0 %v10960_v12  ;;  %v524_v3 = vld [vmem:[%s10305_s13 + $0x670] sm:$0xff]  ;;  %v9418_v20 = vld [vmem:[#allocation14 + $0x36c] ss:$16 sps:$4 sm:$0xff]   ;;  %v9413_v39 = vld [vmem:[#allocation14 + $0x168] ss:$16 sps:$4 sm:$0xff]   ;;  %v10988_v12 = vpack.c.bf16 %v538_v46, %v522_v32 }
 0x1a4   : > { %v3971_v8 = vpop.f32.mrf.mxu1  ;;  %4648 = vmatmul.mubr.bf16.gmra.mxu1 %v10962_v11  ;;  %4699 = vmatpush2.bf16.msra.mxu0 %v9401_v0  ;;  %v9416_v11 = vld [vmem:[#allocation14 + $0x368] ss:$16 sps:$4 sm:$0xff]  }
 0x1a5   : > { %13560 = vst [vmem:[#allocation129_spill] sm:$0xff] %v10968_v63  ;;  %v10980_v34 = vadd.f32 %v3971_v8, %v3858_v48  ;;  %4812 = vmatpush2.bf16.msra.mxu1 %v9404_v38  ;;  %v3860_v18 = vpop.f32.mrf.mxu0  ;;  %4700 = vmatprep.subr.bf16.mxu0 %v9409_v33  ;;  %v555_v48 = vld [vmem:[%s10305_s13 + $0x768] sm:$0xff]  ;;  %13565 = vst [vmem:[#allocation134_spill] sm:$0xff] %v10988_v12  ;;  %v557_v63 = vld [vmem:[%s10305_s13 + $0x778] sm:$0xff] }
 0x1a6   : > { %v3973_v5 = vpop.f32.mrf.mxu1  ;;  %4813 = vmatprep.subr.bf16.mxu1 %v9412_v42  ;;  %4544 = vmatprep.mubr.bf16.mxu0 %v10970_v56  ;;  %v571_v8 = vld [vmem:[%s10305_s13 + $0x7e8] sm:$0xff]  ;;  %v573_v42 = vld [vmem:[%s10305_s13 + $0x7f8] sm:$0xff] }
 0x1a7   : > { %13563 = vst [vmem:[#allocation132_spill] sm:$0xff] %v10980_v34  ;;  %v10982_v9 = vadd.f32 %v3973_v5, %v3860_v18  ;;  %4657 = vmatprep.mubr.bf16.mxu1 %v10972_v4  ;;  %v3862_v0 = vpop.f32.mrf.mxu0  ;;  %v10990_v34 = vpack.c.bf16 %v540_v6, %v524_v3  ;;  %v9421_v18 = vld [vmem:[#allocation14 + $0x14c] ss:$16 sps:$4 sm:$0xff]   ;;  %v9419_v3 = vld [vmem:[#allocation14 + $0x148] ss:$16 sps:$4 sm:$0xff]   ;;  %v10998_v6 = vpack.c.bf16 %v571_v8, %v555_v48 }
 0x1a8   : > { %v3975_v38 = vpop.f32.mrf.mxu1  ;;  %4701 = vmatpush2.bf16.msra.mxu0 %v9407_v35  ;;  %v9424_v56 = vld [vmem:[#allocation14 + $0x34c] ss:$16 sps:$4 sm:$0xff]   ;;  %v9422_v46 = vld [vmem:[#allocation14 + $0x348] ss:$16 sps:$4 sm:$0xff]  }
 0x1a9   : > { %13564 = vst [vmem:[#allocation133_spill] sm:$0xff] %v10982_v9  ;;  %13566 = vst [vmem:[#allocation135_spill] sm:$0xff] %v10990_v34  ;;  %v10994_v33 = vadd.f32 %v3975_v38, %v3862_v0  ;;  %4814 = vmatpush2.bf16.msra.mxu1 %v9410_v30  ;;  %v3864_v5 = vpop.f32.mrf.mxu0  ;;  %4702 = vmatprep.subr.bf16.mxu0 %v9415_v21  ;;  %v11000_v9 = vpack.c.bf16 %v573_v42, %v557_v63  ;;  %v554_v0 = vld [vmem:[%s10305_s13 + $0x760] sm:$0xff]  ;;  %v572_v21 = vld [vmem:[%s10305_s13 + $0x7f0] sm:$0xff] }
 0x1aa   : > { %v3977_v4 = vpop.f32.mrf.mxu1  ;;  %4815 = vmatprep.subr.bf16.mxu1 %v9418_v20  ;;  %13568 = vst [vmem:[#allocation137_spill] sm:$0xff] %v10998_v6  ;;  %v570_v38 = vld [vmem:[%s10305_s13 + $0x7e0] sm:$0xff]  ;;  %v9430_v63 = vld [vmem:[#allocation14 + $0x32c] ss:$16 sps:$4 sm:$0xff]  }
 0x1ab   : > { %13567 = vst [vmem:[#allocation136_spill] sm:$0xff] %v10994_v33  ;;  %v10996_v32 = vadd.f32 %v3977_v4, %v3864_v5  ;;  %13569 = vst [vmem:[#allocation138_spill] sm:$0xff] %v11000_v9  ;;  %v3868_v35 = vpop.f32.mrf.mxu0  ;;  %4545 = vmatmul.mubr.bf16.gmra.mxu0 %v10988_v12  ;;  %v556_v33 = vld [vmem:[%s10305_s13 + $0x770] sm:$0xff]  ;;  %v9427_v4 = vld [vmem:[#allocation14 + $0x12c] ss:$16 sps:$4 sm:$0xff]   ;;  %v11014_v12 = vpack.c.bf16 %v570_v38, %v554_v0 }
 0x1ac   : > { %v3981_v30 = vpop.f32.mrf.mxu1  ;;  %4658 = vmatmul.mubr.bf16.gmra.mxu1 %v10990_v34  ;;  %4703 = vmatpush2.bf16.msra.mxu0 %v9413_v39  ;;  %v9425_v39 = vld [vmem:[#allocation14 + $0x128] ss:$16 sps:$4 sm:$0xff]  }
 0x1ad   : > { %v11008_v20 = vadd.f32 %v3981_v30, %v3868_v35  ;;  %4816 = vmatpush2.bf16.msra.mxu1 %v9416_v11  ;;  %v3870_v5 = vpop.f32.mrf.mxu0  ;;  %4704 = vmatprep.subr.bf16.mxu0 %v9421_v18  ;;  %13571 = vst [vmem:[#allocation140_spill] sm:$0xff] %v11014_v12  ;;  %v11016_v35 = vpack.c.bf16 %v572_v21, %v556_v33  ;;  %v9428_v11 = vld [vmem:[#allocation14 + $0x328] ss:$16 sps:$4 sm:$0xff]   ;;  %v9442_v21 = vld [vmem:[#allocation14 + $0x6ec] ss:$16 sps:$4 sm:$0xff]  }
 0x1ae   : > { %v3983_v48 = vpop.f32.mrf.mxu1  ;;  %4817 = vmatprep.subr.bf16.mxu1 %v9424_v56  ;;  %4554 = vmatprep.mubr.bf16.mxu0 %v10998_v6  ;;  %v9433_v56 = vld [vmem:[#allocation14 + $0x10c] ss:$16 sps:$4 sm:$0xff]   ;;  %v9431_v33 = vld [vmem:[#allocation14 + $0x108] ss:$16 sps:$4 sm:$0xff]  }
 0x1af   : > { %v11010_v8 = vadd.f32 %v3983_v48, %v3870_v5  ;;  %4667 = vmatprep.mubr.bf16.mxu1 %v11000_v9  ;;  %v3872_v42 = vpop.f32.mrf.mxu0  ;;  %13572 = vst [vmem:[#allocation141_spill] sm:$0xff] %v11016_v35  ;;  %v9436_v48 = vld [vmem:[#allocation14 + $0x30c] ss:$16 sps:$4 sm:$0xff]   ;;  %v9434_v0 = vld [vmem:[#allocation14 + $0x308] ss:$16 sps:$4 sm:$0xff]  }
 0x1b0   : > { %v3985_v34 = vpop.f32.mrf.mxu1  ;;  %4705 = vmatpush2.bf16.msra.mxu0 %v9419_v3  ;;  %v9439_v3 = vld [vmem:[#allocation14 + $0x4ec] ss:$16 sps:$4 sm:$0xff]  }
 0x1b1   : > { %13570 = vst [vmem:[#allocation139_spill] sm:$0xff] %v11010_v8  ;;  %v11018_v30 = vadd.f32 %v3985_v34, %v3872_v42  ;;  %4818 = vmatpush2.bf16.msra.mxu1 %v9422_v46  ;;  %v3874_v18 = vpop.f32.mrf.mxu0  ;;  %4706 = vmatprep.subr.bf16.mxu0 %v9427_v4 }
 0x1b2   : > { %v3987_v5 = vpop.f32.mrf.mxu1  ;;  %4819 = vmatprep.subr.bf16.mxu1 %v9430_v63 }
 0x1b3   : > { %v11020_v6 = vadd.f32 %v3987_v5, %v3874_v18  ;;  %v3878_v9 = vpop.f32.mrf.mxu0  ;;  %4555 = vmatmul.mubr.bf16.gmra.mxu0 %v11014_v12  ;;  %v9437_v18 = vld [vmem:[#allocation14 + $0x4e8] ss:$16 sps:$4 sm:$0xff]  }
 0x1b4   : > { %v3991_v8 = vpop.f32.mrf.mxu1  ;;  %4668 = vmatmul.mubr.bf16.gmra.mxu1 %v11016_v35  ;;  %4707 = vmatpush2.bf16.msra.mxu0 %v9425_v39  ;;  %v9440_v5 = vld [vmem:[#allocation14 + $0x6e8] ss:$16 sps:$4 sm:$0xff]  }
 0x1b5   : > { %v11024_v34 = vadd.f32 %v3991_v8, %v3878_v9  ;;  %4820 = vmatpush2.bf16.msra.mxu1 %v9428_v11  ;;  %v3880_v46 = vpop.f32.mrf.mxu0  ;;  %4708 = vmatprep.subr.bf16.mxu0 %v9433_v56  ;;  %v9445_v8 = vld [vmem:[#allocation14 + $0x4cc] ss:$16 sps:$4 sm:$0xff]  }
 0x1b6   : > { %v3993_v38 = vpop.f32.mrf.mxu1  ;;  %4821 = vmatprep.subr.bf16.mxu1 %v9436_v48  ;;  %4710 = vmatprep.mubr.bf16.mxu0 %v10332_v53  ;;  %v9448_v56 = vld [vmem:[#allocation14 + $0x6cc] ss:$16 sps:$4 sm:$0xff]  }
 0x1b7   : > { %v11026_v4 = vadd.f32 %v3993_v38, %v3880_v46  ;;  %4823 = vmatprep.mubr.bf16.mxu1 %v10334_v54  ;;  %v3882_v63 = vpop.f32.mrf.mxu0  ;;  %v9443_v54 = vld [vmem:[#allocation14 + $0x4c8] ss:$16 sps:$4 sm:$0xff]  }
 0x1b8   : > { %v3995_v42 = vpop.f32.mrf.mxu1  ;;  %4709 = vmatpush2.bf16.msra.mxu0 %v9431_v33  ;;  %v9446_v38 = vld [vmem:[#allocation14 + $0x6c8] ss:$16 sps:$4 sm:$0xff]   ;;  %v9451_v33 = vld [vmem:[#allocation14 + $0x4ac] ss:$16 sps:$4 sm:$0xff]  }
 0x1b9   : > { %v11030_v9 = vadd.f32 %v3995_v42, %v3882_v63  ;;  %4822 = vmatpush2.bf16.msra.mxu1 %v9434_v0  ;;  %v3884_v39 = vpop.f32.mrf.mxu0  ;;  %4904 = vmatprep.subr.bf16.mxu0 %v9439_v3  ;;  %v9454_v3 = vld [vmem:[#allocation14 + $0x6ac] ss:$16 sps:$4 sm:$0xff]  }
 0x1ba   : > { %v3997_v11 = vpop.f32.mrf.mxu1  ;;  %5017 = vmatprep.subr.bf16.mxu1 %v9442_v21  ;;  %v13617_v12 = vld [vmem:[#allocation53_spill] sm:$0xff] }
 0x1bb   : > { %v11032_v48 = vadd.f32 %v3997_v11, %v3884_v39  ;;  %v4034_v46 = vpop.f32.mrf.mxu0  ;;  %4711 = vmatmul.mubr.bf16.vlgmr.msra.gmra.mxu0 %v10344_v16  ;;  %v9449_v11 = vld [vmem:[#allocation14 + $0x4a8] ss:$16 sps:$4 sm:$0xff]  }
 0x1bc   : > { %v4147_v53 = vpop.f32.mrf.mxu1  ;;  %4824 = vmatmul.mubr.bf16.vlgmr.msra.gmra.mxu1 %v10346_v17  ;;  %v4035_v63 = vadd.f32 %v4034_v46, %v10838_v52  ;;  %4905 = vmatpush1.bf16.msra.mxu0 %v9437_v18  ;;  %v9452_v52 = vld [vmem:[#allocation14 + $0x6a8] ss:$16 sps:$4 sm:$0xff]  }
 0x1bd   : > { %5018 = vmatpush1.bf16.msra.mxu1 %v9440_v5  ;;  %v4036_v0 = vpop.f32.mrf.mxu0  ;;  %4906 = vmatprep.subr.bf16.mxu0 %v9445_v8  ;;  %v9457_v8 = vld [vmem:[#allocation14 + $0x48c] ss:$16 sps:$4 sm:$0xff]  }
 0x1be   : > { %v4149_v42 = vpop.f32.mrf.mxu1  ;;  %5019 = vmatprep.subr.bf16.mxu1 %v9448_v56  ;;  %v11037_v21 = vadd.f32 %v4147_v53, %v4035_v63  ;;  %v4037_v39 = vadd.f32 %v4036_v0, %v10842_v62  ;;  %4720 = vmatprep.mubr.bf16.mxu0 %v10350_v23  ;;  %v9460_v62 = vld [vmem:[#allocation14 + $0x68c] ss:$16 sps:$4 sm:$0xff]   ;;  %v9455_v0 = vld [vmem:[#allocation14 + $0x488] ss:$16 sps:$4 sm:$0xff]  }
 0x1bf   : > { %4833 = vmatprep.mubr.bf16.mxu1 %v10352_v24  ;;  %v4038_v16 = vpop.f32.mrf.mxu0 }
 0x1c0   : > { %v4151_v17 = vpop.f32.mrf.mxu1  ;;  %v11042_v18 = vadd.f32 %v4149_v42, %v4037_v39  ;;  %v4039_v5 = vadd.f32 %v4038_v16, %v10854_v19  ;;  %4907 = vmatpush1.bf16.msra.mxu0 %v9443_v54  ;;  %v9458_v19 = vld [vmem:[#allocation14 + $0x688] ss:$16 sps:$4 sm:$0xff]  }
 0x1c1   : > { %5020 = vmatpush1.bf16.msra.mxu1 %v9446_v38  ;;  %v4040_v56 = vpop.f32.mrf.mxu0  ;;  %4908 = vmatprep.subr.bf16.mxu0 %v9451_v33  ;;  %v9463_v33 = vld [vmem:[#allocation14 + $0x46c] ss:$16 sps:$4 sm:$0xff]  }
 0x1c2   : > { %v4153_v46 = vpop.f32.mrf.mxu1  ;;  %5021 = vmatprep.subr.bf16.mxu1 %v9454_v3  ;;  %v11045_v53 = vadd.f32 %v4151_v17, %v4039_v5  ;;  %v4041_v23 = vadd.f32 %v4040_v56, %v10856_v29  ;;  %v9466_v29 = vld [vmem:[#allocation14 + $0x66c] ss:$16 sps:$4 sm:$0xff]   ;;  %v9461_v17 = vld [vmem:[#allocation14 + $0x468] ss:$16 sps:$4 sm:$0xff]  }
 0x1c3   : > { %v4044_v24 = vpop.f32.mrf.mxu0  ;;  %4721 = vmatmul.mubr.bf16.gmra.mxu0 %v10364_v36  ;;  %v9469_v5 = vld [vmem:[#allocation14 + $0x44c] ss:$16 sps:$4 sm:$0xff]  }
 0x1c4   : > { %v4157_v63 = vpop.f32.mrf.mxu1  ;;  %4834 = vmatmul.mubr.bf16.gmra.mxu1 %v10366_v37  ;;  %v11050_v54 = vadd.f32 %v4153_v46, %v4041_v23  ;;  %v4045_v38 = vadd.f32 %v4044_v24, %v10866_v7  ;;  %4909 = vmatpush1.bf16.msra.mxu0 %v9449_v11  ;;  %v9464_v7 = vld [vmem:[#allocation14 + $0x668] ss:$16 sps:$4 sm:$0xff]  }
 0x1c5   : > { %5022 = vmatpush1.bf16.msra.mxu1 %v9452_v52  ;;  %v4046_v42 = vpop.f32.mrf.mxu0  ;;  %4910 = vmatprep.subr.bf16.mxu0 %v9457_v8  ;;  %v9467_v23 = vld [vmem:[#allocation14 + $0x448] ss:$16 sps:$4 sm:$0xff]  }
 0x1c6   : > { %v4159_v3 = vpop.f32.mrf.mxu1  ;;  %5023 = vmatprep.subr.bf16.mxu1 %v9460_v62  ;;  %v11053_v39 = vadd.f32 %v4157_v63, %v4045_v38  ;;  %v4047_v36 = vadd.f32 %v4046_v42, %v10870_v31  ;;  %4730 = vmatprep.mubr.bf16.mxu0 %v10370_v43  ;;  %v9472_v31 = vld [vmem:[#allocation14 + $0x64c] ss:$16 sps:$4 sm:$0xff]  }
 0x1c7   : > { %4843 = vmatprep.mubr.bf16.mxu1 %v10372_v44  ;;  %v4048_v37 = vpop.f32.mrf.mxu0 }
 0x1c8   : > { %v4161_v16 = vpop.f32.mrf.mxu1  ;;  %v11058_v11 = vadd.f32 %v4159_v3, %v4047_v36  ;;  %v4049_v52 = vadd.f32 %v4048_v37, %v10882_v27  ;;  %4911 = vmatpush1.bf16.msra.mxu0 %v9455_v0  ;;  %v9470_v27 = vld [vmem:[#allocation14 + $0x648] ss:$16 sps:$4 sm:$0xff]   ;;  %v9475_v0 = vld [vmem:[#allocation14 + $0x42c] ss:$16 sps:$4 sm:$0xff]  }
 0x1c9   : > { %5024 = vmatpush1.bf16.msra.mxu1 %v9458_v19  ;;  %v4050_v8 = vpop.f32.mrf.mxu0  ;;  %4912 = vmatprep.subr.bf16.mxu0 %v9463_v33  ;;  %v9473_v3 = vld [vmem:[#allocation14 + $0x428] ss:$16 sps:$4 sm:$0xff]   ;;  %v9481_v37 = vld [vmem:[#allocation14 + $0x40c] ss:$16 sps:$4 sm:$0xff]  }
 0x1ca   : > { %v4163_v56 = vpop.f32.mrf.mxu1  ;;  %5025 = vmatprep.subr.bf16.mxu1 %v9466_v29  ;;  %v11061_v46 = vadd.f32 %v4161_v16, %v4049_v52  ;;  %v4051_v43 = vadd.f32 %v4050_v8, %v10884_v51  ;;  %v9478_v51 = vld [vmem:[#allocation14 + $0x62c] ss:$16 sps:$4 sm:$0xff]  }
 0x1cb   : > { %v4054_v44 = vpop.f32.mrf.mxu0  ;;  %4731 = vmatmul.mubr.bf16.gmra.mxu0 %v10384_v58 }
 0x1cc   : > { %v4167_v62 = vpop.f32.mrf.mxu1  ;;  %4844 = vmatmul.mubr.bf16.gmra.mxu1 %v10386_v59  ;;  %v11066_v24 = vadd.f32 %v4163_v56, %v4051_v43  ;;  %v4055_v63 = vadd.f32 %v4054_v44, %v10894_v61  ;;  %4913 = vmatpush1.bf16.msra.mxu0 %v9461_v17  ;;  %v9476_v61 = vld [vmem:[#allocation14 + $0x628] ss:$16 sps:$4 sm:$0xff]  }
 0x1cd   : > { %5026 = vmatpush1.bf16.msra.mxu1 %v9464_v7  ;;  %v4056_v19 = vpop.f32.mrf.mxu0  ;;  %4914 = vmatprep.subr.bf16.mxu0 %v9469_v5  ;;  %v9479_v5 = vld [vmem:[#allocation14 + $0x408] ss:$16 sps:$4 sm:$0xff]  }
 0x1ce   : > { %v4169_v38 = vpop.f32.mrf.mxu1  ;;  %5027 = vmatprep.subr.bf16.mxu1 %v9472_v31  ;;  %v11069_v33 = vadd.f32 %v4167_v62, %v4055_v63  ;;  %v4057_v58 = vadd.f32 %v4056_v19, %v10898_v55  ;;  %4740 = vmatprep.mubr.bf16.mxu0 %v10390_v1  ;;  %v9484_v55 = vld [vmem:[#allocation14 + $0x60c] ss:$16 sps:$4 sm:$0xff]  }
 0x1cf   : > { %4853 = vmatprep.mubr.bf16.mxu1 %v10392_v2  ;;  %v4058_v59 = vpop.f32.mrf.mxu0  ;;  %v9487_v31 = vld [vmem:[#allocation14 + $0x5ec] ss:$16 sps:$4 sm:$0xff]  }
 0x1d0   : > { %v4171_v42 = vpop.f32.mrf.mxu1  ;;  %v11074_v29 = vadd.f32 %v4169_v38, %v4057_v58  ;;  %v4059_v36 = vadd.f32 %v4058_v59, %v10910_v60  ;;  %4915 = vmatpush1.bf16.msra.mxu0 %v9467_v23  ;;  %v9482_v60 = vld [vmem:[#allocation14 + $0x608] ss:$16 sps:$4 sm:$0xff]   ;;  %v9493_v19 = vld [vmem:[#allocation14 + $0x5cc] ss:$16 sps:$4 sm:$0xff]  }
 0x1d1   : > { %5028 = vmatpush1.bf16.msra.mxu1 %v9470_v27  ;;  %v4060_v16 = vpop.f32.mrf.mxu0  ;;  %4916 = vmatprep.subr.bf16.mxu0 %v9475_v0  ;;  %v9485_v27 = vld [vmem:[#allocation14 + $0x5e8] ss:$16 sps:$4 sm:$0xff]  }
 0x1d2   : > { %v4173_v17 = vpop.f32.mrf.mxu1  ;;  %5029 = vmatprep.subr.bf16.mxu1 %v9478_v51  ;;  %v11077_v7 = vadd.f32 %v4171_v42, %v4059_v36  ;;  %v4061_v1 = vadd.f32 %v4060_v16, %v10912_v28  ;;  %v9490_v28 = vld [vmem:[#allocation14 + $0x7ec] ss:$16 sps:$4 sm:$0xff]   ;;  %v9491_v42 = vld [vmem:[#allocation14 + $0x5c8] ss:$16 sps:$4 sm:$0xff]  }
 0x1d3   : > { %v4064_v2 = vpop.f32.mrf.mxu0  ;;  %4741 = vmatmul.mubr.bf16.gmra.mxu0 %v10404_v14  ;;  %v9499_v36 = vld [vmem:[#allocation14 + $0x5ac] ss:$16 sps:$4 sm:$0xff]  }
 0x1d4   : > { %v4177_v52 = vpop.f32.mrf.mxu1  ;;  %4854 = vmatmul.mubr.bf16.gmra.mxu1 %v10406_v15  ;;  %v11082_v8 = vadd.f32 %v4173_v17, %v4061_v1  ;;  %v4065_v56 = vadd.f32 %v4064_v2, %v10922_v10  ;;  %4917 = vmatpush1.bf16.msra.mxu0 %v9473_v3  ;;  %v9488_v10 = vld [vmem:[#allocation14 + $0x7e8] ss:$16 sps:$4 sm:$0xff]  }
 0x1d5   : > { %5030 = vmatpush1.bf16.msra.mxu1 %v9476_v61  ;;  %v4066_v43 = vpop.f32.mrf.mxu0  ;;  %4918 = vmatprep.subr.bf16.mxu0 %v9481_v37  ;;  %v9497_v1 = vld [vmem:[#allocation14 + $0x5a8] ss:$16 sps:$4 sm:$0xff]  }
 0x1d6   : > { %v4179_v44 = vpop.f32.mrf.mxu1  ;;  %5031 = vmatprep.subr.bf16.mxu1 %v9484_v55  ;;  %v11085_v62 = vadd.f32 %v4177_v52, %v4065_v56  ;;  %v4067_v14 = vadd.f32 %v4066_v43, %v10926_v13  ;;  %4750 = vmatprep.mubr.bf16.mxu0 %v10410_v25  ;;  %v9496_v13 = vld [vmem:[#allocation14 + $0x7cc] ss:$16 sps:$4 sm:$0xff]   ;;  %v13574_v52 = vld [vmem:[#allocation128_spill] sm:$0xff] }
 0x1d7   : > { %4863 = vmatprep.mubr.bf16.mxu1 %v10412_v26  ;;  %v4068_v15 = vpop.f32.mrf.mxu0 }
 0x1d8   : > { %v4181_v23 = vpop.f32.mrf.mxu1  ;;  %v11090_v63 = vadd.f32 %v4179_v44, %v4067_v14  ;;  %v4069_v0 = vadd.f32 %v4068_v15, %v10938_v22  ;;  %4919 = vmatpush1.bf16.msra.mxu0 %v9479_v5  ;;  %v9494_v22 = vld [vmem:[#allocation14 + $0x7c8] ss:$16 sps:$4 sm:$0xff]  }
 0x1d9   : > { %5032 = vmatpush1.bf16.msra.mxu1 %v9482_v60  ;;  %v4070_v38 = vpop.f32.mrf.mxu0  ;;  %4920 = vmatprep.subr.bf16.mxu0 %v9487_v31  ;;  %v9505_v60 = vld [vmem:[#allocation14 + $0x58c] ss:$16 sps:$4 sm:$0xff]   ;;  %v13577_v14 = vld [vmem:[#allocation30_spill] sm:$0xff] }
 0x1da   : > { %v4183_v51 = vpop.f32.mrf.mxu1  ;;  %5033 = vmatprep.subr.bf16.mxu1 %v9490_v28  ;;  %v11093_v58 = vadd.f32 %v4181_v23, %v4069_v0  ;;  %v4071_v25 = vadd.f32 %v4070_v38, %v10940_v47  ;;  %v9502_v47 = vld [vmem:[#allocation14 + $0x7ac] ss:$16 sps:$4 sm:$0xff]   ;;  %v9503_v23 = vld [vmem:[#allocation14 + $0x588] ss:$16 sps:$4 sm:$0xff]  }
 0x1db   : > { %v4074_v26 = vpop.f32.mrf.mxu0  ;;  %4751 = vmatmul.mubr.bf16.gmra.mxu0 %v10424_v40  ;;  %v13578_v15 = vld [vmem:[#allocation31_spill] sm:$0xff]  ;;  %v13580_v0 = vld [vmem:[#allocation132_spill] sm:$0xff] }
 0x1dc   : > { %v4187_v59 = vpop.f32.mrf.mxu1  ;;  %4864 = vmatmul.mubr.bf16.gmra.mxu1 %v10426_v41  ;;  %v11098_v3 = vadd.f32 %v4183_v51, %v4071_v25  ;;  %v4075_v61 = vadd.f32 %v4074_v26, %v10950_v57  ;;  %4921 = vmatpush2.bf16.msra.mxu0 %v9485_v27  ;;  %v9500_v57 = vld [vmem:[#allocation14 + $0x7a8] ss:$16 sps:$4 sm:$0xff]   ;;  %v9511_v38 = vld [vmem:[#allocation14 + $0x56c] ss:$16 sps:$4 sm:$0xff]  }
 0x1dd   : > { %5034 = vmatpush2.bf16.msra.mxu1 %v9488_v10  ;;  %v4076_v37 = vpop.f32.mrf.mxu0  ;;  %4922 = vmatprep.subr.bf16.mxu0 %v9493_v19  ;;  %v9506_v27 = vld [vmem:[#allocation14 + $0x788] ss:$16 sps:$4 sm:$0xff]   ;;  %v9514_v25 = vld [vmem:[#allocation14 + $0x76c] ss:$16 sps:$4 sm:$0xff]  }
 0x1de   : > { %v4189_v16 = vpop.f32.mrf.mxu1  ;;  %5035 = vmatprep.subr.bf16.mxu1 %v9496_v13  ;;  %v11101_v17 = vadd.f32 %v4187_v59, %v4075_v61  ;;  %v4077_v40 = vadd.f32 %v4076_v37, %v10954_v45  ;;  %4760 = vmatprep.mubr.bf16.mxu0 %v10430_v49  ;;  %v9508_v45 = vld [vmem:[#allocation14 + $0x78c] ss:$16 sps:$4 sm:$0xff]  }
 0x1df   : > { %4873 = vmatprep.mubr.bf16.mxu1 %v10432_v50  ;;  %v4078_v41 = vpop.f32.mrf.mxu0  ;;  %v13576_v49 = vld [vmem:[#allocation129_spill] sm:$0xff] }
 0x1e0   : > { %v4191_v55 = vpop.f32.mrf.mxu1  ;;  %v11106_v2 = vadd.f32 %v4189_v16, %v4077_v40  ;;  %v4079_v5 = vadd.f32 %v4078_v41, %v13574_v52  ;;  %4923 = vmatpush2.bf16.msra.mxu0 %v9491_v42  ;;  %v13582_v59 = vld [vmem:[#allocation133_spill] sm:$0xff]  ;;  %v13586_v41 = vld [vmem:[#allocation136_spill] sm:$0xff] }
 0x1e1   : > { %5036 = vmatpush2.bf16.msra.mxu1 %v9494_v22  ;;  %v4080_v56 = vpop.f32.mrf.mxu0  ;;  %4924 = vmatprep.subr.bf16.mxu0 %v9499_v36  ;;  %v13583_v22 = vld [vmem:[#allocation32_spill] sm:$0xff]  ;;  %v13584_v61 = vld [vmem:[#allocation33_spill] sm:$0xff] }
 0x1e2   : > { %13573 = vst [vmem:[#allocation142_spill] sm:$0xff] %v11106_v2  ;;  %v4193_v31 = vpop.f32.mrf.mxu1  ;;  %5037 = vmatprep.subr.bf16.mxu1 %v9502_v47  ;;  %v11109_v43 = vadd.f32 %v4191_v55, %v4079_v5  ;;  %v4081_v50 = vadd.f32 %v4080_v56, %v13576_v49  ;;  %v9509_v16 = vld [vmem:[#allocation14 + $0x568] ss:$16 sps:$4 sm:$0xff]   ;;  %v9520_v5 = vld [vmem:[#allocation14 + $0x74c] ss:$16 sps:$4 sm:$0xff]  }
 0x1e3   : > { %v4084_v44 = vpop.f32.mrf.mxu0  ;;  %4761 = vmatmul.mubr.bf16.gmra.mxu0 %v13577_v14  ;;  %v9512_v47 = vld [vmem:[#allocation14 + $0x768] ss:$16 sps:$4 sm:$0xff]  }
 0x1e4   : > { %13575 = vst [vmem:[#allocation128_spill] sm:$0xff] %v11109_v43  ;;  %v4197_v28 = vpop.f32.mrf.mxu1  ;;  %4874 = vmatmul.mubr.bf16.gmra.mxu1 %v13578_v15  ;;  %v11114_v10 = vadd.f32 %v4193_v31, %v4081_v50  ;;  %v4085_v19 = vadd.f32 %v4084_v44, %v13580_v0  ;;  %4925 = vmatpush2.bf16.msra.mxu0 %v9497_v1  ;;  %v9517_v1 = vld [vmem:[#allocation14 + $0x54c] ss:$16 sps:$4 sm:$0xff]   ;;  %v13588_v49 = vld [vmem:[#allocation34_spill] sm:$0xff] }
 0x1e5   : > { %5038 = vmatpush2.bf16.msra.mxu1 %v9500_v57  ;;  %v4086_v51 = vpop.f32.mrf.mxu0  ;;  %4926 = vmatprep.subr.bf16.mxu0 %v9505_v60  ;;  %v13589_v50 = vld [vmem:[#allocation35_spill] sm:$0xff] }
 0x1e6   : > { %13579 = vst [vmem:[#allocation129_spill] sm:$0xff] %v11114_v10  ;;  %v4199_v13 = vpop.f32.mrf.mxu1  ;;  %5039 = vmatprep.subr.bf16.mxu1 %v9508_v45  ;;  %v11117_v26 = vadd.f32 %v4197_v28, %v4085_v19  ;;  %v4087_v42 = vadd.f32 %v4086_v51, %v13582_v59  ;;  %4770 = vmatprep.mubr.bf16.mxu0 %v13583_v22  ;;  %v9515_v44 = vld [vmem:[#allocation14 + $0x548] ss:$16 sps:$4 sm:$0xff]  }
 0x1e7   : > { %4883 = vmatprep.mubr.bf16.mxu1 %v13584_v61  ;;  %v4088_v36 = vpop.f32.mrf.mxu0  ;;  %v9518_v28 = vld [vmem:[#allocation14 + $0x748] ss:$16 sps:$4 sm:$0xff]  }
 0x1e8   : > { %13581 = vst [vmem:[#allocation30_spill] sm:$0xff] %v11117_v26  ;;  %v4201_v37 = vpop.f32.mrf.mxu1  ;;  %v11122_v40 = vadd.f32 %v4199_v13, %v4087_v42  ;;  %v4089_v55 = vadd.f32 %v4088_v36, %v13586_v41  ;;  %4927 = vmatpush2.bf16.msra.mxu0 %v9503_v23  ;;  %v9523_v23 = vld [vmem:[#allocation14 + $0x52c] ss:$16 sps:$4 sm:$0xff]   ;;  %v13593_v13 = vld [vmem:[#allocation36_spill] sm:$0xff] }
 0x1e9   : > { %5040 = vmatpush2.bf16.msra.mxu1 %v9506_v27  ;;  %v4090_v57 = vpop.f32.mrf.mxu0  ;;  %4928 = vmatprep.subr.bf16.mxu0 %v9511_v38  ;;  %v13592_v38 = vld [vmem:[#allocation139_spill] sm:$0xff] }
 0x1ea   : > { %13585 = vst [vmem:[#allocation31_spill] sm:$0xff] %v11122_v40  ;;  %v4203_v52 = vpop.f32.mrf.mxu1  ;;  %5041 = vmatprep.subr.bf16.mxu1 %v9514_v25  ;;  %v11125_v60 = vadd.f32 %v4201_v37, %v4089_v55  ;;  %v4091_v56 = vadd.f32 %v4090_v57, %v10996_v32  ;;  %v9526_v32 = vld [vmem:[#allocation14 + $0x72c] ss:$16 sps:$4 sm:$0xff]   ;;  %v9521_v22 = vld [vmem:[#allocation14 + $0x528] ss:$16 sps:$4 sm:$0xff]  }
 0x1eb   : > { %v4094_v31 = vpop.f32.mrf.mxu0  ;;  %4771 = vmatmul.mubr.bf16.gmra.mxu0 %v13588_v49  ;;  %v13594_v25 = vld [vmem:[#allocation37_spill] sm:$0xff]  ;;  %v13626_v26 = vld [vmem:[#allocation59_spill] sm:$0xff] }
 0x1ec   : > { %13587 = vst [vmem:[#allocation132_spill] sm:$0xff] %v11125_v60  ;;  %v4207_v45 = vpop.f32.mrf.mxu1  ;;  %4884 = vmatmul.mubr.bf16.gmra.mxu1 %v13589_v50  ;;  %v11130_v14 = vadd.f32 %v4203_v52, %v4091_v56  ;;  %v4095_v15 = vadd.f32 %v4094_v31, %v11008_v20  ;;  %4929 = vmatpush2.bf16.msra.mxu0 %v9509_v16  ;;  %v9524_v20 = vld [vmem:[#allocation14 + $0x728] ss:$16 sps:$4 sm:$0xff]   ;;  %v9529_v37 = vld [vmem:[#allocation14 + $0x50c] ss:$16 sps:$4 sm:$0xff]  }
 0x1ed   : > { %5042 = vmatpush2.bf16.msra.mxu1 %v9512_v47  ;;  %v4096_v27 = vpop.f32.mrf.mxu0  ;;  %4930 = vmatprep.subr.bf16.mxu0 %v9517_v1  ;;  %v9532_v41 = vld [vmem:[#allocation14 + $0x70c] ss:$16 sps:$4 sm:$0xff]   ;;  %v9527_v31 = vld [vmem:[#allocation14 + $0x508] ss:$16 sps:$4 sm:$0xff]  }
 0x1ee   : > { %13590 = vst [vmem:[#allocation133_spill] sm:$0xff] %v11130_v14  ;;  %v4209_v0 = vpop.f32.mrf.mxu1  ;;  %5043 = vmatprep.subr.bf16.mxu1 %v9520_v5  ;;  %v11133_v19 = vadd.f32 %v4207_v45, %v4095_v15  ;;  %v4097_v51 = vadd.f32 %v4096_v27, %v13592_v38  ;;  %4780 = vmatprep.mubr.bf16.mxu0 %v13593_v13  ;;  %v13597_v5 = vld [vmem:[#allocation38_spill] sm:$0xff]  ;;  %v13598_v56 = vld [vmem:[#allocation39_spill] sm:$0xff]  ;;  %v13601_v27 = vld [vmem:[#allocation40_spill] sm:$0xff] }
 0x1ef   : > { %4893 = vmatprep.mubr.bf16.mxu1 %v13594_v25  ;;  %v4098_v59 = vpop.f32.mrf.mxu0  ;;  %v9535_v50 = vld [vmem:[#allocation14 + $0x8ec] ss:$16 sps:$4 sm:$0xff]   ;;  %v9584_v60 = vld [vmem:[#allocation14 + $0xbe8] ss:$16 sps:$4 sm:$0xff]  }
 0x1f0   : > { %13591 = vst [vmem:[#allocation32_spill] sm:$0xff] %v11133_v19  ;;  %v4211_v42 = vpop.f32.mrf.mxu1  ;;  %v11138_v61 = vadd.f32 %v4209_v0, %v4097_v51  ;;  %v4099_v36 = vadd.f32 %v4098_v59, %v11018_v30  ;;  %4931 = vmatpush2.bf16.msra.mxu0 %v9515_v44  ;;  %v9530_v30 = vld [vmem:[#allocation14 + $0x708] ss:$16 sps:$4 sm:$0xff]   ;;  %v9541_v59 = vld [vmem:[#allocation14 + $0x8cc] ss:$16 sps:$4 sm:$0xff]  }
 0x1f1   : > { %5044 = vmatpush2.bf16.msra.mxu1 %v9518_v28  ;;  %v4100_v16 = vpop.f32.mrf.mxu0  ;;  %4932 = vmatprep.subr.bf16.mxu0 %v9523_v23  ;;  %v13602_v0 = vld [vmem:[#allocation41_spill] sm:$0xff] }
 0x1f2   : > { %13595 = vst [vmem:[#allocation33_spill] sm:$0xff] %v11138_v61  ;;  %v4213_v47 = vpop.f32.mrf.mxu1  ;;  %5045 = vmatprep.subr.bf16.mxu1 %v9526_v32  ;;  %v11141_v55 = vadd.f32 %v4211_v42, %v4099_v36  ;;  %v4101_v1 = vadd.f32 %v4100_v16, %v11020_v6  ;;  %v9538_v6 = vld [vmem:[#allocation14 + $0xaec] ss:$16 sps:$4 sm:$0xff]   ;;  %v9533_v51 = vld [vmem:[#allocation14 + $0x8e8] ss:$16 sps:$4 sm:$0xff]  }
 0x1f3   : > { %v4104_v57 = vpop.f32.mrf.mxu0  ;;  %4781 = vmatmul.mubr.bf16.gmra.mxu0 %v13597_v5  ;;  %v13621_v19 = vld [vmem:[#allocation57_spill] sm:$0xff] }
 0x1f4   : > { %13596 = vst [vmem:[#allocation136_spill] sm:$0xff] %v11141_v55  ;;  %v4217_v52 = vpop.f32.mrf.mxu1  ;;  %4894 = vmatmul.mubr.bf16.gmra.mxu1 %v13598_v56  ;;  %v11146_v45 = vadd.f32 %v4213_v47, %v4101_v1  ;;  %v4105_v49 = vadd.f32 %v4104_v57, %v11024_v34  ;;  %4933 = vmatpush2.bf16.msra.mxu0 %v9521_v22  ;;  %v9536_v34 = vld [vmem:[#allocation14 + $0xae8] ss:$16 sps:$4 sm:$0xff]  }
 0x1f5   : > { %5046 = vmatpush2.bf16.msra.mxu1 %v9524_v20  ;;  %v4106_v44 = vpop.f32.mrf.mxu0  ;;  %4934 = vmatprep.subr.bf16.mxu0 %v9529_v37  ;;  %v13605_v47 = vld [vmem:[#allocation42_spill] sm:$0xff] }
 0x1f6   : > { %13599 = vst [vmem:[#allocation34_spill] sm:$0xff] %v11146_v45  ;;  %v4219_v28 = vpop.f32.mrf.mxu1  ;;  %5047 = vmatprep.subr.bf16.mxu1 %v9532_v41  ;;  %v11149_v15 = vadd.f32 %v4217_v52, %v4105_v49  ;;  %v4107_v23 = vadd.f32 %v4106_v44, %v11026_v4  ;;  %4936 = vmatprep.mubr.bf16.mxu0 %v13601_v27  ;;  %v9544_v4 = vld [vmem:[#allocation14 + $0xacc] ss:$16 sps:$4 sm:$0xff]   ;;  %v9542_v1 = vld [vmem:[#allocation14 + $0xac8] ss:$16 sps:$4 sm:$0xff]  }
 0x1f7   : > { %5049 = vmatprep.mubr.bf16.mxu1 %v13602_v0  ;;  %v4108_v32 = vpop.f32.mrf.mxu0  ;;  %v13606_v41 = vld [vmem:[#allocation43_spill] sm:$0xff] }
 0x1f8   : > { %13600 = vst [vmem:[#allocation35_spill] sm:$0xff] %v11149_v15  ;;  %v4221_v38 = vpop.f32.mrf.mxu1  ;;  %v11154_v13 = vadd.f32 %v4219_v28, %v4107_v23  ;;  %v4109_v25 = vadd.f32 %v4108_v32, %v11030_v9  ;;  %4935 = vmatpush2.bf16.msra.mxu0 %v9527_v31  ;;  %v9539_v9 = vld [vmem:[#allocation14 + $0x8c8] ss:$16 sps:$4 sm:$0xff]   ;;  %v9547_v52 = vld [vmem:[#allocation14 + $0x8ac] ss:$16 sps:$4 sm:$0xff]  }
 0x1f9   : > { %5048 = vmatpush2.bf16.msra.mxu1 %v9530_v30  ;;  %v4110_v42 = vpop.f32.mrf.mxu0  ;;  %5130 = vmatprep.subr.bf16.mxu0 %v9535_v50  ;;  %v13608_v31 = vld [vmem:[#allocation44_spill] sm:$0xff]  ;;  %v13609_v30 = vld [vmem:[#allocation45_spill] sm:$0xff]  ;;  %v13619_v15 = vld [vmem:[#allocation55_spill] sm:$0xff] }
 0x1fa   : > { %13603 = vst [vmem:[#allocation139_spill] sm:$0xff] %v11154_v13  ;;  %v4223_v22 = vpop.f32.mrf.mxu1  ;;  %5243 = vmatprep.subr.bf16.mxu1 %v9538_v6  ;;  %v11157_v20 = vadd.f32 %v4221_v38, %v4109_v25  ;;  %v4111_v36 = vadd.f32 %v4110_v42, %v11032_v48  ;;  %v9550_v48 = vld [vmem:[#allocation14 + $0xaac] ss:$16 sps:$4 sm:$0xff]   ;;  %v9545_v44 = vld [vmem:[#allocation14 + $0x8a8] ss:$16 sps:$4 sm:$0xff]  }
 0x1fb   : > { %v11160_v37 = vpop.f32.mrf.mxu0  ;;  %4937 = vmatmul.mubr.bf16.vlgmr.msra.gmra.mxu0 %v13605_v47  ;;  %v9548_v28 = vld [vmem:[#allocation14 + $0xaa8] ss:$16 sps:$4 sm:$0xff]   ;;  %v9553_v6 = vld [vmem:[#allocation14 + $0x88c] ss:$16 sps:$4 sm:$0xff]  }
 0x1fc   : > { %13604 = vst [vmem:[#allocation36_spill] sm:$0xff] %v11157_v20  ;;  %v11162_v16 = vpop.f32.mrf.mxu1  ;;  %5050 = vmatmul.mubr.bf16.vlgmr.msra.gmra.mxu1 %v13606_v41  ;;  %v11166_v57 = vadd.f32 %v4223_v22, %v4111_v36  ;;  %5131 = vmatpush1.bf16.msra.mxu0 %v9533_v51  ;;  %v9556_v0 = vld [vmem:[#allocation14 + $0xa8c] ss:$16 sps:$4 sm:$0xff]   ;;  %v13610_v51 = vld [vmem:[#allocation46_spill] sm:$0xff]  ;;  %v13612_v47 = vld [vmem:[#allocation48_spill] sm:$0xff] }
 0x1fd   : > { %5244 = vmatpush1.bf16.msra.mxu1 %v9536_v34  ;;  %v11168_v5 = vpop.f32.mrf.mxu0  ;;  %5132 = vmatprep.subr.bf16.mxu0 %v9541_v59  ;;  %v13611_v34 = vld [vmem:[#allocation47_spill] sm:$0xff]  ;;  %v13613_v41 = vld [vmem:[#allocation49_spill] sm:$0xff] }
 0x1fe   : > { %13607 = vst [vmem:[#allocation37_spill] sm:$0xff] %v11166_v57  ;;  %v11170_v56 = vpop.f32.mrf.mxu1  ;;  %5245 = vmatprep.subr.bf16.mxu1 %v9544_v4  ;;  %4946 = vmatprep.mubr.bf16.mxu0 %v13608_v31  ;;  %v9551_v25 = vld [vmem:[#allocation14 + $0x888] ss:$16 sps:$4 sm:$0xff]   ;;  %v9559_v42 = vld [vmem:[#allocation14 + $0x86c] ss:$16 sps:$4 sm:$0xff]  }
 0x1ff   : > { %5059 = vmatprep.mubr.bf16.mxu1 %v13609_v30  ;;  %v11174_v49 = vpop.f32.mrf.mxu0  ;;  %v9554_v59 = vld [vmem:[#allocation14 + $0xa88] ss:$16 sps:$4 sm:$0xff]   ;;  %v9562_v36 = vld [vmem:[#allocation14 + $0xa6c] ss:$16 sps:$4 sm:$0xff]  }
 0x200   : > { %v11176_v50 = vpop.f32.mrf.mxu1  ;;  %5133 = vmatpush1.bf16.msra.mxu0 %v9539_v9  ;;  %v9565_v31 = vld [vmem:[#allocation14 + $0x84c] ss:$16 sps:$4 sm:$0xff]   ;;  %v9572_v20 = vld [vmem:[#allocation14 + $0xa28] ss:$16 sps:$4 sm:$0xff]  }
 0x201   : > { %5246 = vmatpush1.bf16.msra.mxu1 %v9542_v1  ;;  %v11178_v23 = vpop.f32.mrf.mxu0  ;;  %5134 = vmatprep.subr.bf16.mxu0 %v9547_v52  ;;  %v9557_v52 = vld [vmem:[#allocation14 + $0x868] ss:$16 sps:$4 sm:$0xff]  }
 0x202   : > { %v11180_v27 = vpop.f32.mrf.mxu1  ;;  %5247 = vmatprep.subr.bf16.mxu1 %v9550_v48  ;;  %v9560_v48 = vld [vmem:[#allocation14 + $0xa68] ss:$16 sps:$4 sm:$0xff]  }
 0x203   : > { %v11182_v32 = vpop.f32.mrf.mxu0  ;;  %4947 = vmatmul.mubr.bf16.gmra.mxu0 %v13610_v51  ;;  %v13614_v51 = vld [vmem:[#allocation50_spill] sm:$0xff] }
 0x204   : > { %v11184_v38 = vpop.f32.mrf.mxu1  ;;  %5060 = vmatmul.mubr.bf16.gmra.mxu1 %v13611_v34  ;;  %5135 = vmatpush1.bf16.msra.mxu0 %v9545_v44  ;;  %v13615_v34 = vld [vmem:[#allocation51_spill] sm:$0xff] }
 0x205   : > { %5248 = vmatpush1.bf16.msra.mxu1 %v9548_v28  ;;  %v11188_v22 = vpop.f32.mrf.mxu0  ;;  %5136 = vmatprep.subr.bf16.mxu0 %v9553_v6  ;;  %v9568_v28 = vld [vmem:[#allocation14 + $0xa4c] ss:$16 sps:$4 sm:$0xff]   ;;  %v9575_v45 = vld [vmem:[#allocation14 + $0x808] ss:$16 sps:$4 sm:$0xff]  }
 0x206   : > { %v11190_v4 = vpop.f32.mrf.mxu1  ;;  %5249 = vmatprep.subr.bf16.mxu1 %v9556_v0  ;;  %4956 = vmatprep.mubr.bf16.mxu0 %v13612_v47  ;;  %v9563_v47 = vld [vmem:[#allocation14 + $0x848] ss:$16 sps:$4 sm:$0xff]  }
 0x207   : > { %5069 = vmatprep.mubr.bf16.mxu1 %v13613_v41  ;;  %v11194_v9 = vpop.f32.mrf.mxu0  ;;  %v9566_v41 = vld [vmem:[#allocation14 + $0xa48] ss:$16 sps:$4 sm:$0xff]  }
 0x208   : > { %v11196_v1 = vpop.f32.mrf.mxu1  ;;  %5137 = vmatpush1.bf16.msra.mxu0 %v9551_v25  ;;  %v9571_v25 = vld [vmem:[#allocation14 + $0x82c] ss:$16 sps:$4 sm:$0xff]   ;;  %v9578_v55 = vld [vmem:[#allocation14 + $0xa08] ss:$16 sps:$4 sm:$0xff]  }
 0x209   : > { %5250 = vmatpush1.bf16.msra.mxu1 %v9554_v59  ;;  %v11198_v30 = vpop.f32.mrf.mxu0  ;;  %5138 = vmatprep.subr.bf16.mxu0 %v9559_v42  ;;  %v9574_v42 = vld [vmem:[#allocation14 + $0xa2c] ss:$16 sps:$4 sm:$0xff]   ;;  %v9587_v10 = vld [vmem:[#allocation14 + $0x9c8] ss:$16 sps:$4 sm:$0xff]  }
 0x20a   : > { %v11200_v44 = vpop.f32.mrf.mxu1  ;;  %5251 = vmatprep.subr.bf16.mxu1 %v9562_v36  ;;  %v13616_v36 = vld [vmem:[#allocation52_spill] sm:$0xff] }
 0x20b   : > { %v11202_v6 = vpop.f32.mrf.mxu0  ;;  %4957 = vmatmul.mubr.bf16.gmra.mxu0 %v13614_v51  ;;  %v9590_v43 = vld [vmem:[#allocation14 + $0xbc8] ss:$16 sps:$4 sm:$0xff]  }
 0x20c   : > { %v11204_v0 = vpop.f32.mrf.mxu1  ;;  %5070 = vmatmul.mubr.bf16.gmra.mxu1 %v13615_v34  ;;  %5139 = vmatpush1.bf16.msra.mxu0 %v9557_v52  ;;  %v9569_v34 = vld [vmem:[#allocation14 + $0x828] ss:$16 sps:$4 sm:$0xff]   ;;  %v9577_v52 = vld [vmem:[#allocation14 + $0x80c] ss:$16 sps:$4 sm:$0xff]  }
 0x20d   : > { %5252 = vmatpush1.bf16.msra.mxu1 %v9560_v48  ;;  %v11208_v59 = vpop.f32.mrf.mxu0  ;;  %5140 = vmatprep.subr.bf16.mxu0 %v9565_v31  ;;  %v9580_v31 = vld [vmem:[#allocation14 + $0xa0c] ss:$16 sps:$4 sm:$0xff]  }
 0x20e   : > { %v11210_v35 = vpop.f32.mrf.mxu1  ;;  %5253 = vmatprep.subr.bf16.mxu1 %v9568_v28  ;;  %4966 = vmatprep.mubr.bf16.mxu0 %v13616_v36 }
 0x20f   : > { %5079 = vmatprep.mubr.bf16.mxu1 %v13617_v12  ;;  %v11214_v57 = vpop.f32.mrf.mxu0  ;;  %v13618_v12 = vld [vmem:[#allocation54_spill] sm:$0xff] }
 0x210   : > { %v11216_v51 = vpop.f32.mrf.mxu1  ;;  %5141 = vmatpush1.bf16.msra.mxu0 %v9563_v47  ;;  %v9583_v47 = vld [vmem:[#allocation14 + $0x9ec] ss:$16 sps:$4 sm:$0xff]  }
 0x211   : > { %5254 = vmatpush1.bf16.msra.mxu1 %v9566_v41  ;;  %v11218_v48 = vpop.f32.mrf.mxu0  ;;  %5142 = vmatprep.subr.bf16.mxu0 %v9571_v25  ;;  %v9586_v25 = vld [vmem:[#allocation14 + $0xbec] ss:$16 sps:$4 sm:$0xff]  }
 0x212   : > { %v11220_v13 = vpop.f32.mrf.mxu1  ;;  %5255 = vmatprep.subr.bf16.mxu1 %v9574_v42  ;;  %v13620_v42 = vld [vmem:[#allocation56_spill] sm:$0xff] }
 0x213   : > { %v11222_v28 = vpop.f32.mrf.mxu0  ;;  %4967 = vmatmul.mubr.bf16.gmra.mxu0 %v13618_v12 }
 0x214   : > { %v11224_v36 = vpop.f32.mrf.mxu1  ;;  %5080 = vmatmul.mubr.bf16.gmra.mxu1 %v13619_v15  ;;  %5143 = vmatpush1.bf16.msra.mxu0 %v9569_v34  ;;  %v9581_v15 = vld [vmem:[#allocation14 + $0x9e8] ss:$16 sps:$4 sm:$0xff]  }
 0x215   : > { %5256 = vmatpush1.bf16.msra.mxu1 %v9572_v20  ;;  %v11228_v41 = vpop.f32.mrf.mxu0  ;;  %5144 = vmatprep.subr.bf16.mxu0 %v9577_v52  ;;  %v9589_v20 = vld [vmem:[#allocation14 + $0x9cc] ss:$16 sps:$4 sm:$0xff]  }
 0x216   : > { %v11230_v61 = vpop.f32.mrf.mxu1  ;;  %5257 = vmatprep.subr.bf16.mxu1 %v9580_v31  ;;  %4976 = vmatprep.mubr.bf16.mxu0 %v13620_v42  ;;  %v9592_v52 = vld [vmem:[#allocation14 + $0xbcc] ss:$16 sps:$4 sm:$0xff]  }
 0x217   : > { %5089 = vmatprep.mubr.bf16.mxu1 %v13621_v19  ;;  %v11234_v14 = vpop.f32.mrf.mxu0  ;;  %v13625_v19 = vld [vmem:[#allocation58_spill] sm:$0xff] }
 0x218   : > { %v11236_v12 = vpop.f32.mrf.mxu1  ;;  %5145 = vmatpush1.bf16.msra.mxu0 %v9575_v45 }
 0x219   : > { %5258 = vmatpush1.bf16.msra.mxu1 %v9578_v55  ;;  %v11238_v34 = vpop.f32.mrf.mxu0  ;;  %5146 = vmatprep.subr.bf16.mxu0 %v9583_v47  ;;  %v9595_v55 = vld [vmem:[#allocation14 + $0x9ac] ss:$16 sps:$4 sm:$0xff]  }
 0x21a   : > { %v11240_v40 = vpop.f32.mrf.mxu1  ;;  %5259 = vmatprep.subr.bf16.mxu1 %v9586_v25  ;;  %v9598_v47 = vld [vmem:[#allocation14 + $0xbac] ss:$16 sps:$4 sm:$0xff]   ;;  %v13629_v25 = vld [vmem:[#allocation60_spill] sm:$0xff] }
 0x21b   : > { %13622 = vst [vmem:[#allocation38_spill] sm:$0xff] %v11240_v40  ;;  %v11242_v31 = vpop.f32.mrf.mxu0  ;;  %4977 = vmatmul.mubr.bf16.gmra.mxu0 %v13625_v19  ;;  %v13630_v40 = vld [vmem:[#allocation61_spill] sm:$0xff] }
 0x21c   : > { %13623 = vst [vmem:[#allocation39_spill] sm:$0xff] %v11242_v31  ;;  %v11244_v42 = vpop.f32.mrf.mxu1  ;;  %5090 = vmatmul.mubr.bf16.gmra.mxu1 %v13626_v26  ;;  %5147 = vmatpush2.bf16.msra.mxu0 %v9581_v15  ;;  %v9593_v26 = vld [vmem:[#allocation14 + $0x9a8] ss:$16 sps:$4 sm:$0xff]  }
 0x21d   : > { %13624 = vst [vmem:[#allocation40_spill] sm:$0xff] %v11244_v42  ;;  %5260 = vmatpush2.bf16.msra.mxu1 %v9584_v60  ;;  %v11248_v45 = vpop.f32.mrf.mxu0  ;;  %5148 = vmatprep.subr.bf16.mxu0 %v9589_v20  ;;  %v9596_v31 = vld [vmem:[#allocation14 + $0xba8] ss:$16 sps:$4 sm:$0xff]   ;;  %v9601_v60 = vld [vmem:[#allocation14 + $0x98c] ss:$16 sps:$4 sm:$0xff]  }
 0x21e   : > { %13627 = vst [vmem:[#allocation41_spill] sm:$0xff] %v11248_v45  ;;  %v11250_v2 = vpop.f32.mrf.mxu1  ;;  %5261 = vmatprep.subr.bf16.mxu1 %v9592_v52  ;;  %4986 = vmatprep.mubr.bf16.mxu0 %v13629_v25  ;;  %v9604_v20 = vld [vmem:[#allocation14 + $0xb8c] ss:$16 sps:$4 sm:$0xff]  }
 0x21f   : > { %13628 = vst [vmem:[#allocation42_spill] sm:$0xff] %v11250_v2  ;;  %5099 = vmatprep.mubr.bf16.mxu1 %v13630_v40  ;;  %v11254_v42 = vpop.f32.mrf.mxu0  ;;  %v13636_v40 = vld [vmem:[#allocation62_spill] sm:$0xff]  ;;  %v13637_v2 = vld [vmem:[#allocation63_spill] sm:$0xff] }
 0x220   : > { %v11256_v19 = vpop.f32.mrf.mxu1  ;;  %5149 = vmatpush2.bf16.msra.mxu0 %v9587_v10  ;;  %v9599_v10 = vld [vmem:[#allocation14 + $0x988] ss:$16 sps:$4 sm:$0xff]  }
 0x221   : > { %13631 = vst [vmem:[#allocation43_spill] sm:$0xff] %v11256_v19  ;;  %5262 = vmatpush2.bf16.msra.mxu1 %v9590_v43  ;;  %v11258_v15 = vpop.f32.mrf.mxu0  ;;  %5150 = vmatprep.subr.bf16.mxu0 %v9595_v55  ;;  %v9602_v43 = vld [vmem:[#allocation14 + $0xb88] ss:$16 sps:$4 sm:$0xff]   ;;  %v9607_v55 = vld [vmem:[#allocation14 + $0x96c] ss:$16 sps:$4 sm:$0xff]  }
 0x222   : > { %13632 = vst [vmem:[#allocation44_spill] sm:$0xff] %v11258_v15  ;;  %v11260_v45 = vpop.f32.mrf.mxu1  ;;  %5263 = vmatprep.subr.bf16.mxu1 %v9598_v47  ;;  %v9610_v47 = vld [vmem:[#allocation14 + $0xb6c] ss:$16 sps:$4 sm:$0xff]  }
 0x223   : > { %13633 = vst [vmem:[#allocation45_spill] sm:$0xff] %v11260_v45  ;;  %v11262_v52 = vpop.f32.mrf.mxu0  ;;  %4987 = vmatmul.mubr.bf16.gmra.mxu0 %v13636_v40  ;;  %v13640_v45 = vld [vmem:[#allocation64_spill] sm:$0xff] }
 0x224   : > { %13634 = vst [vmem:[#allocation46_spill] sm:$0xff] %v11262_v52  ;;  %v11264_v25 = vpop.f32.mrf.mxu1  ;;  %5100 = vmatmul.mubr.bf16.gmra.mxu1 %v13637_v2  ;;  %5151 = vmatpush2.bf16.msra.mxu0 %v9593_v26  ;;  %v13641_v52 = vld [vmem:[#allocation65_spill] sm:$0xff] }
 0x225   : > { %13635 = vst [vmem:[#allocation47_spill] sm:$0xff] %v11264_v25  ;;  %5264 = vmatpush2.bf16.msra.mxu1 %v9596_v31  ;;  %v11268_v19 = vpop.f32.mrf.mxu0  ;;  %5152 = vmatprep.subr.bf16.mxu0 %v9601_v60  ;;  %v9605_v2 = vld [vmem:[#allocation14 + $0x968] ss:$16 sps:$4 sm:$0xff]   ;;  %v9613_v60 = vld [vmem:[#allocation14 + $0x94c] ss:$16 sps:$4 sm:$0xff]  }
 0x226   : > { %13638 = vst [vmem:[#allocation48_spill] sm:$0xff] %v11268_v19  ;;  %v11270_v15 = vpop.f32.mrf.mxu1  ;;  %5265 = vmatprep.subr.bf16.mxu1 %v9604_v20  ;;  %4996 = vmatprep.mubr.bf16.mxu0 %v13640_v45  ;;  %v9608_v31 = vld [vmem:[#allocation14 + $0xb68] ss:$16 sps:$4 sm:$0xff]   ;;  %v9616_v20 = vld [vmem:[#allocation14 + $0xb4c] ss:$16 sps:$4 sm:$0xff]  }
 0x227   : > { %13639 = vst [vmem:[#allocation49_spill] sm:$0xff] %v11270_v15  ;;  %5109 = vmatprep.mubr.bf16.mxu1 %v13641_v52  ;;  %v11274_v25 = vpop.f32.mrf.mxu0  ;;  %v13648_v52 = vld [vmem:[#allocation66_spill] sm:$0xff] }
 0x228   : > { %13642 = vst [vmem:[#allocation50_spill] sm:$0xff] %v11274_v25  ;;  %v11276_v40 = vpop.f32.mrf.mxu1  ;;  %5153 = vmatpush2.bf16.msra.mxu0 %v9599_v10  ;;  %v13649_v25 = vld [vmem:[#allocation67_spill] sm:$0xff] }
 0x229   : > { %13643 = vst [vmem:[#allocation51_spill] sm:$0xff] %v11276_v40  ;;  %5266 = vmatpush2.bf16.msra.mxu1 %v9602_v43  ;;  %v11278_v26 = vpop.f32.mrf.mxu0  ;;  %5154 = vmatprep.subr.bf16.mxu0 %v9607_v55  ;;  %v9611_v10 = vld [vmem:[#allocation14 + $0x948] ss:$16 sps:$4 sm:$0xff]   ;;  %v9619_v55 = vld [vmem:[#allocation14 + $0x92c] ss:$16 sps:$4 sm:$0xff]  }
 0x22a   : > { %13644 = vst [vmem:[#allocation52_spill] sm:$0xff] %v11278_v26  ;;  %v11280_v19 = vpop.f32.mrf.mxu1  ;;  %5267 = vmatprep.subr.bf16.mxu1 %v9610_v47  ;;  %v9614_v43 = vld [vmem:[#allocation14 + $0xb48] ss:$16 sps:$4 sm:$0xff]   ;;  %v9622_v47 = vld [vmem:[#allocation14 + $0xb2c] ss:$16 sps:$4 sm:$0xff]  }
 0x22b   : > { %13645 = vst [vmem:[#allocation53_spill] sm:$0xff] %v11280_v19  ;;  %v11282_v15 = vpop.f32.mrf.mxu0  ;;  %4997 = vmatmul.mubr.bf16.gmra.mxu0 %v13648_v52  ;;  %v13652_v19 = vld [vmem:[#allocation68_spill] sm:$0xff] }
 0x22c   : > { %13646 = vst [vmem:[#allocation54_spill] sm:$0xff] %v11282_v15  ;;  %v11284_v45 = vpop.f32.mrf.mxu1  ;;  %5110 = vmatmul.mubr.bf16.gmra.mxu1 %v13649_v25  ;;  %5155 = vmatpush2.bf16.msra.mxu0 %v9605_v2  ;;  %v13653_v15 = vld [vmem:[#allocation69_spill] sm:$0xff] }
 0x22d   : > { %13647 = vst [vmem:[#allocation55_spill] sm:$0xff] %v11284_v45  ;;  %5268 = vmatpush2.bf16.msra.mxu1 %v9608_v31  ;;  %v11288_v40 = vpop.f32.mrf.mxu0  ;;  %5156 = vmatprep.subr.bf16.mxu0 %v9613_v60  ;;  %v9617_v25 = vld [vmem:[#allocation14 + $0x928] ss:$16 sps:$4 sm:$0xff]   ;;  %v9625_v60 = vld [vmem:[#allocation14 + $0x90c] ss:$16 sps:$4 sm:$0xff]  }
 0x22e   : > { %13650 = vst [vmem:[#allocation56_spill] sm:$0xff] %v11288_v40  ;;  %v11290_v26 = vpop.f32.mrf.mxu1  ;;  %5269 = vmatprep.subr.bf16.mxu1 %v9616_v20  ;;  %5006 = vmatprep.mubr.bf16.mxu0 %v13652_v19  ;;  %v9620_v2 = vld [vmem:[#allocation14 + $0xb28] ss:$16 sps:$4 sm:$0xff]   ;;  %v9628_v20 = vld [vmem:[#allocation14 + $0xb0c] ss:$16 sps:$4 sm:$0xff]  }
 0x22f   : > { %13651 = vst [vmem:[#allocation57_spill] sm:$0xff] %v11290_v26  ;;  %5119 = vmatprep.mubr.bf16.mxu1 %v13653_v15  ;;  %v11294_v45 = vpop.f32.mrf.mxu0  ;;  %v13659_v15 = vld [vmem:[#allocation70_spill] sm:$0xff] }
 0x230   : > { %13654 = vst [vmem:[#allocation58_spill] sm:$0xff] %v11294_v45  ;;  %v11296_v52 = vpop.f32.mrf.mxu1  ;;  %5157 = vmatpush2.bf16.msra.mxu0 %v9611_v10  ;;  %v13660_v45 = vld [vmem:[#allocation71_spill] sm:$0xff] }
 0x231   : > { %13655 = vst [vmem:[#allocation59_spill] sm:$0xff] %v11296_v52  ;;  %5270 = vmatpush2.bf16.msra.mxu1 %v9614_v43  ;;  %v11298_v31 = vpop.f32.mrf.mxu0  ;;  %5158 = vmatprep.subr.bf16.mxu0 %v9619_v55  ;;  %v9623_v10 = vld [vmem:[#allocation14 + $0x908] ss:$16 sps:$4 sm:$0xff]   ;;  %v9631_v55 = vld [vmem:[#allocation14 + $0xcec] ss:$16 sps:$4 sm:$0xff]  }
 0x232   : > { %v11300_v40 = vpop.f32.mrf.mxu1  ;;  %5271 = vmatprep.subr.bf16.mxu1 %v9622_v47  ;;  %v9626_v43 = vld [vmem:[#allocation14 + $0xb08] ss:$16 sps:$4 sm:$0xff]   ;;  %v9634_v47 = vld [vmem:[#allocation14 + $0xeec] ss:$16 sps:$4 sm:$0xff]  }
 0x233   : > { %13656 = vst [vmem:[#allocation60_spill] sm:$0xff] %v11300_v40  ;;  %v11302_v26 = vpop.f32.mrf.mxu0  ;;  %5007 = vmatmul.mubr.bf16.gmra.mxu0 %v13659_v15  ;;  %v13663_v15 = vld [vmem:[#allocation73_spill] sm:$0xff] }
 0x234   : > { %13657 = vst [vmem:[#allocation61_spill] sm:$0xff] %v11302_v26  ;;  %v11304_v19 = vpop.f32.mrf.mxu1  ;;  %5120 = vmatmul.mubr.bf16.gmra.mxu1 %v13660_v45  ;;  %5159 = vmatpush2.bf16.msra.mxu0 %v9617_v25  ;;  %v13662_v26 = vld [vmem:[#allocation72_spill] sm:$0xff] }
 0x235   : > { %13658 = vst [vmem:[#allocation62_spill] sm:$0xff] %v11304_v19  ;;  %5272 = vmatpush2.bf16.msra.mxu1 %v9620_v2  ;;  %v11308_v52 = vpop.f32.mrf.mxu0  ;;  %5160 = vmatprep.subr.bf16.mxu0 %v9625_v60  ;;  %v4261_v19 = vadd.f32 %v11160_v37, %v11037_v21  ;;  %v4263_v2 = vadd.f32 %v11168_v5, %v11042_v18  ;;  %v9629_v60 = vld [vmem:[#allocation14 + $0xce8] ss:$16 sps:$4 sm:$0xff]  }
 0x236   : > { %v11310_v40 = vpop.f32.mrf.mxu1  ;;  %5273 = vmatprep.subr.bf16.mxu1 %v9628_v20  ;;  %5162 = vmatprep.mubr.bf16.mxu0 %v13662_v26  ;;  %v9632_v20 = vld [vmem:[#allocation14 + $0xee8] ss:$16 sps:$4 sm:$0xff]   ;;  %v9637_v26 = vld [vmem:[#allocation14 + $0xccc] ss:$16 sps:$4 sm:$0xff]  }
 0x237   : > { %13661 = vst [vmem:[#allocation63_spill] sm:$0xff] %v11310_v40  ;;  %5275 = vmatprep.mubr.bf16.mxu1 %v13663_v15  ;;  %v11316_v45 = vpop.f32.mrf.mxu0  ;;  %v4265_v40 = vadd.f32 %v11174_v49, %v11045_v53  ;;  %v9640_v15 = vld [vmem:[#allocation14 + $0xecc] ss:$16 sps:$4 sm:$0xff]   ;;  %v13668_v5 = vld [vmem:[#allocation74_spill] sm:$0xff]  ;;  %v4267_v53 = vadd.f32 %v11178_v23, %v11050_v54  ;;  %v13671_v54 = vld [vmem:[#allocation76_spill] sm:$0xff] }
 0x238   : > { %13664 = vst [vmem:[#allocation64_spill] sm:$0xff] %v11316_v45  ;;  %v11318_v25 = vpop.f32.mrf.mxu1  ;;  %5161 = vmatpush2.bf16.msra.mxu0 %v9623_v10  ;;  %v13669_v10 = vld [vmem:[#allocation75_spill] sm:$0xff]  ;;  %v13672_v23 = vld [vmem:[#allocation77_spill] sm:$0xff] }
 0x239   : > { %13665 = vst [vmem:[#allocation65_spill] sm:$0xff] %v11318_v25  ;;  %5274 = vmatpush2.bf16.msra.mxu1 %v9626_v43  ;;  %v11325_v21 = vpop.f32.mrf.mxu0  ;;  %5356 = vmatprep.subr.bf16.mxu0 %v9631_v55  ;;  %v4374_v25 = vadd.f32 %v11162_v16, %v4261_v19  ;;  %v4376_v43 = vadd.f32 %v11170_v56, %v4263_v2  ;;  %v9635_v55 = vld [vmem:[#allocation14 + $0xcc8] ss:$16 sps:$4 sm:$0xff]  }
 0x23a   : > { %13666 = vst [vmem:[#allocation66_spill] sm:$0xff] %v11325_v21  ;;  %v11327_v37 = vpop.f32.mrf.mxu1  ;;  %5469 = vmatprep.subr.bf16.mxu1 %v9634_v47  ;;  %v9638_v47 = vld [vmem:[#allocation14 + $0xec8] ss:$16 sps:$4 sm:$0xff]   ;;  %v9643_v21 = vld [vmem:[#allocation14 + $0xcac] ss:$16 sps:$4 sm:$0xff]  }
 0x23b   : > { %13667 = vst [vmem:[#allocation67_spill] sm:$0xff] %v11327_v37  ;;  %v4486_v45 = vpop.f32.mrf.mxu0  ;;  %5163 = vmatmul.mubr.bf16.vlgmr.msra.gmra.mxu0 %v13668_v5  ;;  %v4378_v37 = vadd.f32 %v11176_v50, %v4265_v40  ;;  %v9646_v5 = vld [vmem:[#allocation14 + $0xeac] ss:$16 sps:$4 sm:$0xff]  }
 0x23c   : > { %v4599_v18 = vpop.f32.mrf.mxu1  ;;  %5276 = vmatmul.mubr.bf16.vlgmr.msra.gmra.mxu1 %v13669_v10  ;;  %v4487_v49 = vadd.f32 %v4486_v45, %v4374_v25  ;;  %5357 = vmatpush1.bf16.msra.mxu0 %v9629_v60  ;;  %v4271_v10 = vadd.f32 %v11182_v32, %v11053_v39  ;;  %v4273_v45 = vadd.f32 %v11188_v22, %v11058_v11  ;;  %v9641_v60 = vld [vmem:[#allocation14 + $0xca8] ss:$16 sps:$4 sm:$0xff]  }
 0x23d   : > { %5470 = vmatpush1.bf16.msra.mxu1 %v9632_v20  ;;  %v4488_v16 = vpop.f32.mrf.mxu0  ;;  %5358 = vmatprep.subr.bf16.mxu0 %v9637_v26  ;;  %v4380_v25 = vadd.f32 %v11180_v27, %v4267_v53  ;;  %v9644_v20 = vld [vmem:[#allocation14 + $0xea8] ss:$16 sps:$4 sm:$0xff]   ;;  %v4275_v11 = vadd.f32 %v11194_v9, %v11061_v46  ;;  %v9649_v27 = vld [vmem:[#allocation14 + $0xc8c] ss:$16 sps:$4 sm:$0xff]   ;;  %v4277_v9 = vadd.f32 %v11198_v30, %v11066_v24 }
 0x23e   : > { %v4601_v19 = vpop.f32.mrf.mxu1  ;;  %5471 = vmatprep.subr.bf16.mxu1 %v9640_v15  ;;  %v11338_v56 = vadd.f32 %v4599_v18, %v4487_v49  ;;  %v4489_v2 = vadd.f32 %v4488_v16, %v4376_v43  ;;  %5172 = vmatprep.mubr.bf16.mxu0 %v13671_v54  ;;  %v9652_v15 = vld [vmem:[#allocation14 + $0xe8c] ss:$16 sps:$4 sm:$0xff]   ;;  %v4384_v18 = vadd.f32 %v11184_v38, %v4271_v10  ;;  %v9647_v16 = vld [vmem:[#allocation14 + $0xc88] ss:$16 sps:$4 sm:$0xff]  }
 0x23f   : > { %5285 = vmatprep.mubr.bf16.mxu1 %v13672_v23  ;;  %v4490_v50 = vpop.f32.mrf.mxu0  ;;  %v4386_v53 = vadd.f32 %v11190_v4, %v4273_v45  ;;  %v13676_v46 = vld [vmem:[#allocation79_spill] sm:$0xff]  ;;  %v4388_v4 = vadd.f32 %v11196_v1, %v4275_v11  ;;  %v4281_v24 = vadd.f32 %v11202_v6, %v11069_v33  ;;  %v13679_v45 = vld [vmem:[#allocation80_spill] sm:$0xff]  ;;  %v4283_v1 = vadd.f32 %v11208_v59, %v11074_v29 }
 0x240   : > { %13670 = vst [vmem:[#allocation68_spill] sm:$0xff] %v11338_v56  ;;  %v4603_v40 = vpop.f32.mrf.mxu1  ;;  %5587 = vst [vmem:[%s11345_s29] sm:$0xff] %v11338_v56  ;;  %v11349_v39 = vadd.f32 %v4601_v19, %v4489_v2  ;;  %v4491_v32 = vadd.f32 %v4490_v50, %v4378_v37  ;;  %5359 = vmatpush1.bf16.msra.mxu0 %v9635_v55  ;;  %v9650_v19 = vld [vmem:[#allocation14 + $0xe88] ss:$16 sps:$4 sm:$0xff]   ;;  %v9655_v2 = vld [vmem:[#allocation14 + $0xc6c] ss:$16 sps:$4 sm:$0xff]   ;;  %v4285_v11 = vadd.f32 %v11214_v57, %v11077_v7 }
 0x241   : > { %5472 = vmatpush1.bf16.msra.mxu1 %v9638_v47  ;;  %v4492_v22 = vpop.f32.mrf.mxu0  ;;  %5360 = vmatprep.subr.bf16.mxu0 %v9643_v21  ;;  %v13675_v47 = vld [vmem:[#allocation78_spill] sm:$0xff]  ;;  %v9658_v54 = vld [vmem:[#allocation14 + $0xe6c] ss:$16 sps:$4 sm:$0xff]   ;;  %v4287_v57 = vadd.f32 %v11218_v48, %v11082_v8  ;;  %v4291_v8 = vadd.f32 %v11222_v28, %v11085_v62 }
 0x242   : > { %13673 = vst [vmem:[#allocation69_spill] sm:$0xff] %v11349_v39  ;;  %v4605_v26 = vpop.f32.mrf.mxu1  ;;  %5473 = vmatprep.subr.bf16.mxu1 %v9646_v5  ;;  %5588 = vst [vmem:[%s11345_s29 + $0x8] sm:$0xff] %v11349_v39  ;;  %v11356_v43 = vadd.f32 %v4603_v40, %v4491_v32  ;;  %v4493_v37 = vadd.f32 %v4492_v22, %v4380_v25  ;;  %v13680_v50 = vld [vmem:[#allocation81_spill] sm:$0xff]  ;;  %v4390_v32 = vadd.f32 %v11200_v44, %v4277_v9  ;;  %v13684_v7 = vld [vmem:[#allocation83_spill] sm:$0xff] }
 0x243   : > { %v4496_v49 = vpop.f32.mrf.mxu0  ;;  %5173 = vmatmul.mubr.bf16.gmra.mxu0 %v13675_v47  ;;  %v9661_v59 = vld [vmem:[#allocation14 + $0xc4c] ss:$16 sps:$4 sm:$0xff]   ;;  %v9659_v47 = vld [vmem:[#allocation14 + $0xc48] ss:$16 sps:$4 sm:$0xff]  }
 0x244   : > { %13674 = vst [vmem:[#allocation70_spill] sm:$0xff] %v11356_v43  ;;  %v4609_v55 = vpop.f32.mrf.mxu1  ;;  %5286 = vmatmul.mubr.bf16.gmra.mxu1 %v13676_v46  ;;  %5591 = vst [vmem:[%s11345_s29 + $0x20] sm:$0xff] %v11356_v43  ;;  %v11365_v38 = vadd.f32 %v4605_v26, %v4493_v37  ;;  %v4497_v21 = vadd.f32 %v4496_v49, %v4384_v18  ;;  %5361 = vmatpush1.bf16.msra.mxu0 %v9641_v60  ;;  %v9653_v60 = vld [vmem:[#allocation14 + $0xc68] ss:$16 sps:$4 sm:$0xff]   ;;  %v9664_v44 = vld [vmem:[#allocation14 + $0xe4c] ss:$16 sps:$4 sm:$0xff]  }
 0x245   : > { %5474 = vmatpush1.bf16.msra.mxu1 %v9644_v20  ;;  %v4498_v5 = vpop.f32.mrf.mxu0  ;;  %5362 = vmatprep.subr.bf16.mxu0 %v9649_v27  ;;  %v9656_v20 = vld [vmem:[#allocation14 + $0xe68] ss:$16 sps:$4 sm:$0xff]   ;;  %v4394_v26 = vadd.f32 %v11204_v0, %v4281_v24  ;;  %v4396_v18 = vadd.f32 %v11210_v35, %v4283_v1  ;;  %v4398_v35 = vadd.f32 %v11216_v51, %v4285_v11 }
 0x246   : > { %13677 = vst [vmem:[#allocation71_spill] sm:$0xff] %v11365_v38  ;;  %v4611_v10 = vpop.f32.mrf.mxu1  ;;  %5475 = vmatprep.subr.bf16.mxu1 %v9652_v15  ;;  %5592 = vst [vmem:[%s11345_s29 + $0x28] sm:$0xff] %v11365_v38  ;;  %v11372_v30 = vadd.f32 %v4609_v55, %v4497_v21  ;;  %v4499_v23 = vadd.f32 %v4498_v5, %v4386_v53  ;;  %5182 = vmatprep.mubr.bf16.mxu0 %v13679_v45  ;;  %v13683_v49 = vld [vmem:[#allocation82_spill] sm:$0xff]  ;;  %v13687_v5 = vld [vmem:[#allocation84_spill] sm:$0xff] }
 0x247   : > { %5295 = vmatprep.mubr.bf16.mxu1 %v13680_v50  ;;  %v4500_v40 = vpop.f32.mrf.mxu0  ;;  %v9662_v46 = vld [vmem:[#allocation14 + $0xe48] ss:$16 sps:$4 sm:$0xff]   ;;  %v4293_v51 = vadd.f32 %v11228_v41, %v11090_v63  ;;  %v4400_v24 = vadd.f32 %v11220_v13, %v4287_v57  ;;  %v4295_v50 = vadd.f32 %v11234_v14, %v11093_v58  ;;  %v9673_v41 = vld [vmem:[#allocation14 + $0xc0c] ss:$16 sps:$4 sm:$0xff]   ;;  %v4297_v14 = vadd.f32 %v11238_v34, %v11098_v3 }
 0x248   : > { %13678 = vst [vmem:[#allocation72_spill] sm:$0xff] %v11372_v30  ;;  %v4613_v25 = vpop.f32.mrf.mxu1  ;;  %5595 = vst [vmem:[%s11345_s29 + $0x40] sm:$0xff] %v11372_v30  ;;  %v11381_v33 = vadd.f32 %v4611_v10, %v4499_v23  ;;  %v4501_v6 = vadd.f32 %v4500_v40, %v4388_v4  ;;  %5363 = vmatpush1.bf16.msra.mxu0 %v9647_v16  ;;  %v9667_v16 = vld [vmem:[#allocation14 + $0xc2c] ss:$16 sps:$4 sm:$0xff]   ;;  %v9665_v23 = vld [vmem:[#allocation14 + $0xc28] ss:$16 sps:$4 sm:$0xff]   ;;  %v4404_v40 = vadd.f32 %v11224_v36, %v4291_v8 }
 0x249   : > { %5476 = vmatpush1.bf16.msra.mxu1 %v9650_v19  ;;  %v4502_v22 = vpop.f32.mrf.mxu0  ;;  %5364 = vmatprep.subr.bf16.mxu0 %v9655_v2  ;;  %v9670_v19 = vld [vmem:[#allocation14 + $0xe2c] ss:$16 sps:$4 sm:$0xff]   ;;  %v9668_v45 = vld [vmem:[#allocation14 + $0xe28] ss:$16 sps:$4 sm:$0xff]  }
 0x24a   : > { %13681 = vst [vmem:[#allocation73_spill] sm:$0xff] %v11381_v33  ;;  %v4615_v29 = vpop.f32.mrf.mxu1  ;;  %5477 = vmatprep.subr.bf16.mxu1 %v9658_v54  ;;  %5596 = vst [vmem:[%s11345_s29 + $0x48] sm:$0xff] %v11381_v33  ;;  %v11388_v27 = vadd.f32 %v4613_v25, %v4501_v6  ;;  %v4503_v15 = vadd.f32 %v4502_v22, %v4390_v32  ;;  %v13688_v10 = vld [vmem:[#allocation85_spill] sm:$0xff]  ;;  %v4406_v6 = vadd.f32 %v11230_v61, %v4293_v51  ;;  %v13691_v11 = vld [vmem:[#allocation86_spill] sm:$0xff] }
 0x24b   : > { %v4506_v37 = vpop.f32.mrf.mxu0  ;;  %5183 = vmatmul.mubr.bf16.gmra.mxu0 %v13683_v49  ;;  %v9676_v13 = vld [vmem:[#allocation14 + $0xe0c] ss:$16 sps:$4 sm:$0xff]   ;;  %v4408_v61 = vadd.f32 %v11236_v12, %v4295_v50  ;;  %v13696_v49 = vld [vmem:[#allocation88_spill] sm:$0xff]  ;;  %v13698_v12 = vld [vmem:[#allocation142_spill] sm:$0xff] }
 0x24c   : > { %13682 = vst [vmem:[#allocation74_spill] sm:$0xff] %v11388_v27  ;;  %v4619_v53 = vpop.f32.mrf.mxu1  ;;  %5296 = vmatmul.mubr.bf16.gmra.mxu1 %v13684_v7  ;;  %5599 = vst [vmem:[%s11345_s29 + $0x60] sm:$0xff] %v11388_v27  ;;  %v11397_v0 = vadd.f32 %v4615_v29, %v4503_v15  ;;  %v4507_v55 = vadd.f32 %v4506_v37, %v4394_v26  ;;  %5365 = vmatpush1.bf16.msra.mxu0 %v9653_v60  ;;  %v13692_v58 = vld [vmem:[#allocation87_spill] sm:$0xff]  ;;  %v13697_v7 = vld [vmem:[#allocation89_spill] sm:$0xff] }
 0x24d   : > { %5478 = vmatpush1.bf16.msra.mxu1 %v9656_v20  ;;  %v4508_v9 = vpop.f32.mrf.mxu0  ;;  %5366 = vmatprep.subr.bf16.mxu0 %v9661_v59  ;;  %v9671_v29 = vld [vmem:[#allocation14 + $0xc08] ss:$16 sps:$4 sm:$0xff]   ;;  %v9679_v15 = vld [vmem:[#allocation14 + $0xdec] ss:$16 sps:$4 sm:$0xff]  }
 0x24e   : > { %13685 = vst [vmem:[#allocation75_spill] sm:$0xff] %v11397_v0  ;;  %v4621_v21 = vpop.f32.mrf.mxu1  ;;  %5479 = vmatprep.subr.bf16.mxu1 %v9664_v44  ;;  %5600 = vst [vmem:[%s11345_s29 + $0x68] sm:$0xff] %v11397_v0  ;;  %v11404_v48 = vadd.f32 %v4619_v53, %v4507_v55  ;;  %v4509_v4 = vadd.f32 %v4508_v9, %v4396_v18  ;;  %5192 = vmatprep.mubr.bf16.mxu0 %v13687_v5  ;;  %v9674_v59 = vld [vmem:[#allocation14 + $0xe08] ss:$16 sps:$4 sm:$0xff]   ;;  %v9682_v18 = vld [vmem:[#allocation14 + $0xfec] ss:$16 sps:$4 sm:$0xff]  }
 0x24f   : > { %5305 = vmatprep.mubr.bf16.mxu1 %v13688_v10  ;;  %v4510_v2 = vpop.f32.mrf.mxu0  ;;  %v13694_v3 = vld [vmem:[#allocation39_spill] sm:$0xff]  ;;  %v13699_v57 = vld [vmem:[#allocation41_spill] sm:$0xff]  ;;  %v13702_v8 = vld [vmem:[#allocation128_spill] sm:$0xff] }
 0x250   : > { %13686 = vst [vmem:[#allocation76_spill] sm:$0xff] %v11404_v48  ;;  %v4623_v54 = vpop.f32.mrf.mxu1  ;;  %5603 = vst [vmem:[%s11345_s29 + $0x80] sm:$0xff] %v11404_v48  ;;  %v11413_v62 = vadd.f32 %v4621_v21, %v4509_v4  ;;  %v4511_v28 = vadd.f32 %v4510_v2, %v4398_v35  ;;  %5367 = vmatpush1.bf16.msra.mxu0 %v9659_v47  ;;  %v4301_v34 = vadd.f32 %v13694_v3, %v11101_v17  ;;  %v13700_v35 = vld [vmem:[#allocation38_spill] sm:$0xff]  ;;  %v9685_v51 = vld [vmem:[#allocation14 + $0xdcc] ss:$16 sps:$4 sm:$0xff]  }
 0x251   : > { %5480 = vmatpush1.bf16.msra.mxu1 %v9662_v46  ;;  %v4512_v1 = vpop.f32.mrf.mxu0  ;;  %5368 = vmatprep.subr.bf16.mxu0 %v9667_v16  ;;  %v4303_v55 = vadd.f32 %v13699_v57, %v13698_v12  ;;  %v4410_v9 = vadd.f32 %v13700_v35, %v4297_v14  ;;  %v9677_v16 = vld [vmem:[#allocation14 + $0xde8] ss:$16 sps:$4 sm:$0xff]   ;;  %v4305_v4 = vadd.f32 %v11254_v42, %v13702_v8  ;;  %v9688_v2 = vld [vmem:[#allocation14 + $0xfcc] ss:$16 sps:$4 sm:$0xff]  }
 0x252   : > { %13689 = vst [vmem:[#allocation77_spill] sm:$0xff] %v11413_v62  ;;  %v4625_v63 = vpop.f32.mrf.mxu1  ;;  %5481 = vmatprep.subr.bf16.mxu1 %v9670_v19  ;;  %5604 = vst [vmem:[%s11345_s29 + $0x88] sm:$0xff] %v11413_v62  ;;  %v11420_v25 = vadd.f32 %v4623_v54, %v4511_v28  ;;  %v4513_v32 = vadd.f32 %v4512_v1, %v4400_v24  ;;  %v9680_v19 = vld [vmem:[#allocation14 + $0xfe8] ss:$16 sps:$4 sm:$0xff]  }
 0x253   : > { %v4516_v60 = vpop.f32.mrf.mxu0  ;;  %5193 = vmatmul.mubr.bf16.gmra.mxu0 %v13691_v11  ;;  %v13703_v54 = vld [vmem:[#allocation40_spill] sm:$0xff]  ;;  %v13707_v42 = vld [vmem:[#allocation91_spill] sm:$0xff]  ;;  %v13722_v8 = vld [vmem:[#allocation50_spill] sm:$0xff] }
 0x254   : > { %13690 = vst [vmem:[#allocation78_spill] sm:$0xff] %v11420_v25  ;;  %v4629_v20 = vpop.f32.mrf.mxu1  ;;  %5306 = vmatmul.mubr.bf16.gmra.mxu1 %v13692_v58  ;;  %5607 = vst [vmem:[%s11345_s29 + $0xa0] sm:$0xff] %v11420_v25  ;;  %v11429_v36 = vadd.f32 %v4625_v63, %v4513_v32  ;;  %v4517_v22 = vadd.f32 %v4516_v60, %v4404_v40  ;;  %5369 = vmatpush1.bf16.msra.mxu0 %v9665_v23  ;;  %v13709_v40 = vld [vmem:[#allocation44_spill] sm:$0xff]  ;;  %v13711_v58 = vld [vmem:[#allocation43_spill] sm:$0xff] }
 0x255   : > { %5482 = vmatpush1.bf16.msra.mxu1 %v9668_v45  ;;  %v4518_v44 = vpop.f32.mrf.mxu0  ;;  %5370 = vmatprep.subr.bf16.mxu0 %v9673_v41  ;;  %v4414_v24 = vadd.f32 %v13703_v54, %v4301_v34  ;;  %v13705_v45 = vld [vmem:[#allocation42_spill] sm:$0xff]  ;;  %v4418_v14 = vadd.f32 %v13711_v58, %v4305_v4  ;;  %v13715_v34 = vld [vmem:[#allocation92_spill] sm:$0xff]  ;;  %v13723_v54 = vld [vmem:[#allocation47_spill] sm:$0xff] }
 0x256   : > { %13693 = vst [vmem:[#allocation79_spill] sm:$0xff] %v11429_v36  ;;  %v4631_v26 = vpop.f32.mrf.mxu1  ;;  %5483 = vmatprep.subr.bf16.mxu1 %v9676_v13  ;;  %5608 = vst [vmem:[%s11345_s29 + $0xa8] sm:$0xff] %v11429_v36  ;;  %v11436_v37 = vadd.f32 %v4629_v20, %v4517_v22  ;;  %v4519_v53 = vadd.f32 %v4518_v44, %v4406_v6  ;;  %5202 = vmatprep.mubr.bf16.mxu0 %v13696_v49  ;;  %v13706_v41 = vld [vmem:[#allocation90_spill] sm:$0xff]  ;;  %v13708_v13 = vld [vmem:[#allocation129_spill] sm:$0xff] }
 0x257   : > { %5315 = vmatprep.mubr.bf16.mxu1 %v13697_v7  ;;  %v4520_v47 = vpop.f32.mrf.mxu0  ;;  %v4416_v50 = vadd.f32 %v13705_v45, %v4303_v55  ;;  %v4307_v32 = vadd.f32 %v13709_v40, %v13708_v13  ;;  %v9683_v20 = vld [vmem:[#allocation14 + $0xdc8] ss:$16 sps:$4 sm:$0xff]  }
 0x258   : > { %13695 = vst [vmem:[#allocation80_spill] sm:$0xff] %v11436_v37  ;;  %v4633_v46 = vpop.f32.mrf.mxu1  ;;  %5611 = vst [vmem:[%s11345_s29 + $0xc0] sm:$0xff] %v11436_v37  ;;  %v11445_v17 = vadd.f32 %v4631_v26, %v4519_v53  ;;  %v4521_v21 = vadd.f32 %v4520_v47, %v4408_v61  ;;  %5371 = vmatpush1.bf16.msra.mxu0 %v9671_v29  ;;  %v9686_v11 = vld [vmem:[#allocation14 + $0xfc8] ss:$16 sps:$4 sm:$0xff]   ;;  %v9694_v61 = vld [vmem:[#allocation14 + $0xfac] ss:$16 sps:$4 sm:$0xff]  }
 0x259   : > { %5484 = vmatpush1.bf16.msra.mxu1 %v9674_v59  ;;  %v4522_v5 = vpop.f32.mrf.mxu0  ;;  %5372 = vmatprep.subr.bf16.mxu0 %v9679_v15  ;;  %v9691_v59 = vld [vmem:[#allocation14 + $0xdac] ss:$16 sps:$4 sm:$0xff]   ;;  %v13712_v44 = vld [vmem:[#allocation30_spill] sm:$0xff]  ;;  %v13718_v7 = vld [vmem:[#allocation48_spill] sm:$0xff] }
 0x25a   : > { %13701 = vst [vmem:[#allocation81_spill] sm:$0xff] %v11445_v17  ;;  %v4635_v10 = vpop.f32.mrf.mxu1  ;;  %5485 = vmatprep.subr.bf16.mxu1 %v9682_v18  ;;  %5612 = vst [vmem:[%s11345_s29 + $0xc8] sm:$0xff] %v11445_v17  ;;  %v11452_v28 = vadd.f32 %v4633_v46, %v4521_v21  ;;  %v4523_v23 = vadd.f32 %v4522_v5, %v4410_v9  ;;  %v13713_v26 = vld [vmem:[#allocation46_spill] sm:$0xff]  ;;  %v13716_v53 = vld [vmem:[#allocation93_spill] sm:$0xff] }
 0x25b   : > { %v4526_v1 = vpop.f32.mrf.mxu0  ;;  %5203 = vmatmul.mubr.bf16.gmra.mxu0 %v13706_v41  ;;  %v4311_v15 = vadd.f32 %v13713_v26, %v13712_v44  ;;  %v13717_v49 = vld [vmem:[#allocation31_spill] sm:$0xff]  ;;  %v13719_v47 = vld [vmem:[#allocation45_spill] sm:$0xff] }
 0x25c   : > { %13704 = vst [vmem:[#allocation82_spill] sm:$0xff] %v11452_v28  ;;  %v4639_v63 = vpop.f32.mrf.mxu1  ;;  %5316 = vmatmul.mubr.bf16.gmra.mxu1 %v13707_v42  ;;  %5615 = vst [vmem:[%s11345_s29 + $0xe0] sm:$0xff] %v11452_v28  ;;  %v11461_v6 = vadd.f32 %v4635_v10, %v4523_v23  ;;  %v4527_v60 = vadd.f32 %v4526_v1, %v4414_v24  ;;  %5373 = vmatpush2.bf16.msra.mxu0 %v9677_v16  ;;  %v9689_v21 = vld [vmem:[#allocation14 + $0xda8] ss:$16 sps:$4 sm:$0xff]   ;;  %v9703_v44 = vld [vmem:[#allocation14 + $0xd6c] ss:$16 sps:$4 sm:$0xff]  }
 0x25d   : > { %5486 = vmatpush2.bf16.msra.mxu1 %v9680_v19  ;;  %v4528_v22 = vpop.f32.mrf.mxu0  ;;  %5374 = vmatprep.subr.bf16.mxu0 %v9685_v51  ;;  %v4313_v12 = vadd.f32 %v13718_v7, %v13717_v49  ;;  %v4420_v46 = vadd.f32 %v13719_v47, %v4307_v32  ;;  %v9692_v16 = vld [vmem:[#allocation14 + $0xfa8] ss:$16 sps:$4 sm:$0xff]   ;;  %v9697_v51 = vld [vmem:[#allocation14 + $0xd8c] ss:$16 sps:$4 sm:$0xff]   ;;  %v4424_v24 = vadd.f32 %v13723_v54, %v4311_v15 }
 0x25e   : > { %13710 = vst [vmem:[#allocation83_spill] sm:$0xff] %v11461_v6  ;;  %v4641_v29 = vpop.f32.mrf.mxu1  ;;  %5487 = vmatprep.subr.bf16.mxu1 %v9688_v2  ;;  %5616 = vst [vmem:[%s11345_s29 + $0xe8] sm:$0xff] %v11461_v6  ;;  %v11468_v18 = vadd.f32 %v4639_v63, %v4527_v60  ;;  %v4529_v3 = vadd.f32 %v4528_v22, %v4416_v50  ;;  %5212 = vmatprep.mubr.bf16.mxu0 %v13715_v34  ;;  %v13721_v19 = vld [vmem:[#allocation132_spill] sm:$0xff]  ;;  %v9700_v2 = vld [vmem:[#allocation14 + $0xf8c] ss:$16 sps:$4 sm:$0xff]  }
 0x25f   : > { %5325 = vmatprep.mubr.bf16.mxu1 %v13716_v53  ;;  %v4530_v57 = vpop.f32.mrf.mxu0  ;;  %v4315_v4 = vadd.f32 %v13722_v8, %v13721_v19  ;;  %v13725_v50 = vld [vmem:[#allocation49_spill] sm:$0xff]  ;;  %v13726_v42 = vld [vmem:[#allocation94_spill] sm:$0xff]  ;;  %v13727_v13 = vld [vmem:[#allocation95_spill] sm:$0xff] }
 0x260   : > { %13714 = vst [vmem:[#allocation84_spill] sm:$0xff] %v11468_v18  ;;  %v4643_v55 = vpop.f32.mrf.mxu1  ;;  %5619 = vst [vmem:[%s11345_s29 + $0x100] sm:$0xff] %v11468_v18  ;;  %v11477_v35 = vadd.f32 %v4641_v29, %v4529_v3  ;;  %v4531_v9 = vadd.f32 %v4530_v57, %v4418_v14  ;;  %5375 = vmatpush2.bf16.msra.mxu0 %v9683_v20  ;;  %v4426_v1 = vadd.f32 %v13725_v50, %v4313_v12  ;;  %v13728_v40 = vld [vmem:[#allocation133_spill] sm:$0xff]  ;;  %v13729_v32 = vld [vmem:[#allocation52_spill] sm:$0xff] }
 0x261   : > { %5488 = vmatpush2.bf16.msra.mxu1 %v9686_v11  ;;  %v4532_v5 = vpop.f32.mrf.mxu0  ;;  %5376 = vmatprep.subr.bf16.mxu0 %v9691_v59  ;;  %v4317_v60 = vadd.f32 %v13729_v32, %v13728_v40  ;;  %v9695_v58 = vld [vmem:[#allocation14 + $0xd88] ss:$16 sps:$4 sm:$0xff]   ;;  %v9706_v26 = vld [vmem:[#allocation14 + $0xf6c] ss:$16 sps:$4 sm:$0xff]  }
 0x262   : > { %13720 = vst [vmem:[#allocation85_spill] sm:$0xff] %v11477_v35  ;;  %v4645_v10 = vpop.f32.mrf.mxu1  ;;  %5489 = vmatprep.subr.bf16.mxu1 %v9694_v61  ;;  %5620 = vst [vmem:[%s11345_s29 + $0x108] sm:$0xff] %v11477_v35  ;;  %v11484_v23 = vadd.f32 %v4643_v55, %v4531_v9  ;;  %v4533_v45 = vadd.f32 %v4532_v5, %v4420_v46  ;;  %v9698_v14 = vld [vmem:[#allocation14 + $0xf88] ss:$16 sps:$4 sm:$0xff]   ;;  %v9712_v50 = vld [vmem:[#allocation14 + $0xf4c] ss:$16 sps:$4 sm:$0xff]  }
 0x263   : > { %v4536_v63 = vpop.f32.mrf.mxu0  ;;  %5213 = vmatmul.mubr.bf16.gmra.mxu0 %v13726_v42  ;;  %v13731_v22 = vld [vmem:[#allocation51_spill] sm:$0xff]  ;;  %v13732_v15 = vld [vmem:[#allocation32_spill] sm:$0xff]  ;;  %v13733_v3 = vld [vmem:[#allocation54_spill] sm:$0xff] }
 0x264   : > { %13724 = vst [vmem:[#allocation86_spill] sm:$0xff] %v11484_v23  ;;  %v4649_v41 = vpop.f32.mrf.mxu1  ;;  %5326 = vmatmul.mubr.bf16.gmra.mxu1 %v13727_v13  ;;  %5623 = vst [vmem:[%s11345_s29 + $0x120] sm:$0xff] %v11484_v23  ;;  %v11493_v20 = vadd.f32 %v4645_v10, %v4533_v45  ;;  %v4537_v11 = vadd.f32 %v4536_v63, %v4424_v24  ;;  %5377 = vmatpush2.bf16.msra.mxu0 %v9689_v21  ;;  %v13735_v7 = vld [vmem:[#allocation96_spill] sm:$0xff]  ;;  %v13736_v12 = vld [vmem:[#allocation97_spill] sm:$0xff] }
 0x265   : > { %5490 = vmatpush2.bf16.msra.mxu1 %v9692_v16  ;;  %v4428_v29 = vadd.f32 %v13731_v22, %v4315_v4  ;;  %v4538_v59 = vpop.f32.mrf.mxu0  ;;  %5378 = vmatprep.subr.bf16.mxu0 %v9697_v51  ;;  %v4321_v34 = vadd.f32 %v13733_v3, %v13732_v15  ;;  %v13737_v57 = vld [vmem:[#allocation33_spill] sm:$0xff]  ;;  %v13738_v55 = vld [vmem:[#allocation56_spill] sm:$0xff]  ;;  %v13742_v51 = vld [vmem:[#allocation58_spill] sm:$0xff] }
 0x266   : > { %13730 = vst [vmem:[#allocation87_spill] sm:$0xff] %v11493_v20  ;;  %v4651_v61 = vpop.f32.mrf.mxu1  ;;  %5491 = vmatprep.subr.bf16.mxu1 %v9700_v2  ;;  %5624 = vst [vmem:[%s11345_s29 + $0x128] sm:$0xff] %v11493_v20  ;;  %v11500_v53 = vadd.f32 %v4649_v41, %v4537_v11  ;;  %v4539_v49 = vadd.f32 %v4538_v59, %v4426_v1  ;;  %5222 = vmatprep.mubr.bf16.mxu0 %v13735_v7  ;;  %v13739_v21 = vld [vmem:[#allocation53_spill] sm:$0xff]  ;;  %v13741_v10 = vld [vmem:[#allocation136_spill] sm:$0xff] }
 0x267   : > { %5335 = vmatprep.mubr.bf16.mxu1 %v13736_v12  ;;  %v4323_v47 = vadd.f32 %v13738_v55, %v13737_v57  ;;  %v4540_v46 = vpop.f32.mrf.mxu0  ;;  %v4430_v16 = vadd.f32 %v13739_v21, %v4317_v60  ;;  %v9701_v4 = vld [vmem:[#allocation14 + $0xd68] ss:$16 sps:$4 sm:$0xff]   ;;  %v4325_v2 = vadd.f32 %v13742_v51, %v13741_v10  ;;  %v9709_v45 = vld [vmem:[#allocation14 + $0xd4c] ss:$16 sps:$4 sm:$0xff]  }
 0x268   : > { %13734 = vst [vmem:[#allocation39_spill] sm:$0xff] %v11500_v53  ;;  %v4653_v9 = vpop.f32.mrf.mxu1  ;;  %5627 = vst [vmem:[%s11345_s29 + $0x140] sm:$0xff] %v11500_v53  ;;  %v11509_v19 = vadd.f32 %v4651_v61, %v4539_v49  ;;  %v4541_v8 = vadd.f32 %v4540_v46, %v4428_v29  ;;  %5379 = vmatpush2.bf16.msra.mxu0 %v9695_v58  ;;  %v9704_v5 = vld [vmem:[#allocation14 + $0xf68] ss:$16 sps:$4 sm:$0xff]   ;;  %v9715_v49 = vld [vmem:[#allocation14 + $0xd2c] ss:$16 sps:$4 sm:$0xff]  }
 0x269   : > { %5492 = vmatpush2.bf16.msra.mxu1 %v9698_v14  ;;  %v4542_v54 = vpop.f32.mrf.mxu0  ;;  %5380 = vmatprep.subr.bf16.mxu0 %v9703_v44  ;;  %v13743_v1 = vld [vmem:[#allocation55_spill] sm:$0xff]  ;;  %v13745_v13 = vld [vmem:[#allocation57_spill] sm:$0xff]  ;;  %v13746_v11 = vld [vmem:[#allocation98_spill] sm:$0xff] }
 0x26a   : > { %13740 = vst [vmem:[#allocation88_spill] sm:$0xff] %v11509_v19  ;;  %v4655_v24 = vpop.f32.mrf.mxu1  ;;  %5493 = vmatprep.subr.bf16.mxu1 %v9706_v26  ;;  %v4434_v63 = vadd.f32 %v13743_v1, %v4321_v34  ;;  %5628 = vst [vmem:[%s11345_s29 + $0x148] sm:$0xff] %v11509_v19  ;;  %v11516_v41 = vadd.f32 %v4653_v9, %v4541_v8  ;;  %v4543_v42 = vadd.f32 %v4542_v54, %v4430_v16  ;;  %v13747_v58 = vld [vmem:[#allocation99_spill] sm:$0xff]  ;;  %v13748_v14 = vld [vmem:[#allocation34_spill] sm:$0xff] }
 0x26b   : > { %v4436_v40 = vadd.f32 %v13745_v13, %v4323_v47  ;;  %v4546_v32 = vpop.f32.mrf.mxu0  ;;  %5223 = vmatmul.mubr.bf16.gmra.mxu0 %v13746_v11  ;;  %v4327_v22 = vadd.f32 %v11298_v31, %v13748_v14  ;;  %v9707_v61 = vld [vmem:[#allocation14 + $0xd48] ss:$16 sps:$4 sm:$0xff]   ;;  %v9718_v7 = vld [vmem:[#allocation14 + $0xf2c] ss:$16 sps:$4 sm:$0xff]  }
 0x26c   : > { %13744 = vst [vmem:[#allocation89_spill] sm:$0xff] %v11516_v41  ;;  %v4659_v60 = vpop.f32.mrf.mxu1  ;;  %5336 = vmatmul.mubr.bf16.gmra.mxu1 %v13747_v58  ;;  %5631 = vst [vmem:[%s11345_s29 + $0x160] sm:$0xff] %v11516_v41  ;;  %v11525_v29 = vadd.f32 %v4655_v24, %v4543_v42  ;;  %v4547_v59 = vadd.f32 %v4546_v32, %v4434_v63  ;;  %5381 = vmatpush2.bf16.msra.mxu0 %v9701_v4  ;;  %v9710_v44 = vld [vmem:[#allocation14 + $0xf48] ss:$16 sps:$4 sm:$0xff]   ;;  %v9724_v1 = vld [vmem:[#allocation14 + $0xf0c] ss:$16 sps:$4 sm:$0xff]  }
 0x26d   : > { %5494 = vmatpush2.bf16.msra.mxu1 %v9704_v5  ;;  %v13750_v26 = vld [vmem:[#allocation59_spill] sm:$0xff]  ;;  %v4548_v3 = vpop.f32.mrf.mxu0  ;;  %5382 = vmatprep.subr.bf16.mxu0 %v9709_v45  ;;  %v13752_v12 = vld [vmem:[#allocation61_spill] sm:$0xff]  ;;  %v13754_v46 = vld [vmem:[#allocation100_spill] sm:$0xff] }
 0x26e   : > { %13749 = vst [vmem:[#allocation142_spill] sm:$0xff] %v11525_v29  ;;  %v4438_v15 = vadd.f32 %v13750_v26, %v4325_v2  ;;  %v4661_v34 = vpop.f32.mrf.mxu1  ;;  %5495 = vmatprep.subr.bf16.mxu1 %v9712_v50  ;;  %v13751_v31 = vld [vmem:[#allocation35_spill] sm:$0xff]  ;;  %5632 = vst [vmem:[%s11345_s29 + $0x168] sm:$0xff] %v11525_v29  ;;  %v11532_v55 = vadd.f32 %v4659_v60, %v4547_v59  ;;  %v4549_v47 = vadd.f32 %v4548_v3, %v4436_v40  ;;  %v13755_v9 = vld [vmem:[#allocation101_spill] sm:$0xff] }
 0x26f   : > { %v4331_v57 = vadd.f32 %v13752_v12, %v13751_v31  ;;  %5232 = vmatprep.mubr.bf16.mxu0 %v13754_v46  ;;  %5345 = vmatprep.mubr.bf16.mxu1 %v13755_v9  ;;  %v13756_v21 = vld [vmem:[#allocation139_spill] sm:$0xff]  ;;  %v4550_v8 = vpop.f32.mrf.mxu0  ;;  %v13757_v5 = vld [vmem:[#allocation60_spill] sm:$0xff]  ;;  %v13759_v63 = vld [vmem:[#allocation62_spill] sm:$0xff] }
 0x270   : > { %13753 = vst [vmem:[#allocation41_spill] sm:$0xff] %v11532_v55  ;;  %v4333_v16 = vadd.f32 %v11308_v52, %v13756_v21  ;;  %v4663_v4 = vpop.f32.mrf.mxu1  ;;  %v4440_v10 = vadd.f32 %v13757_v5, %v4327_v22  ;;  %5635 = vst [vmem:[%s11345_s29 + $0x180] sm:$0xff] %v11532_v55  ;;  %v11541_v51 = vadd.f32 %v4661_v34, %v4549_v47  ;;  %5383 = vmatpush2.bf16.msra.mxu0 %v9707_v61  ;;  %v9713_v54 = vld [vmem:[#allocation14 + $0xd28] ss:$16 sps:$4 sm:$0xff]   ;;  %v9721_v52 = vld [vmem:[#allocation14 + $0xd0c] ss:$16 sps:$4 sm:$0xff]  }
 0x271   : > { %v4551_v2 = vadd.f32 %v4550_v8, %v4438_v15  ;;  %5496 = vmatpush2.bf16.msra.mxu1 %v9710_v44  ;;  %v9716_v24 = vld [vmem:[#allocation14 + $0xf28] ss:$16 sps:$4 sm:$0xff]   ;;  %v4552_v45 = vpop.f32.mrf.mxu0  ;;  %5384 = vmatprep.subr.bf16.mxu0 %v9715_v49  ;;  %v4444_v42 = vadd.f32 %v13759_v63, %v4331_v57 }
 0x272   : > { %13758 = vst [vmem:[#allocation38_spill] sm:$0xff] %v11541_v51  ;;  %v4665_v50 = vpop.f32.mrf.mxu1  ;;  %5497 = vmatprep.subr.bf16.mxu1 %v9718_v7  ;;  %v13760_v13 = vld [vmem:[#allocation36_spill] sm:$0xff]  ;;  %5636 = vst [vmem:[%s11345_s29 + $0x188] sm:$0xff] %v11541_v51  ;;  %v4553_v11 = vadd.f32 %v4552_v45, %v4440_v10  ;;  %v13763_v58 = vld [vmem:[#allocation63_spill] sm:$0xff] }
 0x273   : > { %v13761_v40 = vld [vmem:[#allocation64_spill] sm:$0xff]  ;;  %v11548_v60 = vadd.f32 %v4663_v4, %v4551_v2  ;;  %v4446_v14 = vadd.f32 %v13763_v58, %v4333_v16  ;;  %v4556_v22 = vpop.f32.mrf.mxu0  ;;  %v13764_v61 = vld [vmem:[#allocation102_spill] sm:$0xff]  ;;  %v13765_v44 = vld [vmem:[#allocation103_spill] sm:$0xff] }
 0x274   : > { %v4335_v32 = vadd.f32 %v13761_v40, %v13760_v13  ;;  %v4669_v59 = vpop.f32.mrf.mxu1  ;;  %5233 = vmatmul.mubr.bf16.gmra.mxu0 %v13764_v61  ;;  %5346 = vmatmul.mubr.bf16.gmra.mxu1 %v13765_v44  ;;  %v13766_v26 = vld [vmem:[#allocation37_spill] sm:$0xff]  ;;  %v13767_v15 = vld [vmem:[#allocation66_spill] sm:$0xff]  ;;  %v11557_v34 = vadd.f32 %v4665_v50, %v4553_v11  ;;  %v4557_v49 = vadd.f32 %v4556_v22, %v4444_v42  ;;  %v13771_v16 = vld [vmem:[#allocation104_spill] sm:$0xff] }
 0x275   : > { %13762 = vst [vmem:[#allocation128_spill] sm:$0xff] %v11548_v60  ;;  %v4337_v3 = vadd.f32 %v13767_v15, %v13766_v26  ;;  %5639 = vst [vmem:[%s11345_s29 + $0x1a0] sm:$0xff] %v11548_v60  ;;  %5385 = vmatpush2.bf16.msra.mxu0 %v9713_v54  ;;  %5498 = vmatpush2.bf16.msra.mxu1 %v9716_v24  ;;  %v9719_v7 = vld [vmem:[#allocation14 + $0xd08] ss:$16 sps:$4 sm:$0xff]   ;;  %v4558_v12 = vpop.f32.mrf.mxu0 }
 0x276   : > { %13768 = vst [vmem:[#allocation40_spill] sm:$0xff] %v11557_v34  ;;  %v9722_v31 = vld [vmem:[#allocation14 + $0xf08] ss:$16 sps:$4 sm:$0xff]   ;;  %v4671_v57 = vpop.f32.mrf.mxu1  ;;  %5386 = vmatprep.subr.bf16.mxu0 %v9721_v52  ;;  %5499 = vmatprep.subr.bf16.mxu1 %v9724_v1  ;;  %5640 = vst [vmem:[%s11345_s29 + $0x1a8] sm:$0xff] %v11557_v34  ;;  %v11562_v9 = vadd.f32 %v4669_v59, %v4557_v49  ;;  %v4559_v21 = vadd.f32 %v4558_v12, %v4446_v14 }
 0x277   : > { %v13769_v47 = vld [vmem:[#allocation65_spill] sm:$0xff]  ;;  %5388 = vmatprep.mubr.bf16.mxu0 %v13771_v16  ;;  %v4560_v4 = vpop.f32.mrf.mxu0  ;;  %v13773_v10 = vld [vmem:[#allocation67_spill] sm:$0xff]  ;;  %v13776_v13 = vld [vmem:[#allocation106_spill] sm:$0xff] }
 0x278   : > { %v4448_v46 = vadd.f32 %v13769_v47, %v4335_v32  ;;  %13770 = vst [vmem:[#allocation42_spill] sm:$0xff] %v11562_v9  ;;  %v13772_v8 = vld [vmem:[#allocation105_spill] sm:$0xff]  ;;  %v4673_v5 = vpop.f32.mrf.mxu1  ;;  %v4450_v2 = vadd.f32 %v13773_v10, %v4337_v3  ;;  %5643 = vst [vmem:[%s11345_s29 + $0x1c0] sm:$0xff] %v11562_v9  ;;  %v11569_v54 = vadd.f32 %v4671_v57, %v4559_v21  ;;  %v13777_v40 = vld [vmem:[#allocation107_spill] sm:$0xff] }
 0x279   : > { %5501 = vmatprep.mubr.bf16.mxu1 %v13772_v8  ;;  %5387 = vmatpush2.bf16.msra.mxu0 %v9719_v7  ;;  %v4562_v45 = vpop.f32.mrf.mxu0  ;;  %v13779_v58 = vld [vmem:[#allocation108_spill] sm:$0xff]  ;;  %v13780_v14 = vld [vmem:[#allocation109_spill] sm:$0xff]  ;;  %v13781_v57 = vld [vmem:[#allocation110_spill] sm:$0xff] }
 0x27a   : > { %13774 = vst [vmem:[#allocation90_spill] sm:$0xff] %v11569_v54  ;;  %v4561_v24 = vadd.f32 %v4560_v4, %v4448_v46  ;;  %5500 = vmatpush2.bf16.msra.mxu1 %v9722_v31  ;;  %v4675_v50 = vpop.f32.mrf.mxu1  ;;  %5644 = vst [vmem:[%s11345_s29 + $0x1c8] sm:$0xff] %v11569_v54  ;;  %v4563_v1 = vadd.f32 %v4562_v45, %v4450_v2  ;;  %v13782_v47 = vld [vmem:[#allocation111_spill] sm:$0xff]  ;;  %v13783_v21 = vld [vmem:[#allocation112_spill] sm:$0xff] }
 0x27b   : > { %v4712_v63 = vpop.f32.mrf.mxu0  ;;  %v13784_v16 = vld [vmem:[#allocation113_spill] sm:$0xff] }
 0x27c   : > { %v11573_v52 = vadd.f32 %v4673_v5, %v4561_v24  ;;  %v4825_v42 = vpop.f32.mrf.mxu1  ;;  %5389 = vmatmul.mubr.bf16.vlgmr.msra.gmra.mxu0 %v13776_v13  ;;  %v11579_v32 = vadd.f32 %v4675_v50, %v4563_v1  ;;  %v13785_v13 = vld [vmem:[#allocation114_spill] sm:$0xff] }
 0x27d   : > { %5502 = vmatmul.mubr.bf16.vlgmr.msra.gmra.mxu1 %v13777_v40  ;;  %v11581_v11 = vadd.f32 %v4825_v42, %v4712_v63  ;;  %5398 = vmatprep.mubr.bf16.mxu0 %v13779_v58  ;;  %v4714_v22 = vpop.f32.mrf.mxu0  ;;  %v13786_v40 = vld [vmem:[#allocation115_spill] sm:$0xff] }
 0x27e   : > { %13775 = vst [vmem:[#allocation91_spill] sm:$0xff] %v11573_v52  ;;  %5647 = vst [vmem:[%s11345_s29 + $0x1e0] sm:$0xff] %v11573_v52  ;;  %5511 = vmatprep.mubr.bf16.mxu1 %v13780_v14  ;;  %v4827_v59 = vpop.f32.mrf.mxu1  ;;  %v13787_v14 = vld [vmem:[#allocation116_spill] sm:$0xff] }
 0x27f   : > { %13778 = vst [vmem:[#allocation129_spill] sm:$0xff] %v11579_v32  ;;  %5648 = vst [vmem:[%s11345_s29 + $0x1e8] sm:$0xff] %v11579_v32  ;;  %v11587_v61 = vadd.f32 %v4827_v59, %v4714_v22  ;;  %v4716_v44 = vpop.f32.mrf.mxu0  ;;  %v13788_v22 = vld [vmem:[#allocation117_spill] sm:$0xff] }
 0x280   : > { %v4829_v26 = vpop.f32.mrf.mxu1 }
 0x281   : > { %v11589_v15 = vadd.f32 %v4829_v26, %v4716_v44  ;;  %v4718_v3 = vpop.f32.mrf.mxu0 }
 0x282   : > { %v4831_v49 = vpop.f32.mrf.mxu1 }
 0x283   : > { %v11591_v7 = vadd.f32 %v4831_v49, %v4718_v3  ;;  %v4722_v31 = vpop.f32.mrf.mxu0 }
 0x284   : > { %v4835_v12 = vpop.f32.mrf.mxu1  ;;  %5399 = vmatmul.mubr.bf16.gmra.mxu0 %v13781_v57 }
 0x285   : > { %5512 = vmatmul.mubr.bf16.gmra.mxu1 %v13782_v47  ;;  %v11595_v46 = vadd.f32 %v4835_v12, %v4722_v31  ;;  %5408 = vmatprep.mubr.bf16.mxu0 %v13783_v21  ;;  %v4724_v8 = vpop.f32.mrf.mxu0 }
 0x286   : > { %5521 = vmatprep.mubr.bf16.mxu1 %v13784_v16  ;;  %v4837_v4 = vpop.f32.mrf.mxu1 }
 0x287   : > { %v11599_v5 = vadd.f32 %v4837_v4, %v4724_v8  ;;  %v4726_v10 = vpop.f32.mrf.mxu0  ;;  %v13789_v8 = vld [vmem:[#allocation118_spill] sm:$0xff]  ;;  %v13790_v4 = vld [vmem:[#allocation119_spill] sm:$0xff] }
 0x288   : > { %v4839_v2 = vpop.f32.mrf.mxu1 }
 0x289   : > { %v11601_v24 = vadd.f32 %v4839_v2, %v4726_v10  ;;  %v4728_v45 = vpop.f32.mrf.mxu0  ;;  %v13791_v2 = vld [vmem:[#allocation120_spill] sm:$0xff] }
 0x28a   : > { %v4841_v50 = vpop.f32.mrf.mxu1 }
 0x28b   : > { %v11603_v1 = vadd.f32 %v4841_v50, %v4728_v45  ;;  %v4732_v63 = vpop.f32.mrf.mxu0  ;;  %v13792_v45 = vld [vmem:[#allocation121_spill] sm:$0xff] }
 0x28c   : > { %v4845_v42 = vpop.f32.mrf.mxu1  ;;  %5409 = vmatmul.mubr.bf16.gmra.mxu0 %v13785_v13 }
 0x28d   : > { %5522 = vmatmul.mubr.bf16.gmra.mxu1 %v13786_v40  ;;  %v11607_v58 = vadd.f32 %v4845_v42, %v4732_v63  ;;  %5418 = vmatprep.mubr.bf16.mxu0 %v13787_v14  ;;  %v4734_v59 = vpop.f32.mrf.mxu0 }
 0x28e   : > { %5531 = vmatprep.mubr.bf16.mxu1 %v13788_v22  ;;  %v4847_v44 = vpop.f32.mrf.mxu1 }
 0x28f   : > { %v11611_v26 = vadd.f32 %v4847_v44, %v4734_v59  ;;  %v4736_v3 = vpop.f32.mrf.mxu0 }
 0x290   : > { %v4849_v49 = vpop.f32.mrf.mxu1 }
 0x291   : > { %v11613_v31 = vadd.f32 %v4849_v49, %v4736_v3  ;;  %v4738_v12 = vpop.f32.mrf.mxu0 }
 0x292   : > { %v4851_v57 = vpop.f32.mrf.mxu1 }
 0x293   : > { %v11615_v47 = vadd.f32 %v4851_v57, %v4738_v12  ;;  %v4742_v21 = vpop.f32.mrf.mxu0  ;;  %v13793_v12 = vld [vmem:[#allocation122_spill] sm:$0xff]  ;;  %v13794_v57 = vld [vmem:[#allocation123_spill] sm:$0xff] }
 0x294   : > { %v4855_v16 = vpop.f32.mrf.mxu1  ;;  %5419 = vmatmul.mubr.bf16.gmra.mxu0 %v13789_v8  ;;  %v13796_v8 = vld [vmem:[#allocation125_spill] sm:$0xff] }
 0x295   : > { %5532 = vmatmul.mubr.bf16.gmra.mxu1 %v13790_v4  ;;  %v11619_v10 = vadd.f32 %v4855_v16, %v4742_v21  ;;  %5428 = vmatprep.mubr.bf16.mxu0 %v13791_v2  ;;  %v4744_v50 = vpop.f32.mrf.mxu0  ;;  %v13795_v16 = vld [vmem:[#allocation124_spill] sm:$0xff] }
 0x296   : > { %5541 = vmatprep.mubr.bf16.mxu1 %v13792_v45  ;;  %v4857_v63 = vpop.f32.mrf.mxu1 }
 0x297   : > { %v11623_v42 = vadd.f32 %v4857_v63, %v4744_v50  ;;  %v4746_v13 = vpop.f32.mrf.mxu0 }
 0x298   : > { %v4859_v40 = vpop.f32.mrf.mxu1 }
 0x299   : > { %v11625_v14 = vadd.f32 %v4859_v40, %v4746_v13  ;;  %v4748_v22 = vpop.f32.mrf.mxu0 }
 0x29a   : > { %v4861_v59 = vpop.f32.mrf.mxu1 }
 0x29b   : > { %v11627_v44 = vadd.f32 %v4861_v59, %v4748_v22  ;;  %v4752_v3 = vpop.f32.mrf.mxu0 }
 0x29c   : > { %v4865_v49 = vpop.f32.mrf.mxu1  ;;  %5429 = vmatmul.mubr.bf16.gmra.mxu0 %v13793_v12 }
 0x29d   : > { %5542 = vmatmul.mubr.bf16.gmra.mxu1 %v13794_v57  ;;  %v11631_v21 = vadd.f32 %v4865_v49, %v4752_v3  ;;  %5438 = vmatprep.mubr.bf16.mxu0 %v13795_v16  ;;  %v4754_v4 = vpop.f32.mrf.mxu0  ;;  %v13797_v3 = vld [vmem:[#allocation126_spill] sm:$0xff]  ;;  %v13798_v49 = vld [vmem:[#allocation127_spill] sm:$0xff] }
 0x29e   : > { %5551 = vmatprep.mubr.bf16.mxu1 %v13796_v8  ;;  %v4867_v2 = vpop.f32.mrf.mxu1  ;;  %v13799_v8 = vld [vmem:[#allocation130_spill] sm:$0xff] }
 0x29f   : > { %v11635_v45 = vadd.f32 %v4867_v2, %v4754_v4  ;;  %v4756_v50 = vpop.f32.mrf.mxu0  ;;  %v13800_v4 = vld [vmem:[#allocation131_spill] sm:$0xff] }
 0x2a0   : > { %v4869_v63 = vpop.f32.mrf.mxu1 }
 0x2a1   : > { %v11637_v13 = vadd.f32 %v4869_v63, %v4756_v50  ;;  %v4758_v40 = vpop.f32.mrf.mxu0 }
 0x2a2   : > { %v4871_v22 = vpop.f32.mrf.mxu1 }
 0x2a3   : > { %v11639_v59 = vadd.f32 %v4871_v22, %v4758_v40  ;;  %v4762_v12 = vpop.f32.mrf.mxu0 }
 0x2a4   : > { %v4875_v57 = vpop.f32.mrf.mxu1  ;;  %5439 = vmatmul.mubr.bf16.gmra.mxu0 %v13797_v3 }
 0x2a5   : > { %5552 = vmatmul.mubr.bf16.gmra.mxu1 %v13798_v49  ;;  %v11643_v16 = vadd.f32 %v4875_v57, %v4762_v12  ;;  %5448 = vmatprep.mubr.bf16.mxu0 %v13799_v8  ;;  %v4764_v2 = vpop.f32.mrf.mxu0  ;;  %v13801_v12 = vld [vmem:[#allocation134_spill] sm:$0xff]  ;;  %v13802_v57 = vld [vmem:[#allocation135_spill] sm:$0xff] }
 0x2a6   : > { %5561 = vmatprep.mubr.bf16.mxu1 %v13800_v4  ;;  %v4877_v32 = vpop.f32.mrf.mxu1  ;;  %v13803_v4 = vld [vmem:[#allocation137_spill] sm:$0xff] }
 0x2a7   : > { %v11647_v50 = vadd.f32 %v4877_v32, %v4764_v2  ;;  %v4766_v63 = vpop.f32.mrf.mxu0  ;;  %v13804_v32 = vld [vmem:[#allocation138_spill] sm:$0xff] }
 0x2a8   : > { %v4879_v52 = vpop.f32.mrf.mxu1 }
 0x2a9   : > { %v11649_v40 = vadd.f32 %v4879_v52, %v4766_v63  ;;  %v4768_v22 = vpop.f32.mrf.mxu0 }
 0x2aa   : > { %v4881_v54 = vpop.f32.mrf.mxu1 }
 0x2ab   : > { %v11651_v9 = vadd.f32 %v4881_v54, %v4768_v22  ;;  %v4772_v3 = vpop.f32.mrf.mxu0 }
 0x2ac   : > { %v4885_v49 = vpop.f32.mrf.mxu1  ;;  %5449 = vmatmul.mubr.bf16.gmra.mxu0 %v13801_v12 }
 0x2ad   : > { %5562 = vmatmul.mubr.bf16.gmra.mxu1 %v13802_v57  ;;  %v11655_v8 = vadd.f32 %v4885_v49, %v4772_v3  ;;  %5458 = vmatprep.mubr.bf16.mxu0 %v13803_v4  ;;  %v4774_v2 = vpop.f32.mrf.mxu0  ;;  %v13805_v3 = vld [vmem:[#allocation140_spill] sm:$0xff]  ;;  %v13806_v49 = vld [vmem:[#allocation141_spill] sm:$0xff] }
 0x2ae   : > { %5571 = vmatprep.mubr.bf16.mxu1 %v13804_v32  ;;  %v4887_v34 = vpop.f32.mrf.mxu1 }
 0x2af   : > { %v11659_v52 = vadd.f32 %v4887_v34, %v4774_v2  ;;  %v4776_v63 = vpop.f32.mrf.mxu0 }
 0x2b0   : > { %v4889_v60 = vpop.f32.mrf.mxu1 }
 0x2b1   : > { %v11661_v54 = vadd.f32 %v4889_v60, %v4776_v63  ;;  %v4778_v22 = vpop.f32.mrf.mxu0 }
 0x2b2   : > { %v4891_v51 = vpop.f32.mrf.mxu1 }
 0x2b3   : > { %v11663_v55 = vadd.f32 %v4891_v51, %v4778_v22  ;;  %v4782_v12 = vpop.f32.mrf.mxu0 }
 0x2b4   : > { %v4895_v57 = vpop.f32.mrf.mxu1  ;;  %5459 = vmatmul.mubr.bf16.gmra.mxu0 %v13805_v3 }
 0x2b5   : > { %5572 = vmatmul.mubr.bf16.gmra.mxu1 %v13806_v49  ;;  %v11667_v4 = vadd.f32 %v4895_v57, %v4782_v12  ;;  %v4784_v32 = vpop.f32.mrf.mxu0 }
 0x2b6   : > { %v4897_v29 = vpop.f32.mrf.mxu1 }
 0x2b7   : > { %v11669_v34 = vadd.f32 %v4897_v29, %v4784_v32  ;;  %v4786_v2 = vpop.f32.mrf.mxu0 }
 0x2b8   : > { %v4899_v41 = vpop.f32.mrf.mxu1 }
 0x2b9   : > { %v11671_v60 = vadd.f32 %v4899_v41, %v4786_v2  ;;  %v4788_v63 = vpop.f32.mrf.mxu0 }
 0x2ba   : > { %v4901_v19 = vpop.f32.mrf.mxu1 }
 0x2bb   : > { %v11673_v51 = vadd.f32 %v4901_v19, %v4788_v63  ;;  %v4938_v22 = vpop.f32.mrf.mxu0 }
 0x2bc   : > { %v5051_v53 = vpop.f32.mrf.mxu1  ;;  %v4939_v3 = vadd.f32 %v4938_v22, %v11581_v11 }
 0x2bd   : > { %v4940_v20 = vpop.f32.mrf.mxu0 }
 0x2be   : > { %v5053_v49 = vpop.f32.mrf.mxu1  ;;  %v11676_v12 = vadd.f32 %v5051_v53, %v4939_v3  ;;  %v4941_v57 = vadd.f32 %v4940_v20, %v11587_v61 }
 0x2bf   : > { %v4942_v29 = vpop.f32.mrf.mxu0 }
 0x2c0   : > { %v5055_v32 = vpop.f32.mrf.mxu1  ;;  %v11679_v23 = vadd.f32 %v5053_v49, %v4941_v57  ;;  %v4943_v41 = vadd.f32 %v4942_v29, %v11589_v15 }
 0x2c1   : > { %v4944_v2 = vpop.f32.mrf.mxu0 }
 0x2c2   : > { %v5057_v35 = vpop.f32.mrf.mxu1  ;;  %v11682_v19 = vadd.f32 %v5055_v32, %v4943_v41  ;;  %v4945_v63 = vadd.f32 %v4944_v2, %v11591_v7 }
 0x2c3   : > { %v4948_v18 = vpop.f32.mrf.mxu0 }
 0x2c4   : > { %v5061_v11 = vpop.f32.mrf.mxu1  ;;  %v11685_v22 = vadd.f32 %v5057_v35, %v4945_v63  ;;  %v4949_v53 = vadd.f32 %v4948_v18, %v11595_v46 }
 0x2c5   : > { %v4950_v3 = vpop.f32.mrf.mxu0 }
 0x2c6   : > { %v5063_v20 = vpop.f32.mrf.mxu1  ;;  %v11688_v61 = vadd.f32 %v5061_v11, %v4949_v53  ;;  %v4951_v49 = vadd.f32 %v4950_v3, %v11599_v5 }
 0x2c7   : > { %v4952_v57 = vpop.f32.mrf.mxu0 }
 0x2c8   : > { %v5065_v15 = vpop.f32.mrf.mxu1  ;;  %v11691_v29 = vadd.f32 %v5063_v20, %v4951_v49  ;;  %v4953_v32 = vadd.f32 %v4952_v57, %v11601_v24 }
 0x2c9   : > { %v4954_v41 = vpop.f32.mrf.mxu0 }
 0x2ca   : > { %v5067_v7 = vpop.f32.mrf.mxu1  ;;  %v11694_v2 = vadd.f32 %v5065_v15, %v4953_v32  ;;  %v4955_v35 = vadd.f32 %v4954_v41, %v11603_v1 }
 0x2cb   : > { %v4958_v63 = vpop.f32.mrf.mxu0 }
 0x2cc   : > { %v5071_v18 = vpop.f32.mrf.mxu1  ;;  %v11697_v46 = vadd.f32 %v5067_v7, %v4955_v35  ;;  %v4959_v11 = vadd.f32 %v4958_v63, %v11607_v58 }
 0x2cd   : > { %v4960_v53 = vpop.f32.mrf.mxu0 }
 0x2ce   : > { %v5073_v5 = vpop.f32.mrf.mxu1  ;;  %v11700_v3 = vadd.f32 %v5071_v18, %v4959_v11  ;;  %v4961_v20 = vadd.f32 %v4960_v53, %v11611_v26 }
 0x2cf   : > { %v4962_v49 = vpop.f32.mrf.mxu0 }
 0x2d0   : > { %v5075_v24 = vpop.f32.mrf.mxu1  ;;  %v11703_v57 = vadd.f32 %v5073_v5, %v4961_v20  ;;  %v4963_v15 = vadd.f32 %v4962_v49, %v11613_v31 }
 0x2d1   : > { %v4964_v32 = vpop.f32.mrf.mxu0 }
 0x2d2   : > { %v5077_v1 = vpop.f32.mrf.mxu1  ;;  %v11706_v41 = vadd.f32 %v5075_v24, %v4963_v15  ;;  %v4965_v7 = vadd.f32 %v4964_v32, %v11615_v47 }
 0x2d3   : > { %v4968_v35 = vpop.f32.mrf.mxu0 }
 0x2d4   : > { %v5081_v58 = vpop.f32.mrf.mxu1  ;;  %v11709_v63 = vadd.f32 %v5077_v1, %v4965_v7  ;;  %v4969_v18 = vadd.f32 %v4968_v35, %v11619_v10 }
 0x2d5   : > { %v4970_v11 = vpop.f32.mrf.mxu0 }
 0x2d6   : > { %v5083_v26 = vpop.f32.mrf.mxu1  ;;  %v11712_v53 = vadd.f32 %v5081_v58, %v4969_v18  ;;  %v4971_v5 = vadd.f32 %v4970_v11, %v11623_v42 }
 0x2d7   : > { %v4972_v20 = vpop.f32.mrf.mxu0 }
 0x2d8   : > { %v5085_v31 = vpop.f32.mrf.mxu1  ;;  %v11715_v49 = vadd.f32 %v5083_v26, %v4971_v5  ;;  %v4973_v24 = vadd.f32 %v4972_v20, %v11625_v14 }
 0x2d9   : > { %v4974_v15 = vpop.f32.mrf.mxu0 }
 0x2da   : > { %v5087_v47 = vpop.f32.mrf.mxu1  ;;  %v11718_v32 = vadd.f32 %v5085_v31, %v4973_v24  ;;  %v4975_v1 = vadd.f32 %v4974_v15, %v11627_v44 }
 0x2db   : > { %v4978_v7 = vpop.f32.mrf.mxu0 }
 0x2dc   : > { %v5091_v10 = vpop.f32.mrf.mxu1  ;;  %v11721_v35 = vadd.f32 %v5087_v47, %v4975_v1  ;;  %v4979_v58 = vadd.f32 %v4978_v7, %v11631_v21 }
 0x2dd   : > { %v4980_v18 = vpop.f32.mrf.mxu0 }
 0x2de   : > { %v5093_v42 = vpop.f32.mrf.mxu1  ;;  %v11724_v11 = vadd.f32 %v5091_v10, %v4979_v58  ;;  %v4981_v26 = vadd.f32 %v4980_v18, %v11635_v45 }
 0x2df   : > { %v4982_v5 = vpop.f32.mrf.mxu0 }
 0x2e0   : > { %v5095_v14 = vpop.f32.mrf.mxu1  ;;  %v11727_v20 = vadd.f32 %v5093_v42, %v4981_v26  ;;  %v4983_v31 = vadd.f32 %v4982_v5, %v11637_v13 }
 0x2e1   : > { %v4984_v24 = vpop.f32.mrf.mxu0 }
 0x2e2   : > { %v5097_v44 = vpop.f32.mrf.mxu1  ;;  %v11730_v15 = vadd.f32 %v5095_v14, %v4983_v31  ;;  %v4985_v47 = vadd.f32 %v4984_v24, %v11639_v59 }
 0x2e3   : > { %v4988_v1 = vpop.f32.mrf.mxu0 }
 0x2e4   : > { %13807 = vst [vmem:[#allocation44_spill] sm:$0xff] %v11730_v15  ;;  %v5101_v21 = vpop.f32.mrf.mxu1  ;;  %v11733_v7 = vadd.f32 %v5097_v44, %v4985_v47  ;;  %v4989_v10 = vadd.f32 %v4988_v1, %v11643_v16 }
 0x2e5   : > { %v4990_v58 = vpop.f32.mrf.mxu0 }
 0x2e6   : > { %13808 = vst [vmem:[#allocation43_spill] sm:$0xff] %v11733_v7  ;;  %v5103_v45 = vpop.f32.mrf.mxu1  ;;  %v11736_v18 = vadd.f32 %v5101_v21, %v4989_v10  ;;  %v4991_v42 = vadd.f32 %v4990_v58, %v11647_v50 }
 0x2e7   : > { %v4992_v26 = vpop.f32.mrf.mxu0 }
 0x2e8   : > { %13809 = vst [vmem:[#allocation30_spill] sm:$0xff] %v11736_v18  ;;  %v5105_v13 = vpop.f32.mrf.mxu1  ;;  %v11739_v5 = vadd.f32 %v5103_v45, %v4991_v42  ;;  %v4993_v14 = vadd.f32 %v4992_v26, %v11649_v40 }
 0x2e9   : > { %v4994_v31 = vpop.f32.mrf.mxu0 }
 0x2ea   : > { %13810 = vst [vmem:[#allocation46_spill] sm:$0xff] %v11739_v5  ;;  %v5107_v59 = vpop.f32.mrf.mxu1  ;;  %v11742_v24 = vadd.f32 %v5105_v13, %v4993_v14  ;;  %v4995_v44 = vadd.f32 %v4994_v31, %v11651_v9 }
 0x2eb   : > { %v4998_v47 = vpop.f32.mrf.mxu0 }
 0x2ec   : > { %13811 = vst [vmem:[#allocation92_spill] sm:$0xff] %v11742_v24  ;;  %v5111_v16 = vpop.f32.mrf.mxu1  ;;  %v11745_v1 = vadd.f32 %v5107_v59, %v4995_v44  ;;  %v4999_v21 = vadd.f32 %v4998_v47, %v11655_v8 }
 0x2ed   : > { %v5000_v10 = vpop.f32.mrf.mxu0 }
 0x2ee   : > { %13812 = vst [vmem:[#allocation93_spill] sm:$0xff] %v11745_v1  ;;  %v5113_v50 = vpop.f32.mrf.mxu1  ;;  %v11748_v58 = vadd.f32 %v5111_v16, %v4999_v21  ;;  %v5001_v45 = vadd.f32 %v5000_v10, %v11659_v52 }
 0x2ef   : > { %v5002_v42 = vpop.f32.mrf.mxu0 }
 0x2f0   : > { %13813 = vst [vmem:[#allocation31_spill] sm:$0xff] %v11748_v58  ;;  %v5115_v40 = vpop.f32.mrf.mxu1  ;;  %v11751_v26 = vadd.f32 %v5113_v50, %v5001_v45  ;;  %v5003_v13 = vadd.f32 %v5002_v42, %v11661_v54 }
 0x2f1   : > { %v5004_v14 = vpop.f32.mrf.mxu0 }
 0x2f2   : > { %13814 = vst [vmem:[#allocation48_spill] sm:$0xff] %v11751_v26  ;;  %v5117_v9 = vpop.f32.mrf.mxu1  ;;  %v11754_v31 = vadd.f32 %v5115_v40, %v5003_v13  ;;  %v5005_v59 = vadd.f32 %v5004_v14, %v11663_v55 }
 0x2f3   : > { %v5008_v44 = vpop.f32.mrf.mxu0 }
 0x2f4   : > { %13815 = vst [vmem:[#allocation45_spill] sm:$0xff] %v11754_v31  ;;  %v5121_v8 = vpop.f32.mrf.mxu1  ;;  %v11757_v47 = vadd.f32 %v5117_v9, %v5005_v59  ;;  %v5009_v16 = vadd.f32 %v5008_v44, %v11667_v4 }
 0x2f5   : > { %v5010_v21 = vpop.f32.mrf.mxu0 }
 0x2f6   : > { %13816 = vst [vmem:[#allocation132_spill] sm:$0xff] %v11757_v47  ;;  %v5123_v52 = vpop.f32.mrf.mxu1  ;;  %v11760_v10 = vadd.f32 %v5121_v8, %v5009_v16  ;;  %v5011_v50 = vadd.f32 %v5010_v21, %v11669_v34 }
 0x2f7   : > { %v5012_v45 = vpop.f32.mrf.mxu0 }
 0x2f8   : > { %13817 = vst [vmem:[#allocation50_spill] sm:$0xff] %v11760_v10  ;;  %v5125_v54 = vpop.f32.mrf.mxu1  ;;  %v11763_v42 = vadd.f32 %v5123_v52, %v5011_v50  ;;  %v5013_v40 = vadd.f32 %v5012_v45, %v11671_v60 }
 0x2f9   : > { %v5014_v13 = vpop.f32.mrf.mxu0 }
 0x2fa   : > { %13818 = vst [vmem:[#allocation47_spill] sm:$0xff] %v11763_v42  ;;  %v5127_v55 = vpop.f32.mrf.mxu1  ;;  %v11766_v14 = vadd.f32 %v5125_v54, %v5013_v40  ;;  %v5015_v9 = vadd.f32 %v5014_v13, %v11673_v51 }
 0x2fb   : > { %v5164_v59 = vpop.f32.mrf.mxu0 }
 0x2fc   : > { %13819 = vst [vmem:[#allocation49_spill] sm:$0xff] %v11766_v14  ;;  %v11769_v4 = vpop.f32.mrf.mxu1  ;;  %v11771_v44 = vadd.f32 %v5127_v55, %v5015_v9 }
 0x2fd   : > { %v5166_v8 = vpop.f32.mrf.mxu0 }
 0x2fe   : > { %13820 = vst [vmem:[#allocation94_spill] sm:$0xff] %v11771_v44  ;;  %v11773_v16 = vpop.f32.mrf.mxu1 }
 0x2ff   : > { %v11775_v34 = vpop.f32.mrf.mxu0 }
 0x300   : > { %v11777_v21 = vpop.f32.mrf.mxu1 }
 0x301   : > { %v11779_v52 = vpop.f32.mrf.mxu0 }
 0x302   : > { %v11781_v60 = vpop.f32.mrf.mxu1 }
 0x303   : > { %v11783_v50 = vpop.f32.mrf.mxu0 }
 0x304   : > { %v11785_v45 = vpop.f32.mrf.mxu1 }
 0x305   : > { %v11787_v51 = vpop.f32.mrf.mxu0 }
 0x306   : > { %v11789_v54 = vpop.f32.mrf.mxu1 }
 0x307   : > { %v11791_v40 = vpop.f32.mrf.mxu0 }
 0x308   : > { %v11793_v13 = vpop.f32.mrf.mxu1 }
 0x309   : > { %v11795_v55 = vpop.f32.mrf.mxu0 }
 0x30a   : > { %v11797_v9 = vpop.f32.mrf.mxu1 }
 0x30b   : > { %v11799_v6 = vpop.f32.mrf.mxu0 }
 0x30c   : > { %v11801_v28 = vpop.f32.mrf.mxu1 }
 0x30d   : > { %v11803_v17 = vpop.f32.mrf.mxu0 }
 0x30e   : > { %v11805_v37 = vpop.f32.mrf.mxu1 }
 0x30f   : > { %v11807_v36 = vpop.f32.mrf.mxu0 }
 0x310   : > { %v11809_v25 = vpop.f32.mrf.mxu1 }
 0x311   : > { %v11811_v62 = vpop.f32.mrf.mxu0 }
 0x312   : > { %v11813_v48 = vpop.f32.mrf.mxu1 }
 0x313   : > { %v11815_v0 = vpop.f32.mrf.mxu0 }
 0x314   : > { %v11817_v27 = vpop.f32.mrf.mxu1 }
 0x315   : > { %v11819_v33 = vpop.f32.mrf.mxu0 }
 0x316   : > { %v11821_v30 = vpop.f32.mrf.mxu1 }
 0x317   : > { %v11823_v38 = vpop.f32.mrf.mxu0 }
 0x318   : > { %v11825_v39 = vpop.f32.mrf.mxu1 }
 0x319   : > { %v11827_v43 = vpop.f32.mrf.mxu0 }
 0x31a   : > { %v11829_v56 = vpop.f32.mrf.mxu1 }
 0x31b   : > { %v11831_v44 = vpop.f32.mrf.mxu0 }
 0x31c   : > { %v11833_v14 = vpop.f32.mrf.mxu1 }
 0x31d   : > { %v11835_v42 = vpop.f32.mrf.mxu0 }
 0x31e   : > { %v11837_v10 = vpop.f32.mrf.mxu1 }
 0x31f   : > { %13821 = vst [vmem:[#allocation95_spill] sm:$0xff] %v11837_v10  ;;  %v11839_v47 = vpop.f32.mrf.mxu0 }
 0x320   : > { %13822 = vst [vmem:[#allocation133_spill] sm:$0xff] %v11839_v47  ;;  %v11841_v31 = vpop.f32.mrf.mxu1 }
 0x321   : > { %13823 = vst [vmem:[#allocation52_spill] sm:$0xff] %v11841_v31  ;;  %v11843_v26 = vpop.f32.mrf.mxu0 }
 0x322   : > { %13824 = vst [vmem:[#allocation51_spill] sm:$0xff] %v11843_v26  ;;  %v11845_v58 = vpop.f32.mrf.mxu1 }
 0x323   : > { %13825 = vst [vmem:[#allocation32_spill] sm:$0xff] %v11845_v58  ;;  %v11847_v1 = vpop.f32.mrf.mxu0 }
 0x324   : > { %13826 = vst [vmem:[#allocation54_spill] sm:$0xff] %v11847_v1  ;;  %v11849_v24 = vpop.f32.mrf.mxu1 }
 0x325   : > { %13827 = vst [vmem:[#allocation96_spill] sm:$0xff] %v11849_v24  ;;  %v11851_v5 = vpop.f32.mrf.mxu0 }
 0x326   : > { %13828 = vst [vmem:[#allocation97_spill] sm:$0xff] %v11851_v5  ;;  %v11853_v18 = vpop.f32.mrf.mxu1 }
 0x327   : > { %13829 = vst [vmem:[#allocation33_spill] sm:$0xff] %v11853_v18  ;;  %v11855_v7 = vpop.f32.mrf.mxu0 }
 0x328   : > { %13830 = vst [vmem:[#allocation56_spill] sm:$0xff] %v11855_v7  ;;  %v11857_v15 = vpop.f32.mrf.mxu1 }
 0x329   : > { %13831 = vst [vmem:[#allocation53_spill] sm:$0xff] %v11857_v15  ;;  %v11859_v10 = vpop.f32.mrf.mxu0 }
 0x32a   : > { %13832 = vst [vmem:[#allocation136_spill] sm:$0xff] %v11859_v10  ;;  %v11861_v47 = vpop.f32.mrf.mxu1 }
 0x32b   : > { %13833 = vst [vmem:[#allocation58_spill] sm:$0xff] %v11861_v47  ;;  %v11863_v31 = vpop.f32.mrf.mxu0 }
 0x32c   : > { %13834 = vst [vmem:[#allocation55_spill] sm:$0xff] %v11863_v31  ;;  %v11865_v26 = vpop.f32.mrf.mxu1 }
 0x32d   : > { %13835 = vst [vmem:[#allocation57_spill] sm:$0xff] %v11865_v26  ;;  %v11867_v58 = vpop.f32.mrf.mxu0  ;;  %v5165_v26 = vadd.f32 %v5164_v59, %v11676_v12  ;;  %v5171_v59 = vadd.f32 %v11779_v52, %v11685_v22  ;;  %v5177_v22 = vadd.f32 %v11787_v51, %v11691_v29  ;;  %v5181_v52 = vadd.f32 %v11795_v55, %v11697_v46 }
 0x32e   : > { %13836 = vst [vmem:[#allocation98_spill] sm:$0xff] %v11867_v58  ;;  %v11869_v1 = vpop.f32.mrf.mxu1 }
 0x32f   : > { %13837 = vst [vmem:[#allocation99_spill] sm:$0xff] %v11869_v1  ;;  %v11871_v24 = vpop.f32.mrf.mxu0  ;;  %v5294_v55 = vadd.f32 %v11797_v9, %v5181_v52 }
 0x330   : > { %13838 = vst [vmem:[#allocation34_spill] sm:$0xff] %v11871_v24  ;;  %v11873_v5 = vpop.f32.mrf.mxu1 }
 0x331   : > { %13839 = vst [vmem:[#allocation59_spill] sm:$0xff] %v11873_v5  ;;  %v11875_v18 = vpop.f32.mrf.mxu0  ;;  %v5167_v5 = vadd.f32 %v5166_v8, %v11679_v23 }
 0x332   : > { %13840 = vst [vmem:[#allocation35_spill] sm:$0xff] %v11875_v18  ;;  %v11877_v7 = vpop.f32.mrf.mxu1 }
 0x333   : > { %13841 = vst [vmem:[#allocation61_spill] sm:$0xff] %v11877_v7  ;;  %v5278_v7 = vadd.f32 %v11769_v4, %v5165_v26  ;;  %v5280_v12 = vadd.f32 %v11773_v16, %v5167_v5  ;;  %v5175_v26 = vadd.f32 %v11783_v50, %v11688_v61 }
 0x334   : > { %v11879_v15 = vpop.f32.mrf.mxu0  ;;  %v11881_v10 = vpop.f32.mrf.mxu1 }
 0x335   : > { %13842 = vst [vmem:[#allocation100_spill] sm:$0xff] %v11881_v10  ;;  %v5169_v10 = vadd.f32 %v11775_v34, %v11682_v19  ;;  %v5288_v61 = vadd.f32 %v11785_v45, %v5175_v26 }
 0x336   : > { %v11883_v47 = vpop.f32.mrf.mxu0  ;;  %v11885_v31 = vpop.f32.mrf.mxu1 }
 0x337   : > { %13843 = vst [vmem:[#allocation101_spill] sm:$0xff] %v11883_v47  ;;  %13844 = vst [vmem:[#allocation139_spill] sm:$0xff] %v11885_v31  ;;  %v5282_v8 = vadd.f32 %v11777_v21, %v5169_v10  ;;  %v5290_v21 = vadd.f32 %v11789_v54, %v5177_v22 }
 0x338   : > { %v11888_v58 = vpop.f32.mrf.mxu0  ;;  %v11890_v1 = vpop.f32.mrf.mxu1 }
 0x339   : > { %13845 = vst [vmem:[#allocation60_spill] sm:$0xff] %v11888_v58  ;;  %13846 = vst [vmem:[#allocation62_spill] sm:$0xff] %v11890_v1 }
 0x33a   : > { %v11893_v24 = vpop.f32.mrf.mxu0  ;;  %v11895_v18 = vpop.f32.mrf.mxu1 }
 0x33b   : > { %13847 = vst [vmem:[#allocation36_spill] sm:$0xff] %v11893_v24  ;;  %13848 = vst [vmem:[#allocation64_spill] sm:$0xff] %v11895_v18  ;;  %v5284_v24 = vadd.f32 %v11781_v60, %v5171_v59 }
 0x33c   : > { %v5390_v47 = vpop.f32.mrf.mxu0 }
 0x33d   : > { %v5503_v31 = vpop.f32.mrf.mxu1  ;;  %v5391_v1 = vadd.f32 %v5390_v47, %v5278_v7 }
 0x33e   : > { %v5392_v58 = vpop.f32.mrf.mxu0 }
 0x33f   : > { %v5505_v23 = vpop.f32.mrf.mxu1  ;;  %v11906_v4 = vadd.f32 %v5503_v31, %v5391_v1  ;;  %v5393_v19 = vadd.f32 %v5392_v58, %v5280_v12  ;;  %v5179_v1 = vadd.f32 %v11791_v40, %v11694_v2  ;;  %v5187_v12 = vadd.f32 %v11803_v17, %v11703_v57 }
 0x340   : > { %v5394_v34 = vpop.f32.mrf.mxu0 }
 0x341   : > { %v5507_v18 = vpop.f32.mrf.mxu1  ;;  %5589 = vst [vmem:[%s11345_s29 + $0x10] sm:$0xff] %v11906_v4  ;;  %v11913_v7 = vadd.f32 %v5505_v23, %v5393_v19  ;;  %v5395_v5 = vadd.f32 %v5394_v34, %v5282_v8  ;;  %v5292_v51 = vadd.f32 %v11793_v13, %v5179_v1  ;;  %v5189_v8 = vadd.f32 %v11807_v36, %v11706_v41 }
 0x342   : > { %v5396_v47 = vpop.f32.mrf.mxu0  ;;  %v5300_v57 = vadd.f32 %v11805_v37, %v5187_v12  ;;  %v5191_v34 = vadd.f32 %v11811_v62, %v11709_v63  ;;  %v5197_v1 = vadd.f32 %v11819_v33, %v11715_v49  ;;  %v13851_v12 = vld [vmem:[#allocation44_spill] sm:$0xff] }
 0x343   : > { %v5509_v10 = vpop.f32.mrf.mxu1  ;;  %5590 = vst [vmem:[%s11345_s29 + $0x18] sm:$0xff] %v11913_v7  ;;  %v11920_v58 = vadd.f32 %v5507_v18, %v5395_v5  ;;  %v5397_v31 = vadd.f32 %v5396_v47, %v5284_v24  ;;  %v5185_v18 = vadd.f32 %v11799_v6, %v11700_v3  ;;  %v5302_v41 = vadd.f32 %v11809_v25, %v5189_v8 }
 0x344   : > { %v5400_v16 = vpop.f32.mrf.mxu0  ;;  %v5195_v47 = vadd.f32 %v11815_v0, %v11712_v53  ;;  %v5304_v63 = vadd.f32 %v11813_v48, %v5191_v34  ;;  %v5310_v49 = vadd.f32 %v11821_v30, %v5197_v1 }
 0x345   : > { %v5513_v29 = vpop.f32.mrf.mxu1  ;;  %5593 = vst [vmem:[%s11345_s29 + $0x30] sm:$0xff] %v11920_v58  ;;  %v11927_v60 = vadd.f32 %v5509_v10, %v5397_v31  ;;  %v5401_v50 = vadd.f32 %v5400_v16, %v5288_v61  ;;  %v5298_v3 = vadd.f32 %v11801_v28, %v5185_v18 }
 0x346   : > { %v5402_v45 = vpop.f32.mrf.mxu0  ;;  %v5308_v53 = vadd.f32 %v11817_v27, %v5195_v47  ;;  %v13859_v47 = vld [vmem:[#allocation54_spill] sm:$0xff] }
 0x347   : > { %v5515_v2 = vpop.f32.mrf.mxu1  ;;  %5594 = vst [vmem:[%s11345_s29 + $0x38] sm:$0xff] %v11927_v60  ;;  %v11934_v24 = vadd.f32 %v5513_v29, %v5401_v50  ;;  %v5403_v54 = vadd.f32 %v5402_v45, %v5290_v21  ;;  %v5199_v29 = vadd.f32 %v11823_v38, %v11718_v32  ;;  %v5201_v50 = vadd.f32 %v11827_v43, %v11721_v35 }
 0x348   : > { %v5404_v40 = vpop.f32.mrf.mxu0 }
 0x349   : > { %v5517_v46 = vpop.f32.mrf.mxu1  ;;  %5597 = vst [vmem:[%s11345_s29 + $0x50] sm:$0xff] %v11934_v24  ;;  %v11941_v13 = vadd.f32 %v5515_v2, %v5403_v54  ;;  %v5405_v59 = vadd.f32 %v5404_v40, %v5292_v51  ;;  %v5312_v32 = vadd.f32 %v11825_v39, %v5199_v29  ;;  %v5205_v51 = vadd.f32 %v11831_v44, %v11724_v11 }
 0x34a   : > { %v5406_v23 = vpop.f32.mrf.mxu0  ;;  %v5314_v35 = vadd.f32 %v11829_v56, %v5201_v50  ;;  %v5207_v40 = vadd.f32 %v11835_v42, %v11727_v20  ;;  %v13853_v42 = vld [vmem:[#allocation95_spill] sm:$0xff]  ;;  %v13863_v50 = vld [vmem:[#allocation96_spill] sm:$0xff] }
 0x34b   : > { %v5519_v6 = vpop.f32.mrf.mxu1  ;;  %5598 = vst [vmem:[%s11345_s29 + $0x58] sm:$0xff] %v11941_v13  ;;  %v11948_v9 = vadd.f32 %v5517_v46, %v5405_v59  ;;  %v5407_v26 = vadd.f32 %v5406_v23, %v5294_v55  ;;  %v5318_v44 = vadd.f32 %v11833_v14, %v5205_v51  ;;  %v13852_v59 = vld [vmem:[#allocation133_spill] sm:$0xff] }
 0x34c   : > { %v5410_v19 = vpop.f32.mrf.mxu0  ;;  %v5209_v23 = vadd.f32 %v13852_v59, %v13851_v12  ;;  %v5320_v8 = vadd.f32 %v13853_v42, %v5207_v40  ;;  %v13872_v42 = vld [vmem:[#allocation55_spill] sm:$0xff] }
 0x34d   : > { %v5523_v17 = vpop.f32.mrf.mxu1  ;;  %5601 = vst [vmem:[%s11345_s29 + $0x70] sm:$0xff] %v11948_v9  ;;  %v11955_v28 = vadd.f32 %v5519_v6, %v5407_v26  ;;  %v5411_v22 = vadd.f32 %v5410_v19, %v5298_v3  ;;  %v13854_v26 = vld [vmem:[#allocation43_spill] sm:$0xff] }
 0x34e   : > { %v5412_v5 = vpop.f32.mrf.mxu0  ;;  %v13855_v19 = vld [vmem:[#allocation51_spill] sm:$0xff] }
 0x34f   : > { %v5525_v36 = vpop.f32.mrf.mxu1  ;;  %5602 = vst [vmem:[%s11345_s29 + $0x78] sm:$0xff] %v11955_v28  ;;  %v11962_v37 = vadd.f32 %v5523_v17, %v5411_v22  ;;  %v5413_v10 = vadd.f32 %v5412_v5, %v5300_v57  ;;  %v5211_v17 = vadd.f32 %v13855_v19, %v13854_v26  ;;  %v13857_v5 = vld [vmem:[#allocation52_spill] sm:$0xff] }
 0x350   : > { %v5414_v61 = vpop.f32.mrf.mxu0 }
 0x351   : > { %v5527_v62 = vpop.f32.mrf.mxu1  ;;  %5605 = vst [vmem:[%s11345_s29 + $0x90] sm:$0xff] %v11962_v37  ;;  %v11969_v25 = vadd.f32 %v5525_v36, %v5413_v10  ;;  %v5415_v31 = vadd.f32 %v5414_v61, %v5302_v41  ;;  %v5322_v36 = vadd.f32 %v13857_v5, %v5209_v23  ;;  %v13858_v41 = vld [vmem:[#allocation30_spill] sm:$0xff]  ;;  %v13875_v5 = vld [vmem:[#allocation48_spill] sm:$0xff] }
 0x352   : > { %v5416_v16 = vpop.f32.mrf.mxu0  ;;  %v5215_v10 = vadd.f32 %v13859_v47, %v13858_v41 }
 0x353   : > { %v5529_v0 = vpop.f32.mrf.mxu1  ;;  %5606 = vst [vmem:[%s11345_s29 + $0x98] sm:$0xff] %v11969_v25  ;;  %v11976_v48 = vadd.f32 %v5527_v62, %v5415_v31  ;;  %v5417_v21 = vadd.f32 %v5416_v16, %v5304_v63  ;;  %v13860_v31 = vld [vmem:[#allocation32_spill] sm:$0xff] }
 0x354   : > { %v5420_v52 = vpop.f32.mrf.mxu0  ;;  %v5324_v16 = vadd.f32 %v13860_v31, %v5211_v17 }
 0x355   : > { %v5533_v33 = vpop.f32.mrf.mxu1  ;;  %5609 = vst [vmem:[%s11345_s29 + $0xb0] sm:$0xff] %v11976_v48  ;;  %v11983_v27 = vadd.f32 %v5529_v0, %v5417_v21  ;;  %v5421_v45 = vadd.f32 %v5420_v52, %v5308_v53  ;;  %v13861_v0 = vld [vmem:[#allocation46_spill] sm:$0xff]  ;;  %v13862_v53 = vld [vmem:[#allocation97_spill] sm:$0xff] }
 0x356   : > { %v5422_v2 = vpop.f32.mrf.mxu0  ;;  %v5217_v29 = vadd.f32 %v13862_v53, %v13861_v0  ;;  %v13880_v0 = vld [vmem:[#allocation34_spill] sm:$0xff] }
 0x357   : > { %v5535_v38 = vpop.f32.mrf.mxu1  ;;  %5610 = vst [vmem:[%s11345_s29 + $0xb8] sm:$0xff] %v11983_v27  ;;  %v11990_v30 = vadd.f32 %v5533_v33, %v5421_v45  ;;  %v5423_v18 = vadd.f32 %v5422_v2, %v5310_v49  ;;  %v5328_v45 = vadd.f32 %v13863_v50, %v5215_v10  ;;  %v13864_v2 = vld [vmem:[#allocation92_spill] sm:$0xff]  ;;  %v13882_v50 = vld [vmem:[#allocation99_spill] sm:$0xff] }
 0x358   : > { %v5424_v54 = vpop.f32.mrf.mxu0 }
 0x359   : > { %13849 = vst [vmem:[#allocation63_spill] sm:$0xff] %v11990_v30  ;;  %v5537_v43 = vpop.f32.mrf.mxu1  ;;  %5613 = vst [vmem:[%s11345_s29 + $0xd0] sm:$0xff] %v11990_v30  ;;  %v11997_v39 = vadd.f32 %v5535_v38, %v5423_v18  ;;  %v5425_v46 = vadd.f32 %v5424_v54, %v5312_v32  ;;  %v13865_v38 = vld [vmem:[#allocation56_spill] sm:$0xff] }
 0x35a   : > { %v5426_v55 = vpop.f32.mrf.mxu0  ;;  %v5219_v32 = vadd.f32 %v13865_v38, %v13864_v2  ;;  %v13883_v2 = vld [vmem:[#allocation132_spill] sm:$0xff]  ;;  %v13884_v38 = vld [vmem:[#allocation35_spill] sm:$0xff] }
 0x35b   : > { %13850 = vst [vmem:[#allocation102_spill] sm:$0xff] %v11997_v39  ;;  %v5539_v11 = vpop.f32.mrf.mxu1  ;;  %5614 = vst [vmem:[%s11345_s29 + $0xd8] sm:$0xff] %v11997_v39  ;;  %v12004_v56 = vadd.f32 %v5537_v43, %v5425_v46  ;;  %v5427_v6 = vadd.f32 %v5426_v55, %v5314_v35  ;;  %v13866_v35 = vld [vmem:[#allocation33_spill] sm:$0xff]  ;;  %v13868_v55 = vld [vmem:[#allocation136_spill] sm:$0xff] }
 0x35c   : > { %v5430_v3 = vpop.f32.mrf.mxu0  ;;  %v5330_v40 = vadd.f32 %v13866_v35, %v5217_v29  ;;  %v13867_v46 = vld [vmem:[#allocation93_spill] sm:$0xff] }
 0x35d   : > { %v5543_v20 = vpop.f32.mrf.mxu1  ;;  %5617 = vst [vmem:[%s11345_s29 + $0xf0] sm:$0xff] %v12004_v56  ;;  %v12011_v14 = vadd.f32 %v5539_v11, %v5427_v6  ;;  %v5431_v57 = vadd.f32 %v5430_v3, %v5318_v44  ;;  %v5221_v11 = vadd.f32 %v13868_v55, %v13867_v46  ;;  %v13870_v6 = vld [vmem:[#allocation53_spill] sm:$0xff]  ;;  %v13887_v55 = vld [vmem:[#allocation50_spill] sm:$0xff] }
 0x35e   : > { %v5432_v34 = vpop.f32.mrf.mxu0  ;;  %v5332_v3 = vadd.f32 %v13870_v6, %v5219_v32  ;;  %v5231_v32 = vadd.f32 %v13884_v38, %v13883_v2  ;;  %v13901_v38 = vld [vmem:[#allocation62_spill] sm:$0xff] }
 0x35f   : > { %13856 = vst [vmem:[#allocation103_spill] sm:$0xff] %v12011_v14  ;;  %v5545_v22 = vpop.f32.mrf.mxu1  ;;  %5618 = vst [vmem:[%s11345_s29 + $0xf8] sm:$0xff] %v12011_v14  ;;  %v12018_v61 = vadd.f32 %v5543_v20, %v5431_v57  ;;  %v5433_v62 = vadd.f32 %v5432_v34, %v5320_v8  ;;  %v13871_v20 = vld [vmem:[#allocation31_spill] sm:$0xff]  ;;  %v13874_v34 = vld [vmem:[#allocation58_spill] sm:$0xff] }
 0x360   : > { %v5434_v63 = vpop.f32.mrf.mxu0  ;;  %v5225_v8 = vadd.f32 %v13872_v42, %v13871_v20  ;;  %v13890_v42 = vld [vmem:[#allocation47_spill] sm:$0xff] }
 0x361   : > { %v5547_v1 = vpop.f32.mrf.mxu1  ;;  %5621 = vst [vmem:[%s11345_s29 + $0x110] sm:$0xff] %v12018_v61  ;;  %v12025_v21 = vadd.f32 %v5545_v22, %v5433_v62  ;;  %v5435_v52 = vadd.f32 %v5434_v63, %v5322_v36  ;;  %v5334_v22 = vadd.f32 %v13874_v34, %v5221_v11  ;;  %v13876_v36 = vld [vmem:[#allocation98_spill] sm:$0xff]  ;;  %v5235_v11 = vadd.f32 %v11879_v15, %v13887_v55 }
 0x362   : > { %v5436_v33 = vpop.f32.mrf.mxu0  ;;  %v5227_v41 = vadd.f32 %v13876_v36, %v13875_v5  ;;  %v13894_v36 = vld [vmem:[#allocation49_spill] sm:$0xff] }
 0x363   : > { %v5549_v49 = vpop.f32.mrf.mxu1  ;;  %5622 = vst [vmem:[%s11345_s29 + $0x118] sm:$0xff] %v12025_v21  ;;  %v12032_v51 = vadd.f32 %v5547_v1, %v5435_v52  ;;  %v5437_v18 = vadd.f32 %v5436_v33, %v5324_v16  ;;  %v13878_v1 = vld [vmem:[#allocation57_spill] sm:$0xff] }
 0x364   : > { %v5440_v54 = vpop.f32.mrf.mxu0  ;;  %v5338_v31 = vadd.f32 %v13878_v1, %v5225_v8  ;;  %v13879_v16 = vld [vmem:[#allocation45_spill] sm:$0xff] }
 0x365   : > { %v5553_v43 = vpop.f32.mrf.mxu1  ;;  %5625 = vst [vmem:[%s11345_s29 + $0x130] sm:$0xff] %v12032_v51  ;;  %v12039_v44 = vadd.f32 %v5549_v49, %v5437_v18  ;;  %v5441_v12 = vadd.f32 %v5440_v54, %v5328_v45  ;;  %v5229_v53 = vadd.f32 %v13880_v0, %v13879_v16  ;;  %v5340_v45 = vadd.f32 %v13882_v50, %v5227_v41  ;;  %v13891_v8 = vld [vmem:[#allocation101_spill] sm:$0xff]  ;;  %v13895_v41 = vld [vmem:[#allocation60_spill] sm:$0xff]  ;;  %v13897_v16 = vld [vmem:[#allocation139_spill] sm:$0xff] }
 0x366   : > { %v5442_v59 = vpop.f32.mrf.mxu0 }
 0x367   : > { %13869 = vst [vmem:[#allocation37_spill] sm:$0xff] %v12039_v44  ;;  %v5555_v23 = vpop.f32.mrf.mxu1  ;;  %5626 = vst [vmem:[%s11345_s29 + $0x138] sm:$0xff] %v12039_v44  ;;  %v12046_v26 = vadd.f32 %v5553_v43, %v5441_v12  ;;  %v5443_v19 = vadd.f32 %v5442_v59, %v5330_v40  ;;  %v13886_v40 = vld [vmem:[#allocation59_spill] sm:$0xff] }
 0x368   : > { %v5444_v17 = vpop.f32.mrf.mxu0  ;;  %v5342_v46 = vadd.f32 %v13886_v40, %v5229_v53  ;;  %v13898_v53 = vld [vmem:[#allocation94_spill] sm:$0xff] }
 0x369   : > { %13873 = vst [vmem:[#allocation66_spill] sm:$0xff] %v12046_v26  ;;  %v5557_v57 = vpop.f32.mrf.mxu1  ;;  %5629 = vst [vmem:[%s11345_s29 + $0x150] sm:$0xff] %v12046_v26  ;;  %v12053_v47 = vadd.f32 %v5555_v23, %v5443_v19  ;;  %v5445_v10 = vadd.f32 %v5444_v17, %v5332_v3  ;;  %v13889_v3 = vld [vmem:[#allocation61_spill] sm:$0xff]  ;;  %v5237_v19 = vadd.f32 %v13891_v8, %v13890_v42 }
 0x36a   : > { %v5446_v62 = vpop.f32.mrf.mxu0  ;;  %v5344_v20 = vadd.f32 %v13889_v3, %v5231_v32 }
 0x36b   : > { %13877 = vst [vmem:[#allocation65_spill] sm:$0xff] %v12053_v47  ;;  %v5559_v63 = vpop.f32.mrf.mxu1  ;;  %5630 = vst [vmem:[%s11345_s29 + $0x158] sm:$0xff] %v12053_v47  ;;  %v12060_v29 = vadd.f32 %v5557_v57, %v5445_v10  ;;  %v5447_v52 = vadd.f32 %v5446_v62, %v5334_v22  ;;  %v13893_v22 = vld [vmem:[#allocation100_spill] sm:$0xff]  ;;  %v5239_v10 = vadd.f32 %v13895_v41, %v13894_v36 }
 0x36c   : > { %v5450_v33 = vpop.f32.mrf.mxu0  ;;  %v5348_v5 = vadd.f32 %v13893_v22, %v5235_v11  ;;  %v5350_v0 = vadd.f32 %v13897_v16, %v5237_v19 }
 0x36d   : > { %13881 = vst [vmem:[#allocation104_spill] sm:$0xff] %v12060_v29  ;;  %v5563_v49 = vpop.f32.mrf.mxu1  ;;  %5633 = vst [vmem:[%s11345_s29 + $0x170] sm:$0xff] %v12060_v29  ;;  %v12067_v18 = vadd.f32 %v5559_v63, %v5447_v52  ;;  %v5451_v54 = vadd.f32 %v5450_v33, %v5338_v31  ;;  %v13899_v52 = vld [vmem:[#allocation36_spill] sm:$0xff]  ;;  %v5352_v32 = vadd.f32 %v13901_v38, %v5239_v10 }
 0x36e   : > { %v5452_v43 = vpop.f32.mrf.mxu0  ;;  %v5241_v33 = vadd.f32 %v13899_v52, %v13898_v53 }
 0x36f   : > { %13885 = vst [vmem:[#allocation105_spill] sm:$0xff] %v12067_v18  ;;  %v5565_v35 = vpop.f32.mrf.mxu1  ;;  %5634 = vst [vmem:[%s11345_s29 + $0x178] sm:$0xff] %v12067_v18  ;;  %v12074_v12 = vadd.f32 %v5563_v49, %v5451_v54  ;;  %v5453_v59 = vadd.f32 %v5452_v43, %v5340_v45 }
 0x370   : > { %v5454_v23 = vpop.f32.mrf.mxu0 }
 0x371   : > { %13888 = vst [vmem:[#allocation67_spill] sm:$0xff] %v12074_v12  ;;  %v5567_v6 = vpop.f32.mrf.mxu1  ;;  %5637 = vst [vmem:[%s11345_s29 + $0x190] sm:$0xff] %v12074_v12  ;;  %v12081_v17 = vadd.f32 %v5565_v35, %v5453_v59  ;;  %v5455_v57 = vadd.f32 %v5454_v23, %v5342_v46  ;;  %v13903_v46 = vld [vmem:[#allocation64_spill] sm:$0xff] }
 0x372   : > { %v5456_v34 = vpop.f32.mrf.mxu0  ;;  %v5354_v55 = vadd.f32 %v13903_v46, %v5241_v33 }
 0x373   : > { %13892 = vst [vmem:[#allocation106_spill] sm:$0xff] %v12081_v17  ;;  %v5569_v15 = vpop.f32.mrf.mxu1  ;;  %5638 = vst [vmem:[%s11345_s29 + $0x198] sm:$0xff] %v12081_v17  ;;  %v12088_v62 = vadd.f32 %v5567_v6, %v5455_v57  ;;  %v5457_v63 = vadd.f32 %v5456_v34, %v5344_v20 }
 0x374   : > { %v5460_v1 = vpop.f32.mrf.mxu0 }
 0x375   : > { %13896 = vst [vmem:[#allocation107_spill] sm:$0xff] %v12088_v62  ;;  %v5573_v31 = vpop.f32.mrf.mxu1  ;;  %5641 = vst [vmem:[%s11345_s29 + $0x1b0] sm:$0xff] %v12088_v62  ;;  %v12095_v49 = vadd.f32 %v5569_v15, %v5457_v63  ;;  %v5461_v50 = vadd.f32 %v5460_v1, %v5348_v5 }
 0x376   : > { %v5462_v45 = vpop.f32.mrf.mxu0 }
 0x377   : > { %13900 = vst [vmem:[#allocation108_spill] sm:$0xff] %v12095_v49  ;;  %v5575_v2 = vpop.f32.mrf.mxu1  ;;  %5642 = vst [vmem:[%s11345_s29 + $0x1b8] sm:$0xff] %v12095_v49  ;;  %v12100_v54 = vadd.f32 %v5573_v31, %v5461_v50  ;;  %v5463_v43 = vadd.f32 %v5462_v45, %v5350_v0 }
 0x378   : > { %v5464_v35 = vpop.f32.mrf.mxu0 }
 0x379   : > { %13902 = vst [vmem:[#allocation109_spill] sm:$0xff] %v12100_v54  ;;  %v5577_v40 = vpop.f32.mrf.mxu1  ;;  %5645 = vst [vmem:[%s11345_s29 + $0x1d0] sm:$0xff] %v12100_v54  ;;  %v12105_v11 = vadd.f32 %v5575_v2, %v5463_v43  ;;  %v5465_v59 = vadd.f32 %v5464_v35, %v5352_v32 }
 0x37a   : > { %v5466_v23 = vpop.f32.mrf.mxu0 }
 0x37b   : > { %13904 = vst [vmem:[#allocation110_spill] sm:$0xff] %v12105_v11  ;;  %5646 = vst [vmem:[%s11345_s29 + $0x1d8] sm:$0xff] %v12105_v11  ;;  %v12109_v6 = vadd.f32 %v5577_v40, %v5465_v59  ;;  %v5467_v3 = vadd.f32 %v5466_v23, %v5354_v55  ;;  %v5579_v20 = vpop.f32.mrf.mxu1  ;;  %5654 = sbr.rel (%p8561_p11) target bundleno = 900 (0x384), region = 64 }
 0x37d   : > { %13905 = vst [vmem:[#allocation111_spill] sm:$0xff] %v12109_v6  ;;  %5649 = vst [vmem:[%s11345_s29 + $0x1f0] sm:$0xff] %v12109_v6  ;;  %v12113_v42 = vadd.f32 %v5579_v20, %v5467_v3 }
 0x37f   : > { %13906 = vst [vmem:[#allocation112_spill] sm:$0xff] %v12113_v42  ;;  %5650 = vst [vmem:[%s11345_s29 + $0x1f8] sm:$0xff] %v12113_v42 }
 0x380   : > { %v5655_v8 = vlaneseq  ;;  %v10093_v19 = vmov 0.0  }
 0x382   : > { %vm5657_vm0 = vcmp.lt.s32.totalorder %v5655_v8, 512 }
 0x383   : > { %5659 = vst.msk [vmem:[#allocation5] sm:$0xf] %vm5657_vm0, %v10093_v19  ;;  %5660 = vst.msk [vmem:[#allocation6] sm:$0xf] %vm5657_vm0, %v10093_v19 }
 0x384 PF: > { %v13907_v57 = vld [vmem:[#allocation68_spill] sm:$0xff]  ;;  %v13908_v34 = vld [vmem:[#allocation70_spill] sm:$0xff]  ;;  %v13909_v22 = vld [vmem:[#allocation69_spill] sm:$0xff]  ;;  %v5704_v41 = vadd.f32 %v11920_v58, %v11906_v4  ;;  %v5725_v10 = vadd.f32 %v11927_v60, %v11913_v7 }
 0x385   : > { %v5662_v15 = vadd.f32 %v13908_v34, %v13907_v57  ;;  %v13910_v5 = vld [vmem:[#allocation71_spill] sm:$0xff]  ;;  %v13911_v63 = vld [vmem:[#allocation72_spill] sm:$0xff]  ;;  %v13912_v31 = vld [vmem:[#allocation73_spill] sm:$0xff] }
 0x386   : > { %v5683_v36 = vadd.f32 %v13910_v5, %v13909_v22  ;;  %v5705_v0 = vadd.f32 %v5704_v41, %v11934_v24  ;;  %v5726_v53 = vadd.f32 %v5725_v10, %v11941_v13  ;;  %v13913_v52 = vld [vmem:[#allocation74_spill] sm:$0xff]  ;;  %v13914_v50 = vld [vmem:[#allocation75_spill] sm:$0xff]  ;;  %v13915_v32 = vld [vmem:[#allocation76_spill] sm:$0xff] }
 0x387   : > { %v5663_v1 = vadd.f32 %v5662_v15, %v13911_v63  ;;  %v13916_v35 = vld [vmem:[#allocation77_spill] sm:$0xff]  ;;  %v13917_v59 = vld [vmem:[#allocation78_spill] sm:$0xff]  ;;  %v13918_v3 = vld [vmem:[#allocation79_spill] sm:$0xff] }
 0x388   : > { %v5684_v16 = vadd.f32 %v5683_v36, %v13912_v31  ;;  %v5706_v2 = vadd.f32 %v5705_v0, %v11948_v9  ;;  %v5727_v38 = vadd.f32 %v5726_v53, %v11955_v28  ;;  %v13919_v15 = vld [vmem:[#allocation80_spill] sm:$0xff]  ;;  %v13920_v41 = vld [vmem:[#allocation81_spill] sm:$0xff]  ;;  %v13921_v0 = vld [vmem:[#allocation82_spill] sm:$0xff] }
 0x389   : > { %v5664_v33 = vadd.f32 %v5663_v1, %v13913_v52 }
 0x38a   : > { %v5685_v45 = vadd.f32 %v5684_v16, %v13914_v50  ;;  %v5707_v46 = vadd.f32 %v5706_v2, %v11962_v37  ;;  %v5728_v55 = vadd.f32 %v5727_v38, %v11969_v25 }
 0x38b   : > { %v5665_v43 = vadd.f32 %v5664_v33, %v13915_v32  ;;  %v13922_v33 = vld [vmem:[#allocation83_spill] sm:$0xff] }
 0x38c   : > { %v5686_v40 = vadd.f32 %v5685_v45, %v13916_v35  ;;  %v5708_v8 = vadd.f32 %v5707_v46, %v11976_v48  ;;  %v5729_v19 = vadd.f32 %v5728_v55, %v11983_v27  ;;  %v13924_v46 = vld [vmem:[#allocation85_spill] sm:$0xff] }
 0x38d   : > { %v5666_v23 = vadd.f32 %v5665_v43, %v13917_v59  ;;  %v13923_v43 = vld [vmem:[#allocation84_spill] sm:$0xff] }
 0x38e   : > { %v5687_v20 = vadd.f32 %v5686_v40, %v13918_v3  ;;  %v5709_v1 = vadd.f32 %v5708_v8, %v11990_v30  ;;  %v5730_v16 = vadd.f32 %v5729_v19, %v11997_v39  ;;  %v13422_v30 = vlaneseq  ;;  %v13925_v19 = vld [vmem:[#allocation86_spill] sm:$0xff] }
 0x38f   : > { %v5667_v36 = vadd.f32 %v5666_v23, %v13919_v15 }
 0x390   : > { %v5688_v10 = vadd.f32 %v5687_v20, %v13920_v41  ;;  %v5710_v2 = vadd.f32 %v5709_v1, %v12004_v56  ;;  %v5731_v38 = vadd.f32 %v5730_v16, %v12011_v14  ;;  %v10094_v41 = vmov 1966171168   ;;  %v13927_v16 = vld [vmem:[#allocation39_spill] sm:$0xff] }
 0x391   : > { %v5668_v53 = vadd.f32 %v5667_v36, %v13921_v0  ;;  %v5753_v8 = vunpack.c.l.s4 %v10094_v41  ;;  %v13926_v36 = vld [vmem:[#allocation87_spill] sm:$0xff]  ;;  %v5756_v41 = vshrl.u32 %v13422_v30, 7  ;;  %v13932_v30 = vld [vmem:[#allocation38_spill] sm:$0xff] }
 0x392   : > { %v5689_v45 = vadd.f32 %v5688_v10, %v13922_v33  ;;  %v5711_v23 = vadd.f32 %v5710_v2, %v12018_v61  ;;  %v5732_v20 = vadd.f32 %v5731_v38, %v12025_v21 }
 0x393   : > { %v5669_v40 = vadd.f32 %v5668_v53, %v13923_v43  ;;  %v13928_v53 = vld [vmem:[#allocation88_spill] sm:$0xff]  ;;  %v5754_v38 = vunpack.c.0.s8 %v5753_v8  ;;  %v12177_v8 = vmul.f32 %v11906_v4, %v11906_v4 }
 0x394   : > { %v5690_v55 = vadd.f32 %v5689_v45, %v13924_v46  ;;  %v5712_v10 = vadd.f32 %v5711_v23, %v12032_v51  ;;  %v5733_v1 = vadd.f32 %v5732_v20, %v12039_v44  ;;  %v13929_v23 = vld [vmem:[#allocation89_spill] sm:$0xff] }
 0x395   : > { %v5670_v39 = vadd.f32 %v5669_v40, %v13925_v19  ;;  %v12165_v40 = vmul.f32 %v13907_v57, %v13907_v57  ;;  %v12181_v57 = vmul.f32 %v11913_v7, %v11913_v7  ;;  %v12191_v4 = vsub.s32 %v5754_v38, %v5756_v41  ;;  %v13935_v41 = vld [vmem:[#allocation42_spill] sm:$0xff] }
 0x396   : > { %v5691_v0 = vadd.f32 %v5690_v55, %v13926_v36  ;;  %v5713_v45 = vadd.f32 %v5712_v10, %v12046_v26  ;;  %v5734_v2 = vadd.f32 %v5733_v1, %v12053_v47  ;;  %v12169_v55 = vmul.f32 %v13909_v22, %v13909_v22  ;;  %v13931_v1 = vld [vmem:[#allocation41_spill] sm:$0xff] }
 0x397   : > { %v5671_v14 = vadd.f32 %v5670_v39, %v13927_v16  ;;  %v13930_v39 = vld [vmem:[#allocation142_spill] sm:$0xff]  ;;  %v5786_v22 = vmul.f32 %v13908_v34, %v13908_v34  ;;  %v5788_v7 = vmul.f32 %v11920_v58, %v11920_v58  ;;  %v5790_v34 = vmul.f32 %v13911_v63, %v13911_v63 }
 0x398   : > { %v5692_v43 = vadd.f32 %v5691_v0, %v13928_v53  ;;  %v5714_v0 = vadd.f32 %v5713_v45, %v12060_v29  ;;  %v5735_v10 = vadd.f32 %v5734_v2, %v12067_v18  ;;  %v5789_v29 = vmul.f32 %v11927_v60, %v11927_v60 }
 0x399   : > { %v5672_v20 = vadd.f32 %v5671_v14, %v13929_v23  ;;  %v5787_v14 = vmul.f32 %v13910_v5, %v13910_v5  ;;  %v13933_v5 = vld [vmem:[#allocation128_spill] sm:$0xff]  ;;  %v5791_v38 = vmul.f32 %v13912_v31, %v13912_v31  ;;  %v5792_v58 = vmul.f32 %v11934_v24, %v11934_v24 }
 0x39a   : > { %v5693_v16 = vadd.f32 %v5692_v43, %v13930_v39  ;;  %v5715_v2 = vadd.f32 %v5714_v0, %v12074_v12  ;;  %v5736_v18 = vadd.f32 %v5735_v10, %v12081_v17  ;;  %v5793_v60 = vmul.f32 %v11941_v13, %v11941_v13 }
 0x39b   : > { %v5673_v43 = vadd.f32 %v5672_v20, %v13931_v1  ;;  %v13934_v20 = vld [vmem:[#allocation40_spill] sm:$0xff]  ;;  %v5794_v63 = vmul.f32 %v13913_v52, %v13913_v52  ;;  %v5795_v31 = vmul.f32 %v13914_v50, %v13914_v50  ;;  %v5796_v24 = vmul.f32 %v11948_v9, %v11948_v9 }
 0x39c   : > { %v5694_v45 = vadd.f32 %v5693_v16, %v13932_v30  ;;  %v5716_v16 = vadd.f32 %v5715_v2, %v12088_v62  ;;  %v5737_v0 = vadd.f32 %v5736_v18, %v12095_v49  ;;  %v5797_v13 = vmul.f32 %v11955_v28, %v11955_v28  ;;  %v13937_v49 = vld [vmem:[#allocation91_spill] sm:$0xff] }
 0x39d   : > { %v5674_v39 = vadd.f32 %v5673_v43, %v13933_v5  ;;  %v13936_v43 = vld [vmem:[#allocation90_spill] sm:$0xff]  ;;  %v5798_v52 = vmul.f32 %v13915_v32, %v13915_v32  ;;  %v5799_v50 = vmul.f32 %v13916_v35, %v13916_v35  ;;  %v5800_v9 = vmul.f32 %v11962_v37, %v11962_v37 }
 0x39e   : > { %v5695_v1 = vadd.f32 %v5694_v45, %v13934_v20  ;;  %v5717_v2 = vadd.f32 %v5716_v16, %v12100_v54  ;;  %v5738_v18 = vadd.f32 %v5737_v0, %v12105_v11  ;;  %v5801_v28 = vmul.f32 %v11969_v25, %v11969_v25 }
 0x39f   : > { %v5675_v10 = vadd.f32 %v5674_v39, %v13935_v41  ;;  %v13938_v41 = vld [vmem:[#allocation129_spill] sm:$0xff]  ;;  %v5802_v32 = vmul.f32 %v13917_v59, %v13917_v59  ;;  %v5805_v35 = vmul.f32 %v11983_v27, %v11983_v27  ;;  %v5806_v37 = vmul.f32 %v13919_v15, %v13919_v15 }
 0x3a0   : > { %v5696_v45 = vadd.f32 %v5695_v1, %v13936_v43  ;;  %v5718_v16 = vadd.f32 %v5717_v2, %v12109_v6  ;;  %v5739_v0 = vadd.f32 %v5738_v18, %v12113_v42  ;;  %v5803_v2 = vmul.f32 %v13918_v3, %v13918_v3  ;;  %v13940_v43 = vld [vmem:[#allocation63_spill] sm:$0xff]  ;;  %v13941_v3 = vld [vmem:[#allocation102_spill] sm:$0xff] }
 0x3a1   : > { %v5676_v39 = vadd.f32 %v5675_v10, %v13937_v49  ;;  %v5804_v18 = vmul.f32 %v11976_v48, %v11976_v48  ;;  %v5808_v62 = vmul.f32 %v13940_v43, %v13940_v43  ;;  %v5809_v20 = vmul.f32 %v13941_v3, %v13941_v3  ;;  %v13942_v48 = vld [vmem:[#allocation82_spill] sm:$0xff] }
 0x3a2   : > { %v5697_v1 = vadd.f32 %v5696_v45, %v13938_v41  ;;  %v5719_v49 = vrot.slane %v5718_v16, 4  ;;  %v5740_v45 = vrot.slane %v5739_v0, 4  ;;  %v13939_v41 = vld [vmem:[#allocation81_spill] sm:$0xff]  ;;  %v5810_v5 = vmul.f32 %v13942_v48, %v13942_v48 }
 0x3a3   : > { %v5677_v11 = vrot.slane %v5676_v39, 4  ;;  %v5807_v54 = vmul.f32 %v13939_v41, %v13939_v41  ;;  %v13943_v41 = vld [vmem:[#allocation103_spill] sm:$0xff]  ;;  %v5846_v43 = vadd.f32 %v5786_v22, %v12165_v40  ;;  %v5867_v3 = vadd.f32 %v5787_v14, %v12169_v55 }
 0x3a4   : > { %v5698_v10 = vrot.slane %v5697_v1, 4  ;;  %v5720_v6 = vadd.f32 %v5719_v49, %v5718_v16  ;;  %v5741_v59 = vadd.f32 %v5740_v45, %v5739_v0  ;;  %v5811_v49 = vmul.f32 %v13922_v33, %v13922_v33 }
 0x3a5   : > { %v5678_v25 = vadd.f32 %v5677_v11, %v5676_v39  ;;  %v5812_v11 = vmul.f32 %v12004_v56, %v12004_v56  ;;  %v5813_v39 = vmul.f32 %v13943_v41, %v13943_v41  ;;  %v5847_v45 = vadd.f32 %v5846_v43, %v5790_v34  ;;  %v13947_v34 = vld [vmem:[#allocation84_spill] sm:$0xff] }
 0x3a6   : > { %v5699_v42 = vadd.f32 %v5698_v10, %v5697_v1  ;;  %v5721_v12 = vrot.slane %v5720_v6, 2  ;;  %v5742_v15 = vrot.slane %v5741_v59, 2  ;;  %v5888_v48 = vadd.f32 %v5788_v7, %v12177_v8 }
 0x3a7   : > { %v5679_v27 = vrot.slane %v5678_v25, 2  ;;  %v5909_v30 = vadd.f32 %v5789_v29, %v12181_v57  ;;  %v5848_v26 = vadd.f32 %v5847_v45, %v5794_v63  ;;  %v5868_v53 = vadd.f32 %v5867_v3, %v5791_v38 }
 0x3a8   : > { %v5700_v17 = vrot.slane %v5699_v42, 2  ;;  %v5722_v0 = vadd.f32 %v5721_v12, %v5720_v6  ;;  %v5743_v10 = vadd.f32 %v5742_v15, %v5741_v59  ;;  %v5889_v41 = vadd.f32 %v5888_v48, %v5792_v58 }
 0x3a9   : > { %v5680_v1 = vadd.f32 %v5679_v27, %v5678_v25  ;;  %v5910_v44 = vadd.f32 %v5909_v30, %v5793_v60  ;;  %v13944_v6 = vlaneseq  ;;  %v5849_v55 = vadd.f32 %v5848_v26, %v5798_v52 }
 0x3aa   : > { %v5701_v16 = vadd.f32 %v5700_v17, %v5699_v42  ;;  %v5723_v47 = vrot.slane %v5722_v0, 1  ;;  %v5744_v56 = vrot.slane %v5743_v10, 1  ;;  %v5869_v8 = vadd.f32 %v5868_v53, %v5795_v31 }
 0x3ab   : > { %v5681_v33 = vrot.slane %v5680_v1, 1  ;;  %vm12262_vm1 = vcmp.lt.s32.totalorder %v13944_v6, 512  ;;  %v5890_v29 = vadd.f32 %v5889_v41, %v5796_v24  ;;  %v5911_v57 = vadd.f32 %v5910_v44, %v5797_v13  ;;  %v13956_v41 = vld [vmem:[#allocation105_spill] sm:$0xff] }
 0x3ac   : > { %v5702_v23 = vrot.slane %v5701_v16, 1  ;;  %v5724_v17 = vadd.f32 %v5723_v47, %v5722_v0  ;;  %v5745_v12 = vadd.f32 %v5744_v56, %v5743_v10  ;;  %v5814_v38 = vmul.f32 %v13947_v34, %v13947_v34  ;;  %v13953_v0 = vld [vmem:[#allocation89_spill] sm:$0xff]  ;;  %v13960_v34 = vld [vmem:[#allocation106_spill] sm:$0xff] }
 0x3ad   : > { %v5682_v40 = vadd.f32 %v5681_v33, %v5680_v1  ;;  %v5815_v30 = vmul.f32 %v13924_v46, %v13924_v46  ;;  %v5870_v47 = vadd.f32 %v5869_v8, %v5799_v50  ;;  %v5891_v58 = vadd.f32 %v5890_v29, %v5800_v9  ;;  %v13958_v29 = vld [vmem:[#allocation38_spill] sm:$0xff] }
 0x3ae   : > { %v5703_v22 = vadd.f32 %v5702_v23, %v5701_v16  ;;  %v5751_v7 = vcombine.low %v5724_v17, %v5745_v12  ;;  %v5850_v23 = vadd.f32 %v5849_v55, %v5802_v32  ;;  %v5912_v60 = vadd.f32 %v5911_v57, %v5801_v28  ;;  %v5661_v28 = vld [vmem:[#allocation5] sm:$0xf] }
 0x3af   : > { %v5816_v26 = vmul.f32 %v12018_v61, %v12018_v61  ;;  %v5817_v44 = vmul.f32 %v12025_v21, %v12025_v21  ;;  %v5871_v31 = vadd.f32 %v5870_v47, %v5803_v2  ;;  %v5892_v24 = vadd.f32 %v5891_v58, %v5804_v18  ;;  %v13948_v2 = vld [vmem:[#allocation37_spill] sm:$0xff] }
 0x3b0   : > { %v5750_v14 = vcombine.low %v5682_v40, %v5703_v22  ;;  %v5765_v25 = vrot.slane %v5751_v7, %v12191_v4  ;;  %v5851_v53 = vadd.f32 %v5850_v23, %v5806_v37  ;;  %v5913_v13 = vadd.f32 %v5912_v60, %v5805_v35  ;;  %v13949_v35 = vld [vmem:[#allocation39_spill] sm:$0xff]  ;;  %v13957_v22 = vld [vmem:[#allocation41_spill] sm:$0xff] }
 0x3b1   : > { %v5818_v46 = vmul.f32 %v13925_v19, %v13925_v19  ;;  %v5819_v50 = vmul.f32 %v13926_v36, %v13926_v36  ;;  %v5820_v9 = vmul.f32 %v12032_v51, %v12032_v51  ;;  %v5872_v61 = vadd.f32 %v5871_v31, %v5807_v54  ;;  %v13950_v19 = vld [vmem:[#allocation88_spill] sm:$0xff]  ;;  %v13952_v54 = vld [vmem:[#allocation65_spill] sm:$0xff] }
 0x3b2   : > { %v5758_v63 = vrot.slane %v5750_v14, %v12191_v4  ;;  %v5852_v32 = vadd.f32 %v5851_v53, %v5810_v5  ;;  %v5893_v59 = vadd.f32 %v5892_v24, %v5808_v62  ;;  %v5914_v27 = vadd.f32 %v5913_v13, %v5809_v20  ;;  %v13951_v5 = vld [vmem:[#allocation66_spill] sm:$0xff]  ;;  %v13959_v14 = vld [vmem:[#allocation67_spill] sm:$0xff]  ;;  %v13964_v31 = vld [vmem:[#allocation108_spill] sm:$0xff] }
 0x3b3   : > { %v5821_v18 = vmul.f32 %v13948_v2, %v13948_v2  ;;  %v5822_v37 = vmul.f32 %v13949_v35, %v13949_v35  ;;  %v5823_v15 = vmul.f32 %v13950_v19, %v13950_v19  ;;  %v5873_v43 = vadd.f32 %v5872_v61, %v5811_v49  ;;  %v13954_v49 = vld [vmem:[#allocation142_spill] sm:$0xff] }
 0x3b4   : > { %v5766_v52 = vcombine.low %v5758_v63, %v5765_v25  ;;  %v5853_v36 = vadd.f32 %v5852_v32, %v5814_v38  ;;  %v5894_v1 = vadd.f32 %v5893_v59, %v5812_v11  ;;  %v5915_v51 = vadd.f32 %v5914_v27, %v5813_v39  ;;  %v13955_v39 = vld [vmem:[#allocation104_spill] sm:$0xff]  ;;  %v13965_v13 = vld [vmem:[#allocation42_spill] sm:$0xff]  ;;  %v13967_v59 = vld [vmem:[#allocation109_spill] sm:$0xff] }
 0x3b5   : > { %v5824_v62 = vmul.f32 %v13951_v5, %v13951_v5  ;;  %v5825_v20 = vmul.f32 %v13952_v54, %v13952_v54  ;;  %v5826_v10 = vmul.f32 %v13953_v0, %v13953_v0  ;;  %v5874_v3 = vadd.f32 %v5873_v43, %v5815_v30  ;;  %v13961_v30 = vld [vmem:[#allocation128_spill] sm:$0xff]  ;;  %v13966_v32 = vld [vmem:[#allocation90_spill] sm:$0xff]  ;;  %v13970_v43 = vld [vmem:[#allocation129_spill] sm:$0xff] }
 0x3b6   : > { %v5773_v21 = vrot.slane %v5766_v52, %v12191_v4  ;;  %v5854_v45 = vadd.f32 %v5853_v36, %v5818_v46  ;;  %v5895_v48 = vadd.f32 %v5894_v1, %v5816_v26  ;;  %v5916_v33 = vadd.f32 %v5915_v51, %v5817_v44  ;;  %v13962_v25 = vld [vmem:[#allocation40_spill] sm:$0xff]  ;;  %v13963_v44 = vld [vmem:[#allocation107_spill] sm:$0xff] }
 0x3b7   : > { %v5827_v11 = vmul.f32 %v13954_v49, %v13954_v49  ;;  %v5828_v56 = vmul.f32 %v13955_v39, %v13955_v39  ;;  %v5829_v40 = vmul.f32 %v13956_v41, %v13956_v41  ;;  %v5830_v17 = vmul.f32 %v13957_v22, %v13957_v22  ;;  %v13971_v51 = vld [vmem:[#allocation111_spill] sm:$0xff]  ;;  %v13972_v5 = vld [vmem:[#allocation112_spill] sm:$0xff] }
 0x3b8   : > { %v5775_v16 = vadd.f32 %v5773_v21, %v5661_v28  ;;  %v5855_v12 = vadd.f32 %v5854_v45, %v5822_v37  ;;  %v5875_v6 = vadd.f32 %v5874_v3, %v5819_v50  ;;  %v5896_v55 = vadd.f32 %v5895_v48, %v5820_v9  ;;  %v13968_v21 = vld [vmem:[#allocation110_spill] sm:$0xff] }
 0x3b9   : > { %v5917_v8 = vadd.f32 %v5916_v33, %v5821_v18  ;;  %v5831_v57 = vmul.f32 %v13958_v29, %v13958_v29  ;;  %v5832_v7 = vmul.f32 %v13959_v14, %v13959_v14  ;;  %v5833_v38 = vmul.f32 %v13960_v34, %v13960_v34  ;;  %v13969_v18 = vld [vmem:[#allocation91_spill] sm:$0xff] }
 0x3ba   : > { %5780 = vst.msk [vmem:[#allocation5] sm:$0xf] %vm12262_vm1, %v5775_v16  ;;  %v5834_v23 = vmul.f32 %v13961_v30, %v13961_v30  ;;  %v5856_v47 = vadd.f32 %v5855_v12, %v5826_v10  ;;  %v5876_v58 = vadd.f32 %v5875_v6, %v5823_v15  ;;  %v5897_v60 = vadd.f32 %v5896_v55, %v5824_v62 }
 0x3bb   : > { %v5918_v63 = vadd.f32 %v5917_v8, %v5825_v20  ;;  %v5835_v26 = vmul.f32 %v13962_v25, %v13962_v25  ;;  %v5836_v53 = vmul.f32 %v13963_v44, %v13963_v44  ;;  %v5837_v24 = vmul.f32 %v13964_v31, %v13964_v31 }
 0x3bc   : > { %v5838_v52 = vmul.f32 %v13965_v13, %v13965_v13  ;;  %v5857_v46 = vadd.f32 %v5856_v47, %v5830_v17  ;;  %v5877_v50 = vadd.f32 %v5876_v58, %v5827_v11  ;;  %v5898_v9 = vadd.f32 %v5897_v60, %v5828_v56 }
 0x3bd   : > { %v5919_v28 = vadd.f32 %v5918_v63, %v5829_v40  ;;  %v5839_v61 = vmul.f32 %v13966_v32, %v13966_v32  ;;  %v5840_v27 = vmul.f32 %v13967_v59, %v13967_v59  ;;  %v5841_v2 = vmul.f32 %v13968_v21, %v13968_v21 }
 0x3be   : > { %v5842_v35 = vmul.f32 %v13969_v18, %v13969_v18  ;;  %v5858_v37 = vadd.f32 %v5857_v46, %v5834_v23  ;;  %v5878_v19 = vadd.f32 %v5877_v50, %v5831_v57  ;;  %v5899_v15 = vadd.f32 %v5898_v9, %v5832_v7  ;;  %v5781_v46 = vld [vmem:[#allocation6] sm:$0xf] }
 0x3bf   : > { %v5920_v36 = vadd.f32 %v5919_v28, %v5833_v38  ;;  %v5843_v1 = vmul.f32 %v13970_v43, %v13970_v43  ;;  %v5844_v16 = vmul.f32 %v13971_v51, %v13971_v51  ;;  %v5845_v62 = vmul.f32 %v13972_v5, %v13972_v5 }
 0x3c0   : > { %v5859_v54 = vadd.f32 %v5858_v37, %v5838_v52  ;;  %v5879_v20 = vadd.f32 %v5878_v19, %v5835_v26  ;;  %v5900_v0 = vadd.f32 %v5899_v15, %v5836_v53 }
 0x3c1   : > { %v5921_v10 = vadd.f32 %v5920_v36, %v5837_v24 }
 0x3c2   : > { %v5860_v45 = vadd.f32 %v5859_v54, %v5842_v35  ;;  %v5880_v3 = vadd.f32 %v5879_v20, %v5839_v61  ;;  %v5901_v48 = vadd.f32 %v5900_v0, %v5840_v27 }
 0x3c3   : > { %v5922_v33 = vadd.f32 %v5921_v10, %v5841_v2 }
 0x3c4   : > { %v5861_v49 = vrot.slane %v5860_v45, 4  ;;  %v5881_v11 = vadd.f32 %v5880_v3, %v5843_v1  ;;  %v5902_v39 = vadd.f32 %v5901_v48, %v5844_v16 }
 0x3c5   : > { %v5923_v56 = vadd.f32 %v5922_v33, %v5845_v62 }
 0x3c6   : > { %v5862_v41 = vadd.f32 %v5861_v49, %v5860_v45  ;;  %v5882_v40 = vrot.slane %v5881_v11, 4  ;;  %v5903_v22 = vrot.slane %v5902_v39, 4 }
 0x3c7   : > { %v5924_v17 = vrot.slane %v5923_v56, 4 }
 0x3c8   : > { %v5863_v12 = vrot.slane %v5862_v41, 2  ;;  %v5883_v6 = vadd.f32 %v5882_v40, %v5881_v11  ;;  %v5904_v55 = vadd.f32 %v5903_v22, %v5902_v39 }
 0x3c9   : > { %v5925_v8 = vadd.f32 %v5924_v17, %v5923_v56 }
 0x3ca   : > { %v5864_v29 = vadd.f32 %v5863_v12, %v5862_v41  ;;  %v5884_v57 = vrot.slane %v5883_v6, 2  ;;  %v5905_v14 = vrot.slane %v5904_v55, 2 }
 0x3cb   : > { %v5926_v7 = vrot.slane %v5925_v8, 2 }
 0x3cc   : > { %v5865_v34 = vrot.slane %v5864_v29, 1  ;;  %v5885_v38 = vadd.f32 %v5884_v57, %v5883_v6  ;;  %v5906_v30 = vadd.f32 %v5905_v14, %v5904_v55 }
 0x3cd   : > { %v5927_v23 = vadd.f32 %v5926_v7, %v5925_v8 }
 0x3ce   : > { %v5866_v47 = vadd.f32 %v5865_v34, %v5864_v29  ;;  %v5886_v58 = vrot.slane %v5885_v38, 1  ;;  %v5907_v60 = vrot.slane %v5906_v30, 1 }
 0x3cf   : > { %v5928_v63 = vrot.slane %v5927_v23, 1 }
 0x3d0   : > { %v5887_v25 = vadd.f32 %v5886_v58, %v5885_v38  ;;  %v5908_v26 = vadd.f32 %v5907_v60, %v5906_v30 }
 0x3d1   : > { %v5929_v44 = vadd.f32 %v5928_v63, %v5927_v23 }
 0x3d2   : > { %v5934_v53 = vcombine.low %v5866_v47, %v5887_v25 }
 0x3d3   : > { %v5935_v31 = vcombine.low %v5908_v26, %v5929_v44 }
 0x3d4   : > { %v5942_v24 = vrot.slane %v5934_v53, %v12191_v4 }
 0x3d5   : > { %v5949_v13 = vrot.slane %v5935_v31, %v12191_v4 }
 0x3d7   : > { %v5950_v52 = vcombine.low %v5942_v24, %v5949_v13 }
 0x3d9   : > { %v5957_v50 = vrot.slane %v5950_v52, %v12191_v4 }
 0x3db   : > { %v5959_v9 = vadd.f32 %v5957_v50, %v5781_v46 }
 0x3dd   : > { %5960 = vst.msk [vmem:[#allocation6] sm:$0xf] %vm12262_vm1, %v5959_v9 }
 0x3de PF: > { %p8562_p12 = scmp.ne.s32.totalorder %s10070_s25, 1 }
 0x3df   : > { %s5980_s12 = sshra.s32 (!%p8562_p12), %s10321_s11, 3  ;;  %p8631_p2 = scmp.ne.s32.totalorder (!%p8562_p12), %s10066_s24, 0 }
 0x3e0   : > { %5964 = sbr.rel (%p8562_p12) target bundleno = 1377 (0x561), region = 68  ;;  %s8676_s15 = sshll.u32 (!%p8562_p12), %s5980_s12, 5 }
 0x3e1   : > { %s12355_s21 = scalar_lea.vmem (!%p8562_p12), [#allocation2], %s8676_s15  ;;  %s8677_s17 = sshll.u32 (!%p8562_p12), %s5980_s12, 4 }
 0x3e2   : > { %s12570_s4 = scalar_lea.vmem (!%p8562_p12), [#allocation3], %s8677_s17 }
 0x3e5   : > { %v9725_v28 = vld [vmem:[#allocation16 + $0x74] ss:$8 sps:$4 sm:$0xff]   ;;  %v9729_v61 = vld [vmem:[#allocation16 + $0x70] ss:$8 sps:$4 sm:$0xff]   ;;  %v9731_v27 = vld [vmem:[#allocation16 + $0x64] ss:$8 sps:$4 sm:$0xff]  }
 0x3e6   : > { %v9727_v32 = vld [vmem:[#allocation16 + $0x174] ss:$8 sps:$4 sm:$0xff]   ;;  %6699 = vmatprep.subr.bf16.mxu0 %v9725_v28  ;;  %v9730_v59 = vld [vmem:[#allocation16 + $0x170] ss:$8 sps:$4 sm:$0xff]   ;;  %v9733_v21 = vld [vmem:[#allocation16 + $0x164] ss:$8 sps:$4 sm:$0xff]  }
 0x3e7   : > { %6812 = vmatprep.subr.bf16.mxu1 %v9727_v32  ;;  %6700 = vmatpush1.bf16.msra.mxu0 %v9729_v61  ;;  %v9735_v2 = vld [vmem:[#allocation16 + $0x60] ss:$8 sps:$4 sm:$0xff]   ;;  %v9737_v42 = vld [vmem:[#allocation16 + $0x54] ss:$8 sps:$4 sm:$0xff]   ;;  %v9741_v35 = vld [vmem:[#allocation16 + $0x50] ss:$8 sps:$4 sm:$0xff]  }
 0x3e8   : > { %6813 = vmatpush1.bf16.msra.mxu1 %v9730_v59  ;;  %6701 = vmatprep.subr.bf16.mxu0 %v9731_v27  ;;  %v9736_v4 = vld [vmem:[#allocation16 + $0x160] ss:$8 sps:$4 sm:$0xff]   ;;  %v9739_v18 = vld [vmem:[#allocation16 + $0x154] ss:$8 sps:$4 sm:$0xff]   ;;  %v9742_v37 = vld [vmem:[#allocation16 + $0x150] ss:$8 sps:$4 sm:$0xff]  }
 0x3e9   : > { %6814 = vmatprep.subr.bf16.mxu1 %v9733_v21  ;;  %v9743_v19 = vld [vmem:[#allocation16 + $0x44] ss:$8 sps:$4 sm:$0xff]   ;;  %v9747_v36 = vld [vmem:[#allocation16 + $0x40] ss:$8 sps:$4 sm:$0xff]   ;;  %v9749_v1 = vld [vmem:[#allocation16 + $0x34] ss:$8 sps:$4 sm:$0xff]  }
 0x3ea   : > { %v9745_v15 = vld [vmem:[#allocation16 + $0x144] ss:$8 sps:$4 sm:$0xff]   ;;  %v9748_v43 = vld [vmem:[#allocation16 + $0x140] ss:$8 sps:$4 sm:$0xff]   ;;  %v9751_v51 = vld [vmem:[#allocation16 + $0x134] ss:$8 sps:$4 sm:$0xff]  }
 0x3eb   : > { %6702 = vmatpush1.bf16.msra.mxu0 %v9735_v2  ;;  %v9753_v16 = vld [vmem:[#allocation16 + $0x30] ss:$8 sps:$4 sm:$0xff]   ;;  %v9755_v62 = vld [vmem:[#allocation16 + $0x24] ss:$8 sps:$4 sm:$0xff]   ;;  %v9759_v20 = vld [vmem:[#allocation16 + $0x20] ss:$8 sps:$4 sm:$0xff]   ;;  %v6050_v2 = vlaneseq }
 0x3ec   : > { %6815 = vmatpush1.bf16.msra.mxu1 %v9736_v4  ;;  %6703 = vmatprep.subr.bf16.mxu0 %v9737_v42  ;;  %v9754_v5 = vld [vmem:[#allocation16 + $0x130] ss:$8 sps:$4 sm:$0xff]   ;;  %v9757_v54 = vld [vmem:[#allocation16 + $0x124] ss:$8 sps:$4 sm:$0xff]   ;;  %v9760_v0 = vld [vmem:[#allocation16 + $0x120] ss:$8 sps:$4 sm:$0xff]  }
 0x3ed   : > { %6816 = vmatprep.subr.bf16.mxu1 %v9739_v18  ;;  %v9761_v10 = vld [vmem:[#allocation16 + $0x14] ss:$8 sps:$4 sm:$0xff]   ;;  %v9765_v3 = vld [vmem:[#allocation16 + $0x10] ss:$8 sps:$4 sm:$0xff]   ;;  %v9767_v33 = vld [vmem:[#allocation16 + $0x4] ss:$8 sps:$4 sm:$0xff]  }
 0x3ee   : > { %v9763_v45 = vld [vmem:[#allocation16 + $0x114] ss:$8 sps:$4 sm:$0xff]   ;;  %v9766_v48 = vld [vmem:[#allocation16 + $0x110] ss:$8 sps:$4 sm:$0xff]   ;;  %v9769_v49 = vld [vmem:[#allocation16 + $0x104] ss:$8 sps:$4 sm:$0xff]  }
 0x3ef   : > { %6704 = vmatpush1.bf16.msra.mxu0 %v9741_v35  ;;  %v9771_v11 = vld [vmem:[#allocation16] ss:$8 sps:$4 sm:$0xff]   ;;  %v9773_v56 = vld [vmem:[#allocation16 + $0xf4] ss:$8 sps:$4 sm:$0xff]   ;;  %v9777_v40 = vld [vmem:[#allocation16 + $0xf0] ss:$8 sps:$4 sm:$0xff]  }
 0x3f0   : > { %6817 = vmatpush1.bf16.msra.mxu1 %v9742_v37  ;;  %6705 = vmatprep.subr.bf16.mxu0 %v9743_v19  ;;  %v9772_v39 = vld [vmem:[#allocation16 + $0x100] ss:$8 sps:$4 sm:$0xff]   ;;  %v9775_v41 = vld [vmem:[#allocation16 + $0x1f4] ss:$8 sps:$4 sm:$0xff]   ;;  %v9778_v22 = vld [vmem:[#allocation16 + $0x1f0] ss:$8 sps:$4 sm:$0xff]  }
 0x3f1   : > { %6818 = vmatprep.subr.bf16.mxu1 %v9745_v15  ;;  %v9779_v17 = vld [vmem:[#allocation16 + $0xe4] ss:$8 sps:$4 sm:$0xff]   ;;  %v9783_v6 = vld [vmem:[#allocation16 + $0xe0] ss:$8 sps:$4 sm:$0xff]   ;;  %v9785_v8 = vld [vmem:[#allocation16 + $0xd4] ss:$8 sps:$4 sm:$0xff]  }
 0x3f2   : > { %v9781_v12 = vld [vmem:[#allocation16 + $0x1e4] ss:$8 sps:$4 sm:$0xff]   ;;  %v9784_v55 = vld [vmem:[#allocation16 + $0x1e0] ss:$8 sps:$4 sm:$0xff]   ;;  %v9787_v29 = vld [vmem:[#allocation16 + $0x1d4] ss:$8 sps:$4 sm:$0xff]  }
 0x3f3   : > { %6706 = vmatpush1.bf16.msra.mxu0 %v9747_v36  ;;  %v9789_v57 = vld [vmem:[#allocation16 + $0xd0] ss:$8 sps:$4 sm:$0xff]   ;;  %v9791_v7 = vld [vmem:[#allocation16 + $0xc4] ss:$8 sps:$4 sm:$0xff]   ;;  %v9795_v47 = vld [vmem:[#allocation16 + $0xc0] ss:$8 sps:$4 sm:$0xff]  }
 0x3f4   : > { %6819 = vmatpush1.bf16.msra.mxu1 %v9748_v43  ;;  %6707 = vmatprep.subr.bf16.mxu0 %v9749_v1  ;;  %v9790_v14 = vld [vmem:[#allocation16 + $0x1d0] ss:$8 sps:$4 sm:$0xff]   ;;  %v9793_v34 = vld [vmem:[#allocation16 + $0x1c4] ss:$8 sps:$4 sm:$0xff]   ;;  %v9796_v58 = vld [vmem:[#allocation16 + $0x1c0] ss:$8 sps:$4 sm:$0xff]  }
 0x3f5   : > { %6820 = vmatprep.subr.bf16.mxu1 %v9751_v51  ;;  %v5965_v38 = vld [vmem:[#allocation5] sm:$0xf]  ;;  %v5966_v30 = vld [vmem:[#allocation6] sm:$0xf]  ;;  %v9803_v24 = vld [vmem:[#allocation16 + $0xa4] ss:$8 sps:$4 sm:$0xff]  }
 0x3f6   : > { %v12341_v23 = vmul.f32 0.00390625, %v5965_v38  ;;  %v5971_v60 = vmul.f32 0.00390625, %v5966_v30  ;;  %v9797_v63 = vld [vmem:[#allocation16 + $0xb4] ss:$8 sps:$4 sm:$0xff]   ;;  %v9801_v53 = vld [vmem:[#allocation16 + $0xb0] ss:$8 sps:$4 sm:$0xff]  }
 0x3f7   : > { %6708 = vmatpush1.bf16.msra.mxu0 %v9753_v16  ;;  %v9799_v25 = vld [vmem:[#allocation16 + $0x1b4] ss:$8 sps:$4 sm:$0xff]   ;;  %v9802_v31 = vld [vmem:[#allocation16 + $0x1b0] ss:$8 sps:$4 sm:$0xff]   ;;  %v9805_v13 = vld [vmem:[#allocation16 + $0x1a4] ss:$8 sps:$4 sm:$0xff]  }
 0x3f8   : > { %6821 = vmatpush1.bf16.msra.mxu1 %v9754_v5  ;;  %6709 = vmatprep.subr.bf16.mxu0 %v9755_v62  ;;  %v5972_v26 = vmul.f32 %v12341_v23, %v12341_v23  ;;  %v9807_v50 = vld [vmem:[#allocation16 + $0xa0] ss:$8 sps:$4 sm:$0xff]   ;;  %v9809_v28 = vld [vmem:[#allocation16 + $0x94] ss:$8 sps:$4 sm:$0xff]   ;;  %v9813_v61 = vld [vmem:[#allocation16 + $0x90] ss:$8 sps:$4 sm:$0xff]  }
 0x3f9   : > { %6822 = vmatprep.subr.bf16.mxu1 %v9757_v54  ;;  %v9808_v9 = vld [vmem:[#allocation16 + $0x1a0] ss:$8 sps:$4 sm:$0xff]   ;;  %v9811_v32 = vld [vmem:[#allocation16 + $0x194] ss:$8 sps:$4 sm:$0xff]   ;;  %v9814_v59 = vld [vmem:[#allocation16 + $0x190] ss:$8 sps:$4 sm:$0xff]  }
 0x3fa   : > { %v5973_v44 = vsub.f32 %v5971_v60, %v5972_v26  ;;  %v9815_v27 = vld [vmem:[#allocation16 + $0x84] ss:$8 sps:$4 sm:$0xff]   ;;  %v9819_v4 = vld [vmem:[#allocation16 + $0x80] ss:$8 sps:$4 sm:$0xff]   ;;  %v12349_v18 = vshrl.u32 %v6050_v2, 7 }
 0x3fb   : > { %6710 = vmatpush1.bf16.msra.mxu0 %v9759_v20  ;;  %v9817_v21 = vld [vmem:[#allocation16 + $0x184] ss:$8 sps:$4 sm:$0xff]   ;;  %v9820_v42 = vld [vmem:[#allocation16 + $0x180] ss:$8 sps:$4 sm:$0xff]  }
 0x3fc   : > { %6823 = vmatpush1.bf16.msra.mxu1 %v9760_v0  ;;  %6711 = vmatprep.subr.bf16.mxu0 %v9761_v10  ;;  %v5974_v52 = vmax.f32 %v5973_v44, 0.0  ;;  %v5967_v35 = vld [vmem:[#allocation17] ss:$8 sm:$0xf]  ;;  %v6056_v37 = vsub.s32 1, %v12349_v18  ;;  %v6064_v19 = vsub.s32 3, %v12349_v18 }
 0x3fd   : > { %6824 = vmatprep.subr.bf16.mxu1 %v9763_v45  ;;  %v6052_v15 = vsub.s32 0, %v12349_v18  ;;  %v6060_v43 = vsub.s32 2, %v12349_v18  ;;  %v5969_v1 = vld [vmem:[#allocation17 + $0x1] ss:$8 sm:$0xf] }
 0x3fe   : > { %v5975_v46 = vadd.f32 1e-05, %v5974_v52  ;;  %v5986_v16 = vld [vmem:[%s12355_s21 + $0x8] sm:$0xff]  ;;  %v5988_v62 = vld [vmem:[%s12355_s21 + $0x18] sm:$0xff]  ;;  %v5985_v45 = vld [vmem:[%s12355_s21] sm:$0xff] }
 0x3ff   : > { %6712 = vmatpush1.bf16.msra.mxu0 %v9765_v3  ;;  %v5990_v5 = vld [vmem:[%s12355_s21 + $0x28] sm:$0xff]  ;;  %v5992_v54 = vld [vmem:[%s12355_s21 + $0x38] sm:$0xff]  ;;  %v5989_v3 = vld [vmem:[%s12355_s21 + $0x20] sm:$0xff] }
 0x400   : > { %6825 = vmatpush1.bf16.msra.mxu1 %v9766_v48  ;;  %6713 = vmatprep.subr.bf16.mxu0 %v9767_v33  ;;  %9821 = vrsqrt.f32 %v5975_v46  ;;  %v5987_v33 = vld [vmem:[%s12355_s21 + $0x10] sm:$0xff] }
 0x401   : > { %6826 = vmatprep.subr.bf16.mxu1 %v9769_v49  ;;  %v5991_v49 = vld [vmem:[%s12355_s21 + $0x30] sm:$0xff] }
 0x403   : > { %6714 = vmatpush1.bf16.msra.mxu0 %v9771_v11 }
 0x404   : > { %6827 = vmatpush1.bf16.msra.mxu1 %v9772_v39  ;;  %6715 = vmatprep.subr.bf16.mxu0 %v9773_v56 }
 0x405   : > { %6828 = vmatprep.subr.bf16.mxu1 %v9775_v41 }
 0x407   : > { %6716 = vmatpush2.bf16.msra.mxu0 %v9777_v40 }
 0x408   : > { %6829 = vmatpush2.bf16.msra.mxu1 %v9778_v22  ;;  %6717 = vmatprep.subr.bf16.mxu0 %v9779_v17  ;;  %v5994_v22 = vld [vmem:[%s12355_s21 + $0x48] sm:$0xff] }
 0x409   : > { %6830 = vmatprep.subr.bf16.mxu1 %v9781_v12  ;;  %v5998_v17 = vld [vmem:[%s12355_s21 + $0x68] sm:$0xff]  ;;  %v5996_v12 = vld [vmem:[%s12355_s21 + $0x58] sm:$0xff] }
 0x40b   : > { %6718 = vmatpush2.bf16.msra.mxu0 %v9783_v6 }
 0x40c   : > { %6831 = vmatpush2.bf16.msra.mxu1 %v9784_v55  ;;  %6719 = vmatprep.subr.bf16.mxu0 %v9785_v8 }
 0x40d   : > { %6832 = vmatprep.subr.bf16.mxu1 %v9787_v29  ;;  %v9822_v36 = vpop.eup %9821 }
 0x40e   : > { %v5977_v51 = vmul.f32 %v9822_v36, %v5967_v35 }
 0x40f   : > { %6720 = vmatpush2.bf16.msra.mxu0 %v9789_v57 }
 0x410   : > { %6833 = vmatpush2.bf16.msra.mxu1 %v9790_v14  ;;  %6721 = vmatprep.subr.bf16.mxu0 %v9791_v7  ;;  %v5978_v20 = vmul.f32 %v5977_v51, %v12341_v23  ;;  %v12362_v0 = vrot.slane %v5977_v51, %v6056_v37  ;;  %v12364_v10 = vrot.slane %v5977_v51, %v6064_v19 }
 0x411   : > { %6834 = vmatprep.subr.bf16.mxu1 %v9793_v34  ;;  %v12368_v48 = vrot.slane %v5977_v51, %v6052_v15  ;;  %v12372_v11 = vrot.slane %v5977_v51, %v6060_v43  ;;  %v6002_v51 = vld [vmem:[%s12355_s21 + $0x88] sm:$0xff] }
 0x412   : > { %v5979_v39 = vsub.f32 %v5969_v1, %v5978_v20  ;;  %v6071_v56 = vmul.f32 %v12362_v0, %v5986_v16  ;;  %v6075_v41 = vmul.f32 %v12362_v0, %v5990_v5  ;;  %v6073_v40 = vmul.f32 %v12364_v10, %v5988_v62  ;;  %v6006_v20 = vld [vmem:[%s12355_s21 + $0xa8] sm:$0xff] }
 0x413   : > { %6722 = vmatpush2.bf16.msra.mxu0 %v9795_v47  ;;  %v6077_v6 = vmul.f32 %v12364_v10, %v5992_v54  ;;  %v6070_v55 = vmul.f32 %v12368_v48, %v5985_v45  ;;  %v6074_v8 = vmul.f32 %v12368_v48, %v5989_v3  ;;  %v6072_v29 = vmul.f32 %v12372_v11, %v5987_v33 }
 0x414   : > { %6835 = vmatpush2.bf16.msra.mxu1 %v9796_v58  ;;  %6723 = vmatprep.subr.bf16.mxu0 %v9797_v63  ;;  %v12384_v57 = vrot.slane %v5979_v39, %v6056_v37  ;;  %v12386_v14 = vrot.slane %v5979_v39, %v6064_v19  ;;  %v12388_v7 = vrot.slane %v5979_v39, %v6052_v15  ;;  %v5995_v37 = vld [vmem:[%s12355_s21 + $0x50] sm:$0xff] }
 0x415   : > { %6836 = vmatprep.subr.bf16.mxu1 %v9799_v25  ;;  %v6076_v34 = vmul.f32 %v12372_v11, %v5991_v49  ;;  %v12391_v38 = vrot.slane %v5979_v39, %v6060_v43  ;;  %v6079_v30 = vmul.f32 %v12362_v0, %v5994_v22  ;;  %v6083_v23 = vmul.f32 %v12362_v0, %v5998_v17  ;;  %v5999_v19 = vld [vmem:[%s12355_s21 + $0x70] sm:$0xff]  ;;  %v6004_v39 = vld [vmem:[%s12355_s21 + $0x98] sm:$0xff] }
 0x416   : > { %v6081_v47 = vmul.f32 %v12364_v10, %v5996_v12  ;;  %v6156_v58 = vadd.f32 %v12384_v57, %v6071_v56  ;;  %v6160_v60 = vadd.f32 %v12384_v57, %v6075_v41  ;;  %v6158_v63 = vadd.f32 %v12386_v14, %v6073_v40 }
 0x417   : > { %6724 = vmatpush2.bf16.msra.mxu0 %v9801_v53  ;;  %v6162_v25 = vadd.f32 %v12386_v14, %v6077_v6  ;;  %v6155_v26 = vadd.f32 %v12388_v7, %v6070_v55  ;;  %v6159_v44 = vadd.f32 %v12388_v7, %v6074_v8  ;;  %v6157_v53 = vadd.f32 %v12391_v38, %v6072_v29  ;;  %v6008_v8 = vld [vmem:[%s12355_s21 + $0xb8] sm:$0xff] }
 0x418   : > { %6837 = vmatpush2.bf16.msra.mxu1 %v9802_v31  ;;  %6725 = vmatprep.subr.bf16.mxu0 %v9803_v24  ;;  %v6161_v31 = vadd.f32 %v12391_v38, %v6076_v34  ;;  %v6220_v24 = vmax.f32 %v6156_v58, 0.0  ;;  %v6222_v52 = vmax.f32 %v6158_v63, 0.0  ;;  %v6168_v35 = vadd.f32 %v12384_v57, %v6083_v23  ;;  %v6005_v58 = vld [vmem:[%s12355_s21 + $0xa0] sm:$0xff] }
 0x419   : > { %6838 = vmatprep.subr.bf16.mxu1 %v9805_v13  ;;  %v6224_v13 = vmax.f32 %v6160_v60, 0.0  ;;  %v6226_v46 = vmax.f32 %v6162_v25, 0.0  ;;  %v6166_v1 = vadd.f32 %v12386_v14, %v6081_v47  ;;  %v6080_v33 = vmul.f32 %v12372_v11, %v5995_v37  ;;  %v6001_v47 = vld [vmem:[%s12355_s21 + $0x80] sm:$0xff] }
 0x41a   : > { %v6232_v5 = vmax.f32 %v6168_v35, 0.0  ;;  %v6084_v49 = vmul.f32 %v12372_v11, %v5999_v19  ;;  %v6087_v22 = vmul.f32 %v12362_v0, %v6002_v51  ;;  %v6091_v55 = vmul.f32 %v12362_v0, %v6006_v20  ;;  %v6016_v51 = vld [vmem:[%s12355_s21 + $0xf8] sm:$0xff]  ;;  %v6009_v20 = vld [vmem:[%s12355_s21 + $0xc0] sm:$0xff] }
 0x41b   : > { %6726 = vmatpush2.bf16.msra.mxu0 %v9807_v50  ;;  %v6000_v50 = vld [vmem:[%s12355_s21 + $0x78] sm:$0xff]  ;;  %v6230_v3 = vmax.f32 %v6166_v1, 0.0  ;;  %v6165_v12 = vadd.f32 %v12391_v38, %v6080_v33  ;;  %v6089_v23 = vmul.f32 %v12364_v10, %v6004_v39 }
 0x41c   : > { %6839 = vmatpush2.bf16.msra.mxu1 %v9808_v9  ;;  %6727 = vmatprep.subr.bf16.mxu0 %v9809_v28  ;;  %v6219_v9 = vmax.f32 %v6155_v26, 0.0  ;;  %v6223_v28 = vmax.f32 %v6159_v44, 0.0  ;;  %v6085_v43 = vmul.f32 %v12364_v10, %v6000_v50  ;;  %v6169_v6 = vadd.f32 %v12391_v38, %v6084_v49  ;;  %v6003_v44 = vld [vmem:[%s12355_s21 + $0x90] sm:$0xff] }
 0x41d   : > { %6840 = vmatprep.subr.bf16.mxu1 %v9811_v32  ;;  %v6221_v32 = vmax.f32 %v6157_v53, 0.0  ;;  %v6229_v63 = vmax.f32 %v6165_v12, 0.0  ;;  %v6176_v26 = vadd.f32 %v12384_v57, %v6091_v55  ;;  %v6007_v53 = vld [vmem:[%s12355_s21 + $0xb0] sm:$0xff] }
 0x41e   : > { %v6283_v15 = vpack.c.bf16 %v6223_v28, %v6219_v9  ;;  %v6170_v45 = vadd.f32 %v12386_v14, %v6085_v43  ;;  %v6233_v25 = vmax.f32 %v6169_v6, 0.0  ;;  %v6086_v9 = vmul.f32 %v12368_v48, %v6001_v47  ;;  %v6015_v12 = vld [vmem:[%s12355_s21 + $0xf0] sm:$0xff]  ;;  %v6018_v6 = vld [vmem:[%s12355_s21 + $0x108] sm:$0xff] }
 0x41f   : > { %6728 = vmatpush2.bf16.msra.mxu0 %v9813_v61  ;;  %v6225_v61 = vmax.f32 %v6161_v31, 0.0  ;;  %v6240_v50 = vmax.f32 %v6176_v26, 0.0  ;;  %v6090_v28 = vmul.f32 %v12368_v48, %v6005_v58  ;;  %v6100_v26 = vmul.f32 %v12372_v11, %v6015_v12 }
 0x420   : > { %6841 = vmatpush2.bf16.msra.mxu1 %v9814_v59  ;;  %6729 = vmatprep.subr.bf16.mxu0 %v9815_v27  ;;  %v5993_v59 = vld [vmem:[%s12355_s21 + $0x40] sm:$0xff]  ;;  %v6234_v17 = vmax.f32 %v6170_v45, 0.0  ;;  %v6171_v37 = vadd.f32 %v12388_v7, %v6086_v9 }
 0x421   : > { %6842 = vmatprep.subr.bf16.mxu1 %v9817_v21  ;;  %v5997_v27 = vld [vmem:[%s12355_s21 + $0x60] sm:$0xff]  ;;  %v6284_v21 = vpack.c.bf16 %v6224_v13, %v6220_v24  ;;  %v6285_v36 = vpack.c.bf16 %v6225_v61, %v6221_v32  ;;  %v6078_v62 = vmul.f32 %v12368_v48, %v5993_v59  ;;  %v6093_v13 = vmul.f32 %v12364_v10, %v6008_v8  ;;  %v6010_v32 = vld [vmem:[%s12355_s21 + $0xc8] sm:$0xff] }
 0x422   : > { %v6082_v54 = vmul.f32 %v12368_v48, %v5997_v27  ;;  %v6290_v60 = vpack.c.bf16 %v6234_v17, %v6230_v3  ;;  %v6088_v27 = vmul.f32 %v12372_v11, %v6003_v44  ;;  %v6175_v19 = vadd.f32 %v12388_v7, %v6090_v28  ;;  %v6013_v45 = vld [vmem:[%s12355_s21 + $0xe0] sm:$0xff] }
 0x423   : > { %6730 = vmatpush2.bf16.msra.mxu0 %v9819_v4  ;;  %v6286_v4 = vpack.c.bf16 %v6226_v46, %v6222_v52  ;;  %6731 = vmatprep.mubr.bf16.mxu0 %v6284_v21  ;;  %v6163_v41 = vadd.f32 %v12388_v7, %v6078_v62  ;;  %v6174_v52 = vadd.f32 %v12386_v14, %v6089_v23 }
 0x424   : > { %6843 = vmatpush2.bf16.msra.mxu1 %v9820_v42  ;;  %v6164_v42 = vadd.f32 %v12384_v57, %v6079_v30  ;;  %v6167_v40 = vadd.f32 %v12388_v7, %v6082_v54  ;;  %v6172_v30 = vadd.f32 %v12384_v57, %v6087_v22  ;;  %v6289_v46 = vpack.c.bf16 %v6233_v25, %v6229_v63 }
 0x425   : > { %6844 = vmatprep.mubr.bf16.mxu1 %v6286_v4  ;;  %v6227_v29 = vmax.f32 %v6163_v41, 0.0  ;;  %v6178_v61 = vadd.f32 %v12386_v14, %v6093_v13  ;;  %v6238_v59 = vmax.f32 %v6174_v52, 0.0  ;;  %v6092_v21 = vmul.f32 %v12372_v11, %v6007_v53  ;;  %v6014_v4 = vld [vmem:[%s12355_s21 + $0xe8] sm:$0xff]  ;;  %v6020_v53 = vld [vmem:[%s12355_s21 + $0x118] sm:$0xff] }
 0x426   : > { %v6228_v16 = vmax.f32 %v6164_v42, 0.0  ;;  %6732 = vmatmul.mubr.bf16.vlgmr.msra.gmra.mxu0 %v6283_v15  ;;  %v6231_v34 = vmax.f32 %v6167_v40, 0.0  ;;  %v6236_v24 = vmax.f32 %v6172_v30, 0.0  ;;  %v6012_v42 = vld [vmem:[%s12355_s21 + $0xd8] sm:$0xff]  ;;  %v6095_v1 = vmul.f32 %v12362_v0, %v6010_v32  ;;  %v6022_v30 = vld [vmem:[%s12355_s21 + $0x128] sm:$0xff] }
 0x427   : > { %6845 = vmatmul.mubr.bf16.vlgmr.msra.gmra.mxu1 %v6285_v36  ;;  %v6242_v15 = vmax.f32 %v6178_v61, 0.0  ;;  %v6173_v36 = vadd.f32 %v12391_v38, %v6088_v27  ;;  %v6177_v43 = vadd.f32 %v12391_v38, %v6092_v21  ;;  %v6099_v62 = vmul.f32 %v12362_v0, %v6014_v4  ;;  %v6017_v61 = vld [vmem:[%s12355_s21 + $0x100] sm:$0xff] }
 0x428   : > { %v6288_v56 = vpack.c.bf16 %v6232_v5, %v6228_v16  ;;  %v6287_v31 = vpack.c.bf16 %v6231_v34, %v6227_v29  ;;  %6854 = vmatprep.mubr.bf16.mxu1 %v6290_v60  ;;  %v6292_v35 = vpack.c.bf16 %v6240_v50, %v6236_v24  ;;  %v6235_v16 = vmax.f32 %v6171_v37, 0.0  ;;  %v6023_v37 = vld [vmem:[%s12355_s21 + $0x130] sm:$0xff] }
 0x429   : > { %v6239_v5 = vmax.f32 %v6175_v19, 0.0  ;;  %v6097_v54 = vmul.f32 %v12364_v10, %v6012_v42  ;;  %v6294_v3 = vpack.c.bf16 %v6242_v15, %v6238_v59  ;;  %v6237_v33 = vmax.f32 %v6173_v36, 0.0  ;;  %v6021_v59 = vld [vmem:[%s12355_s21 + $0x120] sm:$0xff] }
 0x42a   : > { %6741 = vmatprep.mubr.bf16.mxu0 %v6288_v56  ;;  %v6241_v49 = vmax.f32 %v6177_v43, 0.0  ;;  %v6180_v39 = vadd.f32 %v12384_v57, %v6095_v1  ;;  %v6011_v56 = vld [vmem:[%s12355_s21 + $0xd0] sm:$0xff]  ;;  %v6184_v40 = vadd.f32 %v12384_v57, %v6099_v62  ;;  %v6101_v22 = vmul.f32 %v12364_v10, %v6016_v51  ;;  %v6026_v62 = vld [vmem:[%s12355_s21 + $0x148] sm:$0xff] }
 0x42b   : > { %v6291_v41 = vpack.c.bf16 %v6239_v5, %v6235_v16  ;;  %v6182_v17 = vadd.f32 %v12386_v14, %v6097_v54  ;;  %v6094_v29 = vmul.f32 %v12368_v48, %v6009_v20  ;;  %v6098_v34 = vmul.f32 %v12368_v48, %v6013_v45 }
 0x42c   : > { %v6293_v55 = vpack.c.bf16 %v6241_v49, %v6237_v33  ;;  %v6244_v8 = vmax.f32 %v6180_v39, 0.0  ;;  %v6248_v23 = vmax.f32 %v6184_v40, 0.0  ;;  %v6186_v47 = vadd.f32 %v12386_v14, %v6101_v22  ;;  %v6030_v33 = vld [vmem:[%s12355_s21 + $0x168] sm:$0xff]  ;;  %v6028_v49 = vld [vmem:[%s12355_s21 + $0x158] sm:$0xff] }
 0x42d   : > { %v6246_v58 = vmax.f32 %v6182_v17, 0.0  ;;  %v6096_v60 = vmul.f32 %v12372_v11, %v6011_v56  ;;  %v6179_v63 = vadd.f32 %v12388_v7, %v6094_v29  ;;  %v6183_v25 = vadd.f32 %v12388_v7, %v6098_v34 }
 0x42e   : > { %6742 = vmatmul.mubr.bf16.gmra.mxu0 %v6287_v31  ;;  %v6103_v44 = vmul.f32 %v12362_v0, %v6018_v6  ;;  %v6296_v31 = vpack.c.bf16 %v6248_v23, %v6244_v8  ;;  %v6250_v24 = vmax.f32 %v6186_v47, 0.0  ;;  %v6107_v52 = vmul.f32 %v12362_v0, %v6022_v30  ;;  %v6025_v23 = vld [vmem:[%s12355_s21 + $0x140] sm:$0xff] }
 0x42f   : > { %6855 = vmatmul.mubr.bf16.gmra.mxu1 %v6289_v46  ;;  %6751 = vmatprep.mubr.bf16.mxu0 %v6292_v35  ;;  %v6181_v13 = vadd.f32 %v12391_v38, %v6096_v60  ;;  %v6024_v46 = vld [vmem:[%s12355_s21 + $0x138] sm:$0xff]  ;;  %v6243_v50 = vmax.f32 %v6179_v63, 0.0  ;;  %v6247_v9 = vmax.f32 %v6183_v25, 0.0  ;;  %v6185_v28 = vadd.f32 %v12391_v38, %v6100_v26  ;;  %v6019_v35 = vld [vmem:[%s12355_s21 + $0x110] sm:$0xff]  ;;  %v6029_v47 = vld [vmem:[%s12355_s21 + $0x160] sm:$0xff] }
 0x430   : > { %6864 = vmatprep.mubr.bf16.mxu1 %v6294_v3  ;;  %v6188_v32 = vadd.f32 %v12384_v57, %v6103_v44  ;;  %v6298_v27 = vpack.c.bf16 %v6250_v24, %v6246_v58  ;;  %v6192_v4 = vadd.f32 %v12384_v57, %v6107_v52  ;;  %v6105_v42 = vmul.f32 %v12364_v10, %v6020_v53  ;;  %v6027_v26 = vld [vmem:[%s12355_s21 + $0x150] sm:$0xff]  ;;  %v6034_v52 = vld [vmem:[%s12355_s21 + $0x188] sm:$0xff] }
 0x431   : > { %v6245_v21 = vmax.f32 %v6181_v13, 0.0  ;;  %v6295_v19 = vpack.c.bf16 %v6247_v9, %v6243_v50  ;;  %v6249_v15 = vmax.f32 %v6185_v28, 0.0  ;;  %v6109_v43 = vmul.f32 %v12364_v10, %v6024_v46  ;;  %v6031_v13 = vld [vmem:[%s12355_s21 + $0x170] sm:$0xff] }
 0x432   : > { %v6252_v36 = vmax.f32 %v6188_v32, 0.0  ;;  %v6256_v1 = vmax.f32 %v6192_v4, 0.0  ;;  %v6190_v51 = vadd.f32 %v12386_v14, %v6105_v42  ;;  %v6102_v16 = vmul.f32 %v12368_v48, %v6017_v61  ;;  %v6038_v32 = vld [vmem:[%s12355_s21 + $0x1a8] sm:$0xff] }
 0x433   : > { %v6106_v5 = vmul.f32 %v12368_v48, %v6021_v59  ;;  %v6297_v54 = vpack.c.bf16 %v6249_v15, %v6245_v21  ;;  %v6194_v20 = vadd.f32 %v12386_v14, %v6109_v43  ;;  %v6104_v45 = vmul.f32 %v12372_v11, %v6019_v35 }
 0x434   : > { %v6108_v3 = vmul.f32 %v12372_v11, %v6023_v37  ;;  %v6300_v39 = vpack.c.bf16 %v6256_v1, %v6252_v36  ;;  %v6254_v56 = vmax.f32 %v6190_v51, 0.0  ;;  %v6111_v6 = vmul.f32 %v12362_v0, %v6026_v62  ;;  %v6040_v51 = vld [vmem:[%s12355_s21 + $0x1b8] sm:$0xff] }
 0x435   : > { %v6191_v40 = vadd.f32 %v12388_v7, %v6106_v5  ;;  %v6258_v22 = vmax.f32 %v6194_v20, 0.0  ;;  %v6189_v17 = vadd.f32 %v12391_v38, %v6104_v45  ;;  %v6115_v34 = vmul.f32 %v12362_v0, %v6030_v33  ;;  %v6033_v20 = vld [vmem:[%s12355_s21 + $0x180] sm:$0xff] }
 0x436   : > { %6752 = vmatmul.mubr.bf16.gmra.mxu0 %v6291_v41  ;;  %v6187_v41 = vadd.f32 %v12388_v7, %v6102_v16  ;;  %v6193_v12 = vadd.f32 %v12391_v38, %v6108_v3  ;;  %v6113_v30 = vmul.f32 %v12364_v10, %v6028_v49  ;;  %v6196_v25 = vadd.f32 %v12384_v57, %v6111_v6  ;;  %v6037_v45 = vld [vmem:[%s12355_s21 + $0x1a0] sm:$0xff] }
 0x437   : > { %6865 = vmatmul.mubr.bf16.gmra.mxu1 %v6293_v55  ;;  %6761 = vmatprep.mubr.bf16.mxu0 %v6296_v31  ;;  %v6032_v55 = vld [vmem:[%s12355_s21 + $0x178] sm:$0xff]  ;;  %v6255_v29 = vmax.f32 %v6191_v40, 0.0  ;;  %v6302_v58 = vpack.c.bf16 %v6258_v22, %v6254_v56  ;;  %v6253_v60 = vmax.f32 %v6189_v17, 0.0  ;;  %v6200_v53 = vadd.f32 %v12384_v57, %v6115_v34  ;;  %v6035_v56 = vld [vmem:[%s12355_s21 + $0x190] sm:$0xff]  ;;  %v6042_v34 = vld [vmem:[%s12355_s21 + $0x1c8] sm:$0xff] }
 0x438   : > { %6874 = vmatprep.mubr.bf16.mxu1 %v6298_v27  ;;  %v6251_v8 = vmax.f32 %v6187_v41, 0.0  ;;  %v6257_v63 = vmax.f32 %v6193_v12, 0.0  ;;  %v6117_v31 = vmul.f32 %v12364_v10, %v6032_v55  ;;  %v6198_v24 = vadd.f32 %v12386_v14, %v6113_v30  ;;  %v6039_v41 = vld [vmem:[%s12355_s21 + $0x1b0] sm:$0xff] }
 0x439   : > { %v6260_v50 = vmax.f32 %v6196_v25, 0.0  ;;  %v6110_v9 = vmul.f32 %v12368_v48, %v6025_v23  ;;  %v6114_v28 = vmul.f32 %v12368_v48, %v6029_v47  ;;  %v6264_v61 = vmax.f32 %v6200_v53, 0.0 }
 0x43a   : > { %v6299_v44 = vpack.c.bf16 %v6255_v29, %v6251_v8  ;;  %v6301_v46 = vpack.c.bf16 %v6257_v63, %v6253_v60  ;;  %v6202_v59 = vadd.f32 %v12386_v14, %v6117_v31  ;;  %v6262_v27 = vmax.f32 %v6198_v24, 0.0  ;;  %v6046_v60 = vld [vmem:[%s12355_s21 + $0x1e8] sm:$0xff]  ;;  %v6044_v63 = vld [vmem:[%s12355_s21 + $0x1d8] sm:$0xff] }
 0x43b   : > { %v6112_v21 = vmul.f32 %v12372_v11, %v6027_v26  ;;  %v6195_v4 = vadd.f32 %v12388_v7, %v6110_v9  ;;  %v6199_v42 = vadd.f32 %v12388_v7, %v6114_v28  ;;  %v6116_v35 = vmul.f32 %v12372_v11, %v6031_v13 }
 0x43c   : > { %v6119_v37 = vmul.f32 %v12362_v0, %v6034_v52  ;;  %v6304_v15 = vpack.c.bf16 %v6264_v61, %v6260_v50  ;;  %v6266_v36 = vmax.f32 %v6202_v59, 0.0  ;;  %v6123_v1 = vmul.f32 %v12362_v0, %v6038_v32  ;;  %v6041_v61 = vld [vmem:[%s12355_s21 + $0x1c0] sm:$0xff] }
 0x43d   : > { %v6197_v43 = vadd.f32 %v12391_v38, %v6112_v21  ;;  %v6259_v16 = vmax.f32 %v6195_v4, 0.0  ;;  %v6263_v5 = vmax.f32 %v6199_v42, 0.0  ;;  %v6201_v62 = vadd.f32 %v12391_v38, %v6116_v35  ;;  %v6045_v42 = vld [vmem:[%s12355_s21 + $0x1e0] sm:$0xff]  ;;  %v6043_v35 = vld [vmem:[%s12355_s21 + $0x1d0] sm:$0xff] }
 0x43e   : > { %6762 = vmatmul.mubr.bf16.gmra.mxu0 %v6295_v19  ;;  %v6036_v19 = vld [vmem:[%s12355_s21 + $0x198] sm:$0xff]  ;;  %v6306_v3 = vpack.c.bf16 %v6266_v36, %v6262_v27  ;;  %v6208_v49 = vadd.f32 %v12384_v57, %v6123_v1  ;;  %v6125_v12 = vmul.f32 %v12364_v10, %v6040_v51  ;;  %v6118_v8 = vmul.f32 %v12368_v48, %v6033_v20 }
 0x43f   : > { %6875 = vmatmul.mubr.bf16.gmra.mxu1 %v6297_v54  ;;  %6771 = vmatprep.mubr.bf16.mxu0 %v6300_v39  ;;  %v6204_v54 = vadd.f32 %v12384_v57, %v6119_v37  ;;  %v6261_v33 = vmax.f32 %v6197_v43, 0.0  ;;  %v6121_v39 = vmul.f32 %v12364_v10, %v6036_v19  ;;  %v6303_v40 = vpack.c.bf16 %v6263_v5, %v6259_v16 }
 0x440   : > { %6884 = vmatprep.mubr.bf16.mxu1 %v6302_v58  ;;  %v6265_v22 = vmax.f32 %v6201_v62, 0.0  ;;  %v6272_v6 = vmax.f32 %v6208_v49, 0.0  ;;  %v6122_v29 = vmul.f32 %v12368_v48, %v6037_v45  ;;  %v6210_v23 = vadd.f32 %v12386_v14, %v6125_v12 }
 0x441   : > { %v6268_v17 = vmax.f32 %v6204_v54, 0.0  ;;  %v6206_v55 = vadd.f32 %v12386_v14, %v6121_v39  ;;  %v6120_v47 = vmul.f32 %v12372_v11, %v6035_v56  ;;  %v6124_v58 = vmul.f32 %v12372_v11, %v6039_v41 }
 0x442   : > { %v6305_v30 = vpack.c.bf16 %v6265_v22, %v6261_v33  ;;  %v6207_v53 = vadd.f32 %v12388_v7, %v6122_v29  ;;  %v6274_v31 = vmax.f32 %v6210_v23, 0.0  ;;  %v6127_v52 = vmul.f32 %v12362_v0, %v6042_v34 }
 0x443   : > { %v6308_v25 = vpack.c.bf16 %v6272_v6, %v6268_v17  ;;  %v6270_v26 = vmax.f32 %v6206_v55, 0.0  ;;  %v6205_v24 = vadd.f32 %v12391_v38, %v6120_v47  ;;  %v6209_v13 = vadd.f32 %v12391_v38, %v6124_v58 }
 0x444   : > { %v6271_v9 = vmax.f32 %v6207_v53, 0.0  ;;  %v6131_v28 = vmul.f32 %v12362_v0, %v6046_v60  ;;  %v6129_v32 = vmul.f32 %v12364_v10, %v6044_v63  ;;  %v6212_v4 = vadd.f32 %v12384_v57, %v6127_v52 }
 0x445   : > { %v6310_v59 = vpack.c.bf16 %v6274_v31, %v6270_v26  ;;  %v6269_v27 = vmax.f32 %v6205_v24, 0.0  ;;  %v6273_v21 = vmax.f32 %v6209_v13, 0.0  ;;  %v6126_v43 = vmul.f32 %v12368_v48, %v6041_v61 }
 0x446   : > { %6772 = vmatmul.mubr.bf16.gmra.mxu0 %v6299_v44  ;;  %v6203_v44 = vadd.f32 %v12388_v7, %v6118_v8  ;;  %v6216_v37 = vadd.f32 %v12384_v57, %v6131_v28  ;;  %v6276_v0 = vmax.f32 %v6212_v4, 0.0  ;;  %v6214_v36 = vadd.f32 %v12386_v14, %v6129_v32 }
 0x447   : > { %6885 = vmatmul.mubr.bf16.gmra.mxu1 %v6301_v46  ;;  %6781 = vmatprep.mubr.bf16.mxu0 %v6304_v15  ;;  %v6048_v46 = vld [vmem:[%s12355_s21 + $0x1f8] sm:$0xff]  ;;  %v6047_v15 = vld [vmem:[%s12355_s21 + $0x1f0] sm:$0xff]  ;;  %v6130_v16 = vmul.f32 %v12368_v48, %v6045_v42  ;;  %v6128_v5 = vmul.f32 %v12372_v11, %v6043_v35  ;;  %v6309_v54 = vpack.c.bf16 %v6273_v21, %v6269_v27 }
 0x448   : > { %6894 = vmatprep.mubr.bf16.mxu1 %v6306_v3  ;;  %v6267_v50 = vmax.f32 %v6203_v44, 0.0  ;;  %v6133_v19 = vmul.f32 %v12364_v10, %v6048_v46  ;;  %v6280_v1 = vmax.f32 %v6216_v37, 0.0  ;;  %v6278_v57 = vmax.f32 %v6214_v36, 0.0 }
 0x449   : > { %v6132_v10 = vmul.f32 %v12372_v11, %v6047_v15  ;;  %v6211_v45 = vadd.f32 %v12388_v7, %v6126_v43  ;;  %v6215_v3 = vadd.f32 %v12388_v7, %v6130_v16  ;;  %v6213_v33 = vadd.f32 %v12391_v38, %v6128_v5 }
 0x44a   : > { %v6218_v51 = vadd.f32 %v12386_v14, %v6133_v19  ;;  %v6307_v62 = vpack.c.bf16 %v6271_v9, %v6267_v50  ;;  %v6312_v49 = vpack.c.bf16 %v6280_v1, %v6276_v0 }
 0x44b   : > { %v6217_v14 = vadd.f32 %v12391_v38, %v6132_v10  ;;  %v6275_v48 = vmax.f32 %v6211_v45, 0.0  ;;  %v6279_v56 = vmax.f32 %v6215_v3, 0.0  ;;  %v6277_v41 = vmax.f32 %v6213_v33, 0.0 }
 0x44c   : > { %v6282_v20 = vmax.f32 %v6218_v51, 0.0 }
 0x44d   : > { %v6311_v11 = vpack.c.bf16 %v6279_v56, %v6275_v48 }
 0x44e   : > { %6782 = vmatmul.mubr.bf16.gmra.mxu0 %v6303_v40  ;;  %v6314_v39 = vpack.c.bf16 %v6282_v20, %v6278_v57  ;;  %v6281_v40 = vmax.f32 %v6217_v14, 0.0 }
 0x44f   : > { %6895 = vmatmul.mubr.bf16.gmra.mxu1 %v6305_v30  ;;  %6791 = vmatprep.mubr.bf16.mxu0 %v6308_v25 }
 0x450   : > { %6904 = vmatprep.mubr.bf16.mxu1 %v6310_v59  ;;  %v6313_v22 = vpack.c.bf16 %v6281_v40, %v6277_v41 }
 0x456   : > { %6792 = vmatmul.mubr.bf16.gmra.mxu0 %v6307_v62 }
 0x457   : > { %6905 = vmatmul.mubr.bf16.gmra.mxu1 %v6309_v54  ;;  %6801 = vmatprep.mubr.bf16.mxu0 %v6312_v49 }
 0x458   : > { %6914 = vmatprep.mubr.bf16.mxu1 %v6314_v39 }
 0x45e   : > { %6802 = vmatmul.mubr.bf16.gmra.mxu0 %v6311_v11 }
 0x45f   : > { %6915 = vmatmul.mubr.bf16.gmra.mxu1 %v6313_v22 }
 0x4e6   : > { %v6733_v7 = vpop.f32.mrf.mxu0 }
 0x4e7   : > { %v6846_v17 = vpop.f32.mrf.mxu1 }
 0x4e8   : > { %v12568_v12 = vadd.f32 %v6846_v17, %v6733_v7  ;;  %v6735_v38 = vpop.f32.mrf.mxu0 }
 0x4e9   : > { %v6848_v6 = vpop.f32.mrf.mxu1 }
 0x4ea   : > { %6928 = vst [vmem:[%s12570_s4] sm:$0xff] %v12568_v12  ;;  %v12574_v55 = vadd.f32 %v6848_v6, %v6735_v38  ;;  %v6737_v8 = vpop.f32.mrf.mxu0 }
 0x4eb   : > { %v6850_v29 = vpop.f32.mrf.mxu1 }
 0x4ec   : > { %6929 = vst [vmem:[%s12570_s4 + $0x8] sm:$0xff] %v12574_v55  ;;  %v12578_v34 = vadd.f32 %v6850_v29, %v6737_v8  ;;  %v6739_v30 = vpop.f32.mrf.mxu0 }
 0x4ed   : > { %v6852_v23 = vpop.f32.mrf.mxu1 }
 0x4ee   : > { %6930 = vst [vmem:[%s12570_s4 + $0x10] sm:$0xff] %v12578_v34  ;;  %v12582_v47 = vadd.f32 %v6852_v23, %v6739_v30  ;;  %v6743_v58 = vpop.f32.mrf.mxu0 }
 0x4ef   : > { %v6856_v60 = vpop.f32.mrf.mxu1 }
 0x4f0   : > { %6931 = vst [vmem:[%s12570_s4 + $0x18] sm:$0xff] %v12582_v47  ;;  %v12586_v63 = vadd.f32 %v6856_v60, %v6743_v58  ;;  %v6745_v25 = vpop.f32.mrf.mxu0 }
 0x4f1   : > { %v6858_v26 = vpop.f32.mrf.mxu1 }
 0x4f2   : > { %6932 = vst [vmem:[%s12570_s4 + $0x20] sm:$0xff] %v12586_v63  ;;  %v12590_v44 = vadd.f32 %v6858_v26, %v6745_v25  ;;  %v6747_v53 = vpop.f32.mrf.mxu0 }
 0x4f3   : > { %v6860_v31 = vpop.f32.mrf.mxu1 }
 0x4f4   : > { %6933 = vst [vmem:[%s12570_s4 + $0x28] sm:$0xff] %v12590_v44  ;;  %v12594_v24 = vadd.f32 %v6860_v31, %v6747_v53  ;;  %v6749_v13 = vpop.f32.mrf.mxu0 }
 0x4f5   : > { %v6862_v52 = vpop.f32.mrf.mxu1 }
 0x4f6   : > { %6934 = vst [vmem:[%s12570_s4 + $0x30] sm:$0xff] %v12594_v24  ;;  %v12598_v46 = vadd.f32 %v6862_v52, %v6749_v13  ;;  %v6753_v50 = vpop.f32.mrf.mxu0 }
 0x4f7   : > { %v6866_v9 = vpop.f32.mrf.mxu1 }
 0x4f8   : > { %6935 = vst [vmem:[%s12570_s4 + $0x38] sm:$0xff] %v12598_v46  ;;  %v12602_v28 = vadd.f32 %v6866_v9, %v6753_v50  ;;  %v6755_v32 = vpop.f32.mrf.mxu0 }
 0x4f9   : > { %v6868_v61 = vpop.f32.mrf.mxu1 }
 0x4fa   : > { %6936 = vst [vmem:[%s12570_s4 + $0x40] sm:$0xff] %v12602_v28  ;;  %v12606_v59 = vadd.f32 %v6868_v61, %v6755_v32  ;;  %v6757_v27 = vpop.f32.mrf.mxu0 }
 0x4fb   : > { %v6870_v21 = vpop.f32.mrf.mxu1 }
 0x4fc   : > { %6937 = vst [vmem:[%s12570_s4 + $0x48] sm:$0xff] %v12606_v59  ;;  %v12610_v4 = vadd.f32 %v6870_v21, %v6757_v27  ;;  %v6759_v42 = vpop.f32.mrf.mxu0 }
 0x4fd   : > { %v6872_v35 = vpop.f32.mrf.mxu1 }
 0x4fe   : > { %6938 = vst [vmem:[%s12570_s4 + $0x50] sm:$0xff] %v12610_v4  ;;  %v12614_v37 = vadd.f32 %v6872_v35, %v6759_v42  ;;  %v6763_v19 = vpop.f32.mrf.mxu0 }
 0x4ff   : > { %v6876_v15 = vpop.f32.mrf.mxu1 }
 0x500   : > { %6939 = vst [vmem:[%s12570_s4 + $0x58] sm:$0xff] %v12614_v37  ;;  %v12618_v0 = vadd.f32 %v6876_v15, %v6763_v19  ;;  %v6765_v36 = vpop.f32.mrf.mxu0 }
 0x501   : > { %v6878_v43 = vpop.f32.mrf.mxu1 }
 0x502   : > { %6940 = vst [vmem:[%s12570_s4 + $0x60] sm:$0xff] %v12618_v0  ;;  %v12622_v1 = vadd.f32 %v6878_v43, %v6765_v36  ;;  %v6767_v51 = vpop.f32.mrf.mxu0 }
 0x503   : > { %v6880_v16 = vpop.f32.mrf.mxu1 }
 0x504   : > { %6941 = vst [vmem:[%s12570_s4 + $0x68] sm:$0xff] %v12622_v1  ;;  %v12626_v5 = vadd.f32 %v6880_v16, %v6767_v51  ;;  %v6769_v62 = vpop.f32.mrf.mxu0 }
 0x505   : > { %v6882_v54 = vpop.f32.mrf.mxu1 }
 0x506   : > { %6942 = vst [vmem:[%s12570_s4 + $0x70] sm:$0xff] %v12626_v5  ;;  %v12630_v57 = vadd.f32 %v6882_v54, %v6769_v62  ;;  %v6773_v10 = vpop.f32.mrf.mxu0 }
 0x507   : > { %v6886_v20 = vpop.f32.mrf.mxu1 }
 0x508   : > { %6943 = vst [vmem:[%s12570_s4 + $0x78] sm:$0xff] %v12630_v57  ;;  %v12634_v45 = vadd.f32 %v6886_v20, %v6773_v10  ;;  %v6775_v3 = vpop.f32.mrf.mxu0 }
 0x509   : > { %v6888_v33 = vpop.f32.mrf.mxu1 }
 0x50a   : > { %6944 = vst [vmem:[%s12570_s4 + $0x80] sm:$0xff] %v12634_v45  ;;  %v12638_v49 = vadd.f32 %v6888_v33, %v6775_v3  ;;  %v6777_v14 = vpop.f32.mrf.mxu0 }
 0x50b   : > { %v6890_v39 = vpop.f32.mrf.mxu1 }
 0x50c   : > { %6945 = vst [vmem:[%s12570_s4 + $0x88] sm:$0xff] %v12638_v49  ;;  %v12642_v48 = vadd.f32 %v6890_v39, %v6777_v14  ;;  %v6779_v56 = vpop.f32.mrf.mxu0 }
 0x50d   : > { %v6892_v41 = vpop.f32.mrf.mxu1 }
 0x50e   : > { %6946 = vst [vmem:[%s12570_s4 + $0x90] sm:$0xff] %v12642_v48  ;;  %v12646_v40 = vadd.f32 %v6892_v41, %v6779_v56  ;;  %v6783_v11 = vpop.f32.mrf.mxu0 }
 0x50f   : > { %v6896_v22 = vpop.f32.mrf.mxu1 }
 0x510   : > { %6947 = vst [vmem:[%s12570_s4 + $0x98] sm:$0xff] %v12646_v40  ;;  %v12650_v7 = vadd.f32 %v6896_v22, %v6783_v11  ;;  %v6785_v17 = vpop.f32.mrf.mxu0 }
 0x511   : > { %v6898_v38 = vpop.f32.mrf.mxu1 }
 0x512   : > { %6948 = vst [vmem:[%s12570_s4 + $0xa0] sm:$0xff] %v12650_v7  ;;  %v12654_v6 = vadd.f32 %v6898_v38, %v6785_v17  ;;  %v6787_v8 = vpop.f32.mrf.mxu0 }
 0x513   : > { %v6900_v29 = vpop.f32.mrf.mxu1 }
 0x514   : > { %6949 = vst [vmem:[%s12570_s4 + $0xa8] sm:$0xff] %v12654_v6  ;;  %v12658_v30 = vadd.f32 %v6900_v29, %v6787_v8  ;;  %v6789_v23 = vpop.f32.mrf.mxu0 }
 0x515   : > { %v6902_v58 = vpop.f32.mrf.mxu1 }
 0x516   : > { %6950 = vst [vmem:[%s12570_s4 + $0xb0] sm:$0xff] %v12658_v30  ;;  %v12662_v60 = vadd.f32 %v6902_v58, %v6789_v23  ;;  %v6793_v25 = vpop.f32.mrf.mxu0 }
 0x517   : > { %v6906_v26 = vpop.f32.mrf.mxu1 }
 0x518   : > { %6951 = vst [vmem:[%s12570_s4 + $0xb8] sm:$0xff] %v12662_v60  ;;  %v12666_v53 = vadd.f32 %v6906_v26, %v6793_v25  ;;  %v6795_v31 = vpop.f32.mrf.mxu0 }
 0x519   : > { %v6908_v13 = vpop.f32.mrf.mxu1 }
 0x51a   : > { %6952 = vst [vmem:[%s12570_s4 + $0xc0] sm:$0xff] %v12666_v53  ;;  %v12670_v52 = vadd.f32 %v6908_v13, %v6795_v31  ;;  %v6797_v50 = vpop.f32.mrf.mxu0 }
 0x51b   : > { %v6910_v9 = vpop.f32.mrf.mxu1 }
 0x51c   : > { %6953 = vst [vmem:[%s12570_s4 + $0xc8] sm:$0xff] %v12670_v52  ;;  %v12674_v32 = vadd.f32 %v6910_v9, %v6797_v50  ;;  %v6799_v61 = vpop.f32.mrf.mxu0 }
 0x51d   : > { %v6912_v27 = vpop.f32.mrf.mxu1 }
 0x51e   : > { %6954 = vst [vmem:[%s12570_s4 + $0xd0] sm:$0xff] %v12674_v32  ;;  %v12678_v21 = vadd.f32 %v6912_v27, %v6799_v61  ;;  %v6803_v42 = vpop.f32.mrf.mxu0 }
 0x51f   : > { %v6916_v35 = vpop.f32.mrf.mxu1 }
 0x520   : > { %6955 = vst [vmem:[%s12570_s4 + $0xd8] sm:$0xff] %v12678_v21  ;;  %v12682_v19 = vadd.f32 %v6916_v35, %v6803_v42  ;;  %v6805_v15 = vpop.f32.mrf.mxu0 }
 0x521   : > { %v6918_v36 = vpop.f32.mrf.mxu1 }
 0x522   : > { %6956 = vst [vmem:[%s12570_s4 + $0xe0] sm:$0xff] %v12682_v19  ;;  %v12686_v43 = vadd.f32 %v6918_v36, %v6805_v15  ;;  %v6807_v51 = vpop.f32.mrf.mxu0 }
 0x523   : > { %v6920_v16 = vpop.f32.mrf.mxu1 }
 0x524   : > { %6957 = vst [vmem:[%s12570_s4 + $0xe8] sm:$0xff] %v12686_v43  ;;  %v12690_v62 = vadd.f32 %v6920_v16, %v6807_v51  ;;  %v6809_v54 = vpop.f32.mrf.mxu0  ;;  %6963 = sbr.rel (%p8631_p2) target bundleno = 1323 (0x52b), region = 72 }
 0x525   : > { %v6922_v10 = vpop.f32.mrf.mxu1 }
 0x526   : > { %6958 = vst [vmem:[%s12570_s4 + $0xf0] sm:$0xff] %v12690_v62  ;;  %v12694_v20 = vadd.f32 %v6922_v10, %v6809_v54 }
 0x528   : > { %6959 = vst [vmem:[%s12570_s4 + $0xf8] sm:$0xff] %v12694_v20 }
 0x529   : > { %vm6966_vm2 = vcmp.lt.s32.totalorder %v6050_v2, 256  ;;  %v10095_v3 = vmov 0.0  }
 0x52a   : > { %6968 = vst.msk [vmem:[#allocation7] sm:$0x3] %vm6966_vm2, %v10095_v3  ;;  %6969 = vst.msk [vmem:[#allocation8] sm:$0x3] %vm6966_vm2, %v10095_v3 }
 0x52b PF: > { %v6971_v33 = vadd.f32 %v12578_v34, %v12568_v12  ;;  %v6992_v14 = vadd.f32 %v12582_v47, %v12574_v55  ;;  %v7038_v29 = vmul.f32 %v12568_v12, %v12568_v12  ;;  %v7040_v23 = vmul.f32 %v12578_v34, %v12578_v34 }
 0x52c   : > { %v7039_v58 = vmul.f32 %v12574_v55, %v12574_v55  ;;  %v7041_v25 = vmul.f32 %v12582_v47, %v12582_v47  ;;  %v7042_v13 = vmul.f32 %v12586_v63, %v12586_v63  ;;  %v7043_v50 = vmul.f32 %v12590_v44, %v12590_v44 }
 0x52d   : > { %v6972_v39 = vadd.f32 %v6971_v33, %v12586_v63  ;;  %v6993_v56 = vadd.f32 %v6992_v14, %v12590_v44  ;;  %v7044_v55 = vmul.f32 %v12594_v24, %v12594_v24  ;;  %v7070_v9 = vadd.f32 %v7040_v23, %v7038_v29 }
 0x52e   : > { %v7045_v47 = vmul.f32 %v12598_v46, %v12598_v46  ;;  %v7091_v61 = vadd.f32 %v7041_v25, %v7039_v58  ;;  %v7046_v63 = vmul.f32 %v12602_v28, %v12602_v28  ;;  %v7047_v35 = vmul.f32 %v12606_v59, %v12606_v59 }
 0x52f   : > { %v6973_v41 = vadd.f32 %v6972_v39, %v12594_v24  ;;  %v6994_v11 = vadd.f32 %v6993_v56, %v12598_v46  ;;  %v7071_v44 = vadd.f32 %v7070_v9, %v7042_v13  ;;  %v7048_v46 = vmul.f32 %v12610_v4, %v12610_v4 }
 0x530   : > { %v7092_v15 = vadd.f32 %v7091_v61, %v7043_v50  ;;  %v7049_v16 = vmul.f32 %v12614_v37, %v12614_v37  ;;  %v7051_v33 = vmul.f32 %v12622_v1, %v12622_v1  ;;  %v7057_v58 = vmul.f32 %v12646_v40, %v12646_v40 }
 0x531   : > { %v6974_v22 = vadd.f32 %v6973_v41, %v12602_v28  ;;  %v6995_v17 = vadd.f32 %v6994_v11, %v12606_v59  ;;  %v7072_v51 = vadd.f32 %v7071_v44, %v7044_v55  ;;  %v7050_v59 = vmul.f32 %v12618_v0, %v12618_v0 }
 0x532   : > { %v7093_v54 = vadd.f32 %v7092_v15, %v7045_v47  ;;  %v7053_v41 = vmul.f32 %v12630_v57, %v12630_v57  ;;  %v7059_v13 = vmul.f32 %v12654_v6, %v12654_v6  ;;  %v7061_v55 = vmul.f32 %v12662_v60, %v12662_v60 }
 0x533   : > { %v6975_v38 = vadd.f32 %v6974_v22, %v12610_v4  ;;  %v6996_v8 = vadd.f32 %v6995_v17, %v12614_v37  ;;  %v7073_v3 = vadd.f32 %v7072_v51, %v7046_v63  ;;  %v7052_v37 = vmul.f32 %v12626_v5, %v12626_v5 }
 0x534   : > { %v7094_v14 = vadd.f32 %v7093_v54, %v7047_v35  ;;  %v7063_v63 = vmul.f32 %v12670_v52, %v12670_v52  ;;  %vm7034_vm3 = vcmp.lt.s32.totalorder %v6050_v2, 256 }
 0x535   : > { %v6976_v26 = vadd.f32 %v6975_v38, %v12618_v0  ;;  %v6997_v31 = vadd.f32 %v6996_v8, %v12622_v1  ;;  %v7074_v56 = vadd.f32 %v7073_v3, %v7048_v46  ;;  %v7054_v1 = vmul.f32 %v12634_v45, %v12634_v45 }
 0x536   : > { %v7095_v11 = vadd.f32 %v7094_v14, %v7049_v16  ;;  %v7055_v38 = vmul.f32 %v12638_v49, %v12638_v49 }
 0x537   : > { %v6977_v12 = vadd.f32 %v6976_v26, %v12626_v5  ;;  %v6998_v34 = vadd.f32 %v6997_v31, %v12630_v57  ;;  %v7075_v17 = vadd.f32 %v7074_v56, %v7050_v59  ;;  %v7056_v57 = vmul.f32 %v12642_v48, %v12642_v48 }
 0x538   : > { %v7096_v8 = vadd.f32 %v7095_v11, %v7051_v33 }
 0x539   : > { %v6978_v27 = vadd.f32 %v6977_v12, %v12634_v45  ;;  %v6999_v42 = vadd.f32 %v6998_v34, %v12638_v49  ;;  %v7076_v23 = vadd.f32 %v7075_v17, %v7052_v37  ;;  %v7058_v49 = vmul.f32 %v12650_v7, %v12650_v7 }
 0x53a   : > { %v7097_v25 = vadd.f32 %v7096_v8, %v7053_v41 }
 0x53b   : > { %v6979_v36 = vadd.f32 %v6978_v27, %v12642_v48  ;;  %v7000_v24 = vadd.f32 %v6999_v42, %v12646_v40  ;;  %v7077_v31 = vadd.f32 %v7076_v23, %v7054_v1  ;;  %v7060_v40 = vmul.f32 %v12658_v30, %v12658_v30 }
 0x53c   : > { %v7098_v50 = vadd.f32 %v7097_v25, %v7055_v38  ;;  %v6970_v38 = vld [vmem:[#allocation7] sm:$0x3] }
 0x53d   : > { %v6980_v10 = vadd.f32 %v6979_v36, %v12650_v7  ;;  %v7001_v28 = vadd.f32 %v7000_v24, %v12654_v6  ;;  %v7078_v34 = vadd.f32 %v7077_v31, %v7056_v57  ;;  %v7062_v7 = vmul.f32 %v12666_v53, %v12666_v53 }
 0x53e   : > { %v7099_v9 = vadd.f32 %v7098_v50, %v7057_v58  ;;  %v10096_v6 = vmov 1966171168  }
 0x53f   : > { %v6981_v39 = vadd.f32 %v6980_v10, %v12658_v30  ;;  %v7002_v4 = vadd.f32 %v7001_v28, %v12662_v60  ;;  %v7079_v27 = vadd.f32 %v7078_v34, %v7058_v49  ;;  %v7017_v42 = vunpack.c.l.s4 %v10096_v6 }
 0x540   : > { %v7100_v44 = vadd.f32 %v7099_v9, %v7059_v13  ;;  %v7064_v30 = vmul.f32 %v12674_v32, %v12674_v32  ;;  %v7065_v60 = vmul.f32 %v12678_v21, %v12678_v21  ;;  %v7037_v13 = vld [vmem:[#allocation8] sm:$0x3] }
 0x541   : > { %v6982_v22 = vadd.f32 %v6981_v39, %v12666_v53  ;;  %v7003_v0 = vadd.f32 %v7002_v4, %v12670_v52  ;;  %v7080_v36 = vadd.f32 %v7079_v27, %v7060_v40  ;;  %v7066_v53 = vmul.f32 %v12682_v19, %v12682_v19 }
 0x542   : > { %v7101_v24 = vadd.f32 %v7100_v44, %v7061_v55  ;;  %v7018_v54 = vunpack.c.0.s8 %v7017_v42  ;;  %v7067_v52 = vmul.f32 %v12686_v43, %v12686_v43 }
 0x543   : > { %v6983_v29 = vadd.f32 %v6982_v22, %v12674_v32  ;;  %v7004_v5 = vadd.f32 %v7003_v0, %v12678_v21  ;;  %v7081_v16 = vadd.f32 %v7080_v36, %v7062_v7  ;;  %v7068_v32 = vmul.f32 %v12690_v62, %v12690_v62 }
 0x544   : > { %v7102_v10 = vadd.f32 %v7101_v24, %v7063_v63  ;;  %v7069_v21 = vmul.f32 %v12694_v20, %v12694_v20  ;;  %v7021_v41 = vsub.s32 %v7018_v54, %v12349_v18 }
 0x545   : > { %v6984_v26 = vadd.f32 %v6983_v29, %v12682_v19  ;;  %v7005_v45 = vadd.f32 %v7004_v5, %v12686_v43  ;;  %v7082_v3 = vadd.f32 %v7081_v16, %v7064_v30 }
 0x546   : > { %v7103_v33 = vadd.f32 %v7102_v10, %v7065_v60 }
 0x547   : > { %v6985_v12 = vadd.f32 %v6984_v26, %v12690_v62  ;;  %v7006_v48 = vadd.f32 %v7005_v45, %v12694_v20  ;;  %v7083_v4 = vadd.f32 %v7082_v3, %v7066_v53 }
 0x548   : > { %v7104_v19 = vadd.f32 %v7103_v33, %v7067_v52 }
 0x549   : > { %v6986_v47 = vrot.slane %v6985_v12, 4  ;;  %v7007_v61 = vrot.slane %v7006_v48, 4  ;;  %v7084_v43 = vadd.f32 %v7083_v4, %v7068_v32 }
 0x54a   : > { %v7105_v11 = vadd.f32 %v7104_v19, %v7069_v21 }
 0x54b   : > { %v6987_v35 = vadd.f32 %v6986_v47, %v6985_v12  ;;  %v7008_v15 = vadd.f32 %v7007_v61, %v7006_v48  ;;  %v7085_v0 = vrot.slane %v7084_v43, 4 }
 0x54c   : > { %v7106_v1 = vrot.slane %v7105_v11, 4 }
 0x54d   : > { %v6988_v46 = vrot.slane %v6987_v35, 2  ;;  %v7009_v51 = vrot.slane %v7008_v15, 2  ;;  %v7086_v62 = vadd.f32 %v7085_v0, %v7084_v43 }
 0x54e   : > { %v7107_v8 = vadd.f32 %v7106_v1, %v7105_v11 }
 0x54f   : > { %v6989_v28 = vadd.f32 %v6988_v46, %v6987_v35  ;;  %v7010_v59 = vadd.f32 %v7009_v51, %v7008_v15  ;;  %v7087_v20 = vrot.slane %v7086_v62, 2 }
 0x550   : > { %v7108_v5 = vrot.slane %v7107_v8, 2 }
 0x551   : > { %v6990_v14 = vrot.slane %v6989_v28, 1  ;;  %v7011_v39 = vrot.slane %v7010_v59, 1  ;;  %v7088_v23 = vadd.f32 %v7087_v20, %v7086_v62 }
 0x552   : > { %v7109_v58 = vadd.f32 %v7108_v5, %v7107_v8 }
 0x553   : > { %v6991_v37 = vadd.f32 %v6990_v14, %v6989_v28  ;;  %v7012_v56 = vadd.f32 %v7011_v39, %v7010_v59  ;;  %v7089_v25 = vrot.slane %v7088_v23, 1 }
 0x554   : > { %v7110_v18 = vrot.slane %v7109_v58, 1 }
 0x555   : > { %v7015_v22 = vcombine.low %v6991_v37, %v7012_v56  ;;  %v7090_v26 = vadd.f32 %v7089_v25, %v7088_v23 }
 0x556   : > { %v7111_v45 = vadd.f32 %v7110_v18, %v7109_v58 }
 0x557   : > { %v7022_v17 = vrot.slane %v7015_v22, %v7021_v41 }
 0x558   : > { %v7114_v49 = vcombine.low %v7090_v26, %v7111_v45 }
 0x559   : > { %v7029_v29 = vrot.slane %v7022_v17, %v7021_v41 }
 0x55a   : > { %v7121_v31 = vrot.slane %v7114_v49, %v7021_v41 }
 0x55b   : > { %v7031_v57 = vadd.f32 %v7029_v29, %v6970_v38 }
 0x55c   : > { %v7128_v50 = vrot.slane %v7121_v31, %v7021_v41 }
 0x55d   : > { %7036 = vst.msk [vmem:[#allocation7] sm:$0x3] %vm7034_vm3, %v7031_v57 }
 0x55e   : > { %v7130_v12 = vadd.f32 %v7128_v50, %v7037_v13 }
 0x560   : > { %7131 = vst.msk [vmem:[#allocation8] sm:$0x3] %vm7034_vm3, %v7130_v12 }
 0x561 PF: > { %p8632_p0 = scmp.ne.s32.totalorder %s10070_s25, 2 }
 0x562   : > { %s13973_s18 = sld [smem:[#allocation145_spill]] (!%p8632_p0)  ;;  %s7152_s5 = sshra.s32 (!%p8632_p0), %s10321_s11, 3 }
 0x563   : > { %7135 = sbr.rel (%p8632_p0) target bundleno = 1702 (0x6a6), region = 76  ;;  %s12959_s10 = scalar_lea.vmem (!%p8632_p0), [#allocation4], %s10321_s11 }
 0x564   : > { %p8651_p4 = scmp.ne.s32.totalorder (!%p8632_p0), %s10066_s24, 0 }
 0x568   : > { %s13974_s3 = smov %s13973_s18  ;;  %v9823_v2 = vld [vmem:[%s13973_s18 + $0x78] sm:$0xff]   ;;  %v7136_v42 = vld [vmem:[#allocation7] sm:$0x3]  ;;  %v7137_v63 = vld [vmem:[#allocation8] sm:$0x3]  ;;  %v7190_v54 = vlaneseq  ;;  %s8678_s18 = sshll.u32 %s7152_s5, 4 }
 0x569   : > { %v9824_v48 = vld [vmem:[%s13974_s3 + $0x38] sm:$0xff]   ;;  %8679 = vmatprep.subr.bf16.mxu0 %v9823_v2  ;;  %8795 = vmatprep.subr.bf16.mxu1 %v9823_v2  ;;  %v9825_v40 = vld [vmem:[%s13974_s3 + $0x70] sm:$0xff]   ;;  %v9827_v55 = vld [vmem:[%s13974_s3 + $0x68] sm:$0xff]   ;;  %v7142_v44 = vmul.f32 0.00390625, %v7136_v42  ;;  %v7143_v35 = vmul.f32 0.00390625, %v7137_v63  ;;  %s12848_s9 = scalar_lea.vmem [#allocation3], %s8678_s18 }
 0x56a   : > { %8680 = vmatpush3.bf16.msra.mxu0 %v9824_v48  ;;  %8803 = vmatpush3.bf16.msra.mxu1 %v9824_v48  ;;  %v9826_v34 = vld [vmem:[%s13974_s3 + $0x30] sm:$0xff]   ;;  %v9828_v9 = vld [vmem:[%s13974_s3 + $0x28] sm:$0xff]   ;;  %v9829_v47 = vld [vmem:[%s13974_s3 + $0x60] sm:$0xff]   ;;  %v7191_v52 = vshrl.u32 %v7190_v54, 7  ;;  %vm7549_vm4 = vcmask 523264  }
 0x56b   : > { %8681 = vmatprep.subr.bf16.mxu0 %v9825_v40  ;;  %8796 = vmatprep.subr.bf16.mxu1 %v9825_v40  ;;  %v9830_v61 = vld [vmem:[%s13974_s3 + $0x20] sm:$0xff]   ;;  %v9831_v7 = vld [vmem:[%s13974_s3 + $0x58] sm:$0xff]   ;;  %v9833_v6 = vld [vmem:[%s13974_s3 + $0x50] sm:$0xff]   ;;  %v7144_v36 = vmul.f32 %v7142_v44, %v7142_v44 }
 0x56c   : > { %v9832_v27 = vld [vmem:[%s13974_s3 + $0x18] sm:$0xff]   ;;  %v9834_v15 = vld [vmem:[%s13974_s3 + $0x10] sm:$0xff]   ;;  %v9835_v30 = vld [vmem:[%s13974_s3 + $0x48] sm:$0xff]   ;;  %v7196_v28 = vsub.s32 1, %v7191_v52  ;;  %v7192_v59 = vsub.s32 0, %v7191_v52 }
 0x56d   : > { %v7145_v60 = vsub.f32 %v7143_v35, %v7144_v36  ;;  %v9836_v24 = vld [vmem:[%s13974_s3 + $0x8] sm:$0xff]   ;;  %v9837_v46 = vld [vmem:[%s13974_s3 + $0x40] sm:$0xff]   ;;  %v7139_v10 = vld [vmem:[#allocation17 + $0x2] ss:$8 sm:$0x3] }
 0x56e   : > { %8682 = vmatpush3.bf16.msra.mxu0 %v9826_v34  ;;  %8804 = vmatpush3.bf16.msra.mxu1 %v9826_v34  ;;  %v9838_v16 = vld [vmem:[%s13974_s3] sm:$0xff]   ;;  %v7141_v3 = vld [vmem:[#allocation17 + $0x3] ss:$8 sm:$0x3]  ;;  %v7158_v33 = vld [vmem:[%s12848_s9 + $0x8] sm:$0xff] }
 0x56f   : > { %8683 = vmatprep.subr.bf16.mxu0 %v9827_v55  ;;  %8797 = vmatprep.subr.bf16.mxu1 %v9827_v55  ;;  %v7146_v51 = vmax.f32 %v7145_v60, 0.0  ;;  %v7160_v14 = vld [vmem:[%s12848_s9 + $0x18] sm:$0xff]  ;;  %v7174_v39 = vld [vmem:[%s12848_s9 + $0x88] sm:$0xff]  ;;  %v7157_v56 = vld [vmem:[%s12848_s9] sm:$0xff] }
 0x570   : > { %v7176_v4 = vld [vmem:[%s12848_s9 + $0x98] sm:$0xff]  ;;  %v7159_v41 = vld [vmem:[%s12848_s9 + $0x10] sm:$0xff]  ;;  %v7173_v11 = vld [vmem:[%s12848_s9 + $0x80] sm:$0xff] }
 0x571   : > { %v7147_v53 = vadd.f32 1e-05, %v7146_v51  ;;  %v7175_v22 = vld [vmem:[%s12848_s9 + $0x90] sm:$0xff]  ;;  %v7162_v0 = vld [vmem:[%s12848_s9 + $0x28] sm:$0xff]  ;;  %v7164_v1 = vld [vmem:[%s12848_s9 + $0x38] sm:$0xff] }
 0x572   : > { %8684 = vmatpush3.bf16.msra.mxu0 %v9828_v9  ;;  %8805 = vmatpush3.bf16.msra.mxu1 %v9828_v9  ;;  %v7178_v29 = vld [vmem:[%s12848_s9 + $0xa8] sm:$0xff]  ;;  %v7180_v20 = vld [vmem:[%s12848_s9 + $0xb8] sm:$0xff]  ;;  %v7161_v5 = vld [vmem:[%s12848_s9 + $0x20] sm:$0xff] }
 0x573   : > { %8685 = vmatprep.subr.bf16.mxu0 %v9829_v47  ;;  %8798 = vmatprep.subr.bf16.mxu1 %v9829_v47  ;;  %9839 = vrsqrt.f32 %v7147_v53  ;;  %v7177_v51 = vld [vmem:[%s12848_s9 + $0xa0] sm:$0xff]  ;;  %v7179_v53 = vld [vmem:[%s12848_s9 + $0xb0] sm:$0xff] }
 0x576   : > { %8686 = vmatpush3.bf16.msra.mxu0 %v9830_v61  ;;  %8806 = vmatpush3.bf16.msra.mxu1 %v9830_v61 }
 0x577   : > { %8687 = vmatprep.subr.bf16.mxu0 %v9831_v7  ;;  %8799 = vmatprep.subr.bf16.mxu1 %v9831_v7 }
 0x57a   : > { %8688 = vmatpush3.bf16.msra.mxu0 %v9832_v27  ;;  %8807 = vmatpush3.bf16.msra.mxu1 %v9832_v27 }
 0x57b   : > { %8689 = vmatprep.subr.bf16.mxu0 %v9833_v6  ;;  %8800 = vmatprep.subr.bf16.mxu1 %v9833_v6 }
 0x57e   : > { %8690 = vmatpush3.bf16.msra.mxu0 %v9834_v15  ;;  %8808 = vmatpush3.bf16.msra.mxu1 %v9834_v15 }
 0x57f   : > { %8691 = vmatprep.subr.bf16.mxu0 %v9835_v30  ;;  %8801 = vmatprep.subr.bf16.mxu1 %v9835_v30  ;;  %v7163_v30 = vld [vmem:[%s12848_s9 + $0x30] sm:$0xff] }
 0x580   : > { %v9840_v32 = vpop.eup %9839 }
 0x581   : > { %v7149_v21 = vmul.f32 %v9840_v32, %v7139_v10 }
 0x582   : > { %8692 = vmatpush3.bf16.msra.mxu0 %v9836_v24  ;;  %8809 = vmatpush3.bf16.msra.mxu1 %v9836_v24 }
 0x583   : > { %8693 = vmatprep.subr.bf16.mxu0 %v9837_v46  ;;  %8802 = vmatprep.subr.bf16.mxu1 %v9837_v46  ;;  %v7150_v19 = vmul.f32 %v7149_v21, %v7142_v44  ;;  %v12854_v37 = vrot.slane %v7149_v21, %v7196_v28  ;;  %v12858_v43 = vrot.slane %v7149_v21, %v7192_v59 }
 0x585   : > { %v7151_v17 = vsub.f32 %v7141_v3, %v7150_v19  ;;  %v7201_v62 = vmul.f32 %v12854_v37, %v7158_v33  ;;  %v7203_v38 = vmul.f32 %v12854_v37, %v7160_v14  ;;  %v7217_v8 = vmul.f32 %v12854_v37, %v7174_v39  ;;  %v7168_v33 = vld [vmem:[%s12848_s9 + $0x58] sm:$0xff] }
 0x586   : > { %8694 = vmatpush3.bf16.msra.mxu0 %v9838_v16  ;;  %8810 = vmatpush3.bf16.msra.mxu1 %v9838_v16  ;;  %v7219_v57 = vmul.f32 %v12854_v37, %v7176_v4  ;;  %v7200_v23 = vmul.f32 %v12858_v43, %v7157_v56  ;;  %v7202_v58 = vmul.f32 %v12858_v43, %v7159_v41  ;;  %v7182_v56 = vld [vmem:[%s12848_s9 + $0xc8] sm:$0xff]  ;;  %v7184_v41 = vld [vmem:[%s12848_s9 + $0xd8] sm:$0xff] }
 0x587   : > { %v7216_v25 = vmul.f32 %v12858_v43, %v7173_v11  ;;  %v12874_v18 = vrot.slane %v7151_v17, %v7196_v28  ;;  %v12876_v26 = vrot.slane %v7151_v17, %v7192_v59  ;;  %v7218_v45 = vmul.f32 %v12858_v43, %v7175_v22  ;;  %v7166_v28 = vld [vmem:[%s12848_s9 + $0x48] sm:$0xff]  ;;  %v7165_v17 = vld [vmem:[%s12848_s9 + $0x40] sm:$0xff] }
 0x588   : > { %v7205_v49 = vmul.f32 %v12854_v37, %v7162_v0  ;;  %v7207_v31 = vmul.f32 %v12854_v37, %v7164_v1  ;;  %v7221_v13 = vmul.f32 %v12854_v37, %v7178_v29  ;;  %v7223_v50 = vmul.f32 %v12854_v37, %v7180_v20 }
 0x589   : > { %v7204_v12 = vmul.f32 %v12858_v43, %v7161_v5  ;;  %v7244_v2 = vadd.f32 %v12874_v18, %v7201_v62  ;;  %v7246_v48 = vadd.f32 %v12874_v18, %v7203_v38  ;;  %v7260_v40 = vadd.f32 %v12874_v18, %v7217_v8 }
 0x58a   : > { %v7262_v34 = vadd.f32 %v12874_v18, %v7219_v57  ;;  %v7243_v55 = vadd.f32 %v12876_v26, %v7200_v23  ;;  %v7245_v9 = vadd.f32 %v12876_v26, %v7202_v58  ;;  %v7259_v47 = vadd.f32 %v12876_v26, %v7216_v25  ;;  %v7167_v58 = vld [vmem:[%s12848_s9 + $0x50] sm:$0xff] }
 0x58b   : > { %v7261_v61 = vadd.f32 %v12876_v26, %v7218_v45  ;;  %v7276_v7 = vmax.f32 %v7244_v2, 0.0  ;;  %v7278_v27 = vmax.f32 %v7246_v48, 0.0  ;;  %v7292_v6 = vmax.f32 %v7260_v40, 0.0 }
 0x58c   : > { %v7294_v42 = vmax.f32 %v7262_v34, 0.0  ;;  %v7275_v63 = vmax.f32 %v7243_v55, 0.0  ;;  %v7277_v44 = vmax.f32 %v7245_v9, 0.0  ;;  %v7291_v35 = vmax.f32 %v7259_v47, 0.0  ;;  %v7170_v34 = vld [vmem:[%s12848_s9 + $0x68] sm:$0xff] }
 0x58d   : > { %v7293_v15 = vmax.f32 %v7261_v61, 0.0  ;;  %v7308_v36 = vpack.c.bf16 %v7278_v27, %v7276_v7  ;;  %v7248_v24 = vadd.f32 %v12874_v18, %v7205_v49  ;;  %v7250_v46 = vadd.f32 %v12874_v18, %v7207_v31  ;;  %v7172_v7 = vld [vmem:[%s12848_s9 + $0x78] sm:$0xff] }
 0x58e   : > { %v7316_v60 = vpack.c.bf16 %v7294_v42, %v7292_v6  ;;  %v7307_v16 = vpack.c.bf16 %v7277_v44, %v7275_v63  ;;  %v7264_v52 = vadd.f32 %v12874_v18, %v7221_v13  ;;  %v7266_v10 = vadd.f32 %v12874_v18, %v7223_v50  ;;  %v7181_v13 = vld [vmem:[%s12848_s9 + $0xc0] sm:$0xff]  ;;  %v7183_v50 = vld [vmem:[%s12848_s9 + $0xd0] sm:$0xff]  ;;  %v7186_v44 = vld [vmem:[%s12848_s9 + $0xe8] sm:$0xff] }
 0x58f   : > { %v7315_v54 = vpack.c.bf16 %v7293_v15, %v7291_v35  ;;  %7483 = vmatprep.mubr.bf16.mxu0 %v7308_v36  ;;  %v7280_v59 = vmax.f32 %v7248_v24, 0.0  ;;  %v7282_v32 = vmax.f32 %v7250_v46, 0.0  ;;  %v7206_v3 = vmul.f32 %v12858_v43, %v7163_v30  ;;  %v7188_v35 = vld [vmem:[%s12848_s9 + $0xf8] sm:$0xff]  ;;  %v7169_v24 = vld [vmem:[%s12848_s9 + $0x60] sm:$0xff] }
 0x590   : > { %7515 = vmatprep.mubr.bf16.mxu1 %v7316_v60  ;;  %v7247_v21 = vadd.f32 %v12876_v26, %v7204_v12  ;;  %7484 = vmatmul.mubr.bf16.vlgmr.msra.gmra.mxu0 %v7307_v16  ;;  %v7296_v14 = vmax.f32 %v7264_v52, 0.0  ;;  %v7298_v39 = vmax.f32 %v7266_v10, 0.0  ;;  %v7220_v4 = vmul.f32 %v12858_v43, %v7177_v51 }
 0x591   : > { %7516 = vmatmul.mubr.bf16.vlgmr.msra.gmra.mxu1 %v7315_v54  ;;  %v7222_v19 = vmul.f32 %v12858_v43, %v7179_v53  ;;  %v7310_v11 = vpack.c.bf16 %v7282_v32, %v7280_v59  ;;  %v7249_v22 = vadd.f32 %v12876_v26, %v7206_v3  ;;  %v7209_v1 = vmul.f32 %v12854_v37, %v7166_v28  ;;  %v7171_v59 = vld [vmem:[%s12848_s9 + $0x70] sm:$0xff] }
 0x592   : > { %v7279_v0 = vmax.f32 %v7247_v21, 0.0  ;;  %v7318_v62 = vpack.c.bf16 %v7298_v39, %v7296_v14  ;;  %v7263_v38 = vadd.f32 %v12876_v26, %v7220_v4  ;;  %v7211_v29 = vmul.f32 %v12854_v37, %v7168_v33  ;;  %v7185_v14 = vld [vmem:[%s12848_s9 + $0xe0] sm:$0xff]  ;;  %v7187_v39 = vld [vmem:[%s12848_s9 + $0xf0] sm:$0xff] }
 0x593   : > { %v7265_v8 = vadd.f32 %v12876_v26, %v7222_v19  ;;  %7491 = vmatprep.mubr.bf16.mxu0 %v7310_v11  ;;  %v7281_v20 = vmax.f32 %v7249_v22, 0.0  ;;  %v7252_v5 = vadd.f32 %v12874_v18, %v7209_v1  ;;  %v7225_v57 = vmul.f32 %v12854_v37, %v7182_v56 }
 0x594   : > { %v7227_v23 = vmul.f32 %v12854_v37, %v7184_v41  ;;  %7523 = vmatprep.mubr.bf16.mxu1 %v7318_v62  ;;  %v7295_v25 = vmax.f32 %v7263_v38, 0.0  ;;  %v7254_v49 = vadd.f32 %v12874_v18, %v7211_v29  ;;  %v7208_v31 = vmul.f32 %v12858_v43, %v7165_v17 }
 0x595   : > { %v7297_v45 = vmax.f32 %v7265_v8, 0.0  ;;  %v7309_v12 = vpack.c.bf16 %v7281_v20, %v7279_v0  ;;  %v7284_v2 = vmax.f32 %v7252_v5, 0.0  ;;  %v7268_v48 = vadd.f32 %v12874_v18, %v7225_v57 }
 0x596   : > { %v7270_v40 = vadd.f32 %v12874_v18, %v7227_v23  ;;  %v7286_v9 = vmax.f32 %v7254_v49, 0.0  ;;  %v7210_v47 = vmul.f32 %v12858_v43, %v7167_v58  ;;  %v7251_v61 = vadd.f32 %v12876_v26, %v7208_v31 }
 0x597   : > { %v7317_v55 = vpack.c.bf16 %v7297_v45, %v7295_v25  ;;  %v7300_v27 = vmax.f32 %v7268_v48, 0.0  ;;  %v7224_v42 = vmul.f32 %v12858_v43, %v7181_v13  ;;  %v7226_v63 = vmul.f32 %v12858_v43, %v7183_v50 }
 0x598   : > { %v7302_v6 = vmax.f32 %v7270_v40, 0.0  ;;  %7492 = vmatmul.mubr.bf16.gmra.mxu0 %v7309_v12  ;;  %v7312_v15 = vpack.c.bf16 %v7286_v9, %v7284_v2  ;;  %v7253_v30 = vadd.f32 %v12876_v26, %v7210_v47  ;;  %v7283_v36 = vmax.f32 %v7251_v61, 0.0 }
 0x599   : > { %7524 = vmatmul.mubr.bf16.gmra.mxu1 %v7317_v55  ;;  %v7213_v60 = vmul.f32 %v12854_v37, %v7170_v34  ;;  %v7267_v51 = vadd.f32 %v12876_v26, %v7224_v42  ;;  %v7269_v53 = vadd.f32 %v12876_v26, %v7226_v63  ;;  %v7215_v16 = vmul.f32 %v12854_v37, %v7172_v7 }
 0x59a   : > { %v7320_v46 = vpack.c.bf16 %v7302_v6, %v7300_v27  ;;  %7499 = vmatprep.mubr.bf16.mxu0 %v7312_v15  ;;  %v7285_v54 = vmax.f32 %v7253_v30, 0.0  ;;  %v7229_v10 = vmul.f32 %v12854_v37, %v7186_v44  ;;  %v7231_v28 = vmul.f32 %v12854_v37, %v7188_v35 }
 0x59b   : > { %v7256_v52 = vadd.f32 %v12874_v18, %v7213_v60  ;;  %v7299_v32 = vmax.f32 %v7267_v51, 0.0  ;;  %v7301_v3 = vmax.f32 %v7269_v53, 0.0  ;;  %v7258_v21 = vadd.f32 %v12874_v18, %v7215_v16 }
 0x59c   : > { %7531 = vmatprep.mubr.bf16.mxu1 %v7320_v46  ;;  %v7212_v33 = vmul.f32 %v12858_v43, %v7169_v24  ;;  %v7311_v4 = vpack.c.bf16 %v7285_v54, %v7283_v36  ;;  %v7272_v56 = vadd.f32 %v12874_v18, %v7229_v10  ;;  %v7274_v41 = vadd.f32 %v12874_v18, %v7231_v28 }
 0x59d   : > { %v7288_v19 = vmax.f32 %v7256_v52, 0.0  ;;  %v7319_v11 = vpack.c.bf16 %v7301_v3, %v7299_v32  ;;  %v7290_v22 = vmax.f32 %v7258_v21, 0.0  ;;  %v7214_v37 = vmul.f32 %v12858_v43, %v7171_v59 }
 0x59e   : > { %v7255_v0 = vadd.f32 %v12876_v26, %v7212_v33  ;;  %v7304_v1 = vmax.f32 %v7272_v56, 0.0  ;;  %v7306_v17 = vmax.f32 %v7274_v41, 0.0  ;;  %v7228_v62 = vmul.f32 %v12858_v43, %v7185_v14 }
 0x59f   : > { %v7230_v38 = vmul.f32 %v12858_v43, %v7187_v39  ;;  %v7314_v8 = vpack.c.bf16 %v7290_v22, %v7288_v19  ;;  %v7257_v29 = vadd.f32 %v12876_v26, %v7214_v37 }
 0x5a0   : > { %7500 = vmatmul.mubr.bf16.gmra.mxu0 %v7311_v4  ;;  %v7322_v20 = vpack.c.bf16 %v7306_v17, %v7304_v1  ;;  %v7287_v5 = vmax.f32 %v7255_v0, 0.0  ;;  %v7271_v18 = vadd.f32 %v12876_v26, %v7228_v62 }
 0x5a1   : > { %7532 = vmatmul.mubr.bf16.gmra.mxu1 %v7319_v11  ;;  %v7273_v57 = vadd.f32 %v12876_v26, %v7230_v38  ;;  %7507 = vmatprep.mubr.bf16.mxu0 %v7314_v8  ;;  %v7289_v23 = vmax.f32 %v7257_v29, 0.0 }
 0x5a2   : > { %7539 = vmatprep.mubr.bf16.mxu1 %v7322_v20  ;;  %v7303_v58 = vmax.f32 %v7271_v18, 0.0 }
 0x5a3   : > { %v7305_v25 = vmax.f32 %v7273_v57, 0.0  ;;  %v7313_v45 = vpack.c.bf16 %v7289_v23, %v7287_v5 }
 0x5a5   : > { %v7321_v49 = vpack.c.bf16 %v7305_v25, %v7303_v58 }
 0x5a8   : > { %7508 = vmatmul.mubr.bf16.gmra.mxu0 %v7313_v45 }
 0x5a9   : > { %7540 = vmatmul.mubr.bf16.gmra.mxu1 %v7321_v49 }
 0x650   : > { %v8695_v43 = vpop.f32.mrf.mxu0 }
 0x651   : > { %v8719_v31 = vpop.f32.mrf.mxu1 }
 0x652   : > { %v8696_v13 = vpop.f32.mrf.mxu0 }
 0x653   : > { %v8720_v50 = vpop.f32.mrf.mxu1  ;;  %v12954_v12 = vadd.f32 %v8696_v13, %v8695_v43 }
 0x654   : > { %v12956_v2 = vadd.f32 %v8720_v50, %v8719_v31  ;;  %v8698_v26 = vpop.f32.mrf.mxu0 }
 0x655   : > { %v8722_v48 = vpop.f32.mrf.mxu1  ;;  %7550 = vst.msk [vmem:[%s12959_s10] sm:$0xff] %vm7549_vm4, %v12954_v12 }
 0x656   : > { %7558 = vst.msk [vmem:[%s12959_s10 + $0x40] sm:$0xff] %vm7549_vm4, %v12956_v2  ;;  %v8699_v40 = vpop.f32.mrf.mxu0 }
 0x657   : > { %v8723_v34 = vpop.f32.mrf.mxu1  ;;  %v12967_v55 = vadd.f32 %v8699_v40, %v8698_v26 }
 0x658   : > { %v12969_v9 = vadd.f32 %v8723_v34, %v8722_v48  ;;  %v8701_v47 = vpop.f32.mrf.mxu0 }
 0x659   : > { %v8725_v61 = vpop.f32.mrf.mxu1  ;;  %7551 = vst.msk [vmem:[%s12959_s10 + $0x8] sm:$0xff] %vm7549_vm4, %v12967_v55 }
 0x65a   : > { %7559 = vst.msk [vmem:[%s12959_s10 + $0x48] sm:$0xff] %vm7549_vm4, %v12969_v9  ;;  %v8702_v7 = vpop.f32.mrf.mxu0 }
 0x65b   : > { %v8726_v27 = vpop.f32.mrf.mxu1  ;;  %v8703_v6 = vadd.f32 %v8702_v7, %v8701_v47 }
 0x65c   : > { %v12977_v42 = vadd.f32 %v8726_v27, %v8725_v61  ;;  %v8704_v63 = vpop.f32.mrf.mxu0 }
 0x65d   : > { %v8728_v44 = vpop.f32.mrf.mxu1  ;;  %7552 = vst.msk [vmem:[%s12959_s10 + $0x10] sm:$0xff] %vm7549_vm4, %v8703_v6 }
 0x65e   : > { %7560 = vst.msk [vmem:[%s12959_s10 + $0x50] sm:$0xff] %vm7549_vm4, %v12977_v42  ;;  %v8705_v35 = vpop.f32.mrf.mxu0 }
 0x65f   : > { %v8729_v15 = vpop.f32.mrf.mxu1  ;;  %v8706_v30 = vadd.f32 %v8705_v35, %v8704_v63 }
 0x660   : > { %v12984_v36 = vadd.f32 %v8729_v15, %v8728_v44  ;;  %v8707_v60 = vpop.f32.mrf.mxu0 }
 0x661   : > { %v8731_v24 = vpop.f32.mrf.mxu1  ;;  %7553 = vst.msk [vmem:[%s12959_s10 + $0x18] sm:$0xff] %vm7549_vm4, %v8706_v30 }
 0x662   : > { %7561 = vst.msk [vmem:[%s12959_s10 + $0x58] sm:$0xff] %vm7549_vm4, %v12984_v36  ;;  %v8708_v46 = vpop.f32.mrf.mxu0 }
 0x663   : > { %v8732_v51 = vpop.f32.mrf.mxu1  ;;  %v8709_v53 = vadd.f32 %v8708_v46, %v8707_v60 }
 0x664   : > { %v12991_v16 = vadd.f32 %v8732_v51, %v8731_v24  ;;  %v8710_v54 = vpop.f32.mrf.mxu0 }
 0x665   : > { %v8734_v52 = vpop.f32.mrf.mxu1  ;;  %7554 = vst.msk [vmem:[%s12959_s10 + $0x20] sm:$0xff] %vm7549_vm4, %v8709_v53 }
 0x666   : > { %7562 = vst.msk [vmem:[%s12959_s10 + $0x60] sm:$0xff] %vm7549_vm4, %v12991_v16  ;;  %v8711_v10 = vpop.f32.mrf.mxu0 }
 0x667   : > { %v8735_v28 = vpop.f32.mrf.mxu1  ;;  %v8712_v59 = vadd.f32 %v8711_v10, %v8710_v54 }
 0x668   : > { %v12998_v32 = vadd.f32 %v8735_v28, %v8734_v52  ;;  %v8713_v3 = vpop.f32.mrf.mxu0 }
 0x669   : > { %v8737_v21 = vpop.f32.mrf.mxu1  ;;  %7555 = vst.msk [vmem:[%s12959_s10 + $0x28] sm:$0xff] %vm7549_vm4, %v8712_v59 }
 0x66a   : > { %7563 = vst.msk [vmem:[%s12959_s10 + $0x68] sm:$0xff] %vm7549_vm4, %v12998_v32  ;;  %v8714_v33 = vpop.f32.mrf.mxu0 }
 0x66b   : > { %v8738_v14 = vpop.f32.mrf.mxu1  ;;  %v8715_v39 = vadd.f32 %v8714_v33, %v8713_v3 }
 0x66c   : > { %v13005_v4 = vadd.f32 %v8738_v14, %v8737_v21  ;;  %v8716_v19 = vpop.f32.mrf.mxu0 }
 0x66d   : > { %v8740_v56 = vpop.f32.mrf.mxu1  ;;  %7556 = vst.msk [vmem:[%s12959_s10 + $0x30] sm:$0xff] %vm7549_vm4, %v8715_v39 }
 0x66e   : > { %7564 = vst.msk [vmem:[%s12959_s10 + $0x70] sm:$0xff] %vm7549_vm4, %v13005_v4  ;;  %v8717_v41 = vpop.f32.mrf.mxu0  ;;  %7569 = sbr.rel (%p8651_p4) target bundleno = 1653 (0x675), region = 80 }
 0x66f   : > { %v8741_v11 = vpop.f32.mrf.mxu1  ;;  %v8718_v22 = vadd.f32 %v8717_v41, %v8716_v19 }
 0x670   : > { %v13012_v37 = vadd.f32 %v8741_v11, %v8740_v56 }
 0x671   : > { %7557 = vst.msk [vmem:[%s12959_s10 + $0x38] sm:$0xff] %vm7549_vm4, %v8718_v22 }
 0x672   : > { %7565 = vst.msk [vmem:[%s12959_s10 + $0x78] sm:$0xff] %vm7549_vm4, %v13012_v37 }
 0x673   : > { %vm7570_vm5 = vcmask 516096   ;;  %v10097_v0 = vmov 0.0  }
 0x674   : > { %7571 = vst.msk [vmem:[#allocation9] sm:$0x1] %vm7570_vm5, %v10097_v0  ;;  %7572 = vst.msk [vmem:[#allocation10] sm:$0x1] %vm7570_vm5, %v10097_v0 }
 0x675 PF: > { %v7574_v1 = vsel %vm7549_vm4, %v12954_v12, 0.0  ;;  %v7575_v17 = vsel %vm7549_vm4, %v12967_v55, 0.0  ;;  %v7577_v62 = vsel %vm7549_vm4, %v8703_v6, 0.0  ;;  %v7579_v8 = vsel %vm7549_vm4, %v8706_v30, 0.0 }
 0x676   : > { %v7576_v38 = vadd.f32 %v7575_v17, %v7574_v1  ;;  %v7581_v20 = vsel %vm7549_vm4, %v8709_v53, 0.0  ;;  %v7615_v18 = vmul.f32 %v12954_v12, %v12954_v12  ;;  %v7616_v57 = vmul.f32 %v12967_v55, %v12967_v55 }
 0x677   : > { %v7583_v23 = vsel %vm7549_vm4, %v8712_v59, 0.0  ;;  %v7617_v58 = vmul.f32 %v8703_v6, %v8703_v6  ;;  %v7618_v45 = vmul.f32 %v8706_v30, %v8706_v30  ;;  %v7585_v49 = vsel %vm7549_vm4, %v8715_v39, 0.0 }
 0x678   : > { %v7578_v29 = vadd.f32 %v7577_v62, %v7576_v38  ;;  %v7619_v31 = vmul.f32 %v8709_v53, %v8709_v53  ;;  %v7631_v13 = vsel %vm7549_vm4, %v7615_v18, 0.0  ;;  %v7632_v50 = vsel %vm7549_vm4, %v7616_v57, 0.0 }
 0x679   : > { %v7587_v26 = vsel %vm7549_vm4, %v8718_v22, 0.0  ;;  %v7633_v48 = vadd.f32 %v7632_v50, %v7631_v13  ;;  %v7634_v12 = vsel %vm7549_vm4, %v7617_v58, 0.0  ;;  %v7620_v34 = vmul.f32 %v8712_v59, %v8712_v59 }
 0x67a   : > { %v7580_v5 = vadd.f32 %v7579_v8, %v7578_v29  ;;  %v7636_v55 = vsel %vm7549_vm4, %v7618_v45, 0.0  ;;  %v7589_v47 = vsel %vm7549_vm4, %v12956_v2, 0.0  ;;  %v7621_v27 = vmul.f32 %v8715_v39, %v8715_v39 }
 0x67b   : > { %v7635_v61 = vadd.f32 %v7634_v12, %v7633_v48  ;;  %v7638_v6 = vsel %vm7549_vm4, %v7619_v31, 0.0  ;;  %v7591_v63 = vsel %vm7549_vm4, %v12969_v9, 0.0  ;;  %v7622_v15 = vmul.f32 %v8718_v22, %v8718_v22  ;;  %v7573_v48 = vld [vmem:[#allocation9] sm:$0x1] }
 0x67c   : > { %v7582_v25 = vadd.f32 %v7581_v20, %v7580_v5  ;;  %v7640_v30 = vsel %vm7549_vm4, %v7620_v34, 0.0  ;;  %v7593_v60 = vsel %vm7549_vm4, %v12977_v42, 0.0  ;;  %v7623_v51 = vmul.f32 %v12956_v2, %v12956_v2 }
 0x67d   : > { %v7637_v44 = vadd.f32 %v7636_v55, %v7635_v61  ;;  %v7642_v53 = vsel %vm7549_vm4, %v7621_v27, 0.0  ;;  %v7595_v54 = vsel %vm7549_vm4, %v12984_v36, 0.0  ;;  %v7624_v28 = vmul.f32 %v12969_v9, %v12969_v9 }
 0x67e   : > { %v7584_v43 = vadd.f32 %v7583_v23, %v7582_v25  ;;  %v7644_v59 = vsel %vm7549_vm4, %v7622_v15, 0.0  ;;  %v7597_v3 = vsel %vm7549_vm4, %v12991_v16, 0.0  ;;  %v7625_v2 = vmul.f32 %v12977_v42, %v12977_v42 }
 0x67f   : > { %v7639_v24 = vadd.f32 %v7638_v6, %v7637_v44  ;;  %v7646_v14 = vsel %vm7549_vm4, %v7623_v51, 0.0  ;;  %v7599_v39 = vsel %vm7549_vm4, %v12998_v32, 0.0  ;;  %v7626_v9 = vmul.f32 %v12984_v36, %v12984_v36 }
 0x680   : > { %v7586_v40 = vadd.f32 %v7585_v49, %v7584_v43  ;;  %v7648_v41 = vsel %vm7549_vm4, %v7624_v28, 0.0  ;;  %v7601_v11 = vsel %vm7549_vm4, %v13005_v4, 0.0  ;;  %v7627_v42 = vmul.f32 %v12991_v16, %v12991_v16 }
 0x681   : > { %v7641_v52 = vadd.f32 %v7640_v30, %v7639_v24  ;;  %v7650_v1 = vsel %vm7549_vm4, %v7625_v2, 0.0  ;;  %v7603_v17 = vsel %vm7549_vm4, %v13012_v37, 0.0  ;;  %v7628_v36 = vmul.f32 %v12998_v32, %v12998_v32 }
 0x682   : > { %v7588_v7 = vadd.f32 %v7587_v26, %v7586_v40  ;;  %v7652_v8 = vsel %vm7549_vm4, %v7626_v9, 0.0  ;;  %v7629_v5 = vmul.f32 %v13005_v4, %v13005_v4  ;;  %v7654_v18 = vsel %vm7549_vm4, %v7627_v42, 0.0 }
 0x683   : > { %v7643_v21 = vadd.f32 %v7642_v53, %v7641_v52  ;;  %v7630_v23 = vmul.f32 %v13012_v37, %v13012_v37  ;;  %v7656_v58 = vsel %vm7549_vm4, %v7628_v36, 0.0  ;;  %vm7612_vm6 = vcmask 516096  }
 0x684   : > { %v7590_v35 = vadd.f32 %v7589_v47, %v7588_v7  ;;  %v7658_v32 = vsel %vm7549_vm4, %v7629_v5, 0.0  ;;  %v7614_v7 = vld [vmem:[#allocation10] sm:$0x1] }
 0x685   : > { %v7645_v19 = vadd.f32 %v7644_v59, %v7643_v21  ;;  %v7660_v31 = vsel %vm7549_vm4, %v7630_v23, 0.0 }
 0x686   : > { %v7592_v46 = vadd.f32 %v7591_v63, %v7590_v35 }
 0x687   : > { %v7647_v22 = vadd.f32 %v7646_v14, %v7645_v19 }
 0x688   : > { %v7594_v10 = vadd.f32 %v7593_v60, %v7592_v46 }
 0x689   : > { %v7649_v62 = vadd.f32 %v7648_v41, %v7647_v22 }
 0x68a   : > { %v7596_v33 = vadd.f32 %v7595_v54, %v7594_v10 }
 0x68b   : > { %v7651_v29 = vadd.f32 %v7650_v1, %v7649_v62 }
 0x68c   : > { %v7598_v56 = vadd.f32 %v7597_v3, %v7596_v33 }
 0x68d   : > { %v7653_v16 = vadd.f32 %v7652_v8, %v7651_v29 }
 0x68e   : > { %v7600_v0 = vadd.f32 %v7599_v39, %v7598_v56 }
 0x68f   : > { %v7655_v25 = vadd.f32 %v7654_v18, %v7653_v16 }
 0x690   : > { %v7602_v38 = vadd.f32 %v7601_v11, %v7600_v0 }
 0x691   : > { %v7657_v49 = vadd.f32 %v7656_v58, %v7655_v25 }
 0x692   : > { %v7604_v20 = vadd.f32 %v7603_v17, %v7602_v38 }
 0x693   : > { %v7659_v13 = vadd.f32 %v7658_v32, %v7657_v49 }
 0x694   : > { %v7605_v57 = vrot.slane %v7604_v20, 4 }
 0x695   : > { %v7661_v4 = vadd.f32 %v7660_v31, %v7659_v13 }
 0x696   : > { %v7606_v45 = vadd.f32 %v7605_v57, %v7604_v20 }
 0x697   : > { %v7662_v12 = vrot.slane %v7661_v4, 4 }
 0x698   : > { %v7607_v43 = vrot.slane %v7606_v45, 2 }
 0x699   : > { %v7663_v34 = vadd.f32 %v7662_v12, %v7661_v4 }
 0x69a   : > { %v7608_v50 = vadd.f32 %v7607_v43, %v7606_v45 }
 0x69b   : > { %v7664_v55 = vrot.slane %v7663_v34, 2 }
 0x69c   : > { %v7609_v26 = vrot.slane %v7608_v50, 1 }
 0x69d   : > { %v7665_v47 = vadd.f32 %v7664_v55, %v7663_v34 }
 0x69e   : > { %v7610_v40 = vadd.f32 %v7609_v26, %v7608_v50 }
 0x69f   : > { %v7666_v61 = vrot.slane %v7665_v47, 1 }
 0x6a0   : > { %v7611_v37 = vadd.f32 %v7610_v40, %v7573_v48 }
 0x6a1   : > { %v7667_v27 = vadd.f32 %v7666_v61, %v7665_v47 }
 0x6a2   : > { %7613 = vst.msk [vmem:[#allocation9] sm:$0x1] %vm7612_vm6, %v7611_v37 }
 0x6a3   : > { %v7668_v6 = vadd.f32 %v7667_v27, %v7614_v7 }
 0x6a5   : > { %7669 = vst.msk [vmem:[#allocation10] sm:$0x1] %vm7612_vm6, %v7668_v6 }
 0x6a6 PF: > { %p8652_p6 = scmp.ne.s32.totalorder %s10070_s25, 3 }
 0x6a7   : > { %s13086_s1 = scalar_lea.vmem (!%p8652_p6), [#allocation4], %s10321_s11 }
 0x6a8   : > { %7673 = sbr.rel (%p8652_p6) target bundleno = 2039 (0x7f7), region = 84 }
 0x6ad   : > { %v7674_v63 = vld [vmem:[#allocation9] sm:$0x1]  ;;  %v7675_v44 = vld [vmem:[#allocation10] sm:$0x1]  ;;  %v10098_v35 = vmov 0.0   ;;  %vm10099_vm7 = vmmov 0   ;;  %v7705_v52 = vlaneseq }
 0x6ae   : > { %8760 = vmatprep.subr.mxu0 %v10098_v35  ;;  %v7678_v15 = vmul.f32 0.00390625, %v7674_v63  ;;  %v7679_v30 = vmul.f32 0.00390625, %v7675_v44  ;;  %8792 = vmatprep.mubr.msk.f32.mxu0 %vm10099_vm7, %v10098_v35  ;;  %v10100_v24 = vmov 0   ;;  %v7762_v53 = vld [vmem:[#allocation17 + $0x7] ss:$0 sm:$0xff]  ;;  %v7704_v2 = vld [vmem:[%s13086_s1 + $0x78] sm:$0xff] }
 0x6af   : > { %9841 = vset.pattern.permute.xlu0 %v10100_v24  ;;  %v7706_v10 = vshrl.u32 %v7705_v52, 7  ;;  %v7676_v28 = vld [vmem:[#allocation17 + $0x4] ss:$0 sm:$0xff]  ;;  %v7677_v33 = vld [vmem:[#allocation17 + $0x5] ss:$0 sm:$0xff]  ;;  %v7702_v11 = vld [vmem:[%s13086_s1 + $0x68] sm:$0xff] }
 0x6b0   : > { %v7680_v60 = vmul.f32 %v7678_v15, %v7678_v15  ;;  %7765 = vperm.xlu0 %9841, %v7762_v53   ;;  %v7703_v14 = vld [vmem:[%s13086_s1 + $0x70] sm:$0xff]  ;;  %vm7768_vm8 = vcmask 523264   ;;  %v7701_v17 = vld [vmem:[%s13086_s1 + $0x60] sm:$0xff]  ;;  %v7700_v29 = vld [vmem:[%s13086_s1 + $0x58] sm:$0xff] }
 0x6b1   : > { %v7707_v59 = vsub.s32 0, %v7706_v10  ;;  %v7699_v16 = vld [vmem:[%s13086_s1 + $0x50] sm:$0xff]  ;;  %v7698_v25 = vld [vmem:[%s13086_s1 + $0x48] sm:$0xff]  ;;  %v7697_v43 = vld [vmem:[%s13086_s1 + $0x40] sm:$0xff] }
 0x6b2   : > { %v7681_v46 = vsub.f32 %v7679_v30, %v7680_v60  ;;  %v7696_v4 = vld [vmem:[%s13086_s1 + $0x38] sm:$0xff]  ;;  %v7695_v40 = vld [vmem:[%s13086_s1 + $0x30] sm:$0xff]  ;;  %v7694_v47 = vld [vmem:[%s13086_s1 + $0x28] sm:$0xff] }
 0x6b3   : > { %v7693_v6 = vld [vmem:[%s13086_s1 + $0x20] sm:$0xff]  ;;  %v7692_v30 = vld [vmem:[%s13086_s1 + $0x18] sm:$0xff]  ;;  %v7690_v10 = vld [vmem:[%s13086_s1 + $0x8] sm:$0xff] }
 0x6b4   : > { %v7682_v51 = vmax.f32 %v7681_v46, 0.0 }
 0x6b6   : > { %v7683_v54 = vadd.f32 1e-05, %v7682_v51  ;;  %v7691_v51 = vld [vmem:[%s13086_s1 + $0x10] sm:$0xff] }
 0x6b8   : > { %9842 = vrsqrt.f32 %v7683_v54 }
 0x6c5   : > { %v9843_v3 = vpop.eup %9842 }
 0x6c6   : > { %v7685_v21 = vmul.f32 %v9843_v3, %v7676_v28 }
 0x6c8   : > { %v7686_v39 = vmul.f32 %v7685_v21, %v7678_v15  ;;  %v13090_v19 = vrot.slane %v7685_v21, %v7707_v59  ;;  %v7689_v21 = vld [vmem:[%s13086_s1] sm:$0xff] }
 0x6ca   : > { %v7687_v56 = vsub.f32 %v7677_v33, %v7686_v39  ;;  %v7724_v9 = vmul.f32 %v13090_v19, %v7704_v2  ;;  %v7723_v41 = vmul.f32 %v13090_v19, %v7703_v14  ;;  %v7722_v1 = vmul.f32 %v13090_v19, %v7702_v11 }
 0x6cb   : > { %v7721_v8 = vmul.f32 %v13090_v19, %v7701_v17  ;;  %v7720_v18 = vmul.f32 %v13090_v19, %v7700_v29  ;;  %v7719_v58 = vmul.f32 %v13090_v19, %v7699_v16  ;;  %v7718_v49 = vmul.f32 %v13090_v19, %v7698_v25 }
 0x6cc   : > { %v13095_v22 = vrot.slane %v7687_v56, %v7707_v59  ;;  %v7717_v50 = vmul.f32 %v13090_v19, %v7697_v43  ;;  %v7716_v12 = vmul.f32 %v13090_v19, %v7696_v4  ;;  %v7715_v55 = vmul.f32 %v13090_v19, %v7695_v40 }
 0x6cd   : > { %v7714_v27 = vmul.f32 %v13090_v19, %v7694_v47  ;;  %v7713_v15 = vmul.f32 %v13090_v19, %v7693_v6  ;;  %v7712_v46 = vmul.f32 %v13090_v19, %v7692_v30  ;;  %v7711_v52 = vmul.f32 %v13090_v19, %v7691_v51 }
 0x6ce   : > { %v7744_v0 = vadd.f32 %v13095_v22, %v7724_v9  ;;  %v7743_v42 = vadd.f32 %v13095_v22, %v7723_v41  ;;  %v7742_v36 = vadd.f32 %v13095_v22, %v7722_v1  ;;  %v7741_v5 = vadd.f32 %v13095_v22, %v7721_v8  ;;  %v7761_v41 = vld [vmem:[#allocation17 + $0x6] ss:$0 sm:$0xff] }
 0x6cf   : > { %v7740_v23 = vadd.f32 %v13095_v22, %v7720_v18  ;;  %v7739_v32 = vadd.f32 %v13095_v22, %v7719_v58  ;;  %v7738_v13 = vadd.f32 %v13095_v22, %v7718_v49  ;;  %v7737_v48 = vadd.f32 %v13095_v22, %v7717_v50 }
 0x6d0   : > { %v7760_v62 = vmax.f32 %v7744_v0, 0.0  ;;  %v7759_v38 = vmax.f32 %v7743_v42, 0.0  ;;  %v7758_v20 = vmax.f32 %v7742_v36, 0.0  ;;  %v7757_v57 = vmax.f32 %v7741_v5, 0.0 }
 0x6d1   : > { %v7756_v45 = vmax.f32 %v7740_v23, 0.0  ;;  %v7755_v31 = vmax.f32 %v7739_v32, 0.0  ;;  %v7754_v26 = vmax.f32 %v7738_v13, 0.0  ;;  %v7753_v34 = vmax.f32 %v7737_v48, 0.0 }
 0x6d2   : > { %8761 = vmatpush3.xpose.msk.msra.mxu0 %vm7768_vm8, %v7760_v62  ;;  %v7736_v37 = vadd.f32 %v13095_v22, %v7716_v12  ;;  %v7735_v7 = vadd.f32 %v13095_v22, %v7715_v55  ;;  %v7734_v44 = vadd.f32 %v13095_v22, %v7714_v27  ;;  %v7733_v24 = vadd.f32 %v13095_v22, %v7713_v15 }
 0x6d3   : > { %8762 = vmatprep.subr.mxu0 %v10098_v35  ;;  %v7732_v54 = vadd.f32 %v13095_v22, %v7712_v46  ;;  %v7731_v59 = vadd.f32 %v13095_v22, %v7711_v52  ;;  %v7710_v3 = vmul.f32 %v13090_v19, %v7690_v10  ;;  %v7709_v14 = vmul.f32 %v13090_v19, %v7689_v21 }
 0x6d4   : > { %v7752_v61 = vmax.f32 %v7736_v37, 0.0  ;;  %v7751_v63 = vmax.f32 %v7735_v7, 0.0  ;;  %v7750_v60 = vmax.f32 %v7734_v44, 0.0  ;;  %v7749_v53 = vmax.f32 %v7733_v24, 0.0 }
 0x6d5   : > { %v7748_v28 = vmax.f32 %v7732_v54, 0.0  ;;  %v7747_v33 = vmax.f32 %v7731_v59, 0.0  ;;  %v7730_v2 = vadd.f32 %v13095_v22, %v7710_v3  ;;  %v7729_v56 = vadd.f32 %v13095_v22, %v7709_v14 }
 0x6d6   : > { %8763 = vmatpush3.xpose.msk.msra.mxu0 %vm7768_vm8, %v7759_v38 }
 0x6d7   : > { %8764 = vmatprep.subr.mxu0 %v10098_v35  ;;  %v7746_v39 = vmax.f32 %v7730_v2, 0.0  ;;  %v7745_v9 = vmax.f32 %v7729_v56, 0.0 }
 0x6da   : > { %8765 = vmatpush3.xpose.msk.msra.mxu0 %vm7768_vm8, %v7758_v20 }
 0x6db   : > { %8766 = vmatprep.subr.mxu0 %v10098_v35 }
 0x6de   : > { %8767 = vmatpush3.xpose.msk.msra.mxu0 %vm7768_vm8, %v7757_v57 }
 0x6df   : > { %8768 = vmatprep.subr.mxu0 %v10098_v35 }
 0x6e2   : > { %8769 = vmatpush3.xpose.msk.msra.mxu0 %vm7768_vm8, %v7756_v45 }
 0x6e3   : > { %8770 = vmatprep.subr.mxu0 %v10098_v35 }
 0x6e6   : > { %8771 = vmatpush3.xpose.msk.msra.mxu0 %vm7768_vm8, %v7755_v31 }
 0x6e7   : > { %8772 = vmatprep.subr.mxu0 %v10098_v35 }
 0x6ea   : > { %8773 = vmatpush3.xpose.msk.msra.mxu0 %vm7768_vm8, %v7754_v26 }
 0x6eb   : > { %8774 = vmatprep.subr.mxu0 %v10098_v35 }
 0x6ee   : > { %8775 = vmatpush3.xpose.msk.msra.mxu0 %vm7768_vm8, %v7753_v34 }
 0x6ef   : > { %8776 = vmatprep.subr.mxu0 %v10098_v35 }
 0x6f2   : > { %8777 = vmatpush3.xpose.msk.msra.mxu0 %vm7768_vm8, %v7752_v61 }
 0x6f3   : > { %8778 = vmatprep.subr.mxu0 %v10098_v35 }
 0x6f6   : > { %8779 = vmatpush3.xpose.msk.msra.mxu0 %vm7768_vm8, %v7751_v63 }
 0x6f7   : > { %8780 = vmatprep.subr.mxu0 %v10098_v35 }
 0x6fa   : > { %8781 = vmatpush3.xpose.msk.msra.mxu0 %vm7768_vm8, %v7750_v60 }
 0x6fb   : > { %8782 = vmatprep.subr.mxu0 %v10098_v35 }
 0x6fe   : > { %8783 = vmatpush3.xpose.msk.msra.mxu0 %vm7768_vm8, %v7749_v53 }
 0x6ff   : > { %8784 = vmatprep.subr.mxu0 %v10098_v35 }
 0x702   : > { %8785 = vmatpush3.xpose.msk.msra.mxu0 %vm7768_vm8, %v7748_v28 }
 0x703   : > { %8786 = vmatprep.subr.mxu0 %v10098_v35 }
 0x706   : > { %8787 = vmatpush3.xpose.msk.msra.mxu0 %vm7768_vm8, %v7747_v33 }
 0x707   : > { %8788 = vmatprep.subr.mxu0 %v10098_v35 }
 0x70a   : > { %8789 = vmatpush3.xpose.msk.msra.mxu0 %vm7768_vm8, %v7746_v39 }
 0x70b   : > { %8790 = vmatprep.subr.mxu0 %v10098_v35 }
 0x70e   : > { %8791 = vmatpush3.xpose.msk.msra.mxu0 %vm7768_vm8, %v7745_v9 }
 0x711   : > { %8793 = vmatmul.mubr.msk.f32.vlgmr.msra.gmra.mxu0 %vm7768_vm8, %v7761_v41 }
 0x72b   : > { %v7766_v19 = vpop.permute.xlu0 %7765 }
 0x7d1   : > { %v7886_v11 = vpop.f32.mrf.mxu0 }
 0x7d2   : > { %v7887_v0 = vadd.f32 %v7886_v11, %v7766_v19 }
 0x7d3   : > { %v8794_v42 = vpop.f32.mrf.mxu0 }
 0x7d4   : > { %v7890_v1 = vsub.f32 0.0, %v7887_v0 }
 0x7d6   : > { %v7891_v17 = vmul.f32 1.442695, %v7890_v1 }
 0x7d8   : > { %9844 = vpow2.f32 %v7891_v17 }
 0x7e5   : > { %v9845_v22 = vpop.eup %9844 }
 0x7e6   : > { %v7893_v62 = vadd.f32 1.0, %v9845_v22 }
 0x7e8   : > { %9846 = vrcp.f32 %v7893_v62 }
 0x7f5   : > { %v9847_v38 = vpop.eup %9846 }
 0x7f6   : > { %7895 = vst [vmem:[%s10325_s8] sm:$0x1] %v9847_v38 }
 0x7f7 PF: > { %s13975_s11 = sld [smem:[#allocation27_spill]]  ;;  %p7903_p5 = scmp.eq.s32.totalorder %s10070_s25, 3 }
 0x7f8   : > { %s7911_s30 = sshll.u32 %s10325_s8, 4  ;;  %s13976_s29 = sld [smem:[#allocation147_spill]]  ;;  %s7912_s30 = int_to_ptr.vmem [resolvable:$true] %s7911_s30 }
 0x7f9   : > { %s13999_s24 = smov (!%p7903_p5, %s10066_s24), 0  ;;  %s7897_s15 = scalar_lea.sflag [#allocation13], %s305_s26 }
 0x7fa   : > { %s8670_s13 = sshll.u32 %s13999_s24, 4  ;;  %s9954_s21 = scalar_lea.vmem %s7912_s30, 16 }
 0x7fb   : > { %p9955_p9 = scmp.ne.s32.totalorder %s7912_s30, %s9954_s21  ;;  %s10101_s17 = smov [#allocation19]  }
 0x7fc   : > { %s9958_s4 = sshll.u32 %s10101_s17, 4  ;;  %s9959_s4 = int_to_ptr.vmem [resolvable:$false] %s9958_s4 }
 0x7fd   : > { %p13977_p13 = scmp.ne.s32.totalorder %s13975_s11, 0  ;;  %s9960_s14 = scalar_lea.vmem %s9959_s4, 32 }
 0x7fe   : > { %s7909_s12 = scalar_lea.hbm %s13976_s29, %s8670_s13  ;;  %p9961_p1 = scmp.lt.s32.totalorder %s7912_s30, %s9959_s4 }
 0x7ff   : > { %p9956_p8 = pnand %p9955_p9, %p13977_p13  ;;  %p9962_p7 = scmp.lt.s32.totalorder %s9960_s14, %s9954_s21 }
 0x801   : > { %p9957_p10 = pneg %p9956_p8  ;;  %p9963_p3 = por %p9962_p7, %p9961_p1 }
 0x803   : > { %p9964_p11 = pnand %p9963_p3, %p9957_p10 }
 0x805   : > { %9967 = shalt.err (!%p9964_p11)
}
 0x806   : > { %s9968_s24 = scalar_lea.hbm %s7909_s12, 16  ;;  %s9972_s8 = scalar_lea.hbm %s13976_s29, 32 }
 0x807   : > { %p9969_p12 = scmp.ne.s32.totalorder %s7909_s12, %s9968_s24  ;;  %p9973_p4 = scmp.lt.s32.totalorder %s7909_s12, %s13976_s29 }
 0x808   : > { %p9974_p6 = scmp.lt.s32.totalorder %s9972_s8, %s9968_s24 }
 0x809   : > { %p9970_p2 = pnand %p9969_p12, %p13977_p13 }
 0x80a   : > { %p9975_p5 = por %p9974_p6, %p9973_p4 }
 0x80b   : > { %p9971_p0 = pneg %p9970_p2 }
 0x80d   : > { %p9976_p9 = pnand %p9975_p5, %p9971_p0 }
 0x80f   : > { %9979 = shalt.err (!%p9976_p9)
}
 0x810   : > { %8825 = dma.vmem_to_hbm [thread:$0]  (%p13977_p13), %s7912_s30, 16, %s7909_s12, %s7897_s15  }
 0x811 PF: > { %s13978_s9 = sld [smem:[#allocation24_spill]]  ;;  %p8852_p8 = scmp.ge.s32.totalorder %s10082_s28, 2 }
 0x812   : > { %s13979_s10 = sld [smem:[#allocation28_spill]] }
 0x817   : > { %s7923_s1 = sand.u32 1, %s13978_s9  }
 0x818   : > { %p13980_p10 = scmp.ne.s32.totalorder %s13979_s10, 0  ;;  %s7924_s13 = scalar_lea.sflag [#allocation13], %s7923_s1 }
 0x81a   : > { %p8842_p1 = pnand %p8852_p8, %p13980_p10 }
 0x81c   : > { %p8843_p7 = pneg %p8842_p1 }
 0x81e   : > { %10037 = dma.done.wait (%p8843_p7), %s7924_s13, 16  }
 0x81f   : > { %10039 = vsyncadd (%p8843_p7), %s7924_s13, 4294967280  ;;  %s23_s28 = sadd.s32 1, %s10082_s28   ;;  %s13981_s24 = sld [smem:[#allocation25_spill]] }
 0x820   : > { %p20_p3 = scmp.ge.s32.totalorder %s23_s28, 10   ;;  %s13982_s25 = sld [smem:[#allocation26_spill]] }
 0x821   : > { %s13983_s11 = sld [smem:[#allocation29_spill]]  ;;  %s13984_s18 = smov %s10046_s19 }
 0x822   : > { %s13985_s19 = smov %s10050_s20  ;;  %s13986_s20 = smov %s10284_s27 }
 0x823   : > { %s13987_s21 = smov %s10058_s22  ;;  %s13988_s22 = smov %s10062_s23 }
 0x824   : > { %s13989_s23 = smov %s10279_s2  ;;  %s13990_s26 = smov %s13993_s7 }
 0x825   :  { %22 = sbr.rel (!%p20_p3) target bundleno = 17 (0x11), region = 134 }
 0x827   : > { %s13991_s27 = smov %s13983_s11 }
 0x82a   :  { %7928 = vsyncpa [#allocation12], 1 }
 0x82b   :  { %7930 = vsyncpa [#allocation12 + $0x1], 1 }
 0x82c   :  { %7931 = vsyncpa [#allocation15], 1 }
 0x82d   :  { %7932 = vsyncpa [#allocation18], 1 }
 0x82e   :  { %7933 = vsyncpa [#allocation13], 1 }
 0x82f   :  { %7935 = vsyncpa [#allocation13 + $0x1], 1 }

</bundles_post_ra>
